<compile_context>
chip_gen: v6e
topology: v6e:2x2x1
jax: 0.10.0
libtpu: 0.0.40
codegen_flags: <defaults>
</compile_context>

<pallas_src>
import functools

import numpy as np
import jax
import jax.numpy as jnp
from jax.experimental import pallas as pl
from jax.experimental.pallas import tpu as pltpu

# ----------------------------- configuration -------------------------------
BATCH = 2
IN_CHANNELS = 4
IN_RES = 16
FILTERS = (8, 16, 32)
NUM_ENC = 3               # num_encoding_layers
DIM_FG = 8                # dimension_fg
DIM_3D = 24               # dimension_3d (multiple of 3)
HAS_FG = True
N_HEAD = DIM_FG + DIM_3D  # fused to_fg | to_3d output width (= 32)
C_PAD = 32                # every channel axis zero-padded to 32 lanes
K_IM2COL = 9 * C_PAD      # 288 : K of every fused conv dot
# is_batchnorm=False, from_latent_hidden_layers=False


def _geom(h):
    """Flattened zero-padded geometry for an h x h image (conv padding=1)."""
    hp = h + 2                 # padded spatial extent
    t = hp * hp                # flattened padded size per image
    marg = hp + 1              # extra rows so every 3x3 tap shift stays in-bounds
    return hp, t, marg, t + 2 * marg


HP1, T1, MG1, R1 = _geom(IN_RES)          # 18, 324, 19, 362
HP2, T2, MG2, R2 = _geom(IN_RES // 2)     # 10, 100, 11, 122
HP3, T3, MG3, R3 = _geom(IN_RES // 4)     #  6,  36,  7,  50

HW3 = IN_RES // 4                         # 4 : spatial size feeding the head
FEAT = HW3 * HW3 * C_PAD                  # 512 : head K

# static row offsets into the single bf16 weight blob
W_OFF = tuple(i * K_IM2COL for i in range(2 * NUM_ENC))   # 6 conv weight blocks
HEAD_OFF = 2 * NUM_ENC * K_IM2COL                          # 1728 (512 rows)
MASK1_OFF = HEAD_OFF + FEAT                                # 2240
MASK2_OFF = MASK1_OFF + T1                                 # 2564
MASK3_OFF = MASK2_OFF + T2                                 # 2664
WBLOB_ROWS = MASK3_OFF + T3                                # 2700
N_BIAS = 2 * NUM_ENC + 1                                   # 6 conv biases + head


# --------------------------- in-kernel helpers ------------------------------
def _conv3x3(src, dst, w_ref, w_off, b_ref, b_row, hp, t, marg, mask_off):
    """3x3/pad=1 conv + ReLU on a flattened padded (t, 32) image held in `src`
    rows [marg, marg+t).  The 9 shifted tap slices are lane-concatenated into a
    (t, 288) bf16 patch so the conv is ONE MXU dot (f32 accumulation).  An
    optional 0/1 mask re-creates the zero padding so the result can feed the
    next conv directly."""
    taps = []
    for dy in (-1, 0, 1):
        for dx in (-1, 0, 1):
            shift = dy * hp + dx
            taps.append(src[marg + shift: marg + shift + t, :])
    patch = jnp.concatenate(taps, axis=1)                       # (t, 288) bf16
    acc = jnp.dot(patch, w_ref[w_off: w_off + K_IM2COL, :],
                  preferred_element_type=jnp.float32)
    y = jnp.maximum(acc + b_ref[b_row: b_row + 1, :], 0.0)
    if mask_off is not None:
        y = y * w_ref[mask_off: mask_off + t, :].astype(jnp.float32)
    dst[marg: marg + t, :] = y.astype(dst.dtype)


def _maxpool2x2(src, dst, hp_i, marg_i, h_out, hp_o, marg_o):
    """nn.MaxPool2d(2): per output row, 4 stride-2 row reads cover the 2x2
    windows; their elementwise max is stored contiguously into the next
    stage's padded layout (whose pad rows stay zero)."""
    for ho in range(h_out):
        b0 = marg_i + (2 * ho + 1) * hp_i + 1
        r00 = src[pl.ds(b0,             h_out, stride=2), :]
        r01 = src[pl.ds(b0 + 1,         h_out, stride=2), :]
        r10 = src[pl.ds(b0 + hp_i,      h_out, stride=2), :]
        r11 = src[pl.ds(b0 + hp_i + 1,  h_out, stride=2), :]
        v = jnp.maximum(jnp.maximum(r00, r01), jnp.maximum(r10, r11))
        o0 = marg_o + (ho + 1) * hp_o + 1
        dst[o0: o0 + h_out, :] = v.astype(dst.dtype)


def _head(c3, w_ref, b_ref, o_ref):
    """center_flat @ [to_fg_w | to_3d_w] + bias as ONE (1, 512) @ (512, 32)
    dot.  Weight rows were pre-permuted host-side from PyTorch's NCHW flatten
    order to NHWC, matching the lane-concatenation of the 16 interior rows."""
    rows = []
    for p in range(HW3 * HW3):
        h, w = divmod(p, HW3)
        off = MG3 + (h + 1) * HP3 + (w + 1)
        rows.append(c3[off: off + 1, :])
    flat = jnp.concatenate(rows, axis=1)                        # (1, 512) bf16
    acc = jnp.dot(flat, w_ref[HEAD_OFF: HEAD_OFF + FEAT, :],
                  preferred_element_type=jnp.float32)
    o_ref[...] = acc + b_ref[2 * NUM_ENC: 2 * NUM_ENC + 1, :]


# ------------------------------ fused kernel --------------------------------
def _encoder_kernel(x_ref, w_ref, b_ref, o_ref,
                    a1, c1, x2, a2, c2, x3, a3, c3):
    # Only the rows that are READ as zero padding but never written by the
    # compute below are re-zeroed each step: the conv-tap margin rows of the
    # a-buffers and the full (tiny) pooled x2/x3 buffers whose pad rows the
    # strided pool stores skip.  (Zero-once on program_id==0 would be unsafe
    # under 'parallel' grid splitting across v7x TensorCores.)  Interiors of
    # a*/c* are fully overwritten every step; c*-pads are written-but-unread.
    def zero_margins(buf, marg, t):
        z = jnp.zeros((marg, C_PAD), buf.dtype)
        buf[0: marg, :] = z
        buf[marg + t: marg + t + marg, :] = z

    zero_margins(a1, MG1, T1)
    zero_margins(a2, MG2, T2)
    zero_margins(a3, MG3, T3)
    x2[...] = jnp.zeros(x2.shape, x2.dtype)
    x3[...] = jnp.zeros(x3.shape, x3.dtype)

    # stage 1: 16x16, 4 -> 8 -> 8, then 2x2 max-pool -> x2 (8x8)
    _conv3x3(x_ref, a1, w_ref, W_OFF[0], b_ref, 0, HP1, T1, MG1, MASK1_OFF)
    _conv3x3(a1,    c1, w_ref, W_OFF[1], b_ref, 1, HP1, T1, MG1, None)
    _maxpool2x2(c1, x2, HP1, MG1, IN_RES // 2, HP2, MG2)
    # stage 2: 8x8, 8 -> 16 -> 16, then pool -> x3 (4x4)
    _conv3x3(x2,    a2, w_ref, W_OFF[2], b_ref, 2, HP2, T2, MG2, MASK2_OFF)
    _conv3x3(a2,    c2, w_ref, W_OFF[3], b_ref, 3, HP2, T2, MG2, None)
    _maxpool2x2(c2, x3, HP2, MG2, IN_RES // 4, HP3, MG3)
    # stage 3: 4x4, 16 -> 32 -> 32 (no pool: from_latent_hidden_layers=False)
    _conv3x3(x3,    a3, w_ref, W_OFF[4], b_ref, 4, HP3, T3, MG3, MASK3_OFF)
    _conv3x3(a3,    c3, w_ref, W_OFF[5], b_ref, 5, HP3, T3, MG3, None)
    # fused to_fg / to_3d head -> (1, 32) HBM write per batch item
    _head(c3, w_ref, b_ref, o_ref)


# ------------------------------ parameters ----------------------------------
def init_params(key):
    params = {}
    chans = [IN_CHANNELS] + list(FILTERS)
    for li in range(1, NUM_ENC + 1):
        cin, cout = chans[li - 1], chans[li]
        for j in (1, 2):                       # unetConv2 has two conv+ReLU stages
            ci = cin if j == 1 else cout
            key, kw, kb = jax.random.split(key, 3)
            params[f"conv{li}_{j}_w"] = (
                jax.random.normal(kw, (3, 3, ci, cout), jnp.float32)
                * np.sqrt(2.0 / (9 * ci)))
            params[f"conv{li}_{j}_b"] = jax.random.normal(kb, (cout,), jnp.float32) * 0.01
    s = IN_RES // (2 ** (NUM_ENC - 1))
    feat = FILTERS[-1] * s * s
    key, kfw, kfb, k3w, k3b = jax.random.split(key, 5)
    params["to_fg_w"] = jax.random.normal(kfw, (feat, DIM_FG), jnp.float32) / np.sqrt(feat)
    params["to_fg_b"] = jax.random.normal(kfb, (DIM_FG,), jnp.float32) * 0.01
    params["to_3d_w"] = jax.random.normal(k3w, (feat, DIM_3D), jnp.float32) / np.sqrt(feat)
    params["to_3d_b"] = jax.random.normal(k3b, (DIM_3D,), jnp.float32) * 0.01
    return params


def pack_params(params):
    """One-time host-side repack into two blobs:
      * bf16 weight blob (WBLOB_ROWS, 32): 6 conv blocks as (288, 32) tap
        matrices (Cin/Cout zero-padded to 32), the (512, 32) fused head weight
        with rows permuted from NCHW-flatten to NHWC order, and 3 interior
        masks broadcast to 32 lanes.
      * f32 bias blob (7, 32): 6 conv biases (zero-padded) + head bias."""
    blocks, brows = [], []
    for li in range(1, NUM_ENC + 1):
        for j in (1, 2):
            w = params[f"conv{li}_{j}_w"]                  # (3, 3, ci, co) HWIO
            ci, co = w.shape[2], w.shape[3]
            wp = jnp.zeros((3, 3, C_PAD, C_PAD), jnp.float32).at[:, :, :ci, :co].set(w)
            blocks.append(wp.reshape(9 * C_PAD, C_PAD))
            brows.append(jnp.zeros((C_PAD,), jnp.float32)
                         .at[:co].set(params[f"conv{li}_{j}_b"]))
    s = IN_RES // (2 ** (NUM_ENC - 1))
    c = FILTERS[-1]
    wh = jnp.concatenate([params["to_fg_w"], params["to_3d_w"]], axis=1)  # (c*s*s, 32)
    wh = wh.reshape(c, s, s, N_HEAD).transpose(1, 2, 0, 3).reshape(s * s * c, N_HEAD)
    blocks.append(wh)
    brows.append(jnp.concatenate([params["to_fg_b"], params["to_3d_b"]]))
    for hp in (HP1, HP2, HP3):
        m = np.zeros((hp, hp, 1), np.float32)
        m[1:-1, 1:-1, :] = 1.0
        blocks.append(jnp.asarray(np.repeat(m.reshape(hp * hp, 1), C_PAD, axis=1)))
    wblob = jnp.concatenate(blocks, axis=0).astype(jnp.bfloat16)
    bblob = jnp.stack(brows, axis=0)
    assert wblob.shape == (WBLOB_ROWS, C_PAD), wblob.shape
    assert bblob.shape == (N_BIAS, C_PAD), bblob.shape
    return wblob, bblob


# ------------------------------- forward ------------------------------------
def encoder_forward(img_crop_nchw, wblob, bblob, has_fg=True):
    """Mirrors Encoder.forward for encoder_type != 'ResNet'.  One fused
    pallas_call; grid over batch items ("parallel" -> both v7x TensorCores)."""
    bsz = img_crop_nchw.shape[0]
    # layout glue (tiny, fuses in XLA): NCHW -> NHWC, zero-pad spatial and
    # channels (to 32 lanes), flatten to (B, Hp*Wp, 32), add the margin rows
    # used by the in-kernel tap shifts, and cast once to bf16.
    x = jnp.transpose(img_crop_nchw, (0, 2, 3, 1))
    x = jnp.pad(x, ((0, 0), (1, 1), (1, 1), (0, C_PAD - IN_CHANNELS)))
    x = x.reshape(bsz, T1, C_PAD)
    x = jnp.pad(x, ((0, 0), (MG1, MG1), (0, 0))).astype(jnp.bfloat16)

    out = pl.pallas_call(
        _encoder_kernel,
        out_shape=jax.ShapeDtypeStruct((bsz, 1, N_HEAD), jnp.float32),
        grid=(bsz,),
        in_specs=[
            pl.BlockSpec((None, R1, C_PAD), lambda i: (i, 0, 0)),
            pl.BlockSpec((WBLOB_ROWS, C_PAD), lambda i: (0, 0)),   # resident
            pl.BlockSpec((N_BIAS, C_PAD), lambda i: (0, 0)),       # resident
        ],
        out_specs=pl.BlockSpec((None, 1, N_HEAD), lambda i: (i, 0, 0)),
        scratch_shapes=[
            pltpu.VMEM((R1, C_PAD), jnp.bfloat16),   # a1: conv1_1 out
            pltpu.VMEM((R1, C_PAD), jnp.float32),    # c1: conv1_2 out (pool src)
            pltpu.VMEM((R2, C_PAD), jnp.bfloat16),   # x2: pooled stage-2 input
            pltpu.VMEM((R2, C_PAD), jnp.bfloat16),   # a2: conv2_1 out
            pltpu.VMEM((R2, C_PAD), jnp.float32),    # c2: conv2_2 out (pool src)
            pltpu.VMEM((R3, C_PAD), jnp.bfloat16),   # x3: pooled stage-3 input
            pltpu.VMEM((R3, C_PAD), jnp.bfloat16),   # a3: conv3_1 out
            pltpu.VMEM((R3, C_PAD), jnp.bfloat16),   # c3: conv3_2 out (head src)
        ],
        compiler_params=pltpu.CompilerParams(dimension_semantics=("parallel",)),
    )(x, wblob, bblob)

    out = out[:, 0, :]
    latent_fg = out[:, :DIM_FG] if has_fg else None
    latent_3d = out[:, DIM_FG:].reshape(bsz, -1, 3)
    return latent_3d, latent_fg


# ------------------------------ pure-JAX ref ---------------------------------
def _ref_forward(img_crop_nchw, params, has_fg=True):
    hp = jax.lax.Precision.HIGHEST
    x = jnp.transpose(img_crop_nchw, (0, 2, 3, 1))

    def conv(x, w, b):
        y = jax.lax.conv_general_dilated(
            x, w, (1, 1), "SAME",
            dimension_numbers=("NHWC", "HWIO", "NHWC"), precision=hp)
        return jax.nn.relu(y + b)

    def pool(x):
        n, h, w, c = x.shape
        return x.reshape(n, h // 2, 2, w // 2, 2, c).max(axis=(2, 4))

    for li in range(1, NUM_ENC):
        x = conv(x, params[f"conv{li}_1_w"], params[f"conv{li}_1_b"])
        x = conv(x, params[f"conv{li}_2_w"], params[f"conv{li}_2_b"])
        x = pool(x)
    li = NUM_ENC
    x = conv(x, params[f"conv{li}_1_w"], params[f"conv{li}_1_b"])
    x = conv(x, params[f"conv{li}_2_w"], params[f"conv{li}_2_b"])
    bsz = img_crop_nchw.shape[0]
    flat = jnp.transpose(x, (0, 3, 1, 2)).reshape(bsz, -1)
    fg = jnp.dot(flat, params["to_fg_w"], precision=hp) + params["to_fg_b"] if has_fg else None
    l3d = (jnp.dot(flat, params["to_3d_w"], precision=hp) + params["to_3d_b"]).reshape(bsz, -1, 3)
    return l3d, fg


# --------------------------------- main --------------------------------------
if __name__ == "__main__":
    key = jax.random.PRNGKey(0)
    key, kx = jax.random.split(key)
    img_crop = jax.random.normal(kx, (BATCH, IN_CHANNELS, IN_RES, IN_RES), jnp.float32)
    params = init_params(key)
    wblob, bblob = pack_params(params)

    fwd = jax.jit(functools.partial(encoder_forward, has_fg=HAS_FG))
    latent_3d, latent_fg = jax.block_until_ready(fwd(img_crop, wblob, bblob))

    assert latent_3d.shape == (BATCH, DIM_3D // 3, 3), latent_3d.shape
    assert latent_fg.shape == (BATCH, DIM_FG), latent_fg.shape

    ref_3d, ref_fg = _ref_forward(img_crop, params, has_fg=HAS_FG)
    # Kernel stores activations in bf16 and uses bf16 MXU operands with f32
    # accumulation; the reference is f32 HIGHEST, so expected |err| ~ 1e-2
    # while real bugs (wrong tap / ordering / padding) show up as O(1).
    assert np.allclose(np.asarray(latent_3d), np.asarray(ref_3d), rtol=8e-2, atol=8e-2)
    assert np.allclose(np.asarray(latent_fg), np.asarray(ref_fg), rtol=8e-2, atol=8e-2)

    print("KERNEL_OK")
</pallas_src>

<mosaic_0001>
module attributes {stable_mosaic.version = 11 : i64} {
  func.func @_encoder_kernel(%arg0: i32, %arg1: memref<1x362x32xbf16, #tpu.memory_space<vmem>>, %arg2: memref<2700x32xbf16, #tpu.memory_space<vmem>>, %arg3: memref<7x32xf32, #tpu.memory_space<vmem>>, %arg4: memref<1x1x32xf32, #tpu.memory_space<vmem>>, %arg5: memref<362x32xbf16, #tpu.memory_space<vmem>>, %arg6: memref<362x32xf32, #tpu.memory_space<vmem>>, %arg7: memref<122x32xbf16, #tpu.memory_space<vmem>>, %arg8: memref<122x32xbf16, #tpu.memory_space<vmem>>, %arg9: memref<122x32xf32, #tpu.memory_space<vmem>>, %arg10: memref<50x32xbf16, #tpu.memory_space<vmem>>, %arg11: memref<50x32xbf16, #tpu.memory_space<vmem>>, %arg12: memref<50x32xbf16, #tpu.memory_space<vmem>>) attributes {dimension_semantics = [#tpu.dimension_semantics<parallel>], iteration_bounds = array<i64: 2>, scalar_prefetch = 0 : i64, scratch_operands = 8 : i64, tpu.core_type = #tpu.core_type<tc>, window_params = [{transform_indices = @transform_0, window_bounds = array<i64: 1, 362, 32>}, {pipeline_mode = #tpu.pipeline_mode<synchronous>, transform_indices = @transform_1, window_bounds = array<i64: 2700, 32>}, {pipeline_mode = #tpu.pipeline_mode<synchronous>, transform_indices = @transform_2, window_bounds = array<i64: 7, 32>}, {transform_indices = @transform_3, window_bounds = array<i64: 1, 1, 32>}]} {
    %cst = arith.constant 0.000000e+00 : bf16
    %0 = vector.broadcast %cst : bf16 to vector<19x32xbf16>
    %c0 = arith.constant 0 : index
    %c0_0 = arith.constant 0 : index
    %1 = vector.load %arg5[%c0, %c0_0] : memref<362x32xbf16, #tpu.memory_space<vmem>>, vector<19x32xbf16>
    tpu.vector_store %arg5[%c0, %c0_0], %0 {strides = array<i32>} : memref<362x32xbf16, #tpu.memory_space<vmem>>, vector<19x32xbf16>,
    %c343 = arith.constant 343 : index
    %c0_1 = arith.constant 0 : index
    %2 = vector.load %arg5[%c343, %c0_1] : memref<362x32xbf16, #tpu.memory_space<vmem>>, vector<19x32xbf16>
    tpu.vector_store %arg5[%c343, %c0_1], %0 {strides = array<i32>} : memref<362x32xbf16, #tpu.memory_space<vmem>>, vector<19x32xbf16>,
    %cst_2 = arith.constant 0.000000e+00 : bf16
    %3 = vector.broadcast %cst_2 : bf16 to vector<11x32xbf16>
    %c0_3 = arith.constant 0 : index
    %c0_4 = arith.constant 0 : index
    %4 = vector.load %arg8[%c0_3, %c0_4] : memref<122x32xbf16, #tpu.memory_space<vmem>>, vector<11x32xbf16>
    tpu.vector_store %arg8[%c0_3, %c0_4], %3 {strides = array<i32>} : memref<122x32xbf16, #tpu.memory_space<vmem>>, vector<11x32xbf16>,
    %c111 = arith.constant 111 : index
    %c0_5 = arith.constant 0 : index
    %5 = vector.load %arg8[%c111, %c0_5] : memref<122x32xbf16, #tpu.memory_space<vmem>>, vector<11x32xbf16>
    tpu.vector_store %arg8[%c111, %c0_5], %3 {strides = array<i32>} : memref<122x32xbf16, #tpu.memory_space<vmem>>, vector<11x32xbf16>,
    %cst_6 = arith.constant 0.000000e+00 : bf16
    %6 = vector.broadcast %cst_6 : bf16 to vector<7x32xbf16>
    %c0_7 = arith.constant 0 : index
    %c0_8 = arith.constant 0 : index
    %7 = vector.load %arg11[%c0_7, %c0_8] : memref<50x32xbf16, #tpu.memory_space<vmem>>, vector<7x32xbf16>
    tpu.vector_store %arg11[%c0_7, %c0_8], %6 {strides = array<i32>} : memref<50x32xbf16, #tpu.memory_space<vmem>>, vector<7x32xbf16>,
    %c43 = arith.constant 43 : index
    %c0_9 = arith.constant 0 : index
    %8 = vector.load %arg11[%c43, %c0_9] : memref<50x32xbf16, #tpu.memory_space<vmem>>, vector<7x32xbf16>
    tpu.vector_store %arg11[%c43, %c0_9], %6 {strides = array<i32>} : memref<50x32xbf16, #tpu.memory_space<vmem>>, vector<7x32xbf16>,
    %cst_10 = arith.constant 0.000000e+00 : bf16
    %9 = vector.broadcast %cst_10 : bf16 to vector<122x32xbf16>
    %c0_11 = arith.constant 0 : index
    %c0_12 = arith.constant 0 : index
    %10 = vector.load %arg7[%c0_11, %c0_12] : memref<122x32xbf16, #tpu.memory_space<vmem>>, vector<122x32xbf16>
    tpu.vector_store %arg7[%c0_11, %c0_12], %9 {strides = array<i32>} : memref<122x32xbf16, #tpu.memory_space<vmem>>, vector<122x32xbf16>,
    %cst_13 = arith.constant 0.000000e+00 : bf16
    %11 = vector.broadcast %cst_13 : bf16 to vector<50x32xbf16>
    %c0_14 = arith.constant 0 : index
    %c0_15 = arith.constant 0 : index
    %12 = vector.load %arg10[%c0_14, %c0_15] : memref<50x32xbf16, #tpu.memory_space<vmem>>, vector<50x32xbf16>
    tpu.vector_store %arg10[%c0_14, %c0_15], %11 {strides = array<i32>} : memref<50x32xbf16, #tpu.memory_space<vmem>>, vector<50x32xbf16>,
    %c0_16 = arith.constant 0 : index
    %c0_17 = arith.constant 0 : index
    %c0_18 = arith.constant 0 : index
    %13 = vector.load %arg1[%c0_16, %c0_17, %c0_18] : memref<1x362x32xbf16, #tpu.memory_space<vmem>>, vector<1x324x32xbf16>
    %14 = vector.shape_cast %13 : vector<1x324x32xbf16> to vector<324x32xbf16>
    %c0_19 = arith.constant 0 : index
    %c1 = arith.constant 1 : index
    %c0_20 = arith.constant 0 : index
    %15 = vector.load %arg1[%c0_19, %c1, %c0_20] : memref<1x362x32xbf16, #tpu.memory_space<vmem>>, vector<1x324x32xbf16>
    %16 = vector.shape_cast %15 : vector<1x324x32xbf16> to vector<324x32xbf16>
    %c0_21 = arith.constant 0 : index
    %c2 = arith.constant 2 : index
    %c0_22 = arith.constant 0 : index
    %17 = vector.load %arg1[%c0_21, %c2, %c0_22] : memref<1x362x32xbf16, #tpu.memory_space<vmem>>, vector<1x324x32xbf16>
    %18 = vector.shape_cast %17 : vector<1x324x32xbf16> to vector<324x32xbf16>
    %c0_23 = arith.constant 0 : index
    %c18 = arith.constant 18 : index
    %c0_24 = arith.constant 0 : index
    %19 = vector.load %arg1[%c0_23, %c18, %c0_24] : memref<1x362x32xbf16, #tpu.memory_space<vmem>>, vector<1x324x32xbf16>
    %20 = vector.shape_cast %19 : vector<1x324x32xbf16> to vector<324x32xbf16>
    %c0_25 = arith.constant 0 : index
    %c19 = arith.constant 19 : index
    %c0_26 = arith.constant 0 : index
    %21 = vector.load %arg1[%c0_25, %c19, %c0_26] : memref<1x362x32xbf16, #tpu.memory_space<vmem>>, vector<1x324x32xbf16>
    %22 = vector.shape_cast %21 : vector<1x324x32xbf16> to vector<324x32xbf16>
    %c0_27 = arith.constant 0 : index
    %c20 = arith.constant 20 : index
    %c0_28 = arith.constant 0 : index
    %23 = vector.load %arg1[%c0_27, %c20, %c0_28] : memref<1x362x32xbf16, #tpu.memory_space<vmem>>, vector<1x324x32xbf16>
    %24 = vector.shape_cast %23 : vector<1x324x32xbf16> to vector<324x32xbf16>
    %c0_29 = arith.constant 0 : index
    %c36 = arith.constant 36 : index
    %c0_30 = arith.constant 0 : index
    %25 = vector.load %arg1[%c0_29, %c36, %c0_30] : memref<1x362x32xbf16, #tpu.memory_space<vmem>>, vector<1x324x32xbf16>
    %26 = vector.shape_cast %25 : vector<1x324x32xbf16> to vector<324x32xbf16>
    %c0_31 = arith.constant 0 : index
    %c37 = arith.constant 37 : index
    %c0_32 = arith.constant 0 : index
    %27 = vector.load %arg1[%c0_31, %c37, %c0_32] : memref<1x362x32xbf16, #tpu.memory_space<vmem>>, vector<1x324x32xbf16>
    %28 = vector.shape_cast %27 : vector<1x324x32xbf16> to vector<324x32xbf16>
    %c0_33 = arith.constant 0 : index
    %c38 = arith.constant 38 : index
    %c0_34 = arith.constant 0 : index
    %29 = vector.load %arg1[%c0_33, %c38, %c0_34] : memref<1x362x32xbf16, #tpu.memory_space<vmem>>, vector<1x324x32xbf16>
    %30 = vector.shape_cast %29 : vector<1x324x32xbf16> to vector<324x32xbf16>
    %31 = tpu.concatenate %14, %16, %18, %20, %22, %24, %26, %28, %30 in 1 : vector<324x32xbf16>, vector<324x32xbf16>, vector<324x32xbf16>, vector<324x32xbf16>, vector<324x32xbf16>, vector<324x32xbf16>, vector<324x32xbf16>, vector<324x32xbf16>, vector<324x32xbf16> -> vector<324x288xbf16>
    %c0_35 = arith.constant 0 : index
    %c0_36 = arith.constant 0 : index
    %32 = vector.load %arg2[%c0_35, %c0_36] : memref<2700x32xbf16, #tpu.memory_space<vmem>>, vector<288x32xbf16>
    %cst_37 = arith.constant dense<0.000000e+00> : vector<324x32xf32>
    %33 = tpu.matmul %31, %32, %cst_37 {dimension_numbers = #tpu.dot_dimension_numbers<[1], [0], [0], [1], [0, 0, 1, 1], [], []>} : vector<324x288xbf16>, vector<288x32xbf16>, vector<324x32xf32> -> vector<324x32xf32>
    %c0_38 = arith.constant 0 : index
    %c0_39 = arith.constant 0 : index
    %34 = vector.load %arg3[%c0_38, %c0_39] : memref<7x32xf32, #tpu.memory_space<vmem>>, vector<1x32xf32>
    %35 = vector.broadcast %34 : vector<1x32xf32> to vector<324x32xf32>
    %36 = arith.addf %33, %35 : vector<324x32xf32>
    %cst_40 = arith.constant 0.000000e+00 : f32
    %37 = vector.broadcast %cst_40 : f32 to vector<324x32xf32>
    %38 = arith.maximumf %36, %37 : vector<324x32xf32>
    %c2240 = arith.constant 2240 : index
    %c0_41 = arith.constant 0 : index
    %39 = vector.load %arg2[%c2240, %c0_41] : memref<2700x32xbf16, #tpu.memory_space<vmem>>, vector<324x32xbf16>
    %40 = arith.extf %39 : vector<324x32xbf16> to vector<324x32xf32>
    %41 = arith.mulf %38, %40 : vector<324x32xf32>
    %42 = arith.truncf %41 : vector<324x32xf32> to vector<324x32xbf16>
    %c19_42 = arith.constant 19 : index
    %c0_43 = arith.constant 0 : index
    %43 = vector.load %arg5[%c19_42, %c0_43] : memref<362x32xbf16, #tpu.memory_space<vmem>>, vector<324x32xbf16>
    tpu.vector_store %arg5[%c19_42, %c0_43], %42 {strides = array<i32>} : memref<362x32xbf16, #tpu.memory_space<vmem>>, vector<324x32xbf16>,
    %c0_44 = arith.constant 0 : index
    %c0_45 = arith.constant 0 : index
    %44 = vector.load %arg5[%c0_44, %c0_45] : memref<362x32xbf16, #tpu.memory_space<vmem>>, vector<324x32xbf16>
    %c1_46 = arith.constant 1 : index
    %c0_47 = arith.constant 0 : index
    %45 = vector.load %arg5[%c1_46, %c0_47] : memref<362x32xbf16, #tpu.memory_space<vmem>>, vector<324x32xbf16>
    %c2_48 = arith.constant 2 : index
    %c0_49 = arith.constant 0 : index
    %46 = vector.load %arg5[%c2_48, %c0_49] : memref<362x32xbf16, #tpu.memory_space<vmem>>, vector<324x32xbf16>
    %c18_50 = arith.constant 18 : index
    %c0_51 = arith.constant 0 : index
    %47 = vector.load %arg5[%c18_50, %c0_51] : memref<362x32xbf16, #tpu.memory_space<vmem>>, vector<324x32xbf16>
    %c19_52 = arith.constant 19 : index
    %c0_53 = arith.constant 0 : index
    %48 = vector.load %arg5[%c19_52, %c0_53] : memref<362x32xbf16, #tpu.memory_space<vmem>>, vector<324x32xbf16>
    %c20_54 = arith.constant 20 : index
    %c0_55 = arith.constant 0 : index
    %49 = vector.load %arg5[%c20_54, %c0_55] : memref<362x32xbf16, #tpu.memory_space<vmem>>, vector<324x32xbf16>
    %c36_56 = arith.constant 36 : index
    %c0_57 = arith.constant 0 : index
    %50 = vector.load %arg5[%c36_56, %c0_57] : memref<362x32xbf16, #tpu.memory_space<vmem>>, vector<324x32xbf16>
    %c37_58 = arith.constant 37 : index
    %c0_59 = arith.constant 0 : index
    %51 = vector.load %arg5[%c37_58, %c0_59] : memref<362x32xbf16, #tpu.memory_space<vmem>>, vector<324x32xbf16>
    %c38_60 = arith.constant 38 : index
    %c0_61 = arith.constant 0 : index
    %52 = vector.load %arg5[%c38_60, %c0_61] : memref<362x32xbf16, #tpu.memory_space<vmem>>, vector<324x32xbf16>
    %53 = tpu.concatenate %44, %45, %46, %47, %48, %49, %50, %51, %52 in 1 : vector<324x32xbf16>, vector<324x32xbf16>, vector<324x32xbf16>, vector<324x32xbf16>, vector<324x32xbf16>, vector<324x32xbf16>, vector<324x32xbf16>, vector<324x32xbf16>, vector<324x32xbf16> -> vector<324x288xbf16>
    %c288 = arith.constant 288 : index
    %c0_62 = arith.constant 0 : index
    %54 = vector.load %arg2[%c288, %c0_62] : memref<2700x32xbf16, #tpu.memory_space<vmem>>, vector<288x32xbf16>
    %cst_63 = arith.constant dense<0.000000e+00> : vector<324x32xf32>
    %55 = tpu.matmul %53, %54, %cst_63 {dimension_numbers = #tpu.dot_dimension_numbers<[1], [0], [0], [1], [0, 0, 1, 1], [], []>} : vector<324x288xbf16>, vector<288x32xbf16>, vector<324x32xf32> -> vector<324x32xf32>
    %c1_64 = arith.constant 1 : index
    %c0_65 = arith.constant 0 : index
    %56 = vector.load %arg3[%c1_64, %c0_65] : memref<7x32xf32, #tpu.memory_space<vmem>>, vector<1x32xf32>
    %57 = vector.broadcast %56 : vector<1x32xf32> to vector<324x32xf32>
    %58 = arith.addf %55, %57 : vector<324x32xf32>
    %cst_66 = arith.constant 0.000000e+00 : f32
    %59 = vector.broadcast %cst_66 : f32 to vector<324x32xf32>
    %60 = arith.maximumf %58, %59 : vector<324x32xf32>
    %c19_67 = arith.constant 19 : index
    %c0_68 = arith.constant 0 : index
    %61 = vector.load %arg6[%c19_67, %c0_68] : memref<362x32xf32, #tpu.memory_space<vmem>>, vector<324x32xf32>
    tpu.vector_store %arg6[%c19_67, %c0_68], %60 {strides = array<i32>} : memref<362x32xf32, #tpu.memory_space<vmem>>, vector<324x32xf32>,
    %c38_69 = arith.constant 38 : index
    %c0_70 = arith.constant 0 : index
    %62 = tpu.strided_load %arg6[%c38_69, %c0_70] {strides = array<i32: 2, 1>} : memref<362x32xf32, #tpu.memory_space<vmem>>, vector<8x32xf32>
    %c39 = arith.constant 39 : index
    %c0_71 = arith.constant 0 : index
    %63 = tpu.strided_load %arg6[%c39, %c0_71] {strides = array<i32: 2, 1>} : memref<362x32xf32, #tpu.memory_space<vmem>>, vector<8x32xf32>
    %c56 = arith.constant 56 : index
    %c0_72 = arith.constant 0 : index
    %64 = tpu.strided_load %arg6[%c56, %c0_72] {strides = array<i32: 2, 1>} : memref<362x32xf32, #tpu.memory_space<vmem>>, vector<8x32xf32>
    %c57 = arith.constant 57 : index
    %c0_73 = arith.constant 0 : index
    %65 = tpu.strided_load %arg6[%c57, %c0_73] {strides = array<i32: 2, 1>} : memref<362x32xf32, #tpu.memory_space<vmem>>, vector<8x32xf32>
    %66 = arith.maximumf %62, %63 : vector<8x32xf32>
    %67 = arith.maximumf %64, %65 : vector<8x32xf32>
    %68 = arith.maximumf %66, %67 : vector<8x32xf32>
    %69 = arith.truncf %68 : vector<8x32xf32> to vector<8x32xbf16>
    %c22 = arith.constant 22 : index
    %c0_74 = arith.constant 0 : index
    %70 = vector.load %arg7[%c22, %c0_74] : memref<122x32xbf16, #tpu.memory_space<vmem>>, vector<8x32xbf16>
    tpu.vector_store %arg7[%c22, %c0_74], %69 {strides = array<i32>} : memref<122x32xbf16, #tpu.memory_space<vmem>>, vector<8x32xbf16>,
    %c74 = arith.constant 74 : index
    %c0_75 = arith.constant 0 : index
    %71 = tpu.strided_load %arg6[%c74, %c0_75] {strides = array<i32: 2, 1>} : memref<362x32xf32, #tpu.memory_space<vmem>>, vector<8x32xf32>
    %c75 = arith.constant 75 : index
    %c0_76 = arith.constant 0 : index
    %72 = tpu.strided_load %arg6[%c75, %c0_76] {strides = array<i32: 2, 1>} : memref<362x32xf32, #tpu.memory_space<vmem>>, vector<8x32xf32>
    %c92 = arith.constant 92 : index
    %c0_77 = arith.constant 0 : index
    %73 = tpu.strided_load %arg6[%c92, %c0_77] {strides = array<i32: 2, 1>} : memref<362x32xf32, #tpu.memory_space<vmem>>, vector<8x32xf32>
    %c93 = arith.constant 93 : index
    %c0_78 = arith.constant 0 : index
    %74 = tpu.strided_load %arg6[%c93, %c0_78] {strides = array<i32: 2, 1>} : memref<362x32xf32, #tpu.memory_space<vmem>>, vector<8x32xf32>
    %75 = arith.maximumf %71, %72 : vector<8x32xf32>
    %76 = arith.maximumf %73, %74 : vector<8x32xf32>
    %77 = arith.maximumf %75, %76 : vector<8x32xf32>
    %78 = arith.truncf %77 : vector<8x32xf32> to vector<8x32xbf16>
    %c32 = arith.constant 32 : index
    %c0_79 = arith.constant 0 : index
    %79 = vector.load %arg7[%c32, %c0_79] : memref<122x32xbf16, #tpu.memory_space<vmem>>, vector<8x32xbf16>
    tpu.vector_store %arg7[%c32, %c0_79], %78 {strides = array<i32>} : memref<122x32xbf16, #tpu.memory_space<vmem>>, vector<8x32xbf16>,
    %c110 = arith.constant 110 : index
    %c0_80 = arith.constant 0 : index
    %80 = tpu.strided_load %arg6[%c110, %c0_80] {strides = array<i32: 2, 1>} : memref<362x32xf32, #tpu.memory_space<vmem>>, vector<8x32xf32>
    %c111_81 = arith.constant 111 : index
    %c0_82 = arith.constant 0 : index
    %81 = tpu.strided_load %arg6[%c111_81, %c0_82] {strides = array<i32: 2, 1>} : memref<362x32xf32, #tpu.memory_space<vmem>>, vector<8x32xf32>
    %c128 = arith.constant 128 : index
    %c0_83 = arith.constant 0 : index
    %82 = tpu.strided_load %arg6[%c128, %c0_83] {strides = array<i32: 2, 1>} : memref<362x32xf32, #tpu.memory_space<vmem>>, vector<8x32xf32>
    %c129 = arith.constant 129 : index
    %c0_84 = arith.constant 0 : index
    %83 = tpu.strided_load %arg6[%c129, %c0_84] {strides = array<i32: 2, 1>} : memref<362x32xf32, #tpu.memory_space<vmem>>, vector<8x32xf32>
    %84 = arith.maximumf %80, %81 : vector<8x32xf32>
    %85 = arith.maximumf %82, %83 : vector<8x32xf32>
    %86 = arith.maximumf %84, %85 : vector<8x32xf32>
    %87 = arith.truncf %86 : vector<8x32xf32> to vector<8x32xbf16>
    %c42 = arith.constant 42 : index
    %c0_85 = arith.constant 0 : index
    %88 = vector.load %arg7[%c42, %c0_85] : memref<122x32xbf16, #tpu.memory_space<vmem>>, vector<8x32xbf16>
    tpu.vector_store %arg7[%c42, %c0_85], %87 {strides = array<i32>} : memref<122x32xbf16, #tpu.memory_space<vmem>>, vector<8x32xbf16>,
    %c146 = arith.constant 146 : index
    %c0_86 = arith.constant 0 : index
    %89 = tpu.strided_load %arg6[%c146, %c0_86] {strides = array<i32: 2, 1>} : memref<362x32xf32, #tpu.memory_space<vmem>>, vector<8x32xf32>
    %c147 = arith.constant 147 : index
    %c0_87 = arith.constant 0 : index
    %90 = tpu.strided_load %arg6[%c147, %c0_87] {strides = array<i32: 2, 1>} : memref<362x32xf32, #tpu.memory_space<vmem>>, vector<8x32xf32>
    %c164 = arith.constant 164 : index
    %c0_88 = arith.constant 0 : index
    %91 = tpu.strided_load %arg6[%c164, %c0_88] {strides = array<i32: 2, 1>} : memref<362x32xf32, #tpu.memory_space<vmem>>, vector<8x32xf32>
    %c165 = arith.constant 165 : index
    %c0_89 = arith.constant 0 : index
    %92 = tpu.strided_load %arg6[%c165, %c0_89] {strides = array<i32: 2, 1>} : memref<362x32xf32, #tpu.memory_space<vmem>>, vector<8x32xf32>
    %93 = arith.maximumf %89, %90 : vector<8x32xf32>
    %94 = arith.maximumf %91, %92 : vector<8x32xf32>
    %95 = arith.maximumf %93, %94 : vector<8x32xf32>
    %96 = arith.truncf %95 : vector<8x32xf32> to vector<8x32xbf16>
    %c52 = arith.constant 52 : index
    %c0_90 = arith.constant 0 : index
    %97 = vector.load %arg7[%c52, %c0_90] : memref<122x32xbf16, #tpu.memory_space<vmem>>, vector<8x32xbf16>
    tpu.vector_store %arg7[%c52, %c0_90], %96 {strides = array<i32>} : memref<122x32xbf16, #tpu.memory_space<vmem>>, vector<8x32xbf16>,
    %c182 = arith.constant 182 : index
    %c0_91 = arith.constant 0 : index
    %98 = tpu.strided_load %arg6[%c182, %c0_91] {strides = array<i32: 2, 1>} : memref<362x32xf32, #tpu.memory_space<vmem>>, vector<8x32xf32>
    %c183 = arith.constant 183 : index
    %c0_92 = arith.constant 0 : index
    %99 = tpu.strided_load %arg6[%c183, %c0_92] {strides = array<i32: 2, 1>} : memref<362x32xf32, #tpu.memory_space<vmem>>, vector<8x32xf32>
    %c200 = arith.constant 200 : index
    %c0_93 = arith.constant 0 : index
    %100 = tpu.strided_load %arg6[%c200, %c0_93] {strides = array<i32: 2, 1>} : memref<362x32xf32, #tpu.memory_space<vmem>>, vector<8x32xf32>
    %c201 = arith.constant 201 : index
    %c0_94 = arith.constant 0 : index
    %101 = tpu.strided_load %arg6[%c201, %c0_94] {strides = array<i32: 2, 1>} : memref<362x32xf32, #tpu.memory_space<vmem>>, vector<8x32xf32>
    %102 = arith.maximumf %98, %99 : vector<8x32xf32>
    %103 = arith.maximumf %100, %101 : vector<8x32xf32>
    %104 = arith.maximumf %102, %103 : vector<8x32xf32>
    %105 = arith.truncf %104 : vector<8x32xf32> to vector<8x32xbf16>
    %c62 = arith.constant 62 : index
    %c0_95 = arith.constant 0 : index
    %106 = vector.load %arg7[%c62, %c0_95] : memref<122x32xbf16, #tpu.memory_space<vmem>>, vector<8x32xbf16>
    tpu.vector_store %arg7[%c62, %c0_95], %105 {strides = array<i32>} : memref<122x32xbf16, #tpu.memory_space<vmem>>, vector<8x32xbf16>,
    %c218 = arith.constant 218 : index
    %c0_96 = arith.constant 0 : index
    %107 = tpu.strided_load %arg6[%c218, %c0_96] {strides = array<i32: 2, 1>} : memref<362x32xf32, #tpu.memory_space<vmem>>, vector<8x32xf32>
    %c219 = arith.constant 219 : index
    %c0_97 = arith.constant 0 : index
    %108 = tpu.strided_load %arg6[%c219, %c0_97] {strides = array<i32: 2, 1>} : memref<362x32xf32, #tpu.memory_space<vmem>>, vector<8x32xf32>
    %c236 = arith.constant 236 : index
    %c0_98 = arith.constant 0 : index
    %109 = tpu.strided_load %arg6[%c236, %c0_98] {strides = array<i32: 2, 1>} : memref<362x32xf32, #tpu.memory_space<vmem>>, vector<8x32xf32>
    %c237 = arith.constant 237 : index
    %c0_99 = arith.constant 0 : index
    %110 = tpu.strided_load %arg6[%c237, %c0_99] {strides = array<i32: 2, 1>} : memref<362x32xf32, #tpu.memory_space<vmem>>, vector<8x32xf32>
    %111 = arith.maximumf %107, %108 : vector<8x32xf32>
    %112 = arith.maximumf %109, %110 : vector<8x32xf32>
    %113 = arith.maximumf %111, %112 : vector<8x32xf32>
    %114 = arith.truncf %113 : vector<8x32xf32> to vector<8x32xbf16>
    %c72 = arith.constant 72 : index
    %c0_100 = arith.constant 0 : index
    %115 = vector.load %arg7[%c72, %c0_100] : memref<122x32xbf16, #tpu.memory_space<vmem>>, vector<8x32xbf16>
    tpu.vector_store %arg7[%c72, %c0_100], %114 {strides = array<i32>} : memref<122x32xbf16, #tpu.memory_space<vmem>>, vector<8x32xbf16>,
    %c254 = arith.constant 254 : index
    %c0_101 = arith.constant 0 : index
    %116 = tpu.strided_load %arg6[%c254, %c0_101] {strides = array<i32: 2, 1>} : memref<362x32xf32, #tpu.memory_space<vmem>>, vector<8x32xf32>
    %c255 = arith.constant 255 : index
    %c0_102 = arith.constant 0 : index
    %117 = tpu.strided_load %arg6[%c255, %c0_102] {strides = array<i32: 2, 1>} : memref<362x32xf32, #tpu.memory_space<vmem>>, vector<8x32xf32>
    %c272 = arith.constant 272 : index
    %c0_103 = arith.constant 0 : index
    %118 = tpu.strided_load %arg6[%c272, %c0_103] {strides = array<i32: 2, 1>} : memref<362x32xf32, #tpu.memory_space<vmem>>, vector<8x32xf32>
    %c273 = arith.constant 273 : index
    %c0_104 = arith.constant 0 : index
    %119 = tpu.strided_load %arg6[%c273, %c0_104] {strides = array<i32: 2, 1>} : memref<362x32xf32, #tpu.memory_space<vmem>>, vector<8x32xf32>
    %120 = arith.maximumf %116, %117 : vector<8x32xf32>
    %121 = arith.maximumf %118, %119 : vector<8x32xf32>
    %122 = arith.maximumf %120, %121 : vector<8x32xf32>
    %123 = arith.truncf %122 : vector<8x32xf32> to vector<8x32xbf16>
    %c82 = arith.constant 82 : index
    %c0_105 = arith.constant 0 : index
    %124 = vector.load %arg7[%c82, %c0_105] : memref<122x32xbf16, #tpu.memory_space<vmem>>, vector<8x32xbf16>
    tpu.vector_store %arg7[%c82, %c0_105], %123 {strides = array<i32>} : memref<122x32xbf16, #tpu.memory_space<vmem>>, vector<8x32xbf16>,
    %c290 = arith.constant 290 : index
    %c0_106 = arith.constant 0 : index
    %125 = tpu.strided_load %arg6[%c290, %c0_106] {strides = array<i32: 2, 1>} : memref<362x32xf32, #tpu.memory_space<vmem>>, vector<8x32xf32>
    %c291 = arith.constant 291 : index
    %c0_107 = arith.constant 0 : index
    %126 = tpu.strided_load %arg6[%c291, %c0_107] {strides = array<i32: 2, 1>} : memref<362x32xf32, #tpu.memory_space<vmem>>, vector<8x32xf32>
    %c308 = arith.constant 308 : index
    %c0_108 = arith.constant 0 : index
    %127 = tpu.strided_load %arg6[%c308, %c0_108] {strides = array<i32: 2, 1>} : memref<362x32xf32, #tpu.memory_space<vmem>>, vector<8x32xf32>
    %c309 = arith.constant 309 : index
    %c0_109 = arith.constant 0 : index
    %128 = tpu.strided_load %arg6[%c309, %c0_109] {strides = array<i32: 2, 1>} : memref<362x32xf32, #tpu.memory_space<vmem>>, vector<8x32xf32>
    %129 = arith.maximumf %125, %126 : vector<8x32xf32>
    %130 = arith.maximumf %127, %128 : vector<8x32xf32>
    %131 = arith.maximumf %129, %130 : vector<8x32xf32>
    %132 = arith.truncf %131 : vector<8x32xf32> to vector<8x32xbf16>
    %c92_110 = arith.constant 92 : index
    %c0_111 = arith.constant 0 : index
    %133 = vector.load %arg7[%c92_110, %c0_111] : memref<122x32xbf16, #tpu.memory_space<vmem>>, vector<8x32xbf16>
    tpu.vector_store %arg7[%c92_110, %c0_111], %132 {strides = array<i32>} : memref<122x32xbf16, #tpu.memory_space<vmem>>, vector<8x32xbf16>,
    %c0_112 = arith.constant 0 : index
    %c0_113 = arith.constant 0 : index
    %134 = vector.load %arg7[%c0_112, %c0_113] : memref<122x32xbf16, #tpu.memory_space<vmem>>, vector<100x32xbf16>
    %c1_114 = arith.constant 1 : index
    %c0_115 = arith.constant 0 : index
    %135 = vector.load %arg7[%c1_114, %c0_115] : memref<122x32xbf16, #tpu.memory_space<vmem>>, vector<100x32xbf16>
    %c2_116 = arith.constant 2 : index
    %c0_117 = arith.constant 0 : index
    %136 = vector.load %arg7[%c2_116, %c0_117] : memref<122x32xbf16, #tpu.memory_space<vmem>>, vector<100x32xbf16>
    %c10 = arith.constant 10 : index
    %c0_118 = arith.constant 0 : index
    %137 = vector.load %arg7[%c10, %c0_118] : memref<122x32xbf16, #tpu.memory_space<vmem>>, vector<100x32xbf16>
    %c11 = arith.constant 11 : index
    %c0_119 = arith.constant 0 : index
    %138 = vector.load %arg7[%c11, %c0_119] : memref<122x32xbf16, #tpu.memory_space<vmem>>, vector<100x32xbf16>
    %c12 = arith.constant 12 : index
    %c0_120 = arith.constant 0 : index
    %139 = vector.load %arg7[%c12, %c0_120] : memref<122x32xbf16, #tpu.memory_space<vmem>>, vector<100x32xbf16>
    %c20_121 = arith.constant 20 : index
    %c0_122 = arith.constant 0 : index
    %140 = vector.load %arg7[%c20_121, %c0_122] : memref<122x32xbf16, #tpu.memory_space<vmem>>, vector<100x32xbf16>
    %c21 = arith.constant 21 : index
    %c0_123 = arith.constant 0 : index
    %141 = vector.load %arg7[%c21, %c0_123] : memref<122x32xbf16, #tpu.memory_space<vmem>>, vector<100x32xbf16>
    %c22_124 = arith.constant 22 : index
    %c0_125 = arith.constant 0 : index
    %142 = vector.load %arg7[%c22_124, %c0_125] : memref<122x32xbf16, #tpu.memory_space<vmem>>, vector<100x32xbf16>
    %143 = tpu.concatenate %134, %135, %136, %137, %138, %139, %140, %141, %142 in 1 : vector<100x32xbf16>, vector<100x32xbf16>, vector<100x32xbf16>, vector<100x32xbf16>, vector<100x32xbf16>, vector<100x32xbf16>, vector<100x32xbf16>, vector<100x32xbf16>, vector<100x32xbf16> -> vector<100x288xbf16>
    %c576 = arith.constant 576 : index
    %c0_126 = arith.constant 0 : index
    %144 = vector.load %arg2[%c576, %c0_126] : memref<2700x32xbf16, #tpu.memory_space<vmem>>, vector<288x32xbf16>
    %cst_127 = arith.constant dense<0.000000e+00> : vector<100x32xf32>
    %145 = tpu.matmul %143, %144, %cst_127 {dimension_numbers = #tpu.dot_dimension_numbers<[1], [0], [0], [1], [0, 0, 1, 1], [], []>} : vector<100x288xbf16>, vector<288x32xbf16>, vector<100x32xf32> -> vector<100x32xf32>
    %c2_128 = arith.constant 2 : index
    %c0_129 = arith.constant 0 : index
    %146 = vector.load %arg3[%c2_128, %c0_129] : memref<7x32xf32, #tpu.memory_space<vmem>>, vector<1x32xf32>
    %147 = vector.broadcast %146 : vector<1x32xf32> to vector<100x32xf32>
    %148 = arith.addf %145, %147 : vector<100x32xf32>
    %cst_130 = arith.constant 0.000000e+00 : f32
    %149 = vector.broadcast %cst_130 : f32 to vector<100x32xf32>
    %150 = arith.maximumf %148, %149 : vector<100x32xf32>
    %c2564 = arith.constant 2564 : index
    %c0_131 = arith.constant 0 : index
    %151 = vector.load %arg2[%c2564, %c0_131] : memref<2700x32xbf16, #tpu.memory_space<vmem>>, vector<100x32xbf16>
    %152 = arith.extf %151 : vector<100x32xbf16> to vector<100x32xf32>
    %153 = arith.mulf %150, %152 : vector<100x32xf32>
    %154 = arith.truncf %153 : vector<100x32xf32> to vector<100x32xbf16>
    %c11_132 = arith.constant 11 : index
    %c0_133 = arith.constant 0 : index
    %155 = vector.load %arg8[%c11_132, %c0_133] : memref<122x32xbf16, #tpu.memory_space<vmem>>, vector<100x32xbf16>
    tpu.vector_store %arg8[%c11_132, %c0_133], %154 {strides = array<i32>} : memref<122x32xbf16, #tpu.memory_space<vmem>>, vector<100x32xbf16>,
    %c0_134 = arith.constant 0 : index
    %c0_135 = arith.constant 0 : index
    %156 = vector.load %arg8[%c0_134, %c0_135] : memref<122x32xbf16, #tpu.memory_space<vmem>>, vector<100x32xbf16>
    %c1_136 = arith.constant 1 : index
    %c0_137 = arith.constant 0 : index
    %157 = vector.load %arg8[%c1_136, %c0_137] : memref<122x32xbf16, #tpu.memory_space<vmem>>, vector<100x32xbf16>
    %c2_138 = arith.constant 2 : index
    %c0_139 = arith.constant 0 : index
    %158 = vector.load %arg8[%c2_138, %c0_139] : memref<122x32xbf16, #tpu.memory_space<vmem>>, vector<100x32xbf16>
    %c10_140 = arith.constant 10 : index
    %c0_141 = arith.constant 0 : index
    %159 = vector.load %arg8[%c10_140, %c0_141] : memref<122x32xbf16, #tpu.memory_space<vmem>>, vector<100x32xbf16>
    %c11_142 = arith.constant 11 : index
    %c0_143 = arith.constant 0 : index
    %160 = vector.load %arg8[%c11_142, %c0_143] : memref<122x32xbf16, #tpu.memory_space<vmem>>, vector<100x32xbf16>
    %c12_144 = arith.constant 12 : index
    %c0_145 = arith.constant 0 : index
    %161 = vector.load %arg8[%c12_144, %c0_145] : memref<122x32xbf16, #tpu.memory_space<vmem>>, vector<100x32xbf16>
    %c20_146 = arith.constant 20 : index
    %c0_147 = arith.constant 0 : index
    %162 = vector.load %arg8[%c20_146, %c0_147] : memref<122x32xbf16, #tpu.memory_space<vmem>>, vector<100x32xbf16>
    %c21_148 = arith.constant 21 : index
    %c0_149 = arith.constant 0 : index
    %163 = vector.load %arg8[%c21_148, %c0_149] : memref<122x32xbf16, #tpu.memory_space<vmem>>, vector<100x32xbf16>
    %c22_150 = arith.constant 22 : index
    %c0_151 = arith.constant 0 : index
    %164 = vector.load %arg8[%c22_150, %c0_151] : memref<122x32xbf16, #tpu.memory_space<vmem>>, vector<100x32xbf16>
    %165 = tpu.concatenate %156, %157, %158, %159, %160, %161, %162, %163, %164 in 1 : vector<100x32xbf16>, vector<100x32xbf16>, vector<100x32xbf16>, vector<100x32xbf16>, vector<100x32xbf16>, vector<100x32xbf16>, vector<100x32xbf16>, vector<100x32xbf16>, vector<100x32xbf16> -> vector<100x288xbf16>
    %c864 = arith.constant 864 : index
    %c0_152 = arith.constant 0 : index
    %166 = vector.load %arg2[%c864, %c0_152] : memref<2700x32xbf16, #tpu.memory_space<vmem>>, vector<288x32xbf16>
    %cst_153 = arith.constant dense<0.000000e+00> : vector<100x32xf32>
    %167 = tpu.matmul %165, %166, %cst_153 {dimension_numbers = #tpu.dot_dimension_numbers<[1], [0], [0], [1], [0, 0, 1, 1], [], []>} : vector<100x288xbf16>, vector<288x32xbf16>, vector<100x32xf32> -> vector<100x32xf32>
    %c3 = arith.constant 3 : index
    %c0_154 = arith.constant 0 : index
    %168 = vector.load %arg3[%c3, %c0_154] : memref<7x32xf32, #tpu.memory_space<vmem>>, vector<1x32xf32>
    %169 = vector.broadcast %168 : vector<1x32xf32> to vector<100x32xf32>
    %170 = arith.addf %167, %169 : vector<100x32xf32>
    %cst_155 = arith.constant 0.000000e+00 : f32
    %171 = vector.broadcast %cst_155 : f32 to vector<100x32xf32>
    %172 = arith.maximumf %170, %171 : vector<100x32xf32>
    %c11_156 = arith.constant 11 : index
    %c0_157 = arith.constant 0 : index
    %173 = vector.load %arg9[%c11_156, %c0_157] : memref<122x32xf32, #tpu.memory_space<vmem>>, vector<100x32xf32>
    tpu.vector_store %arg9[%c11_156, %c0_157], %172 {strides = array<i32>} : memref<122x32xf32, #tpu.memory_space<vmem>>, vector<100x32xf32>,
    %c22_158 = arith.constant 22 : index
    %c0_159 = arith.constant 0 : index
    %174 = tpu.strided_load %arg9[%c22_158, %c0_159] {strides = array<i32: 2, 1>} : memref<122x32xf32, #tpu.memory_space<vmem>>, vector<4x32xf32>
    %c23 = arith.constant 23 : index
    %c0_160 = arith.constant 0 : index
    %175 = tpu.strided_load %arg9[%c23, %c0_160] {strides = array<i32: 2, 1>} : memref<122x32xf32, #tpu.memory_space<vmem>>, vector<4x32xf32>
    %c32_161 = arith.constant 32 : index
    %c0_162 = arith.constant 0 : index
    %176 = tpu.strided_load %arg9[%c32_161, %c0_162] {strides = array<i32: 2, 1>} : memref<122x32xf32, #tpu.memory_space<vmem>>, vector<4x32xf32>
    %c33 = arith.constant 33 : index
    %c0_163 = arith.constant 0 : index
    %177 = tpu.strided_load %arg9[%c33, %c0_163] {strides = array<i32: 2, 1>} : memref<122x32xf32, #tpu.memory_space<vmem>>, vector<4x32xf32>
    %178 = arith.maximumf %174, %175 : vector<4x32xf32>
    %179 = arith.maximumf %176, %177 : vector<4x32xf32>
    %180 = arith.maximumf %178, %179 : vector<4x32xf32>
    %181 = arith.truncf %180 : vector<4x32xf32> to vector<4x32xbf16>
    %c14 = arith.constant 14 : index
    %c0_164 = arith.constant 0 : index
    %182 = vector.load %arg10[%c14, %c0_164] : memref<50x32xbf16, #tpu.memory_space<vmem>>, vector<4x32xbf16>
    tpu.vector_store %arg10[%c14, %c0_164], %181 {strides = array<i32>} : memref<50x32xbf16, #tpu.memory_space<vmem>>, vector<4x32xbf16>,
    %c42_165 = arith.constant 42 : index
    %c0_166 = arith.constant 0 : index
    %183 = tpu.strided_load %arg9[%c42_165, %c0_166] {strides = array<i32: 2, 1>} : memref<122x32xf32, #tpu.memory_space<vmem>>, vector<4x32xf32>
    %c43_167 = arith.constant 43 : index
    %c0_168 = arith.constant 0 : index
    %184 = tpu.strided_load %arg9[%c43_167, %c0_168] {strides = array<i32: 2, 1>} : memref<122x32xf32, #tpu.memory_space<vmem>>, vector<4x32xf32>
    %c52_169 = arith.constant 52 : index
    %c0_170 = arith.constant 0 : index
    %185 = tpu.strided_load %arg9[%c52_169, %c0_170] {strides = array<i32: 2, 1>} : memref<122x32xf32, #tpu.memory_space<vmem>>, vector<4x32xf32>
    %c53 = arith.constant 53 : index
    %c0_171 = arith.constant 0 : index
    %186 = tpu.strided_load %arg9[%c53, %c0_171] {strides = array<i32: 2, 1>} : memref<122x32xf32, #tpu.memory_space<vmem>>, vector<4x32xf32>
    %187 = arith.maximumf %183, %184 : vector<4x32xf32>
    %188 = arith.maximumf %185, %186 : vector<4x32xf32>
    %189 = arith.maximumf %187, %188 : vector<4x32xf32>
    %190 = arith.truncf %189 : vector<4x32xf32> to vector<4x32xbf16>
    %c20_172 = arith.constant 20 : index
    %c0_173 = arith.constant 0 : index
    %191 = vector.load %arg10[%c20_172, %c0_173] : memref<50x32xbf16, #tpu.memory_space<vmem>>, vector<4x32xbf16>
    tpu.vector_store %arg10[%c20_172, %c0_173], %190 {strides = array<i32>} : memref<50x32xbf16, #tpu.memory_space<vmem>>, vector<4x32xbf16>,
    %c62_174 = arith.constant 62 : index
    %c0_175 = arith.constant 0 : index
    %192 = tpu.strided_load %arg9[%c62_174, %c0_175] {strides = array<i32: 2, 1>} : memref<122x32xf32, #tpu.memory_space<vmem>>, vector<4x32xf32>
    %c63 = arith.constant 63 : index
    %c0_176 = arith.constant 0 : index
    %193 = tpu.strided_load %arg9[%c63, %c0_176] {strides = array<i32: 2, 1>} : memref<122x32xf32, #tpu.memory_space<vmem>>, vector<4x32xf32>
    %c72_177 = arith.constant 72 : index
    %c0_178 = arith.constant 0 : index
    %194 = tpu.strided_load %arg9[%c72_177, %c0_178] {strides = array<i32: 2, 1>} : memref<122x32xf32, #tpu.memory_space<vmem>>, vector<4x32xf32>
    %c73 = arith.constant 73 : index
    %c0_179 = arith.constant 0 : index
    %195 = tpu.strided_load %arg9[%c73, %c0_179] {strides = array<i32: 2, 1>} : memref<122x32xf32, #tpu.memory_space<vmem>>, vector<4x32xf32>
    %196 = arith.maximumf %192, %193 : vector<4x32xf32>
    %197 = arith.maximumf %194, %195 : vector<4x32xf32>
    %198 = arith.maximumf %196, %197 : vector<4x32xf32>
    %199 = arith.truncf %198 : vector<4x32xf32> to vector<4x32xbf16>
    %c26 = arith.constant 26 : index
    %c0_180 = arith.constant 0 : index
    %200 = vector.load %arg10[%c26, %c0_180] : memref<50x32xbf16, #tpu.memory_space<vmem>>, vector<4x32xbf16>
    tpu.vector_store %arg10[%c26, %c0_180], %199 {strides = array<i32>} : memref<50x32xbf16, #tpu.memory_space<vmem>>, vector<4x32xbf16>,
    %c82_181 = arith.constant 82 : index
    %c0_182 = arith.constant 0 : index
    %201 = tpu.strided_load %arg9[%c82_181, %c0_182] {strides = array<i32: 2, 1>} : memref<122x32xf32, #tpu.memory_space<vmem>>, vector<4x32xf32>
    %c83 = arith.constant 83 : index
    %c0_183 = arith.constant 0 : index
    %202 = tpu.strided_load %arg9[%c83, %c0_183] {strides = array<i32: 2, 1>} : memref<122x32xf32, #tpu.memory_space<vmem>>, vector<4x32xf32>
    %c92_184 = arith.constant 92 : index
    %c0_185 = arith.constant 0 : index
    %203 = tpu.strided_load %arg9[%c92_184, %c0_185] {strides = array<i32: 2, 1>} : memref<122x32xf32, #tpu.memory_space<vmem>>, vector<4x32xf32>
    %c93_186 = arith.constant 93 : index
    %c0_187 = arith.constant 0 : index
    %204 = tpu.strided_load %arg9[%c93_186, %c0_187] {strides = array<i32: 2, 1>} : memref<122x32xf32, #tpu.memory_space<vmem>>, vector<4x32xf32>
    %205 = arith.maximumf %201, %202 : vector<4x32xf32>
    %206 = arith.maximumf %203, %204 : vector<4x32xf32>
    %207 = arith.maximumf %205, %206 : vector<4x32xf32>
    %208 = arith.truncf %207 : vector<4x32xf32> to vector<4x32xbf16>
    %c32_188 = arith.constant 32 : index
    %c0_189 = arith.constant 0 : index
    %209 = vector.load %arg10[%c32_188, %c0_189] : memref<50x32xbf16, #tpu.memory_space<vmem>>, vector<4x32xbf16>
    tpu.vector_store %arg10[%c32_188, %c0_189], %208 {strides = array<i32>} : memref<50x32xbf16, #tpu.memory_space<vmem>>, vector<4x32xbf16>,
    %c0_190 = arith.constant 0 : index
    %c0_191 = arith.constant 0 : index
    %210 = vector.load %arg10[%c0_190, %c0_191] : memref<50x32xbf16, #tpu.memory_space<vmem>>, vector<36x32xbf16>
    %c1_192 = arith.constant 1 : index
    %c0_193 = arith.constant 0 : index
    %211 = vector.load %arg10[%c1_192, %c0_193] : memref<50x32xbf16, #tpu.memory_space<vmem>>, vector<36x32xbf16>
    %c2_194 = arith.constant 2 : index
    %c0_195 = arith.constant 0 : index
    %212 = vector.load %arg10[%c2_194, %c0_195] : memref<50x32xbf16, #tpu.memory_space<vmem>>, vector<36x32xbf16>
    %c6 = arith.constant 6 : index
    %c0_196 = arith.constant 0 : index
    %213 = vector.load %arg10[%c6, %c0_196] : memref<50x32xbf16, #tpu.memory_space<vmem>>, vector<36x32xbf16>
    %c7 = arith.constant 7 : index
    %c0_197 = arith.constant 0 : index
    %214 = vector.load %arg10[%c7, %c0_197] : memref<50x32xbf16, #tpu.memory_space<vmem>>, vector<36x32xbf16>
    %c8 = arith.constant 8 : index
    %c0_198 = arith.constant 0 : index
    %215 = vector.load %arg10[%c8, %c0_198] : memref<50x32xbf16, #tpu.memory_space<vmem>>, vector<36x32xbf16>
    %c12_199 = arith.constant 12 : index
    %c0_200 = arith.constant 0 : index
    %216 = vector.load %arg10[%c12_199, %c0_200] : memref<50x32xbf16, #tpu.memory_space<vmem>>, vector<36x32xbf16>
    %c13 = arith.constant 13 : index
    %c0_201 = arith.constant 0 : index
    %217 = vector.load %arg10[%c13, %c0_201] : memref<50x32xbf16, #tpu.memory_space<vmem>>, vector<36x32xbf16>
    %c14_202 = arith.constant 14 : index
    %c0_203 = arith.constant 0 : index
    %218 = vector.load %arg10[%c14_202, %c0_203] : memref<50x32xbf16, #tpu.memory_space<vmem>>, vector<36x32xbf16>
    %219 = tpu.concatenate %210, %211, %212, %213, %214, %215, %216, %217, %218 in 1 : vector<36x32xbf16>, vector<36x32xbf16>, vector<36x32xbf16>, vector<36x32xbf16>, vector<36x32xbf16>, vector<36x32xbf16>, vector<36x32xbf16>, vector<36x32xbf16>, vector<36x32xbf16> -> vector<36x288xbf16>
    %c1152 = arith.constant 1152 : index
    %c0_204 = arith.constant 0 : index
    %220 = vector.load %arg2[%c1152, %c0_204] : memref<2700x32xbf16, #tpu.memory_space<vmem>>, vector<288x32xbf16>
    %cst_205 = arith.constant dense<0.000000e+00> : vector<36x32xf32>
    %221 = tpu.matmul %219, %220, %cst_205 {dimension_numbers = #tpu.dot_dimension_numbers<[1], [0], [0], [1], [0, 0, 1, 1], [], []>} : vector<36x288xbf16>, vector<288x32xbf16>, vector<36x32xf32> -> vector<36x32xf32>
    %c4 = arith.constant 4 : index
    %c0_206 = arith.constant 0 : index
    %222 = vector.load %arg3[%c4, %c0_206] : memref<7x32xf32, #tpu.memory_space<vmem>>, vector<1x32xf32>
    %223 = vector.broadcast %222 : vector<1x32xf32> to vector<36x32xf32>
    %224 = arith.addf %221, %223 : vector<36x32xf32>
    %cst_207 = arith.constant 0.000000e+00 : f32
    %225 = vector.broadcast %cst_207 : f32 to vector<36x32xf32>
    %226 = arith.maximumf %224, %225 : vector<36x32xf32>
    %c2664 = arith.constant 2664 : index
    %c0_208 = arith.constant 0 : index
    %227 = vector.load %arg2[%c2664, %c0_208] : memref<2700x32xbf16, #tpu.memory_space<vmem>>, vector<36x32xbf16>
    %228 = arith.extf %227 : vector<36x32xbf16> to vector<36x32xf32>
    %229 = arith.mulf %226, %228 : vector<36x32xf32>
    %230 = arith.truncf %229 : vector<36x32xf32> to vector<36x32xbf16>
    %c7_209 = arith.constant 7 : index
    %c0_210 = arith.constant 0 : index
    %231 = vector.load %arg11[%c7_209, %c0_210] : memref<50x32xbf16, #tpu.memory_space<vmem>>, vector<36x32xbf16>
    tpu.vector_store %arg11[%c7_209, %c0_210], %230 {strides = array<i32>} : memref<50x32xbf16, #tpu.memory_space<vmem>>, vector<36x32xbf16>,
    %c0_211 = arith.constant 0 : index
    %c0_212 = arith.constant 0 : index
    %232 = vector.load %arg11[%c0_211, %c0_212] : memref<50x32xbf16, #tpu.memory_space<vmem>>, vector<36x32xbf16>
    %c1_213 = arith.constant 1 : index
    %c0_214 = arith.constant 0 : index
    %233 = vector.load %arg11[%c1_213, %c0_214] : memref<50x32xbf16, #tpu.memory_space<vmem>>, vector<36x32xbf16>
    %c2_215 = arith.constant 2 : index
    %c0_216 = arith.constant 0 : index
    %234 = vector.load %arg11[%c2_215, %c0_216] : memref<50x32xbf16, #tpu.memory_space<vmem>>, vector<36x32xbf16>
    %c6_217 = arith.constant 6 : index
    %c0_218 = arith.constant 0 : index
    %235 = vector.load %arg11[%c6_217, %c0_218] : memref<50x32xbf16, #tpu.memory_space<vmem>>, vector<36x32xbf16>
    %c7_219 = arith.constant 7 : index
    %c0_220 = arith.constant 0 : index
    %236 = vector.load %arg11[%c7_219, %c0_220] : memref<50x32xbf16, #tpu.memory_space<vmem>>, vector<36x32xbf16>
    %c8_221 = arith.constant 8 : index
    %c0_222 = arith.constant 0 : index
    %237 = vector.load %arg11[%c8_221, %c0_222] : memref<50x32xbf16, #tpu.memory_space<vmem>>, vector<36x32xbf16>
    %c12_223 = arith.constant 12 : index
    %c0_224 = arith.constant 0 : index
    %238 = vector.load %arg11[%c12_223, %c0_224] : memref<50x32xbf16, #tpu.memory_space<vmem>>, vector<36x32xbf16>
    %c13_225 = arith.constant 13 : index
    %c0_226 = arith.constant 0 : index
    %239 = vector.load %arg11[%c13_225, %c0_226] : memref<50x32xbf16, #tpu.memory_space<vmem>>, vector<36x32xbf16>
    %c14_227 = arith.constant 14 : index
    %c0_228 = arith.constant 0 : index
    %240 = vector.load %arg11[%c14_227, %c0_228] : memref<50x32xbf16, #tpu.memory_space<vmem>>, vector<36x32xbf16>
    %241 = tpu.concatenate %232, %233, %234, %235, %236, %237, %238, %239, %240 in 1 : vector<36x32xbf16>, vector<36x32xbf16>, vector<36x32xbf16>, vector<36x32xbf16>, vector<36x32xbf16>, vector<36x32xbf16>, vector<36x32xbf16>, vector<36x32xbf16>, vector<36x32xbf16> -> vector<36x288xbf16>
    %c1440 = arith.constant 1440 : index
    %c0_229 = arith.constant 0 : index
    %242 = vector.load %arg2[%c1440, %c0_229] : memref<2700x32xbf16, #tpu.memory_space<vmem>>, vector<288x32xbf16>
    %cst_230 = arith.constant dense<0.000000e+00> : vector<36x32xf32>
    %243 = tpu.matmul %241, %242, %cst_230 {dimension_numbers = #tpu.dot_dimension_numbers<[1], [0], [0], [1], [0, 0, 1, 1], [], []>} : vector<36x288xbf16>, vector<288x32xbf16>, vector<36x32xf32> -> vector<36x32xf32>
    %c5 = arith.constant 5 : index
    %c0_231 = arith.constant 0 : index
    %244 = vector.load %arg3[%c5, %c0_231] : memref<7x32xf32, #tpu.memory_space<vmem>>, vector<1x32xf32>
    %245 = vector.broadcast %244 : vector<1x32xf32> to vector<36x32xf32>
    %246 = arith.addf %243, %245 : vector<36x32xf32>
    %cst_232 = arith.constant 0.000000e+00 : f32
    %247 = vector.broadcast %cst_232 : f32 to vector<36x32xf32>
    %248 = arith.maximumf %246, %247 : vector<36x32xf32>
    %249 = arith.truncf %248 : vector<36x32xf32> to vector<36x32xbf16>
    %c7_233 = arith.constant 7 : index
    %c0_234 = arith.constant 0 : index
    %250 = vector.load %arg12[%c7_233, %c0_234] : memref<50x32xbf16, #tpu.memory_space<vmem>>, vector<36x32xbf16>
    tpu.vector_store %arg12[%c7_233, %c0_234], %249 {strides = array<i32>} : memref<50x32xbf16, #tpu.memory_space<vmem>>, vector<36x32xbf16>,
    %c14_235 = arith.constant 14 : index
    %c0_236 = arith.constant 0 : index
    %251 = vector.load %arg12[%c14_235, %c0_236] : memref<50x32xbf16, #tpu.memory_space<vmem>>, vector<1x32xbf16>
    %c15 = arith.constant 15 : index
    %c0_237 = arith.constant 0 : index
    %252 = vector.load %arg12[%c15, %c0_237] : memref<50x32xbf16, #tpu.memory_space<vmem>>, vector<1x32xbf16>
    %c16 = arith.constant 16 : index
    %c0_238 = arith.constant 0 : index
    %253 = vector.load %arg12[%c16, %c0_238] : memref<50x32xbf16, #tpu.memory_space<vmem>>, vector<1x32xbf16>
    %c17 = arith.constant 17 : index
    %c0_239 = arith.constant 0 : index
    %254 = vector.load %arg12[%c17, %c0_239] : memref<50x32xbf16, #tpu.memory_space<vmem>>, vector<1x32xbf16>
    %c20_240 = arith.constant 20 : index
    %c0_241 = arith.constant 0 : index
    %255 = vector.load %arg12[%c20_240, %c0_241] : memref<50x32xbf16, #tpu.memory_space<vmem>>, vector<1x32xbf16>
    %c21_242 = arith.constant 21 : index
    %c0_243 = arith.constant 0 : index
    %256 = vector.load %arg12[%c21_242, %c0_243] : memref<50x32xbf16, #tpu.memory_space<vmem>>, vector<1x32xbf16>
    %c22_244 = arith.constant 22 : index
    %c0_245 = arith.constant 0 : index
    %257 = vector.load %arg12[%c22_244, %c0_245] : memref<50x32xbf16, #tpu.memory_space<vmem>>, vector<1x32xbf16>
    %c23_246 = arith.constant 23 : index
    %c0_247 = arith.constant 0 : index
    %258 = vector.load %arg12[%c23_246, %c0_247] : memref<50x32xbf16, #tpu.memory_space<vmem>>, vector<1x32xbf16>
    %c26_248 = arith.constant 26 : index
    %c0_249 = arith.constant 0 : index
    %259 = vector.load %arg12[%c26_248, %c0_249] : memref<50x32xbf16, #tpu.memory_space<vmem>>, vector<1x32xbf16>
    %c27 = arith.constant 27 : index
    %c0_250 = arith.constant 0 : index
    %260 = vector.load %arg12[%c27, %c0_250] : memref<50x32xbf16, #tpu.memory_space<vmem>>, vector<1x32xbf16>
    %c28 = arith.constant 28 : index
    %c0_251 = arith.constant 0 : index
    %261 = vector.load %arg12[%c28, %c0_251] : memref<50x32xbf16, #tpu.memory_space<vmem>>, vector<1x32xbf16>
    %c29 = arith.constant 29 : index
    %c0_252 = arith.constant 0 : index
    %262 = vector.load %arg12[%c29, %c0_252] : memref<50x32xbf16, #tpu.memory_space<vmem>>, vector<1x32xbf16>
    %c32_253 = arith.constant 32 : index
    %c0_254 = arith.constant 0 : index
    %263 = vector.load %arg12[%c32_253, %c0_254] : memref<50x32xbf16, #tpu.memory_space<vmem>>, vector<1x32xbf16>
    %c33_255 = arith.constant 33 : index
    %c0_256 = arith.constant 0 : index
    %264 = vector.load %arg12[%c33_255, %c0_256] : memref<50x32xbf16, #tpu.memory_space<vmem>>, vector<1x32xbf16>
    %c34 = arith.constant 34 : index
    %c0_257 = arith.constant 0 : index
    %265 = vector.load %arg12[%c34, %c0_257] : memref<50x32xbf16, #tpu.memory_space<vmem>>, vector<1x32xbf16>
    %c35 = arith.constant 35 : index
    %c0_258 = arith.constant 0 : index
    %266 = vector.load %arg12[%c35, %c0_258] : memref<50x32xbf16, #tpu.memory_space<vmem>>, vector<1x32xbf16>
    %267 = tpu.concatenate %251, %252, %253, %254, %255, %256, %257, %258, %259, %260, %261, %262, %263, %264, %265, %266 in 1 : vector<1x32xbf16>, vector<1x32xbf16>, vector<1x32xbf16>, vector<1x32xbf16>, vector<1x32xbf16>, vector<1x32xbf16>, vector<1x32xbf16>, vector<1x32xbf16>, vector<1x32xbf16>, vector<1x32xbf16>, vector<1x32xbf16>, vector<1x32xbf16>, vector<1x32xbf16>, vector<1x32xbf16>, vector<1x32xbf16>, vector<1x32xbf16> -> vector<1x512xbf16>
    %c1728 = arith.constant 1728 : index
    %c0_259 = arith.constant 0 : index
    %268 = vector.load %arg2[%c1728, %c0_259] : memref<2700x32xbf16, #tpu.memory_space<vmem>>, vector<512x32xbf16>
    %cst_260 = arith.constant dense<0.000000e+00> : vector<1x32xf32>
    %269 = tpu.matmul %267, %268, %cst_260 {dimension_numbers = #tpu.dot_dimension_numbers<[1], [0], [0], [1], [0, 0, 1, 1], [], []>} : vector<1x512xbf16>, vector<512x32xbf16>, vector<1x32xf32> -> vector<1x32xf32>
    %c6_261 = arith.constant 6 : index
    %c0_262 = arith.constant 0 : index
    %270 = vector.load %arg3[%c6_261, %c0_262] : memref<7x32xf32, #tpu.memory_space<vmem>>, vector<1x32xf32>
    %271 = arith.addf %269, %270 : vector<1x32xf32>
    %c0_263 = arith.constant 0 : index
    %c0_264 = arith.constant 0 : index
    %c0_265 = arith.constant 0 : index
    %272 = vector.load %arg4[%c0_263, %c0_264, %c0_265] : memref<1x1x32xf32, #tpu.memory_space<vmem>>, vector<1x1x32xf32>
    %273 = vector.shape_cast %272 : vector<1x1x32xf32> to vector<1x32xf32>
    %274 = vector.shape_cast %271 : vector<1x32xf32> to vector<1x1x32xf32>
    tpu.vector_store %arg4[%c0_263, %c0_264, %c0_265], %274 {strides = array<i32>} : memref<1x1x32xf32, #tpu.memory_space<vmem>>, vector<1x1x32xf32>,
    return
  }
  func.func @transform_0(%arg0: i32) -> (i32, i32, i32) {
    %c0_i32 = arith.constant 0 : i32
    %c0_i32_0 = arith.constant 0 : i32
    %c0_i32_1 = arith.constant 0 : i32
    return %arg0, %c0_i32, %c0_i32_0 : i32, i32, i32
  }
  func.func @transform_1(%arg0: i32) -> (i32, i32) {
    %c0_i32 = arith.constant 0 : i32
    %c0_i32_0 = arith.constant 0 : i32
    %c0_i32_1 = arith.constant 0 : i32
    return %c0_i32, %c0_i32_0 : i32, i32
  }
  func.func @transform_2(%arg0: i32) -> (i32, i32) {
    %c0_i32 = arith.constant 0 : i32
    %c0_i32_0 = arith.constant 0 : i32
    %c0_i32_1 = arith.constant 0 : i32
    return %c0_i32, %c0_i32_0 : i32, i32
  }
  func.func @transform_3(%arg0: i32) -> (i32, i32, i32) {
    %c0_i32 = arith.constant 0 : i32
    %c0_i32_0 = arith.constant 0 : i32
    %c0_i32_1 = arith.constant 0 : i32
    return %arg0, %c0_i32, %c0_i32_0 : i32, i32, i32
  }
}

</mosaic_0001>

<bundles_post_ra>
// kernel: encoder_forward.1
= control target key start
LH: loop header
LB: loop body
LE: loop exit
PB: predicated region body
PF: predicated region fallthrough
CT: control target
= control target key end

     0   :  { %s10399_s12 = smov 0   ;;  %s15425_s0 = inlined_call_operand.vmem [shape: bf16[2,362,32], index: 0, kind: input, shape index: {}]   ;;  %s15426_s1 = inlined_call_operand.vmem [shape: bf16[2700,32], index: 1, kind: input, shape index: {}]   ;;  %s15427_s2 = inlined_call_operand.vmem [shape: f32[7,32], index: 2, kind: input, shape index: {}]   ;;  %s15428_s3 = inlined_call_operand.vmem [shape: f32[2,1,32], index: 3, kind: output, shape index: {}]  }
   0x1 LB: > { %s8830_s13 = sadd.s32 4294967295, %s10371_s12   ;;  %p8834_p0 = scmp.ge.s32.totalorder %s10371_s12, 1  ;;  %s10371_s12 = sphi %s10399_s12, %s13_s12  }
   0x2   : > { %p137_p1 = scmp.lt.s32.totalorder %s10371_s12, 3 }
   0x4   : > { %p138_p2 = pnand %p8834_p0, %p137_p1 }
   0x6   : > { %141 = sbr.rel (%p138_p2) target bundleno = 2834 (0xb12), region = 32 }
   0xb   : > { %p159_p3 = scmp.lt.s32.totalorder %s8830_s13, 1  ;;  %v10074_v0 = vld [vmem:[%s15426_s1 + $0x38] sm:$0xff]   ;;  %v15431_v1 = vmov 0   ;;  %v10075_v2 = vld [vmem:[%s15426_s1 + $0x30] sm:$0xff]   ;;  %vm15478_vm0 = vcmask 1045504   ;;  %vm605_vm1 = vcmask 1046528  }
   0xc   : > { %1714 = vmatprep.subr.bf16.mxu0 %v15431_v1  ;;  %v10077_v3 = vld [vmem:[%s15426_s1 + $0x28] sm:$0xff]   ;;  %v10078_v13 = vld [vmem:[%s15426_s1 + $0x20] sm:$0xff]   ;;  %v15433_v14 = vmov 0.0   ;;  %s10375_s26 = smov 64   ;;  %s10376_s27 = smov 32   ;;  %v10079_v39 = vld [vmem:[%s15426_s1 + $0x18] sm:$0xff]  }
   0xd   : > { %s15753_s13 = smov (!%p159_p3, %s8830_s13), 1  ;;  %1715 = vmatpush1.bf16.msra.mxu0 %v10074_v0  ;;  %9774 = vmatprep.subr.bf16.mxu1 %v15433_v14  ;;  %vm392_vm2 = vsmask.f32 7424  ;;  %s10377_s30 = smov 96   ;;  %v10081_v59 = vld [vmem:[%s15426_s1 + $0x10] sm:$0xff]   ;;  %vm15474_vm5 = vmmov 0  }
   0xe   : > { %s10046_s18 = smul.u32 184, %s15753_s13  ;;  %1716 = vmatprep.subr.bf16.mxu0 %v15431_v1  ;;  %vm15479_vm3 = vsmask.f32 5376  ;;  %vm15480_vm4 = vsmask.f32 6400  ;;  %9778 = vmatprep.mubr.msk.bf16.mxu1 %vm15474_vm5, %v15433_v14  ;;  %vm1141_vm6 = vcmask 1044480   ;;  %s166_s7 = scalar_lea.vmem %s15428_s3, %s15753_s13 }
   0xf   : > { %vm1183_vm7 = vcmask 261120   ;;  %vm15473_vm8 = vcmask 523264   ;;  %vm15449_vm9 = vcmask 785408   ;;  %vm15429_vm10 = vcmask 254976  }
  0x10   : > { %s10421_s21 = scalar_lea.vmem %s15425_s0, %s10046_s18  ;;  %vm172_vm11 = vsmask.f32 1280  ;;  %vm15430_vm12 = vcmask 257025   ;;  %vm203_vm14 = vsmask.f32 7942 }
  0x11   : > { %v10427_v4 = vld [vmem:[%s10421_s21 + $0x14] sm:$0xf]  ;;  %1717 = vmatpush1.bf16.msra.mxu0 %v10075_v2  ;;  %v281_v5 = vld [vmem:[%s10421_s21 + $0x10] sm:$0xc]  ;;  %v10431_v6 = vld [vmem:[%s10421_s21 + $0x18] sm:$0xff]  }
  0x12   : > { %v236_v7 = vld [vmem:[%s10421_s21 + $0x10] sm:$0xf]  ;;  %1718 = vmatprep.subr.bf16.mxu0 %v15431_v1  ;;  %v8864_v8 = vcombine.low %v281_v5, %v10427_v4  ;;  %v235_v10 = vld [vmem:[%s10421_s21 + $0xc] sm:$0xf]  ;;  %v275_v11 = vld [vmem:[%s10421_s21 + $0x8] sm:$0xe] }
  0x13   : > { %v10437_v9 = vcombine.low %v236_v7, %v10427_v4  ;;  %v280_v12 = vld [vmem:[%s10421_s21 + $0x8] sm:$0xc]  ;;  %v857_v15 = vrot.slane %v10431_v6, 2  ;;  %v10448_v18 = vcombine.low %v275_v11, %v235_v10  ;;  %v233_v19 = vld [vmem:[%s10421_s21 + $0x4] sm:$0xf]  ;;  %v10487_v44 = vshll.u32 %v10431_v6, 16  ;;  %vm11220_vm13 = vmand %vm15429_vm10, %vm172_vm11 }
  0x14   : > { %v8863_v16 = vcombine.low %v280_v12, %v235_v10  ;;  %v234_v17 = vld [vmem:[%s10421_s21 + $0x8] sm:$0xf]  ;;  %v10452_v20 = vld [vmem:[%s10421_s21 + $0x20] sm:$0xff]   ;;  %v946_v21 = vrot.slane %v8864_v8, 2  ;;  %v10490_v45 = vshrl.u32 %v10431_v6, 16  ;;  %v999_v48 = vshrl.u32 %v8864_v8, 16  ;;  %vm11234_vm15 = vmand %vm15430_vm12, %vm203_vm14 }
  0x15   : > { %v855_v22 = vrot.slane %v10437_v9, 2  ;;  %v10455_v23 = vcombine.low %v234_v17, %v235_v10  ;;  %v274_v24 = vld [vmem:[%s10421_s21] sm:$0xe]  ;;  %1719 = vmatpush1.bf16.msra.mxu0 %v10077_v3  ;;  %v859_v31 = vrot.slane %v10452_v20, 2  ;;  %v10468_v34 = vrot.slane %v10437_v9, 1  ;;  %v10082_v7 = vld [vmem:[%s15426_s1 + $0x8] sm:$0xff]  }
  0x16   : > { %v232_v25 = vld [vmem:[%s10421_s21] sm:$0xf]  ;;  %v854_v26 = vrot.slane %v8863_v16, 2  ;;  %v8858_v27 = vcombine.low %v274_v24, %v233_v19  ;;  %1720 = vmatprep.subr.bf16.mxu0 %v15431_v1  ;;  %v947_v29 = vsel %vm15478_vm0, %v946_v21, %v857_v15  ;;  %v700_v35 = vrot.slane %v10448_v18, 1  ;;  %v10530_v12 = vld [vmem:[%s10421_s21 + $0x28] sm:$0xff]  }
  0x17   : > { %v10459_v28 = vcombine.low %v232_v25, %v233_v19  ;;  %v607_v30 = vrot.slane %v10455_v23, 1  ;;  %952 = vrot.lane.b32.xlu1 %v947_v29, %s10375_s26  ;;  %v401_v38 = vshll.u32 %v10455_v23, 16  ;;  %v858_v40 = vsel %vm15478_vm0, %v855_v22, %v857_v15  ;;  %v10083_v16 = vld [vmem:[%s15426_s1] sm:$0xff]  }
  0x18   : > { %v856_v32 = vsel %vm15478_vm0, %v854_v26, %v855_v22  ;;  %v606_v33 = vrot.slane %v8858_v27, 1  ;;  %v10484_v42 = vsel %vm15478_vm0, %v857_v15, %v859_v31  ;;  %v701_v46 = vsel %vm605_vm1, %v700_v35, %v10468_v34  ;;  %v10085_v26 = vld [vmem:[%s15426_s1 + $0x78] sm:$0xff]  }
  0x19   : > { %895 = vrot.lane.b32.xlu0 %v856_v32, %s10376_s27  ;;  %v394_v36 = vshrl.u32 %v10459_v28, 16  ;;  %v396_v37 = vshll.u32 %v10459_v28, 16  ;;  %1721 = vmatpush1.bf16.msra.mxu0 %v10078_v13  ;;  %v405_v47 = vshrl.u32 %v10455_v23, 16  ;;  %v1002_v49 = vshll.u32 %v8864_v8, 16 }
  0x1a   : > { %v608_v41 = vsel %vm605_vm1, %v606_v33, %v607_v30  ;;  %1722 = vmatprep.subr.bf16.mxu0 %v15431_v1  ;;  %v403_v51 = vrot.slane %v401_v38, 1  ;;  %v409_v52 = vshll.u32 %v10437_v9, 16  ;;  %v1006_v53 = vrot.slane %v10490_v45, 2  ;;  %v10086_v33 = vld [vmem:[%s15426_s1 + $0x70] sm:$0xff]  }
  0x1b   : > { %v398_v43 = vrot.slane %v396_v37, 1  ;;  %647 = vrot.lane.b32.xlu1 %v608_v41, %s10375_s26  ;;  %v1001_v54 = vrot.slane %v999_v48, 2  ;;  %v1004_v55 = vrot.slane %v1002_v49, 3  ;;  %v1007_v56 = vrot.slane %v10487_v44, 3 }
  0x1c   : > { %v10501_v57 = vshll.u32 %v10452_v20, 16  ;;  %v10505_v58 = vshrl.u32 %v10452_v20, 16  ;;  %v610_v60 = vsel %vm605_vm1, %v607_v30, %v10468_v34  ;;  %v407_v61 = vor.u32 %v405_v47, %v403_v51 }
  0x1d   : > { %897 = vrot.lane.b32.xlu0 %v858_v40, %s10376_s27  ;;  %v399_v50 = vor.u32 %v398_v43, %v394_v36  ;;  %1723 = vmatpush1.bf16.msra.mxu0 %v10079_v39  ;;  %v411_v62 = vrot.slane %v409_v52, 1  ;;  %v1005_v2 = vor.u32 %v1004_v55, %v1001_v54  ;;  %v1008_v3 = vor.u32 %v1007_v56, %v1006_v53  ;;  %v10571_v36 = vld [vmem:[%s10421_s21 + $0x30] sm:$0xff]   ;;  %v10087_v39 = vld [vmem:[%s15426_s1 + $0x68] sm:$0xff]   ;;  %v10095_v40 = vld [vmem:[%s15426_s1 + $0x80] sm:$0xff]  }
  0x1e   : > { %1724 = vmatprep.subr.bf16.mxu0 %v15431_v1  ;;  %v1011_v63 = vrot.slane %v10501_v57, 3  ;;  %v1010_v5 = vrot.slane %v10505_v58, 2  ;;  %v611_v10 = vrot.slane %v10431_v6, 1  ;;  %v413_v11 = vshrl.u32 %v10437_v9, 16 }
  0x1f   : > { %706 = vrot.lane.b32.xlu1 %v701_v46, %s10377_s30  ;;  %v404_v0 = vsel %vm392_vm2, %v399_v50, %v403_v51  ;;  %v412_v8 = vsel %vm392_vm2, %v407_v61, %v411_v62  ;;  %v1009_v13 = vsel %vm15479_vm3, %v1005_v2, %v1008_v3  ;;  %v419_v21 = vrot.slane %v10487_v44, 1  ;;  %v10089_v50 = vld [vmem:[%s15426_s1 + $0x60] sm:$0xff]   ;;  %v10615_v61 = vld [vmem:[%s10421_s21 + $0x38] sm:$0xff]  }
  0x20   : > { %v1012_v15 = vor.u32 %v1011_v63, %v1010_v5  ;;  %v612_v17 = vsel %vm605_vm1, %v10468_v34, %v611_v10  ;;  %v415_v19 = vor.u32 %v413_v11, %v411_v62  ;;  %v10543_v22 = vshll.u32 %v10530_v12, 16  ;;  %v10092_v34 = vld [vmem:[%s15426_s1 + $0x88] sm:$0xff]  }
  0x21   : > { %954 = vrot.lane.b32.xlu0 %v10484_v42, %s10375_s26  ;;  %1725 = vmatpush1.bf16.msra.mxu0 %v10081_v59  ;;  %v10547_v25 = vshrl.u32 %v10530_v12, 16  ;;  %v861_v27 = vrot.slane %v10530_v12, 2  ;;  %v613_v35 = vrot.slane %v10452_v20, 1  ;;  %v761_v41 = vrot.slane %v409_v52, 2 }
  0x22   : > { %1726 = vmatprep.subr.bf16.mxu0 %v15431_v1  ;;  %v1013_v24 = vsel %vm15479_vm3, %v1008_v3, %v1012_v15  ;;  %v420_v29 = vsel %vm392_vm2, %v415_v19, %v419_v21  ;;  %v1015_v32 = vrot.slane %v10543_v22, 3  ;;  %9775 = vmatpush3.bf16.msra.mxu1 %v10092_v34  ;;  %v760_v43 = vrot.slane %v413_v11, 1 }
  0x23   : > { %649 = vrot.lane.b32.xlu1 %v610_v60, %s10375_s26  ;;  %v1014_v30 = vrot.slane %v10547_v25, 2  ;;  %9776 = vmatprep.subr.bf16.mxu1 %v15433_v14  ;;  %v862_v37 = vsel %vm15478_vm0, %v859_v31, %v861_v27  ;;  %v427_v31 = vrot.slane %v10501_v57, 1  ;;  %v614_v46 = vsel %vm605_vm1, %v611_v10, %v613_v35  ;;  %v10090_v60 = vld [vmem:[%s15426_s1 + $0x58] sm:$0xff]   ;;  %v10091_v10 = vld [vmem:[%s15426_s1 + $0x50] sm:$0xff]  }
  0x24   : > { %v10592_v47 = vshll.u32 %v10571_v36, 16  ;;  %v10595_v48 = vshrl.u32 %v10571_v36, 16  ;;  %v863_v52 = vrot.slane %v10571_v36, 2  ;;  %v762_v55 = vor.u32 %v761_v41, %v760_v43 }
  0x25   : > { %560 = vrot.lane.b32.xlu0 %v404_v0, %s10376_s27  ;;  %1727 = vmatpush1.bf16.msra.mxu0 %v10082_v7  ;;  %v1016_v38 = vor.u32 %v1015_v32, %v1014_v30  ;;  %v753_v56 = vshrl.u32 %v10448_v18, 16  ;;  %v756_v59 = vshll.u32 %v10448_v18, 16  ;;  %v615_v63 = vrot.slane %v10530_v12, 1 }
  0x26   : > { %1728 = vmatprep.subr.bf16.mxu0 %v15431_v1  ;;  %9777 = vmatpush3.bf16.msra.mxu1 %v10095_v40  ;;  %v1018_v53 = vrot.slane %v10595_v48, 2  ;;  %v1019_v54 = vrot.slane %v10592_v47, 3  ;;  %v764_v2 = vrot.slane %v10490_v45, 1  ;;  %v765_v3 = vrot.slane %v10487_v44, 2  ;;  %v10686_v40 = vld [vmem:[%s10421_s21 + $0x40] sm:$0xff]  }
  0x27   : > { %562 = vrot.lane.b32.xlu1 %v412_v8, %s10376_s27  ;;  %4371 = vmatprep.subr.bf16.mxu1 %v15431_v1  ;;  %v1017_v49 = vsel %vm15479_vm3, %v1012_v15, %v1016_v38  ;;  %v755_v62 = vrot.slane %v753_v56, 1  ;;  %v758_v0 = vrot.slane %v756_v59, 2  ;;  %v864_v18 = vsel %vm15478_vm0, %v861_v27, %v863_v52 }
  0x28   : > { %v10626_v5 = vor.u32 %v1019_v54, %v1018_v53  ;;  %v766_v8 = vor.u32 %v765_v3, %v764_v2  ;;  %v435_v44 = vrot.slane %v10543_v22, 1  ;;  %v616_v15 = vsel %vm605_vm1, %v613_v35, %v615_v63 }
  0x29   : > { %1096 = vrot.lane.b32.xlu0 %v1009_v13, %s10377_s30  ;;  %1729 = vmatpush1.bf16.msra.mxu0 %v10083_v16  ;;  %v759_v7 = vor.u32 %v758_v0, %v755_v62  ;;  %v431_v16 = vor.u32 %v10505_v58, %v427_v31  ;;  %v10650_v19 = vshrl.u32 %v10615_v61, 16  ;;  %v1143_v27 = vrot.slane %v10431_v6, 3 }
  0x2a   : > { %1730 = vmatprep.subr.bf16.mxu0 %v15431_v1  ;;  %v10639_v13 = vsel %vm15480_vm4, %v762_v55, %v766_v8  ;;  %v768_v30 = vrot.slane %v10505_v58, 1  ;;  %v769_v32 = vrot.slane %v10501_v57, 2  ;;  %v10097_v58 = vld [vmem:[%s15426_s1 + $0x40] sm:$0xff]   ;;  %v617_v57 = vrot.slane %v10571_v36, 1 }
  0x2b   : > { %708 = vrot.lane.b32.xlu1 %v612_v17, %s10377_s30  ;;  %v10636_v11 = vsel %vm15480_vm4, %v759_v7, %v762_v55  ;;  %v1022_v6 = vrot.slane %v10650_v19, 2  ;;  %v772_v41 = vrot.slane %v10547_v25, 1  ;;  %v10711_v54 = vshrl.u32 %v10686_v40, 16 }
  0x2c   : > { %v776_v55 = vrot.slane %v10595_v48, 1  ;;  %v777_v56 = vrot.slane %v10592_v47, 2  ;;  %v867_v62 = vrot.slane %v10686_v40, 2  ;;  %v780_v2 = vrot.slane %v10650_v19, 1 }
  0x2d   : > { %1098 = vrot.lane.b32.xlu0 %v1013_v24, %s10377_s30  ;;  %1731 = vmatpush2.bf16.msra.mxu0 %v10085_v26  ;;  %v10094_v24 = vld [vmem:[%s15426_s1 + $0x48] sm:$0xff]   ;;  %vm15477_vm14 = vcmask 257024   ;;  %vm2402_vm10 = vsmask.f32 5392 }
  0x2e   : > { %1732 = vmatprep.subr.bf16.mxu0 %v15431_v1  ;;  %v778_v59 = vor.u32 %v777_v56, %v776_v55  ;;  %169 = vst.msk [vmem:[#allocation2] sm:$0xf] %vm15477_vm14, %v15431_v1  ;;  %170 = vst.msk [vmem:[#allocation2 + $0x4] sm:$0xf] %vm15477_vm14, %v15431_v1 }
  0x2f   : > { %564 = vrot.lane.b32.xlu1 %v420_v29, %s10376_s27  ;;  %183 = vst.msk [vmem:[#allocation2 + $0xac] sm:$0xf] %vm15477_vm14, %v15431_v1  ;;  %184 = vst.msk [vmem:[#allocation2 + $0xb0] sm:$0xf] %vm15477_vm14, %v15431_v1 }
  0x30   : > { %187 = vst.msk [vmem:[#allocation5] sm:$0xf] %vm15477_vm14, %v15431_v1  ;;  %194 = vst.msk [vmem:[#allocation5 + $0x38] sm:$0xf] %vm15477_vm14, %v15431_v1 }
  0x31   : > { %899 = vrot.lane.b32.xlu0 %v10484_v42, %s10376_s27  ;;  %1733 = vmatpush2.bf16.msra.mxu0 %v10086_v33  ;;  %v423_v42 = vor.u32 %v10490_v45, %v419_v21  ;;  %v285_v45 = vld [vmem:[%s10421_s21 + $0x10] sm:$0x8]  ;;  %v1021_v21 = vsel %vm15479_vm3, %v1016_v38, %v10626_v5  ;;  %v436_v33 = vsel %vm392_vm2, %v431_v16, %v435_v44  ;;  %v1145_v38 = vrot.slane %v10452_v20, 3  ;;  %vm11682_vm12 = vmor %vm172_vm11, %vm2402_vm10 }
  0x32   : > { %1734 = vmatprep.subr.bf16.mxu0 %v15431_v1  ;;  %v8868_v26 = vcombine.low %v285_v45, %v10427_v4  ;;  %v865_v4 = vrot.slane %v10615_v61, 2  ;;  %v618_v20 = vsel %vm605_vm1, %v615_v63, %v617_v57  ;;  %v1026_v63 = vrot.slane %v10711_v54, 2  ;;  %209 = vst.msk [vmem:[#allocation4] sm:$0xf] %vm15477_vm14, %v15431_v1  ;;  %210 = vst.msk [vmem:[#allocation4 + $0x4] sm:$0xf] %vm15477_vm14, %v15431_v1 }
  0x33   : > { %651 = vrot.lane.b32.xlu1 %v612_v17, %s10375_s26  ;;  %v428_v51 = vsel %vm392_vm2, %v423_v42, %v427_v31  ;;  %v10647_v17 = vshll.u32 %v10615_v61, 16  ;;  %v773_v42 = vrot.slane %v10543_v22, 2  ;;  %v439_v22 = vor.u32 %v10547_v25, %v435_v44  ;;  %211 = vst.msk [vmem:[#allocation4 + $0x8] sm:$0xf] %vm15477_vm14, %v15431_v1  ;;  %212 = vst.msk [vmem:[#allocation4 + $0xc] sm:$0xf] %vm15477_vm14, %v15431_v1 }
  0x34   : > { %v1142_v29 = vrot.slane %v8868_v26, 3  ;;  %v866_v31 = vsel %vm15478_vm0, %v863_v52, %v865_v4  ;;  %v1147_v25 = vrot.slane %v10530_v12, 3  ;;  %v868_v7 = vsel %vm15478_vm0, %v865_v4, %v867_v62  ;;  %213 = vst.msk [vmem:[#allocation4 + $0x10] sm:$0xf] %vm15477_vm14, %v15431_v1  ;;  %214 = vst.msk [vmem:[#allocation4 + $0x14] sm:$0xf] %vm15477_vm14, %v15431_v1 }
  0x35   : > { %956 = vrot.lane.b32.xlu0 %v862_v37, %s10375_s26  ;;  %1735 = vmatpush2.bf16.msra.mxu0 %v10087_v39  ;;  %v1023_v34 = vrot.slane %v10647_v17, 3  ;;  %v781_v3 = vrot.slane %v10647_v17, 2  ;;  %v784_v44 = vrot.slane %v10711_v54, 1  ;;  %v451_v26 = vrot.slane %v10647_v17, 1  ;;  %215 = vst.msk [vmem:[#allocation4 + $0x18] sm:$0xf] %vm15477_vm14, %v15431_v1 }
  0x36   : > { %1736 = vmatprep.subr.bf16.mxu0 %v15431_v1  ;;  %v1144_v35 = vsel %vm1141_vm6, %v1142_v29, %v1143_v27  ;;  %v1148_v12 = vsel %vm1141_vm6, %v1145_v38, %v1147_v25  ;;  %216 = vst.msk [vmem:[#allocation4 + $0x1c] sm:$0xf] %vm15477_vm14, %v15431_v1  ;;  %217 = vst.msk [vmem:[#allocation4 + $0x20] sm:$0xf] %vm15477_vm14, %v15431_v1  ;;  %vm15469_vm10 = vcmask 257027  }
  0x37   : > { %710 = vrot.lane.b32.xlu1 %v614_v46, %s10377_s30  ;;  %9779 = vmatmul.mubr.msk.bf16.vlgmr.msra.gmra.mxu1 %vm1183_vm7, %v1144_v35  ;;  %v1024_v43 = vor.u32 %v1023_v34, %v1022_v6  ;;  %218 = vst.msk [vmem:[#allocation4 + $0x24] sm:$0xf] %vm15477_vm14, %v15431_v1  ;;  %219 = vst.msk [vmem:[#allocation4 + $0x28] sm:$0xf] %vm15477_vm14, %v15431_v1  ;;  %vm178_vm11 = vsmask.f32 7950 }
  0x38   : > { %9782 = vmatprep.mubr.msk.bf16.mxu1 %vm15474_vm5, %v15433_v14  ;;  %220 = vst.msk [vmem:[#allocation4 + $0x2c] sm:$0xf] %vm15477_vm14, %v15431_v1  ;;  %221 = vst.msk [vmem:[#allocation4 + $0x30] sm:$0xf] %vm15477_vm14, %v15431_v1 }
  0x39   : > { %1100 = vrot.lane.b32.xlu0 %v1017_v49, %s10377_s30  ;;  %1737 = vmatpush2.bf16.msra.mxu0 %v10089_v50  ;;  %v1146_v49 = vsel %vm1141_vm6, %v1143_v27, %v1145_v38  ;;  %v443_v50 = vrot.slane %v10592_v47, 1  ;;  %v1025_v53 = vsel %vm15479_vm3, %v10626_v5, %v1024_v43  ;;  %v782_v5 = vor.u32 %v781_v3, %v780_v2 }
  0x3a   : > { %1738 = vmatprep.subr.bf16.mxu0 %v15431_v1  ;;  %v1151_v38 = vrot.slane %v10615_v61, 3  ;;  %222 = vst.msk [vmem:[#allocation4 + $0x34] sm:$0xf] %vm15477_vm14, %v15431_v1  ;;  %223 = vst.msk [vmem:[#allocation4 + $0x38] sm:$0xf] %vm15477_vm14, %v15431_v1 }
  0x3b   : > { %566 = vrot.lane.b32.xlu1 %v428_v51, %s10376_s27  ;;  %v10703_v51 = vshll.u32 %v10686_v40, 16  ;;  %v10740_v45 = vsel %vm15480_vm4, %v778_v59, %v782_v5  ;;  %225 = vst.msk [vmem:[#allocation7] sm:$0xf] %vm15477_vm14, %v15431_v1  ;;  %226 = vst.msk [vmem:[#allocation7 + $0x4] sm:$0xf] %vm15477_vm14, %v15431_v1 }
  0x3c   : > { %227 = vst.msk [vmem:[#allocation7 + $0x8] sm:$0xf] %vm15477_vm14, %v15431_v1  ;;  %228 = vst.msk [vmem:[#allocation7 + $0xc] sm:$0xf] %vm15477_vm14, %v15431_v1 }
  0x3d   : > { %901 = vrot.lane.b32.xlu0 %v862_v37, %s10376_s27  ;;  %1739 = vmatpush2.bf16.msra.mxu0 %v10090_v60  ;;  %v770_v37 = vor.u32 %v769_v32, %v768_v30  ;;  %v444_v60 = vsel %vm392_vm2, %v439_v22, %v443_v50  ;;  %v1027_v47 = vrot.slane %v10703_v51, 3  ;;  %v785_v16 = vrot.slane %v10703_v51, 2  ;;  %229 = vst.msk [vmem:[#allocation7 + $0x10] sm:$0xf] %vm15477_vm14, %v15431_v1 }
  0x3e   : > { %1740 = vmatprep.subr.bf16.mxu0 %v15431_v1  ;;  %v455_v22 = vor.u32 %v10650_v19, %v451_v26  ;;  %230 = vst.msk [vmem:[#allocation7 + $0x14] sm:$0xf] %vm15477_vm14, %v15431_v1 }
  0x3f   : > { %653 = vrot.lane.b32.xlu1 %v614_v46, %s10375_s26  ;;  %v10682_v39 = vsel %vm15480_vm4, %v766_v8, %v770_v37  ;;  %v774_v46 = vor.u32 %v773_v42, %v772_v41  ;;  %9783 = vmatmul.mubr.msk.bf16.gmra.mxu1 %vm1183_vm7, %v1146_v49  ;;  %v1028_v8 = vor.u32 %v1027_v47, %v1026_v63 }
  0x40   : > { %9786 = vmatprep.mubr.msk.bf16.mxu1 %vm15474_vm5, %v15433_v14 }
  0x41   : > { %958 = vrot.lane.b32.xlu0 %v864_v18, %s10375_s26  ;;  %1741 = vmatpush2.bf16.msra.mxu0 %v10091_v10  ;;  %v10706_v52 = vsel %vm15480_vm4, %v770_v37, %v774_v46  ;;  %v10726_v0 = vsel %vm15480_vm4, %v774_v46, %v778_v59  ;;  %v10736_v10 = vld [vmem:[%s10421_s21 + $0x48] sm:$0xff]   ;;  %v1029_v27 = vsel %vm15479_vm3, %v1024_v43, %v1028_v8  ;;  %v459_v43 = vrot.slane %v10703_v51, 1  ;;  %v10810_v59 = vld [vmem:[%s10421_s21 + $0x58] sm:$0xff]  }
  0x42   : > { %1742 = vmatprep.subr.bf16.mxu0 %v15431_v1  ;;  %v10754_v29 = vshll.u32 %v10736_v10, 16  ;;  %v10757_v30 = vshrl.u32 %v10736_v10, 16  ;;  %v869_v4 = vrot.slane %v10736_v10, 2  ;;  %v623_v56 = vrot.slane %v10736_v10, 1 }
  0x43   : > { %712 = vrot.lane.b32.xlu1 %v616_v15, %s10377_s30  ;;  %v460_v19 = vsel %vm392_vm2, %v455_v22, %v459_v43 }
  0x44   : > { %v789_v6 = vrot.slane %v10754_v29, 2  ;;  %v1030_v34 = vrot.slane %v10757_v30, 2  ;;  %v1031_v35 = vrot.slane %v10754_v29, 3  ;;  %v870_v42 = vsel %vm15478_vm0, %v867_v62, %v869_v4 }
  0x45   : > { %1102 = vrot.lane.b32.xlu0 %v1021_v21, %s10377_s30  ;;  %1743 = vmatpush2.bf16.msra.mxu0 %v10094_v24  ;;  %v447_v24 = vor.u32 %v10595_v48, %v443_v50  ;;  %v788_v48 = vrot.slane %v10757_v30, 1 }
  0x46   : > { %1744 = vmatprep.subr.bf16.mxu0 %v15431_v1 }
  0x47   : > { %568 = vrot.lane.b32.xlu1 %v436_v33, %s10376_s27  ;;  %9787 = vmatmul.mubr.msk.bf16.gmra.mxu1 %vm1183_vm7, %v1148_v12  ;;  %v452_v17 = vsel %vm392_vm2, %v447_v24, %v451_v26  ;;  %v790_v37 = vor.u32 %v789_v6, %v788_v48  ;;  %v467_v12 = vrot.slane %v10754_v29, 1  ;;  %v10853_v48 = vld [vmem:[%s10421_s21 + $0x68] sm:$0xff]  }
  0x48   : > { %9790 = vmatprep.mubr.msk.bf16.mxu1 %vm15474_vm5, %v15433_v14 }
  0x49   : > { %903 = vrot.lane.b32.xlu0 %v864_v18, %s10376_s27  ;;  %1745 = vmatpush2.bf16.msra.mxu0 %v10097_v58  ;;  %v619_v18 = vrot.slane %v10615_v61, 1  ;;  %v10772_v58 = vld [vmem:[%s10421_s21 + $0x50] sm:$0xff]   ;;  %v471_v22 = vor.u32 %v10757_v30, %v467_v12 }
  0x4a   : > { %9862 = vmatprep.subr.bf16.mxu0 %v15433_v14  ;;  %v10788_v46 = vshll.u32 %v10772_v58, 16  ;;  %v871_v51 = vrot.slane %v10772_v58, 2  ;;  %v1157_v6 = vrot.slane %v10772_v58, 3 }
  0x4b   : > { %655 = vrot.lane.b32.xlu1 %v616_v15, %s10375_s26  ;;  %v1149_v15 = vrot.slane %v10571_v36, 3  ;;  %v620_v21 = vsel %vm605_vm1, %v617_v57, %v619_v18  ;;  %v786_v36 = vor.u32 %v785_v16, %v784_v44  ;;  %v621_v57 = vrot.slane %v10686_v40, 1 }
  0x4c   : > { %v793_v55 = vrot.slane %v10788_v46, 2  ;;  %v1035_v63 = vrot.slane %v10788_v46, 3  ;;  %v463_v44 = vor.u32 %v10711_v54, %v459_v43  ;;  %v873_v54 = vrot.slane %v10810_v59, 2  ;;  %v10882_v43 = vld [vmem:[%s10421_s21 + $0x70] sm:$0xff]  }
  0x4d   : > { %960 = vrot.lane.b32.xlu0 %v866_v31, %s10375_s26  ;;  %v1150_v32 = vsel %vm1141_vm6, %v1147_v25, %v1149_v15  ;;  %v10762_v33 = vsel %vm15480_vm4, %v782_v5, %v786_v36  ;;  %v10782_v41 = vsel %vm15480_vm4, %v786_v36, %v790_v37  ;;  %v1152_v61 = vsel %vm1141_vm6, %v1149_v15, %v1151_v38 }
  0x4e   : > { %v622_v49 = vsel %vm605_vm1, %v619_v18, %v621_v57  ;;  %v1153_v25 = vrot.slane %v10686_v40, 3  ;;  %v872_v40 = vsel %vm15478_vm0, %v869_v4, %v871_v51  ;;  %v10823_v18 = vshll.u32 %v10810_v59, 16 }
  0x4f   : > { %714 = vrot.lane.b32.xlu1 %v618_v20, %s10377_s30  ;;  %9791 = vmatmul.mubr.msk.bf16.gmra.mxu1 %vm1183_vm7, %v1150_v32  ;;  %v10826_v5 = vshrl.u32 %v10810_v59, 16  ;;  %v625_v36 = vrot.slane %v10772_v58, 1  ;;  %v10850_v32 = vld [vmem:[%s10421_s21 + $0x60] sm:$0xff]   ;;  %v475_v4 = vrot.slane %v10788_v46, 1 }
  0x50   : > { %9794 = vmatprep.mubr.msk.bf16.mxu1 %vm15474_vm5, %v15433_v14  ;;  %v1154_v2 = vsel %vm1141_vm6, %v1151_v38, %v1153_v25  ;;  %v1039_v24 = vrot.slane %v10823_v18, 3  ;;  %v875_v38 = vrot.slane %v10850_v32, 2 }
  0x51   : > { %1104 = vrot.lane.b32.xlu0 %v1025_v53, %s10377_s30  ;;  %v796_v16 = vrot.slane %v10826_v5, 1 }
  0x53   : > { %570 = vrot.lane.b32.xlu1 %v444_v60, %s10376_s27 }
  0x55   : > { %905 = vrot.lane.b32.xlu0 %v866_v31, %s10376_s27  ;;  %v1032_v31 = vor.u32 %v1031_v35, %v1030_v34  ;;  %v874_v35 = vsel %vm15478_vm0, %v871_v51, %v873_v54 }
  0x57   : > { %657 = vrot.lane.b32.xlu1 %v618_v20, %s10375_s26  ;;  %v10791_v20 = vshrl.u32 %v10772_v58, 16  ;;  %v1033_v50 = vsel %vm15479_vm3, %v1028_v8, %v1032_v31  ;;  %9795 = vmatmul.mubr.msk.bf16.gmra.mxu1 %vm1183_vm7, %v1152_v61  ;;  %v624_v8 = vsel %vm605_vm1, %v621_v57, %v623_v56  ;;  %v10871_v57 = vshrl.u32 %v10850_v32, 16 }
  0x58   : > { %9798 = vmatprep.mubr.msk.bf16.mxu1 %vm15474_vm5, %v15433_v14  ;;  %v10879_v58 = vshrl.u32 %v10853_v48, 16  ;;  %v626_v61 = vsel %vm605_vm1, %v623_v56, %v625_v36 }
  0x59   : > { %962 = vrot.lane.b32.xlu0 %v868_v7, %s10375_s26  ;;  %v792_v53 = vrot.slane %v10791_v20, 1  ;;  %v1034_v62 = vrot.slane %v10791_v20, 2 }
  0x5a   : > { %v1046_v56 = vrot.slane %v10879_v58, 2 }
  0x5b   : > { %716 = vrot.lane.b32.xlu1 %v620_v21, %s10377_s30  ;;  %v794_v60 = vor.u32 %v793_v55, %v792_v53  ;;  %v1036_v3 = vor.u32 %v1035_v63, %v1034_v62  ;;  %v483_v53 = vrot.slane %v10823_v18, 1  ;;  %v877_v55 = vrot.slane %v10853_v48, 2 }
  0x5c   : > { %v1159_v62 = vrot.slane %v10810_v59, 3  ;;  %v476_v63 = vsel %vm392_vm2, %v471_v22, %v475_v4 }
  0x5d   : > { %1106 = vrot.lane.b32.xlu0 %v1029_v27, %s10377_s30  ;;  %v10815_v47 = vsel %vm15480_vm4, %v790_v37, %v794_v60  ;;  %v1037_v15 = vsel %vm15479_vm3, %v1032_v31, %v1036_v3  ;;  %v468_v27 = vsel %vm392_vm2, %v463_v44, %v467_v12  ;;  %v10868_v37 = vshll.u32 %v10850_v32, 16 }
  0x5e   : > { %v10876_v31 = vshll.u32 %v10853_v48, 16  ;;  %v10914_v12 = vshrl.u32 %v10882_v43, 16 }
  0x5f   : > { %572 = vrot.lane.b32.xlu1 %v452_v17, %s10376_s27  ;;  %9799 = vmatmul.mubr.msk.bf16.gmra.mxu1 %vm1183_vm7, %v1154_v2  ;;  %v1043_v51 = vrot.slane %v10868_v37, 3  ;;  %v491_v30 = vrot.slane %v10868_v37, 1  ;;  %v879_v2 = vrot.slane %v10882_v43, 2 }
  0x60   : > { %9802 = vmatprep.mubr.msk.bf16.mxu1 %vm15474_vm5, %v15433_v14  ;;  %v499_v44 = vrot.slane %v10876_v31, 1 }
  0x61   : > { %907 = vrot.lane.b32.xlu0 %v868_v7, %s10376_s27  ;;  %v1155_v7 = vrot.slane %v10736_v10, 3  ;;  %v1038_v10 = vrot.slane %v10826_v5, 2 }
  0x63   : > { %659 = vrot.lane.b32.xlu1 %v620_v21, %s10375_s26  ;;  %v797_v21 = vrot.slane %v10823_v18, 2  ;;  %v1156_v26 = vsel %vm1141_vm6, %v1153_v25, %v1155_v7  ;;  %v1040_v34 = vor.u32 %v1039_v24, %v1038_v10  ;;  %v1158_v46 = vsel %vm1141_vm6, %v1155_v7, %v1157_v6 }
  0x64   : > { %v629_v25 = vrot.slane %v10850_v32, 1  ;;  %v876_v7 = vsel %vm15478_vm0, %v873_v54, %v875_v38  ;;  %v1163_v54 = vrot.slane %v10853_v48, 3 }
  0x65   : > { %964 = vrot.lane.b32.xlu0 %v870_v42, %s10375_s26  ;;  %v10845_v29 = vor.u32 %v797_v21, %v796_v16  ;;  %v479_v21 = vor.u32 %v10791_v20, %v475_v4 }
  0x67   : > { %718 = vrot.lane.b32.xlu1 %v622_v49, %s10377_s30  ;;  %9803 = vmatmul.mubr.msk.bf16.gmra.mxu1 %vm1183_vm7, %v1156_v26  ;;  %v10858_v17 = vsel %vm15480_vm4, %v794_v60, %v10845_v29  ;;  %v10901_v60 = vshll.u32 %v10882_v43, 16 }
  0x68   : > { %9806 = vmatprep.mubr.msk.bf16.mxu1 %vm15474_vm5, %v15433_v14 }
  0x69   : > { %1108 = vrot.lane.b32.xlu0 %v1033_v50, %s10377_s30  ;;  %v1042_v50 = vrot.slane %v10871_v57, 2  ;;  %v1051_v18 = vrot.slane %v10901_v60, 3 }
  0x6b   : > { %574 = vrot.lane.b32.xlu1 %v460_v19, %s10376_s27  ;;  %v1047_v19 = vrot.slane %v10876_v31, 3 }
  0x6d   : > { %909 = vrot.lane.b32.xlu0 %v870_v42, %s10376_s27  ;;  %v627_v42 = vrot.slane %v10810_v59, 1 }
  0x6f   : > { %661 = vrot.lane.b32.xlu1 %v622_v49, %s10375_s26  ;;  %v1041_v49 = vsel %vm15479_vm3, %v1036_v3, %v1040_v34  ;;  %9807 = vmatmul.mubr.msk.bf16.gmra.mxu1 %vm1183_vm7, %v1158_v46  ;;  %v1160_v3 = vsel %vm1141_vm6, %v1157_v6, %v1159_v62  ;;  %v628_v16 = vsel %vm605_vm1, %v625_v36, %v627_v42  ;;  %v10937_v46 = vld [vmem:[%s10421_s21 + $0x78] sm:$0xff]  }
  0x70   : > { %9810 = vmatprep.mubr.msk.bf16.mxu1 %vm15474_vm5, %v15433_v14  ;;  %v881_v22 = vrot.slane %v10937_v46, 2 }
  0x71   : > { %966 = vrot.lane.b32.xlu0 %v872_v40, %s10375_s26 }
  0x73   : > { %720 = vrot.lane.b32.xlu1 %v624_v8, %s10377_s30 }
  0x75   : > { %1110 = vrot.lane.b32.xlu0 %v1037_v15, %s10377_s30  ;;  %v1161_v15 = vrot.slane %v10850_v32, 3 }
  0x77   : > { %576 = vrot.lane.b32.xlu1 %v468_v27, %s10376_s27  ;;  %9811 = vmatmul.mubr.msk.bf16.gmra.mxu1 %vm1183_vm7, %v1160_v3  ;;  %v1050_v27 = vrot.slane %v10914_v12, 2  ;;  %v1162_v6 = vsel %vm1141_vm6, %v1159_v62, %v1161_v15  ;;  %v630_v62 = vsel %vm605_vm1, %v627_v42, %v629_v25  ;;  %v10960_v3 = vshll.u32 %v10937_v46, 16 }
  0x78   : > { %9814 = vmatprep.mubr.msk.bf16.mxu1 %vm15474_vm5, %v15433_v14 }
  0x79   : > { %911 = vrot.lane.b32.xlu0 %v872_v40, %s10376_s27  ;;  %v631_v40 = vrot.slane %v10853_v48, 1 }
  0x7b   : > { %663 = vrot.lane.b32.xlu1 %v624_v8, %s10375_s26  ;;  %v1044_v8 = vor.u32 %v1043_v51, %v1042_v50  ;;  %v633_v50 = vrot.slane %v10882_v43, 1  ;;  %v1164_v51 = vsel %vm1141_vm6, %v1161_v15, %v1163_v54 }
  0x7d   : > { %968 = vrot.lane.b32.xlu0 %v874_v35, %s10375_s26  ;;  %v1045_v24 = vsel %vm15479_vm3, %v1040_v34, %v1044_v8  ;;  %v878_v34 = vsel %vm15478_vm0, %v875_v38, %v877_v55  ;;  %v487_v38 = vor.u32 %v10826_v5, %v483_v53 }
  0x7f   : > { %722 = vrot.lane.b32.xlu1 %v626_v61, %s10377_s30  ;;  %9815 = vmatmul.mubr.msk.bf16.gmra.mxu1 %vm1183_vm7, %v1162_v6  ;;  %v492_v5 = vsel %vm392_vm2, %v487_v38, %v491_v30  ;;  %v1052_v6 = vor.u32 %v1051_v18, %v1050_v27  ;;  %v632_v18 = vsel %vm605_vm1, %v629_v25, %v631_v40 }
  0x80   : > { %9818 = vmatprep.mubr.msk.bf16.mxu1 %vm15474_vm5, %v15433_v14  ;;  %v495_v27 = vor.u32 %v10871_v57, %v491_v30 }
  0x81   : > { %1112 = vrot.lane.b32.xlu0 %v1041_v49, %s10377_s30 }
  0x82   : > { %v500_v30 = vsel %vm392_vm2, %v495_v27, %v499_v44  ;;  %v11079_v27 = vld [vmem:[%s10421_s21 + $0x88] sm:$0xff]  }
  0x83   : > { %578 = vrot.lane.b32.xlu1 %v476_v63, %s10376_s27 }
  0x85   : > { %913 = vrot.lane.b32.xlu0 %v874_v35, %s10376_s27  ;;  %v484_v35 = vsel %vm392_vm2, %v479_v21, %v483_v53 }
  0x87   : > { %665 = vrot.lane.b32.xlu1 %v626_v61, %s10375_s26  ;;  %v1048_v61 = vor.u32 %v1047_v19, %v1046_v56  ;;  %9819 = vmatmul.mubr.msk.bf16.gmra.mxu1 %vm1183_vm7, %v1164_v51  ;;  %v1055_v51 = vrot.slane %v10960_v3, 3 }
  0x88   : > { %9822 = vmatprep.mubr.msk.bf16.mxu1 %vm15474_vm5, %v15433_v14 }
  0x89   : > { %970 = vrot.lane.b32.xlu0 %v876_v7, %s10375_s26  ;;  %v953_v10 = vpop.permute.xlu1 %952  ;;  %v1049_v56 = vsel %vm15479_vm3, %v1044_v8, %v1048_v61 }
  0x8b   : > { %v896_v26 = vpop.permute.xlu0 %895  ;;  %724 = vrot.lane.b32.xlu1 %v628_v16, %s10377_s30 }
  0x8c   : > { %v1336_v15 = vsel %vm1183_vm7, %v10636_v11, %v896_v26 }
  0x8d   : > { %1114 = vrot.lane.b32.xlu0 %v1045_v24, %s10377_s30  ;;  %v648_v36 = vpop.permute.xlu1 %647  ;;  %v1398_v11 = vsel %vm15473_vm8, %v1336_v15, %v953_v10  ;;  %v880_v10 = vsel %vm15478_vm0, %v877_v55, %v879_v2 }
  0x8f   : > { %v898_v20 = vpop.permute.xlu0 %897  ;;  %580 = vrot.lane.b32.xlu1 %v484_v35, %s10376_s27 }
  0x90   : > { %v1339_v24 = vsel %vm1183_vm7, %v10639_v13, %v898_v20  ;;  %v1167_v13 = vrot.slane %v10937_v46, 3 }
  0x91   : > { %915 = vrot.lane.b32.xlu0 %v876_v7, %s10376_s27  ;;  %v707_v4 = vpop.permute.xlu1 %706  ;;  %v1165_v7 = vrot.slane %v10882_v43, 3 }
  0x93   : > { %v955_v49 = vpop.permute.xlu0 %954  ;;  %667 = vrot.lane.b32.xlu1 %v628_v16, %s10375_s26  ;;  %v1166_v16 = vsel %vm1141_vm6, %v1163_v54, %v1165_v7  ;;  %v1168_v32 = vsel %vm1141_vm6, %v1165_v7, %v1167_v13 }
  0x94   : > { %v1400_v54 = vsel %vm15473_vm8, %v1339_v24, %v955_v49  ;;  %9823 = vmatmul.mubr.msk.bf16.gmra.mxu1 %vm1183_vm7, %v1166_v16 }
  0x95   : > { %972 = vrot.lane.b32.xlu0 %v878_v34, %s10375_s26  ;;  %v650_v19 = vpop.permute.xlu1 %649  ;;  %9826 = vmatprep.mubr.msk.bf16.mxu1 %vm15474_vm5, %v15433_v14 }
  0x97   : > { %v561_v63 = vpop.permute.xlu0 %560  ;;  %726 = vrot.lane.b32.xlu1 %v630_v62, %s10377_s30 }
  0x98   : > { %v1185_v59 = vsel %vm1183_vm7, %v10459_v28, %v561_v63 }
  0x99   : > { %1116 = vrot.lane.b32.xlu0 %v1049_v56, %s10377_s30  ;;  %v563_v42 = vpop.permute.xlu1 %562  ;;  %v1229_v53 = vsel %vm15473_vm8, %v1185_v59, %v648_v36  ;;  %v10993_v36 = vshrl.u32 %v10937_v46, 16  ;;  %v11024_v56 = vld [vmem:[%s10421_s21 + $0x80] sm:$0xff]   ;;  %v882_v59 = vsel %vm15478_vm0, %v879_v2, %v881_v22  ;;  %v634_v2 = vsel %vm605_vm1, %v631_v40, %v633_v50 }
  0x9a   : > { %v1272_v21 = vsel %vm15449_vm9, %v1229_v53, %v707_v4  ;;  %v1187_v55 = vsel %vm1183_vm7, %v10455_v23, %v563_v42  ;;  %v11062_v48 = vshrl.u32 %v11024_v56, 16 }
  0x9b   : > { %v1097_v8 = vpop.permute.xlu0 %1096  ;;  %582 = vrot.lane.b32.xlu1 %v492_v5, %s10376_s27  ;;  %v1054_v23 = vrot.slane %v10993_v36, 2 }
  0x9c   : > { %v1440_v28 = vsel %vm15449_vm9, %v1398_v11, %v1097_v8  ;;  %9827 = vmatmul.mubr.msk.bf16.gmra.mxu1 %vm1183_vm7, %v1168_v32  ;;  %v1169_v8 = vrot.slane %v11024_v56, 3  ;;  %v503_v11 = vor.u32 %v10879_v58, %v499_v44 }
  0x9d   : > { %917 = vrot.lane.b32.xlu0 %v878_v34, %s10376_s27  ;;  %1746 = vmatprep.mubr.bf16.mxu0 %v1440_v28  ;;  %v709_v26 = vpop.permute.xlu1 %708  ;;  %v1053_v34 = vsel %vm15479_vm3, %v1048_v61, %v1052_v6  ;;  %v1056_v5 = vor.u32 %v1055_v51, %v1054_v23  ;;  %v507_v28 = vrot.slane %v10901_v60, 1 }
  0x9e   : > { %1747 = vmatmul.mubr.bf16.vlgmr.msra.gmra.mxu0 %v1272_v21  ;;  %9830 = vmatprep.mubr.msk.bf16.mxu1 %vm15474_vm5, %v15433_v14  ;;  %v1170_v16 = vsel %vm1141_vm6, %v1167_v13, %v1169_v8 }
  0x9f   : > { %v1099_v35 = vpop.permute.xlu0 %1098  ;;  %669 = vrot.lane.b32.xlu1 %v630_v62, %s10375_s26  ;;  %v1231_v62 = vsel %vm15473_vm8, %v1187_v55, %v650_v19  ;;  %v1057_v24 = vsel %vm15479_vm3, %v1052_v6, %v1056_v5  ;;  %v508_v44 = vsel %vm392_vm2, %v503_v11, %v507_v28  ;;  %v883_v6 = vrot.slane %v11024_v56, 2  ;;  %v11121_v11 = vld [vmem:[%s10421_s21 + $0x90] sm:$0xff]  }
  0xa0   : > { %v1443_v20 = vsel %vm15449_vm9, %v1400_v54, %v1099_v35  ;;  %v1275_v25 = vsel %vm15449_vm9, %v1231_v62, %v709_v26  ;;  %v11059_v26 = vshll.u32 %v11024_v56, 16  ;;  %v1058_v54 = vrot.slane %v11062_v48, 2 }
  0xa1   : > { %974 = vrot.lane.b32.xlu0 %v880_v10, %s10375_s26  ;;  %1754 = vmatprep.mubr.bf16.mxu0 %v1443_v20  ;;  %v565_v4 = vpop.permute.xlu1 %564  ;;  %v10331_v20 = vld [vmem:[%s10421_s21 + $0x18] sm:$0xff]   ;;  %v884_v23 = vsel %vm15478_vm0, %v881_v22, %v883_v6  ;;  %v515_v22 = vrot.slane %v10960_v3, 1 }
  0xa2   : > { %v1189_v19 = vsel %vm1183_vm7, %v10437_v9, %v565_v4  ;;  %v1059_v35 = vrot.slane %v11059_v26, 3 }
  0xa3   : > { %v900_v49 = vpop.permute.xlu0 %899  ;;  %728 = vrot.lane.b32.xlu1 %v632_v18, %s10377_s30 }
  0xa4   : > { %v1342_v63 = vsel %vm1183_vm7, %v10682_v39, %v900_v49  ;;  %9831 = vmatmul.mubr.msk.bf16.gmra.mxu1 %vm1183_vm7, %v1170_v16  ;;  %v1060_v51 = vor.u32 %v1059_v35, %v1058_v54  ;;  %v1173_v35 = vrot.slane %v11121_v11, 3 }
  0xa5   : > { %1118 = vrot.lane.b32.xlu0 %v1053_v34, %s10377_s30  ;;  %v652_v61 = vpop.permute.xlu1 %651  ;;  %9834 = vmatprep.mubr.msk.bf16.mxu1 %vm15474_vm5, %v15433_v14 }
  0xa6   : > { %1755 = vmatmul.mubr.bf16.gmra.mxu0 %v1275_v25  ;;  %v1233_v7 = vsel %vm15473_vm8, %v1189_v19, %v652_v61 }
  0xa7   : > { %v957_v38 = vpop.permute.xlu0 %956  ;;  %584 = vrot.lane.b32.xlu1 %v500_v30, %s10376_s27  ;;  %v1171_v30 = vrot.slane %v11079_v27, 3 }
  0xa8   : > { %v1402_v42 = vsel %vm15473_vm8, %v1342_v63, %v957_v38  ;;  %v1061_v63 = vsel %vm15479_vm3, %v1056_v5, %v1060_v51  ;;  %v885_v5 = vrot.slane %v11079_v27, 2 }
  0xa9   : > { %919 = vrot.lane.b32.xlu0 %v880_v10, %s10376_s27  ;;  %v711_v15 = vpop.permute.xlu1 %710  ;;  %v1172_v38 = vsel %vm1141_vm6, %v1169_v8, %v1171_v30  ;;  %v10332_v8 = vld [vmem:[%s10421_s21 + $0x20] sm:$0xff]  }
  0xaa   : > { %v1278_v9 = vsel %vm15449_vm9, %v1233_v7, %v711_v15  ;;  %v11101_v7 = vshll.u32 %v11079_v27, 16  ;;  %v11104_v15 = vshrl.u32 %v11079_v27, 16 }
  0xab   : > { %v1101_v53 = vpop.permute.xlu0 %1100  ;;  %671 = vrot.lane.b32.xlu1 %v632_v18, %s10375_s26  ;;  %v635_v18 = vrot.slane %v10937_v46, 1  ;;  %v511_v46 = vor.u32 %v10914_v12, %v507_v28 }
  0xac   : > { %v1446_v39 = vsel %vm15449_vm9, %v1402_v42, %v1101_v53  ;;  %9835 = vmatmul.mubr.msk.bf16.gmra.mxu1 %vm1183_vm7, %v1172_v38  ;;  %v1062_v42 = vrot.slane %v11104_v15, 2  ;;  %v1063_v53 = vrot.slane %v11101_v7, 3 }
  0xad   : > { %976 = vrot.lane.b32.xlu0 %v882_v59, %s10375_s26  ;;  %1762 = vmatprep.mubr.bf16.mxu0 %v1446_v39  ;;  %v567_v21 = vpop.permute.xlu1 %566 }
  0xae   : > { %1763 = vmatmul.mubr.bf16.gmra.mxu0 %v1278_v9  ;;  %v1191_v55 = vsel %vm1183_vm7, %v10331_v20, %v567_v21  ;;  %9838 = vmatprep.mubr.msk.bf16.mxu1 %vm15474_vm5, %v15433_v14  ;;  %v1174_v20 = vsel %vm1141_vm6, %v1171_v30, %v1173_v35 }
  0xaf   : > { %v902_v40 = vpop.permute.xlu0 %901  ;;  %730 = vrot.lane.b32.xlu1 %v634_v2, %s10377_s30 }
  0xb0   : > { %v1345_v4 = vsel %vm1183_vm7, %v10706_v52, %v902_v40  ;;  %v636_v52 = vsel %vm605_vm1, %v633_v50, %v635_v18  ;;  %v516_v50 = vsel %vm392_vm2, %v511_v46, %v515_v22  ;;  %v1064_v40 = vor.u32 %v1063_v53, %v1062_v42 }
  0xb1   : > { %1120 = vrot.lane.b32.xlu0 %v1057_v24, %s10377_s30  ;;  %v654_v10 = vpop.permute.xlu1 %653  ;;  %v886_v24 = vsel %vm15478_vm0, %v883_v6, %v885_v5  ;;  %v523_v6 = vrot.slane %v11059_v26, 1  ;;  %v639_v46 = vrot.slane %v11079_v27, 1 }
  0xb2   : > { %v1235_v34 = vsel %vm15473_vm8, %v1191_v55, %v654_v10 }
  0xb3   : > { %v959_v13 = vpop.permute.xlu0 %958  ;;  %586 = vrot.lane.b32.xlu1 %v508_v44, %s10376_s27 }
  0xb4   : > { %v1404_v62 = vsel %vm15473_vm8, %v1345_v4, %v959_v13  ;;  %v519_v13 = vor.u32 %v10993_v36, %v515_v22  ;;  %v1065_v4 = vsel %vm15479_vm3, %v1060_v51, %v1064_v40  ;;  %9839 = vmatmul.mubr.msk.bf16.gmra.mxu1 %vm1183_vm7, %v1174_v20  ;;  %v11159_v22 = vld [vmem:[%s10421_s21 + $0x98] sm:$0xff]  }
  0xb5   : > { %921 = vrot.lane.b32.xlu0 %v882_v59, %s10376_s27  ;;  %v713_v49 = vpop.permute.xlu1 %712  ;;  %9842 = vmatprep.mubr.msk.bf16.mxu1 %vm15474_vm5, %v15433_v14 }
  0xb6   : > { %v1281_v25 = vsel %vm15449_vm9, %v1235_v34, %v713_v49  ;;  %v11139_v34 = vshll.u32 %v11121_v11, 16  ;;  %v11142_v49 = vshrl.u32 %v11121_v11, 16 }
  0xb7   : > { %v1103_v32 = vpop.permute.xlu0 %1102  ;;  %673 = vrot.lane.b32.xlu1 %v634_v2, %s10375_s26  ;;  %v637_v2 = vrot.slane %v11024_v56, 1 }
  0xb8   : > { %v1449_v61 = vsel %vm15449_vm9, %v1404_v62, %v1103_v32  ;;  %v887_v62 = vrot.slane %v11121_v11, 2  ;;  %v1066_v32 = vrot.slane %v11142_v49, 2 }
  0xb9   : > { %978 = vrot.lane.b32.xlu0 %v884_v23, %s10375_s26  ;;  %1770 = vmatprep.mubr.bf16.mxu0 %v1449_v61  ;;  %v569_v19 = vpop.permute.xlu1 %568  ;;  %v10333_v61 = vld [vmem:[%s10421_s21 + $0x28] sm:$0xff]  }
  0xba   : > { %1771 = vmatmul.mubr.bf16.gmra.mxu0 %v1281_v25  ;;  %v1193_v39 = vsel %vm1183_vm7, %v10332_v8, %v569_v19  ;;  %v1067_v25 = vrot.slane %v11139_v34, 3 }
  0xbb   : > { %v904_v43 = vpop.permute.xlu0 %903  ;;  %732 = vrot.lane.b32.xlu1 %v636_v52, %s10377_s30 }
  0xbc   : > { %v1348_v28 = vsel %vm1183_vm7, %v10726_v0, %v904_v43  ;;  %v638_v0 = vsel %vm605_vm1, %v635_v18, %v637_v2  ;;  %v888_v43 = vsel %vm15478_vm0, %v885_v5, %v887_v62  ;;  %v531_v5 = vrot.slane %v11101_v7, 1 }
  0xbd   : > { %1122 = vrot.lane.b32.xlu0 %v1061_v63, %s10377_s30  ;;  %v656_v59 = vpop.permute.xlu1 %655 }
  0xbe   : > { %v1237_v16 = vsel %vm15473_vm8, %v1193_v39, %v656_v59  ;;  %v527_v39 = vor.u32 %v11062_v48, %v523_v6 }
  0xbf   : > { %v961_v9 = vpop.permute.xlu0 %960  ;;  %588 = vrot.lane.b32.xlu1 %v516_v50, %s10376_s27  ;;  %v1068_v50 = vor.u32 %v1067_v25, %v1066_v32 }
  0xc0   : > { %v1406_v44 = vsel %vm15473_vm8, %v1348_v28, %v961_v9  ;;  %v1175_v9 = vrot.slane %v11159_v22, 3 }
  0xc1   : > { %923 = vrot.lane.b32.xlu0 %v884_v23, %s10376_s27  ;;  %v715_v21 = vpop.permute.xlu1 %714  ;;  %v524_v23 = vsel %vm392_vm2, %v519_v13, %v523_v6  ;;  %v641_v13 = vrot.slane %v11121_v11, 1  ;;  %v10334_v6 = vld [vmem:[%s10421_s21 + $0x30] sm:$0xff]  }
  0xc2   : > { %v1284_v54 = vsel %vm15449_vm9, %v1237_v16, %v715_v21  ;;  %v1176_v28 = vsel %vm1141_vm6, %v1173_v35, %v1175_v9  ;;  %v1069_v21 = vsel %vm15479_vm3, %v1064_v40, %v1068_v50  ;;  %v532_v40 = vsel %vm392_vm2, %v527_v39, %v531_v5 }
  0xc3   : > { %v1105_v10 = vpop.permute.xlu0 %1104  ;;  %675 = vrot.lane.b32.xlu1 %v636_v52, %s10375_s26  ;;  %9843 = vmatmul.mubr.msk.bf16.gmra.mxu1 %vm1183_vm7, %v1176_v28 }
  0xc4   : > { %v1452_v56 = vsel %vm15449_vm9, %v1406_v44, %v1105_v10  ;;  %v11180_v44 = vshrl.u32 %v11159_v22, 16  ;;  %9846 = vmatprep.mubr.msk.bf16.mxu1 %vm15474_vm5, %v15433_v14 }
  0xc5   : > { %980 = vrot.lane.b32.xlu0 %v886_v24, %s10375_s26  ;;  %1778 = vmatprep.mubr.bf16.mxu0 %v1452_v56  ;;  %v571_v55 = vpop.permute.xlu1 %570 }
  0xc6   : > { %1779 = vmatmul.mubr.bf16.gmra.mxu0 %v1284_v54  ;;  %v1195_v52 = vsel %vm1183_vm7, %v10333_v61, %v571_v55  ;;  %v889_v54 = vrot.slane %v11159_v22, 2  ;;  %v1070_v35 = vrot.slane %v11180_v44, 2  ;;  %v11197_v55 = vld [vmem:[%s10421_s21 + $0xa0] sm:$0xff]  }
  0xc7   : > { %v906_v18 = vpop.permute.xlu0 %905  ;;  %734 = vrot.lane.b32.xlu1 %v638_v0, %s10377_s30 }
  0xc8   : > { %v1351_v38 = vsel %vm1183_vm7, %v10740_v45, %v906_v18  ;;  %v640_v45 = vsel %vm605_vm1, %v637_v2, %v639_v46 }
  0xc9   : > { %1124 = vrot.lane.b32.xlu0 %v1065_v4, %s10377_s30  ;;  %v658_v51 = vpop.permute.xlu1 %657 }
  0xca   : > { %v1239_v19 = vsel %vm15473_vm8, %v1195_v52, %v658_v51  ;;  %v890_v51 = vsel %vm15478_vm0, %v887_v62, %v889_v54  ;;  %v642_v52 = vsel %vm605_vm1, %v639_v46, %v641_v13  ;;  %v174_v62 = vld [vmem:[#allocation2 + $0x8] sm:$0x3]  ;;  %v15481_v46 = vmov 0 }
  0xcb   : > { %v963_v30 = vpop.permute.xlu0 %962  ;;  %590 = vrot.lane.b32.xlu1 %v524_v23, %s10376_s27  ;;  %v15482_v46 = vsel %vm11220_vm13, 4294967295, %v15481_v46  ;;  %v175_v39 = vsel %vm11220_vm13, 0, %v174_v62 }
  0xcc   : > { %v1408_v59 = vsel %vm15473_vm8, %v1351_v38, %v963_v30  ;;  %15483 = vst [vmem:[#allocation10_spill] sm:$0xff] %v15482_v46  ;;  %176 = vst [vmem:[#allocation2 + $0x8] sm:$0x3] %v175_v39 }
  0xcd   : > { %925 = vrot.lane.b32.xlu0 %v886_v24, %s10376_s27  ;;  %v717_v63 = vpop.permute.xlu1 %716  ;;  %v11177_v24 = vshll.u32 %v11159_v22, 16 }
  0xce   : > { %v1287_v53 = vsel %vm15449_vm9, %v1239_v19, %v717_v63  ;;  %v535_v19 = vor.u32 %v11104_v15, %v531_v5  ;;  %v539_v63 = vrot.slane %v11139_v34, 1  ;;  %v15484_v5 = vmov 0 }
  0xcf   : > { %v1107_v42 = vpop.permute.xlu0 %1106  ;;  %677 = vrot.lane.b32.xlu1 %v638_v0, %s10375_s26  ;;  %v1071_v56 = vrot.slane %v11177_v24, 3  ;;  %v15485_v5 = vsel %vm11234_vm15, 4294967295, %v15484_v5 }
  0xd0   : > { %v1455_v8 = vsel %vm15449_vm9, %v1408_v59, %v1107_v42  ;;  %15486 = vst [vmem:[#allocation11_spill] sm:$0xff] %v15485_v5  ;;  %v540_v28 = vsel %vm392_vm2, %v535_v19, %v539_v63 }
  0xd1   : > { %982 = vrot.lane.b32.xlu0 %v888_v43, %s10375_s26  ;;  %1786 = vmatprep.mubr.bf16.mxu0 %v1455_v8  ;;  %v573_v16 = vpop.permute.xlu1 %572  ;;  %v11205_v32 = vor.u32 %v1071_v56, %v1070_v35  ;;  %v833_v8 = vshrl.u32 %v11197_v55, 16  ;;  %v282_v35 = vld [vmem:[%s10421_s21 + $0xac] sm:$0xf] }
  0xd2   : > { %1787 = vmatmul.mubr.bf16.gmra.mxu0 %v1287_v53  ;;  %v1197_v20 = vsel %vm1183_vm7, %v10334_v6, %v573_v16  ;;  %v11247_v16 = vrot.slane %v11197_v55, 2  ;;  %v10335_v6 = vld [vmem:[%s10421_s21 + $0x38] sm:$0xff]  }
  0xd3   : > { %v908_v2 = vpop.permute.xlu0 %907  ;;  %736 = vrot.lane.b32.xlu1 %v640_v45, %s10377_s30  ;;  %v1073_v53 = vsel %vm15479_vm3, %v1068_v50, %v11205_v32 }
  0xd4   : > { %v1354_v4 = vsel %vm1183_vm7, %v10762_v33, %v908_v2  ;;  %v1177_v33 = vrot.slane %v11197_v55, 3  ;;  %v1074_v2 = vrot.slane %v833_v8, 2 }
  0xd5   : > { %1126 = vrot.lane.b32.xlu0 %v1069_v21, %s10377_s30  ;;  %v660_v10 = vpop.permute.xlu1 %659 }
  0xd6   : > { %v1241_v18 = vsel %vm15473_vm8, %v1197_v20, %v660_v10  ;;  %v1178_v59 = vsel %vm1141_vm6, %v1175_v9, %v1177_v33  ;;  %v11254_v10 = vld [vmem:[%s10421_s21 + $0xa8] sm:$0xf] }
  0xd7   : > { %v965_v0 = vpop.permute.xlu0 %964  ;;  %592 = vrot.lane.b32.xlu1 %v532_v40, %s10376_s27  ;;  %9847 = vmatmul.mubr.msk.bf16.gmra.mxu1 %vm1183_vm7, %v1178_v59 }
  0xd8   : > { %v1410_v25 = vsel %vm15473_vm8, %v1354_v4, %v965_v0  ;;  %9850 = vmatprep.mubr.msk.bf16.mxu1 %vm15474_vm5, %v15433_v14  ;;  %v11259_v0 = vrot.slane %v11159_v22, 1  ;;  %v11265_v4 = vcombine.low %v11254_v10, %v282_v35  ;;  %v10336_v35 = vld [vmem:[%s10421_s21 + $0x40] sm:$0xff]  }
  0xd9   : > { %927 = vrot.lane.b32.xlu0 %v888_v43, %s10376_s27  ;;  %v719_v23 = vpop.permute.xlu1 %718  ;;  %v205_v43 = vld [vmem:[#allocation8 + $0x14] sm:$0xe] }
  0xda   : > { %v1290_v61 = vsel %vm15449_vm9, %v1241_v18, %v719_v23  ;;  %v206_v50 = vsel %vm11234_vm15, 0, %v205_v43  ;;  %v1179_v22 = vrot.slane %v11265_v4, 3  ;;  %v547_v43 = vrot.slane %v11177_v24, 1 }
  0xdb   : > { %v1109_v30 = vpop.permute.xlu0 %1108  ;;  %679 = vrot.lane.b32.xlu1 %v640_v45, %s10375_s26  ;;  %v836_v45 = vshll.u32 %v11197_v55, 16  ;;  %207 = vst [vmem:[#allocation8 + $0x14] sm:$0xe] %v206_v50  ;;  %v1082_v59 = vshll.u32 %v11265_v4, 16 }
  0xdc   : > { %v1458_v38 = vsel %vm15449_vm9, %v1410_v25, %v1109_v30  ;;  %v892_v30 = vsel %vm15478_vm0, %v889_v54, %v11247_v16  ;;  %v543_v54 = vor.u32 %v11142_v49, %v539_v63  ;;  %v1180_v63 = vsel %vm1141_vm6, %v1177_v33, %v1179_v22 }
  0xdd   : > { %984 = vrot.lane.b32.xlu0 %v890_v51, %s10375_s26  ;;  %1794 = vmatprep.mubr.bf16.mxu0 %v1458_v38  ;;  %v575_v42 = vpop.permute.xlu1 %574  ;;  %v1075_v40 = vrot.slane %v836_v45, 3  ;;  %v1084_v33 = vrot.slane %v1082_v59, 3  ;;  %v551_v59 = vor.u32 %v11180_v44, %v547_v43 }
  0xde   : > { %1795 = vmatmul.mubr.bf16.gmra.mxu0 %v1290_v61  ;;  %v1199_v20 = vsel %vm1183_vm7, %v10335_v6, %v575_v42 }
  0xdf   : > { %v910_v9 = vpop.permute.xlu0 %909  ;;  %738 = vrot.lane.b32.xlu1 %v642_v52, %s10377_s30  ;;  %v11274_v61 = vor.u32 %v1075_v40, %v1074_v2  ;;  %9851 = vmatmul.mubr.msk.bf16.gmra.mxu1 %vm1183_vm7, %v1180_v63  ;;  %v284_v2 = vld [vmem:[%s10421_s21 + $0xb4] sm:$0x1]  ;;  %v702_v40 = vrot.slane %v11197_v55, 1 }
  0xe0   : > { %v1357_v18 = vsel %vm1183_vm7, %v10782_v41, %v910_v9  ;;  %v11284_v41 = vsel %vm605_vm1, %v641_v13, %v11259_v0  ;;  %9854 = vmatprep.mubr.msk.bf16.mxu1 %vm15474_vm5, %v15433_v14  ;;  %v11311_v9 = vld [vmem:[%s10421_s21 + $0xa0] ss:$0 sps:$4 sm:$0x77]  }
  0xe1   : > { %1128 = vrot.lane.b32.xlu0 %v1073_v53, %s10377_s30  ;;  %v662_v21 = vpop.permute.xlu1 %661  ;;  %v1077_v13 = vsel %vm15479_vm3, %v11205_v32, %v11274_v61  ;;  %v548_v32 = vsel %vm392_vm2, %v543_v54, %v547_v43  ;;  %v948_v53 = vrot.slane %v11265_v4, 2 }
  0xe2   : > { %v1243_v23 = vsel %vm15473_vm8, %v1199_v20, %v662_v21  ;;  %v11314_v21 = vld [vmem:[%s10421_s21 + $0xb0] sm:$0xf] }
  0xe3   : > { %v967_v56 = vpop.permute.xlu0 %966  ;;  %594 = vrot.lane.b32.xlu1 %v540_v28, %s10376_s27  ;;  %v949_v6 = vsel %vm15478_vm0, %v11247_v16, %v948_v53 }
  0xe4   : > { %v1412_v38 = vsel %vm15473_vm8, %v1357_v18, %v967_v56  ;;  %v553_v18 = vshll.u32 %v11311_v9, 16 }
  0xe5   : > { %929 = vrot.lane.b32.xlu0 %v890_v51, %s10376_s27  ;;  %v721_v25 = vpop.permute.xlu1 %720 }
  0xe6   : > { %v1293_v51 = vsel %vm15449_vm9, %v1243_v23, %v721_v25 }
  0xe7   : > { %v1111_v62 = vpop.permute.xlu0 %1110  ;;  %681 = vrot.lane.b32.xlu1 %v642_v52, %s10375_s26  ;;  %v1079_v52 = vshrl.u32 %v11265_v4, 16 }
  0xe8   : > { %v1461_v19 = vsel %vm15449_vm9, %v1412_v38, %v1111_v62  ;;  %v11388_v38 = vcombine.low %v11254_v10, %v11254_v10  ;;  %v8867_v62 = vcombine.low %v11314_v21, %v284_v2 }
  0xe9   : > { %986 = vrot.lane.b32.xlu0 %v892_v30, %s10375_s26  ;;  %1802 = vmatprep.mubr.bf16.mxu0 %v1461_v19  ;;  %v577_v11 = vpop.permute.xlu1 %576  ;;  %v1081_v39 = vrot.slane %v1079_v52, 2 }
  0xea   : > { %1803 = vmatmul.mubr.bf16.gmra.mxu0 %v1293_v51  ;;  %v1201_v56 = vsel %vm1183_vm7, %v10336_v35, %v577_v11  ;;  %v1181_v11 = vrot.slane %v8867_v62, 3  ;;  %v893_v63 = vrot.slane %v11388_v38, 2 }
  0xeb   : > { %v912_v42 = vpop.permute.xlu0 %911  ;;  %740 = vrot.lane.b32.xlu1 %v11284_v41, %s10377_s30  ;;  %v11326_v20 = vor.u32 %v1084_v33, %v1081_v39  ;;  %v1091_v39 = vshll.u32 %v8867_v62, 16 }
  0xec   : > { %v1360_v23 = vsel %vm1183_vm7, %v10815_v47, %v912_v42  ;;  %v703_v47 = vsel %vm605_vm1, %v11259_v0, %v702_v40  ;;  %v8866_v42 = vcombine.low %v11314_v21, %v11314_v21  ;;  %v894_v2 = vsel %vm15478_vm0, %v11247_v16, %v893_v63 }
  0xed   : > { %1130 = vrot.lane.b32.xlu0 %v1077_v13, %s10377_s30  ;;  %v664_v50 = vpop.permute.xlu1 %663  ;;  %v1086_v10 = vsel %vm15479_vm3, %v11274_v61, %v11326_v20  ;;  %v1182_v61 = vsel %vm1141_vm6, %v1179_v22, %v1181_v11 }
  0xee   : > { %v1245_v25 = vsel %vm15473_vm8, %v1201_v56, %v664_v50  ;;  %9855 = vmatmul.mubr.msk.bf16.gmra.mxu1 %vm1183_vm7, %v1182_v61  ;;  %v645_v50 = vrot.slane %v11311_v9, 1  ;;  %v950_v22 = vrot.slane %v8866_v42, 2  ;;  %v1093_v56 = vrot.slane %v1091_v39, 3 }
  0xef   : > { %v969_v28 = vpop.permute.xlu0 %968  ;;  %596 = vrot.lane.b32.xlu1 %v548_v32, %s10376_s27  ;;  %v1088_v32 = vshrl.u32 %v8867_v62, 16  ;;  %9858 = vmatprep.mubr.msk.bf16.mxu1 %vm15474_vm5, %v15433_v14 }
  0xf0   : > { %v1414_v51 = vsel %vm15473_vm8, %v1360_v23, %v969_v28  ;;  %v11419_v28 = vld [vmem:[%s10421_s21 + $0xa8] ss:$0 sps:$4 sm:$0x77]  }
  0xf1   : > { %931 = vrot.lane.b32.xlu0 %v892_v30, %s10376_s27  ;;  %v723_v30 = vpop.permute.xlu1 %722  ;;  %v1090_v35 = vrot.slane %v1088_v32, 2 }
  0xf2   : > { %v1296_v54 = vsel %vm15449_vm9, %v1245_v25, %v723_v30  ;;  %v646_v25 = vsel %vm605_vm1, %v11259_v0, %v645_v50  ;;  %v704_v30 = vrot.slane %v11419_v28, 1  ;;  %v800_v0 = vrot.slane %v10871_v57, 1 }
  0xf3   : > { %v1113_v19 = vpop.permute.xlu0 %1112  ;;  %683 = vrot.lane.b32.xlu1 %v11284_v41, %s10375_s26  ;;  %v555_v41 = vrot.slane %v553_v18, 1  ;;  %v10337_v18 = vld [vmem:[%s10421_s21 + $0x48] sm:$0xff]  }
  0xf4   : > { %v1464_v52 = vsel %vm15449_vm9, %v1414_v51, %v1113_v19  ;;  %v951_v19 = vsel %vm15478_vm0, %v948_v53, %v950_v22  ;;  %v705_v4 = vsel %vm605_vm1, %v702_v40, %v704_v30  ;;  %v10338_v40 = vld [vmem:[%s10421_s21 + $0x50] sm:$0xff]  }
  0xf5   : > { %988 = vrot.lane.b32.xlu0 %v949_v6, %s10375_s26  ;;  %1810 = vmatprep.mubr.bf16.mxu0 %v1464_v52  ;;  %v579_v13 = vpop.permute.xlu1 %578  ;;  %v556_v43 = vsel %vm392_vm2, %v551_v59, %v555_v41  ;;  %v801_v59 = vrot.slane %v10868_v37, 2 }
  0xf6   : > { %1811 = vmatmul.mubr.bf16.gmra.mxu0 %v1296_v54  ;;  %v1203_v23 = vsel %vm1183_vm7, %v10337_v18, %v579_v13  ;;  %v1094_v54 = vor.u32 %v1093_v56, %v1090_v35  ;;  %v557_v13 = vshrl.u32 %v11311_v9, 16  ;;  %9859 = vmatmul.mubr.msk.bf16.gmra.mxu1 %vm1183_vm7, %v1181_v11  ;;  %v804_v35 = vrot.slane %v10879_v58, 1 }
  0xf7   : > { %v914_v33 = vpop.permute.xlu0 %913  ;;  %742 = vrot.lane.b32.xlu1 %v703_v47, %s10377_s30  ;;  %v802_v53 = vor.u32 %v801_v59, %v800_v0  ;;  %v805_v56 = vrot.slane %v10876_v31, 2 }
  0xf8   : > { %v1363_v62 = vsel %vm1183_vm7, %v10858_v17, %v914_v33  ;;  %v1095_v37 = vsel %vm15479_vm3, %v11326_v20, %v1094_v54  ;;  %v559_v9 = vor.u32 %v557_v13, %v555_v41  ;;  %v11456_v33 = vpop.f32.mrf.mxu1 }
  0xf9   : > { %1132 = vrot.lane.b32.xlu0 %v1086_v10, %s10377_s30  ;;  %v666_v21 = vpop.permute.xlu1 %665  ;;  %v803_v32 = vsel %vm15480_vm4, %v10845_v29, %v802_v53  ;;  %v806_v58 = vor.u32 %v805_v56, %v804_v35 }
  0xfa   : > { %v1247_v16 = vsel %vm15473_vm8, %v1203_v23, %v666_v21  ;;  %v9780_v20 = vpop.f32.mrf.mxu1  ;;  %v10116_v23 = vld [vmem:[%s15426_s1 + $0x118] sm:$0xff]  }
  0xfb   : > { %v971_v6 = vpop.permute.xlu0 %970  ;;  %598 = vrot.lane.b32.xlu1 %v556_v43, %s10376_s27  ;;  %9863 = vmatpush3.bf16.msra.mxu0 %v10116_v23  ;;  %v812_v23 = vrot.slane %v10993_v36, 1 }
  0xfc   : > { %v1416_v52 = vsel %vm15473_vm8, %v1363_v62, %v971_v6  ;;  %v11468_v6 = vpop.f32.mrf.mxu1  ;;  %9864 = vmatprep.subr.bf16.mxu0 %v15433_v14 }
  0xfd   : > { %933 = vrot.lane.b32.xlu0 %v894_v2, %s10376_s27  ;;  %v725_v51 = vpop.permute.xlu1 %724 }
  0xfe   : > { %v1299_v10 = vsel %vm15449_vm9, %v1247_v16, %v725_v51  ;;  %v9781_v18 = vpop.f32.mrf.mxu1  ;;  %v807_v51 = vsel %vm15480_vm4, %v802_v53, %v806_v58 }
  0xff   : > { %v1115_v47 = vpop.permute.xlu0 %1114  ;;  %685 = vrot.lane.b32.xlu1 %v646_v25, %s10375_s26 }
 0x100   : > { %v1467_v17 = vsel %vm15449_vm9, %v1416_v52, %v1115_v47  ;;  %v11476_v31 = vpop.f32.mrf.mxu1  ;;  %v10339_v47 = vld [vmem:[%s10421_s21 + $0x58] sm:$0xff]  }
 0x101   : > { %990 = vrot.lane.b32.xlu0 %v951_v19, %s10375_s26  ;;  %1818 = vmatprep.mubr.bf16.mxu0 %v1467_v17  ;;  %v581_v57 = vpop.permute.xlu1 %580 }
 0x102   : > { %1819 = vmatmul.mubr.bf16.gmra.mxu0 %v1299_v10  ;;  %v1205_v61 = vsel %vm1183_vm7, %v10338_v40, %v581_v57  ;;  %v808_v57 = vrot.slane %v10914_v12, 1 }
 0x103   : > { %v916_v42 = vpop.permute.xlu0 %915  ;;  %744 = vrot.lane.b32.xlu1 %v705_v4, %s10377_s30 }
 0x104   : > { %v1366_v43 = vsel %vm1183_vm7, %v803_v32, %v916_v42 }
 0x105   : > { %1134 = vrot.lane.b32.xlu0 %v1095_v37, %s10377_s30  ;;  %v668_v11 = vpop.permute.xlu1 %667  ;;  %v809_v37 = vrot.slane %v10901_v60, 2  ;;  %v10340_v60 = vld [vmem:[%s10421_s21 + $0x60] sm:$0xff]  }
 0x106   : > { %v1249_v41 = vsel %vm15473_vm8, %v1205_v61, %v668_v11 }
 0x107   : > { %v973_v39 = vpop.permute.xlu0 %972  ;;  %600 = vrot.lane.b32.xlu1 %v559_v9, %s10376_s27  ;;  %v810_v32 = vor.u32 %v809_v37, %v808_v57 }
 0x108   : > { %v1418_v21 = vsel %vm15473_vm8, %v1366_v43, %v973_v39 }
 0x109   : > { %935 = vrot.lane.b32.xlu0 %v893_v63, %s10376_s27  ;;  %v727_v28 = vpop.permute.xlu1 %726  ;;  %v811_v43 = vsel %vm15480_vm4, %v806_v58, %v810_v32 }
 0x10a   : > { %v1302_v29 = vsel %vm15449_vm9, %v1249_v41, %v727_v28 }
 0x10b   : > { %v1117_v2 = vpop.permute.xlu0 %1116  ;;  %687 = vrot.lane.b32.xlu1 %v645_v50, %s10375_s26  ;;  %v9784_v50 = vpop.f32.mrf.mxu1 }
 0x10c   : > { %v1470_v63 = vsel %vm15449_vm9, %v1418_v21, %v1117_v2 }
 0x10d   : > { %992 = vrot.lane.b32.xlu0 %v950_v22, %s10375_s26  ;;  %1826 = vmatprep.mubr.bf16.mxu0 %v1470_v63  ;;  %v583_v25 = vpop.permute.xlu1 %582  ;;  %v10117_v22 = vld [vmem:[%s15426_s1 + $0x110] sm:$0xff]   ;;  %v11485_v52 = vpop.f32.mrf.mxu1 }
 0x10e   : > { %1827 = vmatmul.mubr.bf16.gmra.mxu0 %v1302_v29 }
 0x10f   : > { %v918_v62 = vpop.permute.xlu0 %917  ;;  %746 = vrot.lane.b32.xlu1 %v704_v30, %s10377_s30  ;;  %9865 = vmatpush3.bf16.msra.mxu0 %v10117_v22  ;;  %v1207_v30 = vsel %vm1183_vm7, %v10339_v47, %v583_v25  ;;  %v9785_v10 = vpop.f32.mrf.mxu1  ;;  %v813_v25 = vrot.slane %v10960_v3, 2  ;;  %v10341_v3 = vld [vmem:[%s10421_s21 + $0x68] sm:$0xff]  }
 0x110   : > { %9950 = vmatprep.subr.bf16.mxu0 %v15433_v14 }
 0x111   : > { %1136 = vrot.lane.b32.xlu0 %v1094_v54, %s10377_s30  ;;  %v670_v16 = vpop.permute.xlu1 %669  ;;  %v1369_v54 = vsel %vm1183_vm7, %v807_v51, %v918_v62  ;;  %v11496_v53 = vpop.f32.mrf.mxu1 }
 0x112   : > { %v1251_v0 = vsel %vm15473_vm8, %v1207_v30, %v670_v16  ;;  %v814_v16 = vor.u32 %v813_v25, %v812_v23 }
 0x113   : > { %v975_v19 = vpop.permute.xlu0 %974  ;;  %v9788_v9 = vpop.f32.mrf.mxu1 }
 0x114   : > { %v1420_v17 = vsel %vm15473_vm8, %v1369_v54, %v975_v19  ;;  %v815_v10 = vsel %vm15480_vm4, %v810_v32, %v814_v16  ;;  %v816_v9 = vrot.slane %v11062_v48, 1 }
 0x115   : > { %v729_v59 = vpop.permute.xlu1 %728  ;;  %v11499_v40 = vpop.f32.mrf.mxu1 }
 0x116   : > { %v1305_v4 = vsel %vm15449_vm9, %v1251_v0, %v729_v59 }
 0x117   : > { %v1119_v13 = vpop.permute.xlu0 %1118  ;;  %v9789_v61 = vpop.f32.mrf.mxu1 }
 0x118   : > { %v1473_v42 = vsel %vm15449_vm9, %v1420_v17, %v1119_v13 }
 0x119   : > { %1834 = vmatprep.mubr.bf16.mxu0 %v1473_v42  ;;  %v585_v11 = vpop.permute.xlu1 %584  ;;  %v11502_v41 = vpop.f32.mrf.mxu1 }
 0x11a   : > { %1835 = vmatmul.mubr.bf16.gmra.mxu0 %v1305_v4  ;;  %v1209_v28 = vsel %vm1183_vm7, %v10340_v60, %v585_v11  ;;  %v817_v11 = vrot.slane %v11059_v26, 2  ;;  %v10342_v26 = vld [vmem:[%s10421_s21 + $0x70] sm:$0xff]  }
 0x11b   : > { %v920_v39 = vpop.permute.xlu0 %919  ;;  %v9792_v21 = vpop.f32.mrf.mxu1 }
 0x11c   : > { %v1372_v2 = vsel %vm1183_vm7, %v811_v43, %v920_v39  ;;  %v818_v43 = vor.u32 %v817_v11, %v816_v9 }
 0x11d   : > { %v672_v20 = vpop.permute.xlu1 %671  ;;  %v11512_v58 = vpop.f32.mrf.mxu1 }
 0x11e   : > { %v1253_v29 = vsel %vm15473_vm8, %v1209_v28, %v672_v20 }
 0x11f   : > { %v977_v12 = vpop.permute.xlu0 %976  ;;  %v9793_v50 = vpop.f32.mrf.mxu1 }
 0x120   : > { %v1422_v56 = vsel %vm15473_vm8, %v1372_v2, %v977_v12  ;;  %v819_v2 = vsel %vm15480_vm4, %v814_v16, %v818_v43  ;;  %v821_v16 = vrot.slane %v11101_v7, 2 }
 0x121   : > { %v731_v35 = vpop.permute.xlu1 %730  ;;  %v11515_v19 = vpop.f32.mrf.mxu1 }
 0x122   : > { %v1308_v18 = vsel %vm15449_vm9, %v1253_v29, %v731_v35 }
 0x123   : > { %v1121_v63 = vpop.permute.xlu0 %1120  ;;  %v9796_v47 = vpop.f32.mrf.mxu1 }
 0x124   : > { %v1476_v62 = vsel %vm15449_vm9, %v1422_v56, %v1121_v63 }
 0x125   : > { %1842 = vmatprep.mubr.bf16.mxu0 %v1476_v62  ;;  %v587_v22 = vpop.permute.xlu1 %586  ;;  %v11518_v54 = vpop.f32.mrf.mxu1 }
 0x126   : > { %1843 = vmatmul.mubr.bf16.gmra.mxu0 %v1308_v18  ;;  %v1211_v0 = vsel %vm1183_vm7, %v10341_v3, %v587_v22  ;;  %v820_v22 = vrot.slane %v11104_v15, 1  ;;  %v10121_v15 = vld [vmem:[%s15426_s1 + $0xc8] sm:$0xff]  }
 0x127   : > { %v922_v51 = vpop.permute.xlu0 %921  ;;  %v9797_v59 = vpop.f32.mrf.mxu1  ;;  %4372 = vmatpush1.bf16.msra.mxu1 %v10121_v15 }
 0x128   : > { %v1375_v17 = vsel %vm1183_vm7, %v815_v10, %v922_v51  ;;  %4373 = vmatprep.subr.bf16.mxu1 %v15431_v1 }
 0x129   : > { %v674_v30 = vpop.permute.xlu1 %673  ;;  %v11528_v32 = vpop.f32.mrf.mxu1 }
 0x12a   : > { %v1255_v13 = vsel %vm15473_vm8, %v1211_v0, %v674_v30 }
 0x12b   : > { %v979_v36 = vpop.permute.xlu0 %978  ;;  %v9800_v61 = vpop.f32.mrf.mxu1 }
 0x12c   : > { %v1424_v57 = vsel %vm15473_vm8, %v1375_v17, %v979_v36  ;;  %v822_v36 = vor.u32 %v821_v16, %v820_v22 }
 0x12d   : > { %v733_v4 = vpop.permute.xlu1 %732  ;;  %v11531_v60 = vpop.f32.mrf.mxu1 }
 0x12e   : > { %v1311_v42 = vsel %vm15449_vm9, %v1255_v13, %v733_v4  ;;  %v823_v7 = vsel %vm15480_vm4, %v818_v43, %v822_v36 }
 0x12f   : > { %v1123_v37 = vpop.permute.xlu0 %1122  ;;  %v9801_v28 = vpop.f32.mrf.mxu1 }
 0x130   : > { %v1479_v39 = vsel %vm15449_vm9, %v1424_v57, %v1123_v37  ;;  %v10343_v57 = vld [vmem:[%s10421_s21 + $0x78] sm:$0xff]   ;;  %v825_v28 = vrot.slane %v11139_v34, 2 }
 0x131   : > { %1850 = vmatprep.mubr.bf16.mxu0 %v1479_v39  ;;  %v589_v20 = vpop.permute.xlu1 %588  ;;  %v11534_v29 = vpop.f32.mrf.mxu1 }
 0x132   : > { %1851 = vmatmul.mubr.bf16.gmra.mxu0 %v1311_v42  ;;  %v1213_v35 = vsel %vm1183_vm7, %v10342_v26, %v589_v20 }
 0x133   : > { %v924_v12 = vpop.permute.xlu0 %923  ;;  %v9804_v56 = vpop.f32.mrf.mxu1 }
 0x134   : > { %v1378_v63 = vsel %vm1183_vm7, %v819_v2, %v924_v12  ;;  %v824_v12 = vrot.slane %v11142_v49, 1 }
 0x135   : > { %v676_v21 = vpop.permute.xlu1 %675  ;;  %v11544_v51 = vpop.f32.mrf.mxu1 }
 0x136   : > { %v1257_v18 = vsel %vm15473_vm8, %v1213_v35, %v676_v21  ;;  %v826_v56 = vor.u32 %v825_v28, %v824_v12  ;;  %v11599_v12 = vld [vmem:[%s15427_s2] ss:$0 sm:$0xff] }
 0x137   : > { %v981_v48 = vpop.permute.xlu0 %980  ;;  %v9805_v30 = vpop.f32.mrf.mxu1 }
 0x138   : > { %v1426_v25 = vsel %vm15473_vm8, %v1378_v63, %v981_v48  ;;  %v10123_v48 = vld [vmem:[%s15426_s1 + $0xc0] sm:$0xff]  }
 0x139   : > { %v735_v23 = vpop.permute.xlu1 %734  ;;  %v11547_v0 = vpop.f32.mrf.mxu1  ;;  %4374 = vmatpush1.bf16.msra.mxu1 %v10123_v48  ;;  %v838_v48 = vrot.slane %v836_v45, 2 }
 0x13a   : > { %v1314_v50 = vsel %vm15449_vm9, %v1257_v18, %v735_v23  ;;  %4375 = vmatprep.subr.bf16.mxu1 %v15431_v1  ;;  %v827_v23 = vsel %vm15480_vm4, %v822_v36, %v826_v56  ;;  %v829_v36 = vrot.slane %v11177_v24, 2 }
 0x13b   : > { %v1125_v62 = vpop.permute.xlu0 %1124  ;;  %v9808_v59 = vpop.f32.mrf.mxu1 }
 0x13c   : > { %v1482_v47 = vsel %vm15449_vm9, %v1426_v25, %v1125_v62 }
 0x13d   : > { %1858 = vmatprep.mubr.bf16.mxu0 %v1482_v47  ;;  %v591_v10 = vpop.permute.xlu1 %590  ;;  %v11553_v4 = vpop.f32.mrf.mxu1 }
 0x13e   : > { %1859 = vmatmul.mubr.bf16.gmra.mxu0 %v1314_v50  ;;  %v1215_v37 = vsel %vm1183_vm7, %v10343_v57, %v591_v10  ;;  %v10344_v50 = vld [vmem:[%s10421_s21 + $0x80] sm:$0xff]   ;;  %v10125_v57 = vld [vmem:[%s15426_s1 + $0xb8] sm:$0xff]  }
 0x13f   : > { %v926_v3 = vpop.permute.xlu0 %925  ;;  %v9809_v42 = vpop.f32.mrf.mxu1  ;;  %4376 = vmatpush1.bf16.msra.mxu1 %v10125_v57  ;;  %v10128_v57 = vld [vmem:[%s15426_s1 + $0xa8] sm:$0xff]  }
 0x140   : > { %v1381_v9 = vsel %vm1183_vm7, %v823_v7, %v926_v3  ;;  %4377 = vmatprep.subr.bf16.mxu1 %v15431_v1 }
 0x141   : > { %v678_v17 = vpop.permute.xlu1 %677  ;;  %v11564_v21 = vpop.f32.mrf.mxu1 }
 0x142   : > { %v1259_v11 = vsel %vm15473_vm8, %v1215_v37, %v678_v17  ;;  %v828_v17 = vrot.slane %v11180_v44, 1 }
 0x143   : > { %v983_v13 = vpop.permute.xlu0 %982  ;;  %v9812_v26 = vpop.f32.mrf.mxu1 }
 0x144   : > { %v1428_v61 = vsel %vm15473_vm8, %v1381_v9, %v983_v13  ;;  %v830_v9 = vor.u32 %v829_v36, %v828_v17 }
 0x145   : > { %v737_v39 = vpop.permute.xlu1 %736  ;;  %v11570_v18 = vpop.f32.mrf.mxu1 }
 0x146   : > { %v1317_v43 = vsel %vm15449_vm9, %v1259_v11, %v737_v39 }
 0x147   : > { %v1127_v20 = vpop.permute.xlu0 %1126  ;;  %v9813_v34 = vpop.f32.mrf.mxu1 }
 0x148   : > { %v1485_v2 = vsel %vm15449_vm9, %v1428_v61, %v1127_v20  ;;  %v831_v61 = vsel %vm15480_vm4, %v826_v56, %v830_v9  ;;  %v9446_v34 = vld [vmem:[%s15426_s1 + $0x460] sm:$0xff]  }
 0x149   : > { %1866 = vmatprep.mubr.bf16.mxu0 %v1485_v2  ;;  %v593_v35 = vpop.permute.xlu1 %592  ;;  %v11574_v62 = vpop.f32.mrf.mxu1  ;;  %v835_v2 = vrot.slane %v833_v8, 1 }
 0x14a   : > { %1867 = vmatmul.mubr.bf16.gmra.mxu0 %v1317_v43  ;;  %v1217_v22 = vsel %vm1183_vm7, %v10344_v50, %v593_v35  ;;  %v10127_v50 = vld [vmem:[%s15426_s1 + $0xb0] sm:$0xff]  }
 0x14b   : > { %v928_v63 = vpop.permute.xlu0 %927  ;;  %v9816_v16 = vpop.f32.mrf.mxu1  ;;  %4378 = vmatpush1.bf16.msra.mxu1 %v10127_v50 }
 0x14c   : > { %v1384_v47 = vsel %vm1183_vm7, %v827_v23, %v928_v63  ;;  %v9344_v16 = vunpack.c.l.bf16 %v9446_v34  ;;  %4379 = vmatprep.subr.bf16.mxu1 %v15431_v1 }
 0x14d   : > { %v680_v49 = vpop.permute.xlu1 %679  ;;  %v11584_v7 = vpop.f32.mrf.mxu1 }
 0x14e   : > { %v1261_v30 = vsel %vm15473_vm8, %v1217_v22, %v680_v49 }
 0x14f   : > { %v985_v25 = vpop.permute.xlu0 %984  ;;  %v9817_v37 = vpop.f32.mrf.mxu1  ;;  %4380 = vmatpush1.bf16.msra.mxu1 %v10128_v57 }
 0x150   : > { %v1430_v3 = vsel %vm15473_vm8, %v1384_v47, %v985_v25  ;;  %v11620_v47 = vor.u32 %v838_v48, %v835_v2  ;;  %4381 = vmatprep.subr.bf16.mxu1 %v15431_v1 }
 0x151   : > { %v739_v10 = vpop.permute.xlu1 %738  ;;  %v11590_v39 = vpop.f32.mrf.mxu1 }
 0x152   : > { %v1320_v15 = vsel %vm15449_vm9, %v1261_v30, %v739_v10 }
 0x153   : > { %v1129_v59 = vpop.permute.xlu0 %1128  ;;  %v9820_v24 = vpop.f32.mrf.mxu1 }
 0x154   : > { %v1488_v13 = vsel %vm15449_vm9, %v1430_v3, %v1129_v59  ;;  %v842_v3 = vshrl.u32 %v11388_v38, 16  ;;  %v845_v59 = vshll.u32 %v11388_v38, 16  ;;  %v840_v38 = vsel %vm15480_vm4, %v830_v9, %v11620_v47  ;;  %v11637_v24 = vld [vmem:[%s15426_s1 + $0x468] sm:$0xff]  }
 0x155   : > { %1874 = vmatprep.mubr.bf16.mxu0 %v1488_v13  ;;  %v595_v42 = vpop.permute.xlu1 %594  ;;  %v11594_v43 = vpop.f32.mrf.mxu1 }
 0x156   : > { %1875 = vmatmul.mubr.bf16.gmra.mxu0 %v1320_v15  ;;  %v1219_v28 = vsel %vm1183_vm7, %v11079_v27, %v595_v42  ;;  %v847_v2 = vrot.slane %v845_v59, 2 }
 0x157   : > { %v930_v11 = vpop.permute.xlu0 %929  ;;  %v9821_v26 = vpop.f32.mrf.mxu1 }
 0x158   : > { %v1387_v35 = vsel %vm1183_vm7, %v831_v61, %v930_v11  ;;  %v9345_v11 = vunpack.c.h.bf16 %v9446_v34  ;;  %v10345_v34 = vld [vmem:[%s10421_s21 + $0x90] sm:$0xff]  }
 0x159   : > { %v682_v44 = vpop.permute.xlu1 %681  ;;  %v11625_v13 = vpop.f32.mrf.mxu1 }
 0x15a   : > { %v1263_v56 = vsel %vm15473_vm8, %v1219_v28, %v682_v44  ;;  %v844_v28 = vrot.slane %v842_v3, 1 }
 0x15b   : > { %v987_v20 = vpop.permute.xlu0 %986  ;;  %v9824_v44 = vpop.f32.mrf.mxu1 }
 0x15c   : > { %v1432_v23 = vsel %vm15473_vm8, %v1387_v35, %v987_v20 }
 0x15d   : > { %v741_v49 = vpop.permute.xlu1 %740  ;;  %v11642_v9 = vpop.f32.mrf.mxu1 }
 0x15e   : > { %v1748_v63 = vpop.f32.mrf.mxu0  ;;  %v1323_v8 = vsel %vm15449_vm9, %v1263_v56, %v741_v49  ;;  %v2898_v56 = vld [vmem:[#allocation2] sm:$0xf] }
 0x15f   : > { %v1749_v27 = vadd.f32 %v11599_v12, %v1748_v63  ;;  %v1131_v25 = vpop.permute.xlu0 %1130  ;;  %v11640_v63 = vld [vmem:[#allocation2 + $0x4] sm:$0xf] }
 0x160   : > { %v1750_v55 = vpop.f32.mrf.mxu0  ;;  %v1491_v45 = vsel %vm15449_vm9, %v1432_v23, %v1131_v25 }
 0x161   : > { %v1949_v22 = vadd.f32 %v11456_v33, %v1749_v27  ;;  %1882 = vmatprep.mubr.bf16.mxu0 %v1491_v45  ;;  %v597_v10 = vpop.permute.xlu1 %596  ;;  %v9348_v27 = vunpack.c.l.bf16 %v11637_v24 }
 0x162   : > { %v1751_v30 = vpop.f32.mrf.mxu0  ;;  %1883 = vmatmul.mubr.bf16.gmra.mxu0 %v1323_v8  ;;  %v1221_v49 = vsel %vm1183_vm7, %v10345_v34, %v597_v10  ;;  %v11655_v10 = vcombine.low %v2898_v56, %v11640_v63  ;;  %v9349_v34 = vunpack.c.h.bf16 %v11637_v24 }
 0x163   : > { %v2114_v15 = vmax.f32 %v1949_v22, 0.0  ;;  %v1752_v17 = vadd.f32 %v11599_v12, %v1751_v30  ;;  %v932_v36 = vpop.permute.xlu0 %931  ;;  %v2940_v22 = vld [vmem:[#allocation2] sm:$0xe] }
 0x164   : > { %v1753_v33 = vpop.f32.mrf.mxu0  ;;  %v1390_v23 = vsel %vm1183_vm7, %v840_v38, %v932_v36 }
 0x165   : > { %v2237_v37 = vmul.f32 %v9344_v16, %v2114_v15  ;;  %v1952_v42 = vadd.f32 %v11468_v6, %v1752_v17  ;;  %v684_v20 = vpop.permute.xlu1 %683  ;;  %v9825_v16 = vpop.f32.mrf.mxu1  ;;  %v11652_v17 = vor.u32 %v847_v2, %v844_v28  ;;  %v10130_v28 = vld [vmem:[%s15426_s1 + $0xa0] sm:$0xff]  }
 0x166   : > { %v1756_v61 = vpop.f32.mrf.mxu0  ;;  %v1265_v30 = vsel %vm15473_vm8, %v1221_v49, %v684_v20  ;;  %v8972_v20 = vcombine.low %v2940_v22, %v11640_v63  ;;  %4382 = vmatpush1.bf16.msra.mxu1 %v10130_v28 }
 0x167   : > { %v9269_v48 = vpack.c.bf16 %v2237_v37, %v2237_v37  ;;  %v2115_v26 = vmax.f32 %v1952_v42, 0.0  ;;  %v1757_v6 = vadd.f32 %v11599_v12, %v1756_v61  ;;  %v989_v35 = vpop.permute.xlu0 %988  ;;  %4383 = vmatprep.subr.bf16.mxu1 %v15431_v1 }
 0x168   : > { %v1758_v25 = vpop.f32.mrf.mxu0  ;;  %v1434_v3 = vsel %vm15473_vm8, %v1390_v23, %v989_v35  ;;  %v11667_v35 = vld [vmem:[%s15426_s1 + $0x470] sm:$0xff]   ;;  %v849_v23 = vsel %vm15480_vm4, %v11620_v47, %v11652_v17 }
 0x169   : > { %v2405_v8 = vshrl.u32 %v9269_v48, 16  ;;  %v2408_v55 = vshll.u32 %v9269_v48, 16  ;;  %v2238_v45 = vmul.f32 %v9345_v11, %v2115_v26  ;;  %v1957_v50 = vadd.f32 %v11476_v31, %v1757_v6  ;;  %v743_v15 = vpop.permute.xlu1 %742  ;;  %v2853_v11 = vld [vmem:[#allocation2 + $0x8] sm:$0xe] }
 0x16a   : > { %v1759_v59 = vpop.f32.mrf.mxu0  ;;  %v1326_v61 = vsel %vm15449_vm9, %v1265_v30, %v743_v15  ;;  %v9352_v16 = vunpack.c.l.bf16 %v11667_v35 }
 0x16b   : > { %v2407_v36 = vrot.slane %v2405_v8, 6  ;;  %v2410_v33 = vrot.slane %v2408_v55, 7  ;;  %v9270_v57 = vpack.c.bf16 %v2238_v45, %v2238_v45  ;;  %v2116_v37 = vmax.f32 %v1957_v50, 0.0  ;;  %v1133_v42 = vpop.permute.xlu0 %1132  ;;  %v11677_v50 = vpop.f32.mrf.mxu1 }
 0x16c   : > { %v1760_v31 = vadd.f32 %v11599_v12, %v1759_v59  ;;  %v1761_v38 = vpop.f32.mrf.mxu0  ;;  %v1494_v44 = vsel %vm15449_vm9, %v1434_v3, %v1133_v42  ;;  %v3061_v45 = vshll.u32 %v11655_v10, 16  ;;  %v10132_v3 = vld [vmem:[%s15426_s1 + $0x98] sm:$0xff]  }
 0x16d   : > { %v2411_v2 = vor.u32 %v2410_v33, %v2407_v36  ;;  %v2414_v48 = vshrl.u32 %v9270_v57, 16  ;;  %v2417_v26 = vshll.u32 %v9270_v57, 16  ;;  %v2239_v6 = vmul.f32 %v9348_v27, %v2116_v37  ;;  %1890 = vmatprep.mubr.bf16.mxu0 %v1494_v44  ;;  %v599_v63 = vpop.permute.xlu1 %598  ;;  %v9828_v57 = vpop.f32.mrf.mxu1  ;;  %4384 = vmatpush1.bf16.msra.mxu1 %v10132_v3 }
 0x16e   : > { %v1960_v56 = vadd.f32 %v11485_v52, %v1760_v31  ;;  %v1764_v49 = vpop.f32.mrf.mxu0  ;;  %1891 = vmatmul.mubr.bf16.gmra.mxu0 %v1326_v61  ;;  %v9353_v36 = vunpack.c.h.bf16 %v11667_v35  ;;  %v11692_v33 = vrot.slane %v8972_v20, 1  ;;  %v3063_v20 = vrot.slane %v3061_v45, 1  ;;  %4385 = vmatprep.subr.bf16.mxu1 %v15431_v1 }
 0x16f   : > { %v2854_v27 = vsel %vm11234_vm15, %v2411_v2, %v2853_v11  ;;  %v2416_v25 = vrot.slane %v2414_v48, 6  ;;  %v2419_v8 = vrot.slane %v2417_v26, 7  ;;  %v934_v55 = vpop.permute.xlu0 %933  ;;  %v9271_v47 = vpack.c.bf16 %v2239_v6, %v2239_v6  ;;  %v11699_v26 = vpop.f32.mrf.mxu1 }
 0x170   : > { %2855 = vst [vmem:[#allocation2 + $0x8] sm:$0xe] %v2854_v27  ;;  %v2117_v24 = vmax.f32 %v1960_v56, 0.0  ;;  %v1765_v22 = vadd.f32 %v11599_v12, %v1764_v49  ;;  %v1766_v30 = vpop.f32.mrf.mxu0  ;;  %v2412_v59 = vrot.slane %v2411_v2, 4  ;;  %v3059_v48 = vshrl.u32 %v11655_v10, 16  ;;  %v11706_v49 = vld [vmem:[%s15426_s1 + $0x478] sm:$0xff]  }
 0x171   : > { %v2420_v15 = vor.u32 %v2419_v8, %v2416_v25  ;;  %v2424_v37 = vshrl.u32 %v9271_v47, 16  ;;  %v2427_v42 = vshll.u32 %v9271_v47, 16  ;;  %v686_v44 = vpop.permute.xlu1 %685  ;;  %v10133_v27 = vld [vmem:[%s15426_s1 + $0x90] sm:$0xff]   ;;  %v10346_v8 = vld [vmem:[%s10421_s21 + $0x98] sm:$0xff]   ;;  %v1393_v47 = vsel %vm1183_vm7, %v849_v23, %v934_v55 }
 0x172   : > { %v2240_v11 = vmul.f32 %v9349_v34, %v2117_v24  ;;  %v1965_v31 = vadd.f32 %v11496_v53, %v1765_v22  ;;  %v1767_v38 = vpop.f32.mrf.mxu0  ;;  %v1223_v45 = vsel %vm1183_vm7, %v10346_v8, %v599_v63  ;;  %v9829_v22 = vpop.f32.mrf.mxu1  ;;  %4386 = vmatpush1.bf16.msra.mxu1 %v10133_v27  ;;  %v11721_v63 = vld [vmem:[%s15426_s1 + $0x480] sm:$0xff]   ;;  %v9357_v8 = vunpack.c.h.bf16 %v11706_v49 }
 0x173   : > { %v2421_v61 = vsel %vm11682_vm12, %v2412_v59, %v2420_v15  ;;  %v1768_v28 = vadd.f32 %v11599_v12, %v1767_v38  ;;  %v991_v2 = vpop.permute.xlu0 %990  ;;  %v2426_v53 = vrot.slane %v2424_v37, 6  ;;  %v2429_v6 = vrot.slane %v2427_v42, 7  ;;  %4387 = vmatprep.subr.bf16.mxu1 %v15431_v1  ;;  %v10111_v27 = vld [vmem:[%s10421_s21 + $0xa0] ss:$0 sps:$4 sm:$0x33]  }
 0x174   : > { %2856 = vst.msk [vmem:[#allocation2 + $0xc] sm:$0xf] %vm15477_vm14, %v2421_v61  ;;  %v9272_v35 = vpack.c.bf16 %v2240_v11, %v2240_v11  ;;  %v2118_v56 = vmax.f32 %v1965_v31, 0.0  ;;  %v1769_v34 = vpop.f32.mrf.mxu0  ;;  %v2422_v25 = vrot.slane %v2420_v15, 4  ;;  %v1267_v11 = vsel %vm15473_vm8, %v1223_v45, %v686_v44  ;;  %v10134_v44 = vld [vmem:[%s15426_s1 + $0x108] sm:$0xff]  }
 0x175   : > { %v1968_v24 = vadd.f32 %v11499_v40, %v1768_v28  ;;  %v2430_v30 = vor.u32 %v2429_v6, %v2426_v53  ;;  %v745_v37 = vpop.permute.xlu1 %744  ;;  %v1436_v31 = vsel %vm15473_vm8, %v1393_v47, %v991_v2  ;;  %v9356_v38 = vunpack.c.l.bf16 %v11706_v49  ;;  %v11737_v6 = vld [vmem:[%s15426_s1 + $0x488] sm:$0xff]  }
 0x176   : > { %v2434_v3 = vshrl.u32 %v9272_v35, 16  ;;  %v2437_v59 = vshll.u32 %v9272_v35, 16  ;;  %v2241_v57 = vmul.f32 %v9352_v16, %v2118_v56  ;;  %v1329_v16 = vsel %vm15449_vm9, %v1267_v11, %v745_v37  ;;  %4388 = vmatpush2.bf16.msra.mxu1 %v10134_v44  ;;  %v10136_v11 = vld [vmem:[%s15426_s1 + $0x100] sm:$0xff]  }
 0x177   : > { %v2119_v42 = vmax.f32 %v1968_v24, 0.0  ;;  %v1135_v15 = vpop.permute.xlu0 %1134  ;;  %v2431_v40 = vsel %vm11682_vm12, %v2422_v25, %v2430_v30  ;;  %v11732_v53 = vor.u32 %v3063_v20, %v3059_v48  ;;  %v2432_v35 = vrot.slane %v2430_v30, 4  ;;  %v11745_v30 = vpop.f32.mrf.mxu1  ;;  %4389 = vmatprep.subr.bf16.mxu1 %v15431_v1 }
 0x178   : > { %v2436_v23 = vrot.slane %v2434_v3, 6  ;;  %v2439_v55 = vrot.slane %v2437_v59, 7  ;;  %2857 = vst.msk [vmem:[#allocation2 + $0x10] sm:$0xf] %vm15477_vm14, %v2431_v40  ;;  %v9273_v61 = vpack.c.bf16 %v2241_v57, %v2241_v57  ;;  %v1497_v2 = vsel %vm15449_vm9, %v1436_v31, %v1135_v15 }
 0x179   : > { %v2242_v28 = vmul.f32 %v9353_v36, %v2119_v42  ;;  %1898 = vmatprep.mubr.bf16.mxu0 %v1497_v2  ;;  %v601_v25 = vpop.permute.xlu1 %600  ;;  %v9360_v45 = vunpack.c.l.bf16 %v11721_v63  ;;  %v9361_v37 = vunpack.c.h.bf16 %v11721_v63  ;;  %v9364_v42 = vunpack.c.l.bf16 %v11737_v6 }
 0x17a   : > { %v2440_v56 = vor.u32 %v2439_v55, %v2436_v23  ;;  %v1772_v34 = vpop.f32.mrf.mxu0  ;;  %v2444_v36 = vshrl.u32 %v9273_v61, 16  ;;  %v2447_v47 = vshll.u32 %v9273_v61, 16  ;;  %1899 = vmatmul.mubr.bf16.gmra.mxu0 %v1329_v16  ;;  %v2900_v55 = vld [vmem:[#allocation2 + $0x8] sm:$0xf]  ;;  %v9832_v16 = vpop.f32.mrf.mxu1  ;;  %v1226_v61 = vsel %vm1183_vm7, %v10111_v27, %v601_v25  ;;  %4390 = vmatpush2.bf16.msra.mxu1 %v10136_v11 }
 0x17b   : > { %v9274_v48 = vpack.c.bf16 %v2242_v28, %v2242_v28  ;;  %v1773_v20 = vadd.f32 %v11599_v12, %v1772_v34  ;;  %v936_v24 = vpop.permute.xlu0 %935  ;;  %v11743_v22 = vld [vmem:[#allocation2 + $0xc] sm:$0xf]  ;;  %v2946_v16 = vld [vmem:[#allocation2 + $0x8] sm:$0xc]  ;;  %4391 = vmatprep.subr.bf16.mxu1 %v15431_v1 }
 0x17c   : > { %v2441_v3 = vsel %vm11682_vm12, %v2432_v35, %v2440_v56  ;;  %v2442_v59 = vrot.slane %v2440_v56, 4  ;;  %v1774_v57 = vpop.f32.mrf.mxu0  ;;  %v2446_v31 = vrot.slane %v2444_v36, 6  ;;  %v2449_v15 = vrot.slane %v2447_v47, 7 }
 0x17d   : > { %2858 = vst.msk [vmem:[#allocation2 + $0x14] sm:$0xf] %vm15477_vm14, %v2441_v3  ;;  %v2454_v40 = vshrl.u32 %v9274_v48, 16  ;;  %v2457_v23 = vshll.u32 %v9274_v48, 16  ;;  %v1973_v44 = vadd.f32 %v11502_v41, %v1773_v20  ;;  %v1396_v28 = vsel %vm1183_vm7, %v11652_v17, %v936_v24  ;;  %v688_v35 = vpop.permute.xlu1 %687  ;;  %v2941_v57 = vld [vmem:[#allocation2 + $0x8] sm:$0xe]  ;;  %v11764_v41 = vpop.f32.mrf.mxu1 }
 0x17e   : > { %v1775_v2 = vpop.f32.mrf.mxu0  ;;  %v11761_v56 = vcombine.low %v2900_v55, %v11743_v22  ;;  %v2450_v34 = vor.u32 %v2449_v15, %v2446_v31  ;;  %v11769_v20 = vcombine.low %v2941_v57, %v11743_v22  ;;  %v8977_v24 = vcombine.low %v2946_v16, %v11743_v22  ;;  %v10137_v55 = vld [vmem:[%s15426_s1 + $0xf8] sm:$0xff]  }
 0x17f   : > { %v2456_v36 = vrot.slane %v2454_v40, 6  ;;  %v2459_v47 = vrot.slane %v2457_v23, 7  ;;  %v1776_v48 = vadd.f32 %v11599_v12, %v1775_v2  ;;  %v993_v3 = vpop.permute.xlu0 %992  ;;  %v2120_v27 = vmax.f32 %v1973_v44, 0.0  ;;  %v9833_v23 = vpop.f32.mrf.mxu1  ;;  %4392 = vmatpush2.bf16.msra.mxu1 %v10137_v55 }
 0x180   : > { %v1777_v17 = vpop.f32.mrf.mxu0  ;;  %v3271_v25 = vrot.slane %v11761_v56, 1  ;;  %v2451_v11 = vsel %vm11682_vm12, %v2442_v59, %v2450_v34  ;;  %v2452_v31 = vrot.slane %v2450_v34, 4  ;;  %v1269_v22 = vsel %vm15473_vm8, %v1226_v61, %v688_v35  ;;  %v2902_v35 = vld [vmem:[#allocation2 + $0x10] sm:$0xf]  ;;  %4393 = vmatprep.subr.bf16.mxu1 %v15431_v1 }
 0x181   : > { %v11774_v15 = vor.u32 %v2459_v47, %v2456_v36  ;;  %v1976_v40 = vadd.f32 %v11512_v58, %v1776_v48  ;;  %2859 = vst.msk [vmem:[#allocation2 + $0x18] sm:$0xf] %vm15477_vm14, %v2451_v11  ;;  %v2243_v44 = vmul.f32 %v9356_v38, %v2120_v27  ;;  %v747_v2 = vpop.permute.xlu1 %746  ;;  %v3066_v58 = vshll.u32 %v11761_v56, 16 }
 0x182   : > { %v3272_v59 = vsel %vm605_vm1, %v11692_v33, %v3271_v25  ;;  %v1438_v47 = vsel %vm15473_vm8, %v1396_v28, %v993_v3  ;;  %v1332_v61 = vsel %vm15449_vm9, %v1269_v22, %v747_v2  ;;  %v3364_v27 = vrot.slane %v11769_v20, 1  ;;  %v10138_v28 = vld [vmem:[%s15426_s1 + $0xf0] sm:$0xff]  }
 0x183   : > { %v2461_v34 = vsel %vm11682_vm12, %v2452_v31, %v11774_v15  ;;  %v2121_v36 = vmax.f32 %v1976_v40, 0.0  ;;  %3311 = vrot.lane.b32.xlu1 %v3272_v59, %s10375_s26  ;;  %v1137_v38 = vpop.permute.xlu0 %1136  ;;  %v9275_v33 = vpack.c.bf16 %v2243_v44, %v2243_v44  ;;  %v3068_v48 = vrot.slane %v3066_v58, 1  ;;  %v11810_v59 = vpop.f32.mrf.mxu1  ;;  %4394 = vmatpush2.bf16.msra.mxu1 %v10138_v28 }
 0x184   : > { %2860 = vst.msk [vmem:[#allocation2 + $0x1c] sm:$0xf] %vm15477_vm14, %v2461_v34  ;;  %v1500_v57 = vsel %vm15449_vm9, %v1438_v47, %v1137_v38  ;;  %v2903_v16 = vld [vmem:[#allocation2 + $0x14] sm:$0xf]  ;;  %v2462_v3 = vrot.slane %v11774_v15, 4  ;;  %v3516_v31 = vrot.slane %v8977_v24, 2  ;;  %4395 = vmatprep.subr.bf16.mxu1 %v15431_v1  ;;  %vm12392_vm9 = vmand %vm15469_vm10, %vm178_vm11 }
 0x185   : > { %v2244_v17 = vmul.f32 %v9357_v8, %v2121_v36  ;;  %1906 = vmatprep.mubr.bf16.mxu0 %v1500_v57  ;;  %v11805_v11 = vcombine.low %v2902_v35, %v2903_v16  ;;  %v2464_v40 = vshrl.u32 %v9275_v33, 16  ;;  %v2467_v23 = vshll.u32 %v9275_v33, 16  ;;  %v9836_v38 = vpop.f32.mrf.mxu1 }
 0x186   : > { %v3069_v55 = vsel %vm392_vm2, %v11732_v53, %v3068_v48  ;;  %v1780_v44 = vpop.f32.mrf.mxu0  ;;  %1907 = vmatmul.mubr.bf16.gmra.mxu0 %v1332_v61  ;;  %v3070_v22 = vshrl.u32 %v11761_v56, 16  ;;  %v2947_v53 = vld [vmem:[#allocation2 + $0x10] sm:$0xc]  ;;  %vm15468_vm11 = vcmask 253952  }
 0x187   : > { %v9276_v2 = vpack.c.bf16 %v2244_v17, %v2244_v17  ;;  %3225 = vrot.lane.b32.xlu1 %v3069_v55, %s10376_s27  ;;  %v1781_v49 = vadd.f32 %v11599_v12, %v1780_v44  ;;  %v11815_v8 = vrot.slane %v11805_v11, 1  ;;  %v3517_v24 = vrot.slane %v11805_v11, 2  ;;  %9866 = vmatprep.mubr.msk.bf16.mxu0 %vm15474_vm5, %v15433_v14  ;;  %v2951_v17 = vld [vmem:[#allocation2 + $0x10] sm:$0x8] }
 0x188   : > { %v2466_v15 = vrot.slane %v2464_v40, 6  ;;  %v2469_v58 = vrot.slane %v2467_v23, 7  ;;  %v1782_v34 = vpop.f32.mrf.mxu0  ;;  %v3074_v36 = vshll.u32 %v11805_v11, 16  ;;  %v11821_v47 = vcombine.low %v2947_v53, %v2903_v16 }
 0x189   : > { %v2474_v61 = vshrl.u32 %v9276_v2, 16  ;;  %v2477_v35 = vshll.u32 %v9276_v2, 16  ;;  %v1981_v33 = vadd.f32 %v11515_v19, %v1781_v49  ;;  %v3365_v57 = vsel %vm605_vm1, %v3364_v27, %v11815_v8 }
 0x18a   : > { %v2470_v55 = vor.u32 %v2469_v58, %v2466_v15  ;;  %v3518_v40 = vsel %vm15478_vm0, %v3516_v31, %v3517_v24  ;;  %v1783_v23 = vpop.f32.mrf.mxu0  ;;  %v11832_v28 = vrot.slane %v3074_v36, 1  ;;  %v8982_v44 = vcombine.low %v2951_v17, %v2903_v16 }
 0x18b   : > { %v2476_v2 = vrot.slane %v2474_v61, 6  ;;  %v2479_v53 = vrot.slane %v2477_v35, 7  ;;  %v2122_v19 = vmax.f32 %v1981_v33, 0.0  ;;  %3370 = vrot.lane.b32.xlu1 %v3365_v57, %s10377_s30  ;;  %3557 = vrot.lane.b32.xlu0 %v3518_v40, %s10376_s27  ;;  %v1784_v27 = vadd.f32 %v11599_v12, %v1783_v23  ;;  %v11837_v49 = vld [vmem:[#allocation2 + $0x18] sm:$0xff]  }
 0x18c   : > { %v2471_v31 = vsel %vm11682_vm12, %v2462_v3, %v2470_v55  ;;  %v2472_v15 = vrot.slane %v2470_v55, 4  ;;  %v1785_v58 = vpop.f32.mrf.mxu0  ;;  %v3274_v16 = vsel %vm605_vm1, %v3271_v25, %v11815_v8  ;;  %v3072_v34 = vor.u32 %v3070_v22, %v3068_v48 }
 0x18d   : > { %2861 = vst.msk [vmem:[#allocation2 + $0x20] sm:$0xf] %vm15477_vm14, %v2471_v31  ;;  %v2480_v38 = vor.u32 %v2479_v53, %v2476_v2  ;;  %v2245_v61 = vmul.f32 %v9360_v45, %v2122_v19  ;;  %v1984_v35 = vadd.f32 %v11518_v54, %v1784_v27  ;;  %v11850_v33 = vrot.slane %v11837_v49, 2  ;;  %v11869_v2 = vpop.f32.mrf.mxu1  ;;  %v10140_v53 = vld [vmem:[%s15426_s1 + $0xe8] sm:$0xff]  }
 0x18e   : > { %v3608_v3 = vrot.slane %v11821_v47, 2  ;;  %v3802_v57 = vrot.slane %v8982_v44, 3  ;;  %v3803_v17 = vrot.slane %v11837_v49, 3  ;;  %v11855_v55 = vshll.u32 %v11837_v49, 16  ;;  %4396 = vmatpush2.bf16.msra.mxu1 %v10140_v53 }
 0x18f   : > { %v2481_v25 = vsel %vm11682_vm12, %v2472_v15, %v2480_v38  ;;  %v9277_v48 = vpack.c.bf16 %v2245_v61, %v2245_v61  ;;  %v2123_v22 = vmax.f32 %v1984_v35, 0.0  ;;  %3313 = vrot.lane.b32.xlu1 %v3274_v16, %s10375_s26  ;;  %v3077_v54 = vsel %vm392_vm2, %v3072_v34, %v11832_v28  ;;  %4397 = vmatprep.subr.bf16.mxu1 %v15431_v1 }
 0x190   : > { %v2482_v45 = vrot.slane %v2480_v38, 4  ;;  %2862 = vst.msk [vmem:[#allocation2 + $0x24] sm:$0xf] %vm15477_vm14, %v2481_v25  ;;  %v3609_v40 = vsel %vm15478_vm0, %v3608_v3, %v11850_v33  ;;  %v3804_v23 = vsel %vm1141_vm6, %v3802_v57, %v3803_v17  ;;  %v3275_v44 = vrot.slane %v11837_v49, 1 }
 0x191   : > { %v2484_v19 = vshrl.u32 %v9277_v48, 16  ;;  %v2487_v27 = vshll.u32 %v9277_v48, 16  ;;  %v2246_v31 = vmul.f32 %v9361_v37, %v2123_v22  ;;  %3614 = vrot.lane.b32.xlu0 %v3609_v40, %s10375_s26  ;;  %9867 = vmatmul.mubr.msk.bf16.vlgmr.msra.gmra.mxu0 %vm1183_vm7, %v3804_v23  ;;  %v11879_v15 = vshrl.u32 %v11837_v49, 16  ;;  %v9837_v37 = vpop.f32.mrf.mxu1  ;;  %v10141_v23 = vld [vmem:[%s15426_s1 + $0xe0] sm:$0xff]  }
 0x192   : > { %v1788_v58 = vpop.f32.mrf.mxu0  ;;  %v3660_v16 = vshrl.u32 %v11821_v47, 16  ;;  %v3663_v34 = vshll.u32 %v11821_v47, 16  ;;  %v3668_v38 = vrot.slane %v11855_v55, 3  ;;  %9870 = vmatprep.mubr.msk.bf16.mxu0 %vm15474_vm5, %v15433_v14  ;;  %v3078_v63 = vshrl.u32 %v11805_v11, 16  ;;  %4398 = vmatpush2.bf16.msra.mxu1 %v10141_v23 }
 0x193   : > { %v2486_v61 = vrot.slane %v2484_v19, 6  ;;  %v2489_v35 = vrot.slane %v2487_v27, 7  ;;  %v9278_v3 = vpack.c.bf16 %v2246_v31, %v2246_v31  ;;  %3227 = vrot.lane.b32.xlu1 %v3077_v54, %s10376_s27  ;;  %v1789_v57 = vadd.f32 %v11599_v12, %v1788_v58  ;;  %v11898_v53 = vpop.f32.mrf.mxu1  ;;  %4399 = vmatprep.subr.bf16.mxu1 %v15431_v1 }
 0x194   : > { %v1790_v25 = vpop.f32.mrf.mxu0  ;;  %v3520_v47 = vsel %vm15478_vm0, %v3517_v24, %v11850_v33  ;;  %v3662_v48 = vrot.slane %v3660_v16, 2  ;;  %v3665_v22 = vrot.slane %v3663_v34, 3  ;;  %v3667_v40 = vrot.slane %v11879_v15, 2 }
 0x195   : > { %v2490_v54 = vor.u32 %v2489_v35, %v2486_v61  ;;  %v2494_v19 = vshrl.u32 %v9278_v3, 16  ;;  %v2497_v27 = vshll.u32 %v9278_v3, 16  ;;  %v1989_v31 = vadd.f32 %v11528_v32, %v1789_v57  ;;  %3559 = vrot.lane.b32.xlu0 %v3520_v47, %s10376_s27  ;;  %v10142_v61 = vld [vmem:[%s15426_s1 + $0xd8] sm:$0xff]   ;;  %v9840_v35 = vpop.f32.mrf.mxu1 }
 0x196   : > { %v3276_v24 = vsel %vm605_vm1, %v11815_v8, %v3275_v44  ;;  %v1791_v58 = vpop.f32.mrf.mxu0  ;;  %v9365_v16 = vunpack.c.h.bf16 %v11737_v6  ;;  %v3666_v34 = vor.u32 %v3665_v22, %v3662_v48  ;;  %v11907_v37 = vor.u32 %v3668_v38, %v3667_v40  ;;  %4400 = vmatpush2.bf16.msra.mxu1 %v10142_v61 }
 0x197   : > { %v2491_v32 = vsel %vm11682_vm12, %v2482_v45, %v2490_v54  ;;  %v2496_v3 = vrot.slane %v2494_v19, 6  ;;  %v2499_v57 = vrot.slane %v2497_v27, 7  ;;  %3372 = vrot.lane.b32.xlu1 %v3276_v24, %s10377_s30  ;;  %v3080_v8 = vor.u32 %v3078_v63, %v11832_v28  ;;  %v11918_v25 = vld [vmem:[#allocation2 + $0x20] sm:$0xff]   ;;  %4401 = vmatprep.subr.bf16.mxu1 %v15431_v1 }
 0x198   : > { %2863 = vst.msk [vmem:[#allocation2 + $0x28] sm:$0xf] %vm15477_vm14, %v2491_v32  ;;  %v2124_v38 = vmax.f32 %v1989_v31, 0.0  ;;  %v1792_v47 = vadd.f32 %v11599_v12, %v1791_v58  ;;  %v1793_v48 = vpop.f32.mrf.mxu0  ;;  %v3670_v45 = vsel %vm15479_vm3, %v3666_v34, %v11907_v37  ;;  %v15435_v22 = vrot.slane %v11855_v55, 1  ;;  %v11937_v58 = vld [vmem:[%s15426_s1 + $0x490] sm:$0xff]  }
 0x199   : > { %v2492_v40 = vrot.slane %v2490_v54, 4  ;;  %v11926_v23 = vor.u32 %v2499_v57, %v2496_v3  ;;  %3757 = vrot.lane.b32.xlu0 %v3670_v45, %s10377_s30  ;;  %v15437_v28 = vrot.slane %v11918_v25, 2  ;;  %v15436_v19 = vrot.slane %v11918_v25, 3  ;;  %v11971_v57 = vpop.f32.mrf.mxu1 }
 0x19a   : > { %v2247_v27 = vmul.f32 %v9364_v42, %v2124_v38  ;;  %v1992_v31 = vadd.f32 %v11531_v60, %v1792_v47  ;;  %v11940_v54 = vshll.u32 %v11918_v25, 16  ;;  %v11943_v34 = vshrl.u32 %v11918_v25, 16  ;;  %v10144_v38 = vld [vmem:[%s15426_s1 + $0xd0] sm:$0xff]  }
 0x19b   : > { %v2501_v35 = vsel %vm11682_vm12, %v2492_v40, %v11926_v23  ;;  %3315 = vrot.lane.b32.xlu1 %v3276_v24, %s10375_s26  ;;  %v3522_v60 = vsel %vm15478_vm0, %v11850_v33, %v15437_v28  ;;  %v3806_v6 = vsel %vm1141_vm6, %v3803_v17, %v15436_v19  ;;  %v15440_v24 = vrot.slane %v11918_v25, 1  ;;  %v9841_v1 = vpop.f32.mrf.mxu1  ;;  %4402 = vmatpush2.bf16.msra.mxu1 %v10144_v38 }
 0x19c   : > { %2864 = vst.msk [vmem:[#allocation2 + $0x2c] sm:$0xf] %vm15477_vm14, %v2501_v35  ;;  %v9279_v42 = vpack.c.bf16 %v2247_v27, %v2247_v27  ;;  %v2125_v61 = vmax.f32 %v1992_v31, 0.0  ;;  %9871 = vmatmul.mubr.msk.bf16.gmra.mxu0 %vm1183_vm7, %v3806_v6  ;;  %v3671_v32 = vrot.slane %v11943_v34, 2  ;;  %v3085_v33 = vsel %vm392_vm2, %v3080_v8, %v15435_v22 }
 0x19d   : > { %3616 = vrot.lane.b32.xlu0 %v3522_v60, %s10375_s26  ;;  %v9368_v17 = vunpack.c.l.bf16 %v11937_v58  ;;  %v3672_v3 = vrot.slane %v11940_v54, 3  ;;  %9874 = vmatprep.mubr.msk.bf16.mxu0 %vm15474_vm5, %v15433_v14  ;;  %v3416_v8 = vshrl.u32 %v11769_v20, 16  ;;  %v2502_v27 = vrot.slane %v11926_v23, 4 }
 0x19e   : > { %v2504_v47 = vshrl.u32 %v9279_v42, 16  ;;  %v2507_v48 = vshll.u32 %v9279_v42, 16  ;;  %v2248_v45 = vmul.f32 %v9365_v16, %v2125_v61  ;;  %v1796_v40 = vpop.f32.mrf.mxu0  ;;  %v9369_v35 = vunpack.c.h.bf16 %v11937_v58  ;;  %v11994_v61 = vpop.f32.mrf.mxu1 }
 0x19f   : > { %3229 = vrot.lane.b32.xlu1 %v3085_v33, %s10376_s27  ;;  %v1797_v31 = vadd.f32 %v11599_v12, %v1796_v40  ;;  %v11981_v6 = vor.u32 %v3672_v3, %v3671_v32  ;;  %v3278_v16 = vsel %vm605_vm1, %v3275_v44, %v15440_v24  ;;  %v3092_v58 = vrot.slane %v11940_v54, 1 }
 0x1a0   : > { %v2506_v14 = vrot.slane %v2504_v47, 6  ;;  %v2509_v22 = vrot.slane %v2507_v48, 7  ;;  %v9280_v19 = vpack.c.bf16 %v2248_v45, %v2248_v45  ;;  %v1798_v28 = vpop.f32.mrf.mxu0  ;;  %v11991_v42 = vrot.slane %v3416_v8, 1 }
 0x1a1   : > { %v1997_v23 = vadd.f32 %v11534_v29, %v1797_v31  ;;  %3561 = vrot.lane.b32.xlu0 %v3522_v60, %s10376_s27  ;;  %v3419_v1 = vshll.u32 %v11769_v20, 16  ;;  %v3674_v49 = vsel %vm15479_vm3, %v11907_v37, %v11981_v6  ;;  %v3423_v20 = vrot.slane %v3078_v63, 1 }
 0x1a2   : > { %v2510_v28 = vor.u32 %v2509_v22, %v2506_v14  ;;  %v2514_v32 = vshrl.u32 %v9280_v19, 16  ;;  %v2517_v33 = vshll.u32 %v9280_v19, 16  ;;  %v1799_v3 = vpop.f32.mrf.mxu0  ;;  %v3424_v14 = vrot.slane %v3074_v36, 2  ;;  %v9844_v22 = vpop.f32.mrf.mxu1 }
 0x1a3   : > { %v2126_v44 = vmax.f32 %v1997_v23, 0.0  ;;  %3374 = vrot.lane.b32.xlu1 %v3278_v16, %s10377_s30  ;;  %v1800_v29 = vadd.f32 %v11599_v12, %v1799_v3  ;;  %v12001_v60 = vld [vmem:[#allocation2 + $0x28] sm:$0xff]   ;;  %v3421_v48 = vrot.slane %v3419_v1, 2 }
 0x1a4   : > { %v2511_v19 = vsel %vm11682_vm12, %v2502_v27, %v2510_v28  ;;  %v2516_v38 = vrot.slane %v2514_v32, 6  ;;  %v2519_v47 = vrot.slane %v2517_v33, 7  ;;  %v1801_v37 = vpop.f32.mrf.mxu0  ;;  %v15439_v63 = vrot.slane %v12001_v60, 2 }
 0x1a5   : > { %2865 = vst.msk [vmem:[#allocation2 + $0x30] sm:$0xf] %vm15477_vm14, %v2511_v19  ;;  %v2249_v45 = vmul.f32 %v9368_v17, %v2126_v44  ;;  %v2000_v40 = vadd.f32 %v11544_v51, %v1800_v29  ;;  %3759 = vrot.lane.b32.xlu0 %v3674_v49, %s10377_s30  ;;  %v15438_v8 = vrot.slane %v12001_v60, 3  ;;  %v2512_v36 = vrot.slane %v2510_v28, 4  ;;  %v12038_v29 = vpop.f32.mrf.mxu1 }
 0x1a6   : > { %v2520_v31 = vor.u32 %v2519_v47, %v2516_v38  ;;  %v12015_v23 = vshll.u32 %v12001_v60, 16  ;;  %v12018_v27 = vshrl.u32 %v12001_v60, 16  ;;  %v15489_v51 = vrot.slane %v11918_v25, 2  ;;  %v12045_v47 = vld [vmem:[%s15426_s1 + $0x498] sm:$0xff]  }
 0x1a7   : > { %v9281_v1 = vpack.c.bf16 %v2249_v45, %v2249_v45  ;;  %v2127_v32 = vmax.f32 %v2000_v40, 0.0  ;;  %3317 = vrot.lane.b32.xlu1 %v3278_v16, %s10375_s26  ;;  %v15490_v28 = vrot.slane %v11918_v25, 3  ;;  %v15491_v49 = vrot.slane %v11855_v55, 1 }
 0x1a8   : > { %v3524_v17 = vsel %vm15478_vm0, %v15489_v51, %v15439_v63  ;;  %v2521_v3 = vsel %vm11682_vm12, %v2512_v36, %v2520_v31  ;;  %v3675_v16 = vrot.slane %v12018_v27, 2  ;;  %v3676_v37 = vrot.slane %v12015_v23, 3  ;;  %v9845_v51 = vpop.f32.mrf.mxu1 }
 0x1a9   : > { %v3808_v33 = vsel %vm1141_vm6, %v15490_v28, %v15438_v8  ;;  %v3088_v44 = vor.u32 %v11879_v15, %v15491_v49  ;;  %2866 = vst.msk [vmem:[#allocation2 + $0x34] sm:$0xf] %vm15477_vm14, %v2521_v3  ;;  %v2524_v22 = vshrl.u32 %v9281_v1, 16  ;;  %v2527_v19 = vshll.u32 %v9281_v1, 16  ;;  %3618 = vrot.lane.b32.xlu0 %v3524_v17, %s10375_s26 }
 0x1aa   : > { %9875 = vmatmul.mubr.msk.bf16.gmra.mxu0 %vm1183_vm7, %v3808_v33  ;;  %v2250_v38 = vmul.f32 %v9369_v35, %v2127_v32  ;;  %v15492_v45 = vmov 0.0   ;;  %v1804_v36 = vpop.f32.mrf.mxu0  ;;  %v3279_v1 = vrot.slane %v12001_v60, 1  ;;  %v3422_v35 = vor.u32 %v3421_v48, %v11991_v42  ;;  %v12065_v42 = vld [vmem:[%s15426_s1 + $0x4a0] sm:$0xff]  }
 0x1ab   : > { %9878 = vmatprep.mubr.msk.bf16.mxu0 %vm15474_vm5, %v15492_v45  ;;  %v3093_v40 = vsel %vm392_vm2, %v3088_v44, %v3092_v58  ;;  %v12055_v32 = vor.u32 %v3424_v14, %v3423_v20  ;;  %v2526_v28 = vrot.slane %v2524_v22, 6  ;;  %v2529_v33 = vrot.slane %v2527_v19, 7  ;;  %v12071_v14 = vpop.f32.mrf.mxu1 }
 0x1ac   : > { %v9282_v3 = vpack.c.bf16 %v2250_v38, %v2250_v38  ;;  %3231 = vrot.lane.b32.xlu1 %v3093_v40, %s10376_s27  ;;  %v1805_v49 = vadd.f32 %v11599_v12, %v1804_v36  ;;  %v2522_v8 = vrot.slane %v2520_v31, 4  ;;  %v9372_v63 = vunpack.c.l.bf16 %v12045_v47  ;;  %v1806_v24 = vpop.f32.mrf.mxu0 }
 0x1ad   : > { %v12060_v44 = vor.u32 %v3676_v37, %v3675_v16  ;;  %v12069_v20 = vsel %vm15480_vm4, %v3422_v35, %v12055_v32  ;;  %v2530_v48 = vor.u32 %v2529_v33, %v2526_v28  ;;  %3563 = vrot.lane.b32.xlu0 %v3524_v17, %s10376_s27  ;;  %v15493_v24 = vrot.slane %v11918_v25, 1  ;;  %v9848_v35 = vpop.f32.mrf.mxu1 }
 0x1ae   : > { %v2534_v22 = vshrl.u32 %v9282_v3, 16  ;;  %v2537_v19 = vshll.u32 %v9282_v3, 16  ;;  %v2005_v31 = vadd.f32 %v11547_v0, %v1805_v49  ;;  %v1807_v38 = vpop.f32.mrf.mxu0  ;;  %v9373_v37 = vunpack.c.h.bf16 %v12045_v47 }
 0x1af   : > { %v3280_v16 = vsel %vm605_vm1, %v15493_v24, %v3279_v1  ;;  %v3427_v40 = vrot.slane %v11879_v15, 1  ;;  %v3428_v36 = vrot.slane %v11855_v55, 2  ;;  %v2531_v51 = vsel %vm11682_vm12, %v2522_v8, %v2530_v48 }
 0x1b0   : > { %v2536_v0 = vrot.slane %v2534_v22, 6  ;;  %v2539_v28 = vrot.slane %v2537_v19, 7  ;;  %3376 = vrot.lane.b32.xlu1 %v3280_v16, %s10377_s30  ;;  %v9376_v17 = vunpack.c.l.bf16 %v12065_v42  ;;  %2867 = vst.msk [vmem:[#allocation2 + $0x38] sm:$0xf] %vm15477_vm14, %v2531_v51  ;;  %v2128_v25 = vmax.f32 %v2005_v31, 0.0  ;;  %v1809_v47 = vpop.f32.mrf.mxu0  ;;  %v12092_v15 = vld [vmem:[#allocation2 + $0x30] sm:$0xff]  }
 0x1b1   : > { %v1808_v33 = vadd.f32 %v11599_v12, %v1807_v38  ;;  %v3678_v55 = vsel %vm15479_vm3, %v11981_v6, %v12060_v44  ;;  %v3429_v3 = vor.u32 %v3428_v36, %v3427_v40  ;;  %v2532_v8 = vrot.slane %v2530_v48, 4 }
 0x1b2   : > { %v12094_v49 = vor.u32 %v2539_v28, %v2536_v0  ;;  %3761 = vrot.lane.b32.xlu0 %v3678_v55, %s10377_s30  ;;  %v3096_v22 = vor.u32 %v11943_v34, %v3092_v58  ;;  %v15441_v19 = vrot.slane %v12015_v23, 1  ;;  %v2251_v12 = vmul.f32 %v9372_v63, %v2128_v25  ;;  %v12134_v25 = vpop.f32.mrf.mxu1 }
 0x1b3   : > { %v2008_v31 = vadd.f32 %v11553_v4, %v1808_v33  ;;  %v3525_v24 = vrot.slane %v12092_v15, 2  ;;  %v3809_v6 = vrot.slane %v12092_v15, 3  ;;  %v12109_v38 = vshll.u32 %v12092_v15, 16 }
 0x1b4   : > { %v2541_v48 = vsel %vm11682_vm12, %v2532_v8, %v12094_v49  ;;  %3319 = vrot.lane.b32.xlu1 %v3280_v16, %s10375_s26  ;;  %v3431_v58 = vrot.slane %v11943_v34, 1  ;;  %v3432_v40 = vrot.slane %v11940_v54, 2  ;;  %v9283_v4 = vpack.c.bf16 %v2251_v12, %v2251_v12 }
 0x1b5   : > { %2868 = vst.msk [vmem:[#allocation2 + $0x3c] sm:$0xf] %vm15477_vm14, %v2541_v48  ;;  %v2129_v63 = vmax.f32 %v2008_v31, 0.0  ;;  %v15494_v36 = vrot.slane %v12001_v60, 2  ;;  %v15495_v16 = vrot.slane %v12001_v60, 3  ;;  %v3101_v54 = vsel %vm392_vm2, %v3096_v22, %v15441_v19 }
 0x1b6   : > { %v15442_v34 = vrot.slane %v12092_v15, 1  ;;  %v12131_v0 = vshrl.u32 %v12092_v15, 16  ;;  %v3680_v28 = vrot.slane %v12109_v38, 3  ;;  %v2544_v33 = vshrl.u32 %v9283_v4, 16  ;;  %v1812_v8 = vpop.f32.mrf.mxu0  ;;  %v12147_v31 = vld [vmem:[%s15427_s2] ss:$0 sm:$0xff] }
 0x1b7   : > { %v3526_v35 = vsel %vm15478_vm0, %v15494_v36, %v3525_v24  ;;  %v3810_v51 = vsel %vm1141_vm6, %v15495_v16, %v3809_v6  ;;  %v2547_v47 = vshll.u32 %v9283_v4, 16  ;;  %v2252_v55 = vmul.f32 %v9373_v37, %v2129_v63  ;;  %v9849_v63 = vpop.f32.mrf.mxu1 }
 0x1b8   : > { %3620 = vrot.lane.b32.xlu0 %v3526_v35, %s10375_s26  ;;  %9879 = vmatmul.mubr.msk.bf16.gmra.mxu0 %vm1183_vm7, %v3810_v51  ;;  %v12140_v22 = vsel %vm15480_vm4, %v12055_v32, %v3429_v3  ;;  %v2542_v12 = vrot.slane %v12094_v49, 4  ;;  %v1813_v48 = vadd.f32 %v12147_v31, %v1812_v8  ;;  %v9377_v37 = vunpack.c.h.bf16 %v12065_v42  ;;  %v1814_v51 = vpop.f32.mrf.mxu0 }
 0x1b9   : > { %9882 = vmatprep.mubr.msk.bf16.mxu0 %vm15474_vm5, %v15492_v45  ;;  %3233 = vrot.lane.b32.xlu1 %v3101_v54, %s10376_s27  ;;  %v3679_v4 = vrot.slane %v12131_v0, 2  ;;  %v2546_v36 = vrot.slane %v2544_v33, 6  ;;  %v2549_v16 = vrot.slane %v2547_v47, 7  ;;  %v9284_v32 = vpack.c.bf16 %v2252_v55, %v2252_v55  ;;  %v12164_v33 = vpop.f32.mrf.mxu1 }
 0x1ba   : > { %v12152_v19 = vor.u32 %v3432_v40, %v3431_v58  ;;  %v2013_v49 = vadd.f32 %v11564_v21, %v1813_v48  ;;  %v3282_v54 = vsel %vm605_vm1, %v3279_v1, %v15442_v34  ;;  %v15445_v63 = vrot.slane %v12109_v38, 1  ;;  %v1815_v40 = vpop.f32.mrf.mxu0 }
 0x1bb   : > { %v12161_v8 = vor.u32 %v3680_v28, %v3679_v4  ;;  %v2550_v47 = vor.u32 %v2549_v16, %v2546_v36  ;;  %v2554_v55 = vshrl.u32 %v9284_v32, 16  ;;  %v2557_v58 = vshll.u32 %v9284_v32, 16  ;;  %v9852_v4 = vpop.f32.mrf.mxu1 }
 0x1bc   : > { %3565 = vrot.lane.b32.xlu0 %v3526_v35, %s10376_s27  ;;  %v12168_v21 = vsel %vm15480_vm4, %v3429_v3, %v12152_v19  ;;  %v2130_v48 = vmax.f32 %v2013_v49, 0.0  ;;  %v1816_v60 = vadd.f32 %v12147_v31, %v1815_v40  ;;  %v12175_v35 = vld [vmem:[#allocation2 + $0x38] sm:$0xff]   ;;  %v3435_v28 = vrot.slane %v12018_v27, 1  ;;  %v1817_v32 = vpop.f32.mrf.mxu0 }
 0x1bd   : > { %3378 = vrot.lane.b32.xlu1 %v3282_v54, %s10377_s30  ;;  %v3682_v1 = vsel %vm15479_vm3, %v12060_v44, %v12161_v8  ;;  %v2551_v36 = vsel %vm11682_vm12, %v2542_v12, %v2550_v47  ;;  %v2556_v16 = vrot.slane %v2554_v55, 6  ;;  %v2559_v3 = vrot.slane %v2557_v58, 7 }
 0x1be   : > { %v3436_v51 = vrot.slane %v12015_v23, 2  ;;  %2869 = vst.msk [vmem:[#allocation2 + $0x40] sm:$0xf] %vm15477_vm14, %v2551_v36  ;;  %v2253_v49 = vmul.f32 %v9376_v17, %v2130_v48  ;;  %v2016_v44 = vadd.f32 %v11570_v18, %v1816_v60  ;;  %v15444_v40 = vrot.slane %v12175_v35, 2  ;;  %v12208_v17 = vld [vmem:[%s15426_s1 + $0x4a8] sm:$0xff]   ;;  %v12217_v60 = vpop.f32.mrf.mxu1 }
 0x1bf   : > { %v15443_v4 = vrot.slane %v12175_v35, 3  ;;  %v2552_v34 = vrot.slane %v2550_v47, 4  ;;  %v2560_v12 = vor.u32 %v2559_v3, %v2556_v16  ;;  %v12189_v55 = vshll.u32 %v12175_v35, 16 }
 0x1c0   : > { %3763 = vrot.lane.b32.xlu0 %v3682_v1, %s10377_s30  ;;  %v12192_v58 = vshrl.u32 %v12175_v35, 16  ;;  %v9285_v36 = vpack.c.bf16 %v2253_v49, %v2253_v49  ;;  %v2131_v32 = vmax.f32 %v2016_v44, 0.0  ;;  %v3528_v18 = vsel %vm15478_vm0, %v3525_v24, %v15444_v40 }
 0x1c1   : > { %3321 = vrot.lane.b32.xlu1 %v3282_v54, %s10375_s26  ;;  %v3812_v42 = vsel %vm1141_vm6, %v3809_v6, %v15443_v4  ;;  %v2561_v54 = vsel %vm11682_vm12, %v2552_v34, %v2560_v12  ;;  %v15496_v47 = vrot.slane %v12015_v23, 1  ;;  %v3684_v3 = vrot.slane %v12189_v55, 3 }
 0x1c2   : > { %9883 = vmatmul.mubr.msk.bf16.gmra.mxu0 %vm1183_vm7, %v3812_v42  ;;  %v3683_v24 = vrot.slane %v12192_v58, 2  ;;  %2870 = vst.msk [vmem:[#allocation2 + $0x44] sm:$0xf] %vm15477_vm14, %v2561_v54  ;;  %v2564_v6 = vshrl.u32 %v9285_v36, 16  ;;  %v2567_v1 = vshll.u32 %v9285_v36, 16  ;;  %v2254_v16 = vmul.f32 %v9377_v37, %v2131_v32  ;;  %v9853_v36 = vpop.f32.mrf.mxu1 }
 0x1c3   : > { %v3104_v48 = vor.u32 %v12018_v27, %v15496_v47  ;;  %9886 = vmatprep.mubr.msk.bf16.mxu0 %vm15474_vm5, %v15492_v45  ;;  %v1820_v27 = vpop.f32.mrf.mxu0  ;;  %v9380_v34 = vunpack.c.l.bf16 %v12208_v17  ;;  %v15448_v49 = vrot.slane %v12175_v35, 1  ;;  %v12229_v44 = vor.u32 %v3436_v51, %v3435_v28  ;;  %v12236_v47 = vld [vmem:[%s15426_s1 + $0x4b0] sm:$0xff]  }
 0x1c4   : > { %3622 = vrot.lane.b32.xlu0 %v3528_v18, %s10375_s26  ;;  %v2566_v37 = vrot.slane %v2564_v6, 6  ;;  %v2569_v32 = vrot.slane %v2567_v1, 7  ;;  %v9286_v42 = vpack.c.bf16 %v2254_v16, %v2254_v16  ;;  %v1821_v54 = vadd.f32 %v12147_v31, %v1820_v27  ;;  %v12246_v51 = vpop.f32.mrf.mxu1 }
 0x1c5   : > { %v3109_v23 = vsel %vm392_vm2, %v3104_v48, %v15445_v63  ;;  %v2562_v48 = vrot.slane %v2560_v12, 4  ;;  %v1822_v4 = vpop.f32.mrf.mxu0  ;;  %v9381_v40 = vunpack.c.h.bf16 %v12208_v17  ;;  %v12239_v63 = vor.u32 %v3684_v3, %v3683_v24 }
 0x1c6   : > { %3235 = vrot.lane.b32.xlu1 %v3109_v23, %s10376_s27  ;;  %v12244_v28 = vsel %vm15480_vm4, %v12152_v19, %v12229_v44  ;;  %v2570_v6 = vor.u32 %v2569_v32, %v2566_v37  ;;  %v2574_v1 = vshrl.u32 %v9286_v42, 16  ;;  %v2577_v16 = vshll.u32 %v9286_v42, 16  ;;  %v9856_v27 = vpop.f32.mrf.mxu1 }
 0x1c7   : > { %v2021_v23 = vadd.f32 %v11574_v62, %v1821_v54  ;;  %v15497_v4 = vrot.slane %v12092_v15, 1  ;;  %v1823_v17 = vpop.f32.mrf.mxu0  ;;  %v3439_v19 = vrot.slane %v12131_v0, 1  ;;  %v3440_v3 = vrot.slane %v12109_v38, 2 }
 0x1c8   : > { %3567 = vrot.lane.b32.xlu0 %v3528_v18, %s10376_s27  ;;  %v2571_v36 = vsel %vm11682_vm12, %v2562_v48, %v2570_v6  ;;  %v2576_v62 = vrot.slane %v2574_v1, 6  ;;  %v2579_v37 = vrot.slane %v2577_v16, 7  ;;  %v1824_v32 = vadd.f32 %v12147_v31, %v1823_v17 }
 0x1c9   : > { %v3284_v12 = vsel %vm605_vm1, %v15497_v4, %v15448_v49  ;;  %2871 = vst.msk [vmem:[#allocation2 + $0x48] sm:$0xf] %vm15477_vm14, %v2571_v36  ;;  %v2132_v15 = vmax.f32 %v2021_v23, 0.0  ;;  %v1825_v42 = vpop.f32.mrf.mxu0  ;;  %v3686_v54 = vsel %vm15479_vm3, %v12161_v8, %v12239_v63  ;;  %v12267_v4 = vld [vmem:[#allocation2 + $0x40] sm:$0xff]   ;;  %v3441_v27 = vor.u32 %v3440_v3, %v3439_v19 }
 0x1ca   : > { %3380 = vrot.lane.b32.xlu1 %v3284_v12, %s10377_s30  ;;  %v2572_v48 = vrot.slane %v2570_v6, 4  ;;  %v2580_v1 = vor.u32 %v2579_v37, %v2576_v62  ;;  %v15498_v16 = vrot.slane %v12109_v38, 1  ;;  %v3116_v23 = vrot.slane %v12189_v55, 1 }
 0x1cb   : > { %v2255_v36 = vmul.f32 %v9380_v34, %v2132_v15  ;;  %v2024_v17 = vadd.f32 %v11584_v7, %v1824_v32  ;;  %v15447_v42 = vrot.slane %v12267_v4, 2  ;;  %v15446_v8 = vrot.slane %v12267_v4, 3 }
 0x1cc   : > { %3765 = vrot.lane.b32.xlu0 %v3686_v54, %s10377_s30  ;;  %v3112_v18 = vor.u32 %v12131_v0, %v15498_v16  ;;  %v2581_v19 = vsel %vm11682_vm12, %v2572_v48, %v2580_v1  ;;  %v12281_v6 = vshll.u32 %v12267_v4, 16  ;;  %v3443_v38 = vrot.slane %v12192_v58, 1  ;;  %v12304_v48 = vpop.f32.mrf.mxu1 }
 0x1cd   : > { %v3444_v0 = vrot.slane %v12189_v55, 2  ;;  %2872 = vst.msk [vmem:[#allocation2 + $0x4c] sm:$0xf] %vm15477_vm14, %v2581_v19  ;;  %v9287_v34 = vpack.c.bf16 %v2255_v36, %v2255_v36  ;;  %v2133_v7 = vmax.f32 %v2024_v17, 0.0  ;;  %v15499_v3 = vrot.slane %v12175_v35, 2 }
 0x1ce   : > { %3323 = vrot.lane.b32.xlu1 %v3284_v12, %s10375_s26  ;;  %v15500_v12 = vrot.slane %v12175_v35, 3  ;;  %v3117_v15 = vsel %vm392_vm2, %v3112_v18, %v3116_v23  ;;  %v12301_v32 = vshrl.u32 %v12267_v4, 16  ;;  %v3688_v54 = vrot.slane %v12281_v6, 3  ;;  %v1828_v19 = vpop.f32.mrf.mxu0 }
 0x1cf   : > { %v3530_v62 = vsel %vm15478_vm0, %v15499_v3, %v15447_v42  ;;  %v2584_v16 = vshrl.u32 %v9287_v34, 16  ;;  %v2587_v36 = vshll.u32 %v9287_v34, 16  ;;  %v2256_v17 = vmul.f32 %v9381_v40, %v2133_v7  ;;  %v9857_v42 = vpop.f32.mrf.mxu1 }
 0x1d0   : > { %v3814_v37 = vsel %vm1141_vm6, %v15500_v12, %v15446_v8  ;;  %3624 = vrot.lane.b32.xlu0 %v3530_v62, %s10375_s26  ;;  %v12310_v18 = vsel %vm15480_vm4, %v12229_v44, %v3441_v27  ;;  %v2582_v3 = vrot.slane %v2580_v1, 4  ;;  %v1829_v12 = vadd.f32 %v12147_v31, %v1828_v19  ;;  %v1830_v24 = vpop.f32.mrf.mxu0 }
 0x1d1   : > { %9887 = vmatmul.mubr.msk.bf16.gmra.mxu0 %vm1183_vm7, %v3814_v37  ;;  %v3687_v37 = vrot.slane %v12301_v32, 2  ;;  %v3120_v8 = vor.u32 %v12192_v58, %v3116_v23  ;;  %v2586_v34 = vrot.slane %v2584_v16, 6  ;;  %v2589_v40 = vrot.slane %v2587_v36, 7  ;;  %v12328_v23 = vpop.f32.mrf.mxu1 }
 0x1d2   : > { %9890 = vmatprep.mubr.msk.bf16.mxu0 %vm15474_vm5, %v15492_v45  ;;  %3237 = vrot.lane.b32.xlu1 %v3117_v15, %s10376_s27  ;;  %v9288_v7 = vpack.c.bf16 %v2256_v17, %v2256_v17  ;;  %v12316_v49 = vor.u32 %v3444_v0, %v3443_v38  ;;  %v2029_v55 = vadd.f32 %v11590_v39, %v1829_v12  ;;  %v15501_v44 = vrot.slane %v12267_v4, 1  ;;  %v1831_v0 = vpop.f32.mrf.mxu0 }
 0x1d3   : > { %v15502_v1 = vrot.slane %v12175_v35, 1  ;;  %v12325_v19 = vor.u32 %v3688_v54, %v3687_v37  ;;  %v15452_v58 = vrot.slane %v12281_v6, 1  ;;  %v2590_v42 = vor.u32 %v2589_v40, %v2586_v34  ;;  %v9860_v17 = vpop.f32.mrf.mxu1 }
 0x1d4   : > { %3569 = vrot.lane.b32.xlu0 %v3530_v62, %s10376_s27  ;;  %v2594_v24 = vshrl.u32 %v9288_v7, 16  ;;  %v2597_v38 = vshll.u32 %v9288_v7, 16  ;;  %v12332_v39 = vsel %vm15480_vm4, %v3441_v27, %v12316_v49  ;;  %v2134_v16 = vmax.f32 %v2029_v55, 0.0  ;;  %v12339_v54 = vld [vmem:[#allocation2 + $0x48] sm:$0xff]   ;;  %v1833_v34 = vpop.f32.mrf.mxu0 }
 0x1d5   : > { %v3286_v15 = vsel %vm605_vm1, %v15502_v1, %v15501_v44  ;;  %v1832_v35 = vadd.f32 %v12147_v31, %v1831_v0  ;;  %v3690_v62 = vsel %vm15479_vm3, %v12239_v63, %v12325_v19  ;;  %v3447_v36 = vrot.slane %v12301_v32, 1  ;;  %v2111_v0 = vpop.f32.mrf.mxu1 }
 0x1d6   : > { %3382 = vrot.lane.b32.xlu1 %v3286_v15, %s10377_s30  ;;  %v2591_v12 = vsel %vm11682_vm12, %v2582_v3, %v2590_v42  ;;  %v2596_v37 = vrot.slane %v2594_v24, 6  ;;  %v2599_v27 = vrot.slane %v2597_v38, 7  ;;  %v3448_v55 = vrot.slane %v12281_v6, 2 }
 0x1d7   : > { %2873 = vst.msk [vmem:[#allocation2 + $0x50] sm:$0xf] %vm15477_vm14, %v2591_v12  ;;  %v15503_v40 = vunpack.c.l.bf16 %v12236_v47  ;;  %v2032_v63 = vadd.f32 %v11594_v43, %v1832_v35  ;;  %v15451_v44 = vrot.slane %v12339_v54, 2  ;;  %v15450_v1 = vrot.slane %v12339_v54, 3 }
 0x1d8   : > { %3767 = vrot.lane.b32.xlu0 %v3690_v62, %s10377_s30  ;;  %v2592_v3 = vrot.slane %v2590_v42, 4  ;;  %v2600_v24 = vor.u32 %v2599_v27, %v2596_v37  ;;  %v12353_v38 = vshll.u32 %v12339_v54, 16  ;;  %v12356_v17 = vshrl.u32 %v12339_v54, 16  ;;  %v9861_v62 = vpop.f32.mrf.mxu1 }
 0x1d9   : > { %v2257_v7 = vmul.f32 %v15503_v40, %v2134_v16  ;;  %v2135_v34 = vmax.f32 %v2032_v63, 0.0  ;;  %v15504_v43 = vrot.slane %v12267_v4, 2  ;;  %v15505_v42 = vrot.slane %v12267_v4, 3 }
 0x1da   : > { %3325 = vrot.lane.b32.xlu1 %v3286_v15, %s10375_s26  ;;  %v2601_v37 = vsel %vm11682_vm12, %v2592_v3, %v2600_v24  ;;  %v3125_v15 = vsel %vm392_vm2, %v3120_v8, %v15452_v58  ;;  %v3691_v27 = vrot.slane %v12356_v17, 2  ;;  %v15506_v63 = vunpack.c.h.bf16 %v12236_v47  ;;  %v1836_v3 = vpop.f32.mrf.mxu0 }
 0x1db   : > { %v9289_v12 = vpack.c.bf16 %v2257_v7, %v2257_v7  ;;  %v3532_v16 = vsel %vm15478_vm0, %v15504_v43, %v15451_v44  ;;  %v3816_v35 = vsel %vm1141_vm6, %v15505_v42, %v15450_v1  ;;  %2874 = vst.msk [vmem:[#allocation2 + $0x54] sm:$0xf] %vm15477_vm14, %v2601_v37  ;;  %v3692_v43 = vrot.slane %v12353_v38, 3 }
 0x1dc   : > { %9891 = vmatmul.mubr.msk.bf16.gmra.mxu0 %vm1183_vm7, %v3816_v35  ;;  %v2258_v0 = vmul.f32 %v15506_v63, %v2135_v34  ;;  %3626 = vrot.lane.b32.xlu0 %v3532_v16, %s10375_s26  ;;  %v15455_v8 = vrot.slane %v12339_v54, 1  ;;  %v12384_v42 = vor.u32 %v3448_v55, %v3447_v36  ;;  %v1837_v47 = vadd.f32 %v12147_v31, %v1836_v3  ;;  %v9457_v34 = vld [vmem:[%s15426_s1 + $0x4b8] sm:$0xff]   ;;  %v180_v36 = vld [vmem:[#allocation2 + $0xa8] sm:$0x8]  ;;  %v1838_v63 = vpop.f32.mrf.mxu0 }
 0x1dd   : > { %v2604_v40 = vshrl.u32 %v9289_v12, 16  ;;  %v2607_v7 = vshll.u32 %v9289_v12, 16  ;;  %9894 = vmatprep.mubr.msk.bf16.mxu0 %vm15474_vm5, %v15492_v45  ;;  %v15507_v37 = vmov 0  ;;  %v2602_v55 = vrot.slane %v2600_v24, 4 }
 0x1de   : > { %v9290_v12 = vpack.c.bf16 %v2258_v0, %v2258_v0  ;;  %3239 = vrot.lane.b32.xlu1 %v3125_v15, %s10376_s27  ;;  %v15508_v37 = vsel %vm12392_vm9, 4294967295, %v15507_v37  ;;  %v12396_v1 = vor.u32 %v3692_v43, %v3691_v27  ;;  %v12401_v15 = vld [vmem:[%s15426_s1 + $0x4c0] sm:$0xff]   ;;  %v2037_v44 = vadd.f32 %v11625_v13, %v1837_v47  ;;  %v1839_v63 = vpop.f32.mrf.mxu0 }
 0x1df   : > { %v2606_v35 = vrot.slane %v2604_v40, 6  ;;  %v2609_v62 = vrot.slane %v2607_v7, 7  ;;  %15509 = vst [vmem:[#allocation12_spill] sm:$0xff] %v15508_v37  ;;  %v12406_v40 = vsel %vm15480_vm4, %v12316_v49, %v12384_v42  ;;  %v9388_v24 = vunpack.c.l.bf16 %v9457_v34 }
 0x1e0   : > { %v2614_v0 = vshrl.u32 %v9290_v12, 16  ;;  %v2617_v3 = vshll.u32 %v9290_v12, 16  ;;  %3571 = vrot.lane.b32.xlu0 %v3532_v16, %s10376_s27  ;;  %v15510_v27 = vrot.slane %v12267_v4, 1  ;;  %v9389_v58 = vunpack.c.h.bf16 %v9457_v34  ;;  %v1841_v47 = vpop.f32.mrf.mxu0 }
 0x1e1   : > { %v2610_v7 = vor.u32 %v2609_v62, %v2606_v35  ;;  %v181_v49 = vsel %vm12392_vm9, 0, %v180_v36  ;;  %v2136_v4 = vmax.f32 %v2037_v44, 0.0  ;;  %v1840_v16 = vadd.f32 %v12147_v31, %v1839_v63 }
 0x1e2   : > { %v3288_v43 = vsel %vm605_vm1, %v15510_v27, %v15455_v8  ;;  %v2616_v62 = vrot.slane %v2614_v0, 6  ;;  %v2619_v12 = vrot.slane %v2617_v3, 7  ;;  %182 = vst [vmem:[#allocation2 + $0xa8] sm:$0x8] %v181_v49  ;;  %v3694_v34 = vsel %vm15479_vm3, %v12325_v19, %v12396_v1 }
 0x1e3   : > { %v2611_v35 = vsel %vm11682_vm12, %v2602_v55, %v2610_v7  ;;  %3384 = vrot.lane.b32.xlu1 %v3288_v43, %s10377_s30  ;;  %v3132_v36 = vrot.slane %v12353_v38, 1  ;;  %v12427_v55 = vld [vmem:[#allocation2 + $0x50] sm:$0xff]   ;;  %v2612_v0 = vrot.slane %v2610_v7, 4  ;;  %v3451_v27 = vrot.slane %v12356_v17, 1 }
 0x1e4   : > { %2875 = vst.msk [vmem:[#allocation2 + $0x58] sm:$0xf] %vm15477_vm14, %v2611_v35  ;;  %v2620_v3 = vor.u32 %v2619_v12, %v2616_v62  ;;  %3769 = vrot.lane.b32.xlu0 %v3694_v34, %s10377_s30  ;;  %v3452_v49 = vrot.slane %v12353_v38, 2  ;;  %v2259_v44 = vmul.f32 %v9388_v24, %v2136_v4  ;;  %v2040_v63 = vadd.f32 %v11642_v9, %v1840_v16 }
 0x1e5   : > { %v15454_v35 = vrot.slane %v12427_v55, 2  ;;  %v15453_v47 = vrot.slane %v12427_v55, 3  ;;  %v15511_v7 = vrot.slane %v12281_v6, 1  ;;  %v12443_v38 = vshll.u32 %v12427_v55, 16 }
 0x1e6   : > { %v2621_v19 = vsel %vm11682_vm12, %v2612_v0, %v2620_v3  ;;  %v9291_v9 = vpack.c.bf16 %v2259_v44, %v2259_v44  ;;  %v2137_v24 = vmax.f32 %v2040_v63, 0.0  ;;  %v15512_v4 = vrot.slane %v12339_v54, 2 }
 0x1e7   : > { %3327 = vrot.lane.b32.xlu1 %v3288_v43, %s10375_s26  ;;  %v3128_v62 = vor.u32 %v12301_v32, %v15511_v7  ;;  %2876 = vst.msk [vmem:[#allocation2 + $0x5c] sm:$0xf] %vm15477_vm14, %v2621_v19  ;;  %v15513_v6 = vrot.slane %v12339_v54, 3  ;;  %v12461_v0 = vshrl.u32 %v12427_v55, 16  ;;  %v3696_v44 = vrot.slane %v12443_v38, 3 }
 0x1e8   : > { %v3534_v16 = vsel %vm15478_vm0, %v15512_v4, %v15454_v35  ;;  %v2624_v63 = vshrl.u32 %v9291_v9, 16  ;;  %v2627_v19 = vshll.u32 %v9291_v9, 16  ;;  %v2260_v7 = vmul.f32 %v9389_v58, %v2137_v24  ;;  %v1844_v4 = vpop.f32.mrf.mxu0 }
 0x1e9   : > { %v3818_v32 = vsel %vm1141_vm6, %v15513_v6, %v15453_v47  ;;  %v3133_v43 = vsel %vm392_vm2, %v3128_v62, %v3132_v36  ;;  %3628 = vrot.lane.b32.xlu0 %v3534_v16, %s10375_s26  ;;  %v3453_v6 = vor.u32 %v3452_v49, %v3451_v27  ;;  %v2622_v62 = vrot.slane %v2620_v3, 4 }
 0x1ea   : > { %9895 = vmatmul.mubr.msk.bf16.gmra.mxu0 %vm1183_vm7, %v3818_v32  ;;  %v1845_v32 = vadd.f32 %v12147_v31, %v1844_v4  ;;  %v3695_v12 = vrot.slane %v12461_v0, 2  ;;  %v3136_v47 = vor.u32 %v12356_v17, %v3132_v36  ;;  %v2626_v35 = vrot.slane %v2624_v63, 6  ;;  %v1846_v34 = vpop.f32.mrf.mxu0 }
 0x1eb   : > { %9898 = vmatprep.mubr.msk.bf16.mxu0 %vm15474_vm5, %v15492_v45  ;;  %3241 = vrot.lane.b32.xlu1 %v3133_v43, %s10376_s27  ;;  %v2629_v13 = vrot.slane %v2627_v19, 7  ;;  %v9292_v8 = vpack.c.bf16 %v2260_v7, %v2260_v7  ;;  %v12472_v58 = vsel %vm15480_vm4, %v12384_v42, %v3453_v6  ;;  %v3455_v27 = vrot.slane %v12461_v0, 1 }
 0x1ec   : > { %v2045_v9 = vadd.f32 %v11677_v50, %v1845_v32  ;;  %v12476_v3 = vor.u32 %v3696_v44, %v3695_v12  ;;  %v3456_v49 = vrot.slane %v12443_v38, 2  ;;  %v15514_v43 = vrot.slane %v12427_v55, 1  ;;  %v1847_v63 = vpop.f32.mrf.mxu0 }
 0x1ed   : > { %3573 = vrot.lane.b32.xlu0 %v3534_v16, %s10376_s27  ;;  %v2630_v24 = vor.u32 %v2629_v13, %v2626_v35  ;;  %v2634_v17 = vshrl.u32 %v9292_v8, 16  ;;  %v2637_v36 = vshll.u32 %v9292_v8, 16  ;;  %v15515_v34 = vrot.slane %v12339_v54, 1 }
 0x1ee   : > { %v2138_v19 = vmax.f32 %v2045_v9, 0.0  ;;  %v1848_v50 = vadd.f32 %v12147_v31, %v1847_v63  ;;  %v15458_v12 = vrot.slane %v12443_v38, 1  ;;  %v12488_v16 = vld [vmem:[#allocation2 + $0x58] sm:$0xff]   ;;  %v3457_v44 = vor.u32 %v3456_v49, %v3455_v27  ;;  %v1849_v7 = vpop.f32.mrf.mxu0 }
 0x1ef   : > { %v3290_v42 = vsel %vm605_vm1, %v15515_v34, %v15514_v43  ;;  %v2631_v8 = vsel %vm11682_vm12, %v2622_v62, %v2630_v24  ;;  %v2636_v13 = vrot.slane %v2634_v17, 6  ;;  %v2639_v35 = vrot.slane %v2637_v36, 7 }
 0x1f0   : > { %3386 = vrot.lane.b32.xlu1 %v3290_v42, %s10377_s30  ;;  %v3698_v54 = vsel %vm15479_vm3, %v12396_v1, %v12476_v3  ;;  %2877 = vst.msk [vmem:[#allocation2 + $0x60] sm:$0xf] %vm15477_vm14, %v2631_v8  ;;  %v15516_v4 = vunpack.c.l.bf16 %v12401_v15  ;;  %v2048_v9 = vadd.f32 %v11699_v26, %v1848_v50  ;;  %v15457_v27 = vrot.slane %v12488_v16, 2 }
 0x1f1   : > { %3771 = vrot.lane.b32.xlu0 %v3698_v54, %s10377_s30  ;;  %v15456_v62 = vrot.slane %v12488_v16, 3  ;;  %v2632_v49 = vrot.slane %v2630_v24, 4  ;;  %v2640_v17 = vor.u32 %v2639_v35, %v2636_v13  ;;  %v12503_v36 = vshll.u32 %v12488_v16, 16 }
 0x1f2   : > { %v2261_v32 = vmul.f32 %v15516_v4, %v2138_v19  ;;  %v12506_v1 = vshrl.u32 %v12488_v16, 16  ;;  %v2139_v34 = vmax.f32 %v2048_v9, 0.0  ;;  %v15517_v26 = vrot.slane %v12427_v55, 2 }
 0x1f3   : > { %v15518_v24 = vrot.slane %v12427_v55, 3  ;;  %v2641_v50 = vsel %vm11682_vm12, %v2632_v49, %v2640_v17  ;;  %v3141_v8 = vsel %vm392_vm2, %v3136_v47, %v15458_v12  ;;  %v15519_v7 = vunpack.c.h.bf16 %v12401_v15 }
 0x1f4   : > { %v9293_v43 = vpack.c.bf16 %v2261_v32, %v2261_v32  ;;  %3329 = vrot.lane.b32.xlu1 %v3290_v42, %s10375_s26  ;;  %v3536_v63 = vsel %vm15478_vm0, %v15517_v26, %v15457_v27  ;;  %v3699_v42 = vrot.slane %v12506_v1, 2  ;;  %2878 = vst.msk [vmem:[#allocation2 + $0x64] sm:$0xf] %vm15477_vm14, %v2641_v50  ;;  %v3700_v4 = vrot.slane %v12503_v36, 3  ;;  %v1852_v32 = vpop.f32.mrf.mxu0 }
 0x1f5   : > { %v3820_v19 = vsel %vm1141_vm6, %v15518_v24, %v15456_v62  ;;  %v2262_v54 = vmul.f32 %v15519_v7, %v2139_v34  ;;  %3630 = vrot.lane.b32.xlu0 %v3536_v63, %s10375_s26  ;;  %v15461_v47 = vrot.slane %v12488_v16, 1  ;;  %v12535_v9 = vsel %vm15480_vm4, %v3453_v6, %v3457_v44 }
 0x1f6   : > { %9899 = vmatmul.mubr.msk.bf16.gmra.mxu0 %vm1183_vm7, %v3820_v19  ;;  %v2644_v13 = vshrl.u32 %v9293_v43, 16  ;;  %v2647_v35 = vshll.u32 %v9293_v43, 16  ;;  %v3459_v49 = vrot.slane %v12506_v1, 1  ;;  %v3460_v43 = vrot.slane %v12503_v36, 2  ;;  %v12544_v19 = vld [vmem:[%s15426_s1 + $0x4c8] sm:$0xff]   ;;  %v1854_v7 = vpop.f32.mrf.mxu0 }
 0x1f7   : > { %9902 = vmatprep.mubr.msk.bf16.mxu0 %vm15474_vm5, %v15492_v45  ;;  %v9294_v34 = vpack.c.bf16 %v2262_v54, %v2262_v54  ;;  %v1853_v24 = vadd.f32 %v12147_v31, %v1852_v32  ;;  %v2642_v50 = vrot.slane %v2640_v17, 4  ;;  %v12546_v6 = vor.u32 %v3700_v4, %v3699_v42  ;;  %v12551_v54 = vpop.permute.xlu1 %3311  ;;  %v12563_v32 = vld [vmem:[%s15426_s1 + $0x4d0] sm:$0xff]  }
 0x1f8   : > { %v2646_v26 = vrot.slane %v2644_v13, 6  ;;  %v2649_v15 = vrot.slane %v2647_v35, 7  ;;  %3243 = vrot.lane.b32.xlu1 %v3141_v8, %s10376_s27  ;;  %v12548_v62 = vor.u32 %v3460_v43, %v3459_v49  ;;  %v9396_v8 = vunpack.c.l.bf16 %v12544_v19  ;;  %v1855_v4 = vpop.f32.mrf.mxu0 }
 0x1f9   : > { %v2654_v12 = vshrl.u32 %v9294_v34, 16  ;;  %v2657_v13 = vshll.u32 %v9294_v34, 16  ;;  %v2053_v35 = vadd.f32 %v11745_v30, %v1853_v24  ;;  %3575 = vrot.lane.b32.xlu0 %v3536_v63, %s10376_s27  ;;  %v15520_v17 = vrot.slane %v12427_v55, 1  ;;  %v12592_v24 = vld [vmem:[%s15426_s1 + $0x4d8] sm:$0xff]  }
 0x1fa   : > { %v2650_v27 = vor.u32 %v2649_v15, %v2646_v26  ;;  %v12567_v30 = vsel %vm15480_vm4, %v3457_v44, %v12548_v62  ;;  %v15522_v55 = vmov 0   ;;  %v1856_v44 = vadd.f32 %v12147_v31, %v1855_v4  ;;  %v1857_v26 = vpop.f32.mrf.mxu0 }
 0x1fb   : > { %v3292_v42 = vsel %vm605_vm1, %v15520_v17, %v15461_v47  ;;  %15521 = vst [vmem:[#allocation13_spill] sm:$0xff] %v12567_v30  ;;  %v2656_v49 = vrot.slane %v2654_v12, 6  ;;  %v2659_v43 = vrot.slane %v2657_v13, 7  ;;  %186 = vst.msk [vmem:[#allocation2 + $0xb4] sm:$0x1] %vm15468_vm11, %v15522_v55  ;;  %v2140_v12 = vmax.f32 %v2053_v35, 0.0  ;;  %v3226_v35 = vpop.permute.xlu1 %3225 }
 0x1fc   : > { %v2651_v63 = vsel %vm11682_vm12, %v2642_v50, %v2650_v27  ;;  %3388 = vrot.lane.b32.xlu1 %v3292_v42, %s10377_s30  ;;  %195 = vst.msk [vmem:[#allocation5 + $0x3c] sm:$0x1] %vm15468_vm11, %v15522_v55  ;;  %208 = vst.msk [vmem:[#allocation8 + $0x18] sm:$0x1] %vm15468_vm11, %v15522_v55  ;;  %v3702_v15 = vsel %vm15479_vm3, %v12476_v3, %v12546_v6  ;;  %v12587_v34 = vld [vmem:[#allocation2 + $0x60] sm:$0xff]   ;;  %v2652_v50 = vrot.slane %v2650_v27, 4  ;;  %v9397_v13 = vunpack.c.h.bf16 %v12544_v19 }
 0x1fd   : > { %224 = vst.msk [vmem:[#allocation4 + $0x3c] sm:$0x1] %vm15468_vm11, %v15522_v55  ;;  %231 = vst.msk [vmem:[#allocation7 + $0x18] sm:$0x1] %vm15468_vm11, %v15522_v55  ;;  %v12594_v7 = vor.u32 %v2659_v43, %v2656_v49  ;;  %3773 = vrot.lane.b32.xlu0 %v3702_v15, %s10377_s30  ;;  %v2263_v4 = vmul.f32 %v9396_v8, %v2140_v12  ;;  %v2056_v3 = vadd.f32 %v11764_v41, %v1856_v44  ;;  %v12621_v15 = vld [vmem:[%s15426_s1 + $0x4e0] sm:$0xff]   ;;  %v3558_v17 = vpop.permute.xlu0 %3557  ;;  %vm15533_vm11 = vcmask 785408  }
 0x1fe   : > { %2879 = vst.msk [vmem:[#allocation2 + $0x68] sm:$0xf] %vm15477_vm14, %v2651_v63  ;;  %v15462_v63 = vrot.slane %v12503_v36, 1  ;;  %v15459_v55 = vrot.slane %v12587_v34, 2  ;;  %v15460_v19 = vrot.slane %v12587_v34, 3  ;;  %v15523_v12 = vrot.slane %v12443_v38, 1  ;;  %vm15534_vm10 = vmmov %vm15533_vm11 }
 0x1ff   : > { %v2661_v27 = vsel %vm11682_vm12, %v2652_v50, %v12594_v7  ;;  %v9295_v8 = vpack.c.bf16 %v2263_v4, %v2263_v4  ;;  %v2141_v41 = vmax.f32 %v2056_v3, 0.0  ;;  %v15524_v26 = vrot.slane %v12488_v16, 2  ;;  %v12623_v50 = vpop.permute.xlu1 %3370 }
 0x200   : > { %3331 = vrot.lane.b32.xlu1 %v3292_v42, %s10375_s26  ;;  %2880 = vst.msk [vmem:[#allocation2 + $0x6c] sm:$0xf] %vm15477_vm14, %v2661_v27  ;;  %v3144_v44 = vor.u32 %v12461_v0, %v15523_v12  ;;  %v15525_v38 = vrot.slane %v12488_v16, 3  ;;  %v12633_v3 = vshll.u32 %v12587_v34, 16  ;;  %v12636_v27 = vshrl.u32 %v12587_v34, 16 }
 0x201   : > { %v3538_v42 = vsel %vm15478_vm0, %v15524_v26, %v15459_v55  ;;  %v2664_v12 = vshrl.u32 %v9295_v8, 16  ;;  %v2667_v26 = vshll.u32 %v9295_v8, 16  ;;  %v2264_v43 = vmul.f32 %v9397_v13, %v2141_v41  ;;  %v1860_v55 = vpop.f32.mrf.mxu0 }
 0x202   : > { %3632 = vrot.lane.b32.xlu0 %v3538_v42, %s10375_s26  ;;  %v3822_v0 = vsel %vm1141_vm6, %v15525_v38, %v15460_v19  ;;  %v3149_v49 = vsel %vm392_vm2, %v3144_v44, %v15462_v63  ;;  %v1861_v38 = vadd.f32 %v12147_v31, %v1860_v55  ;;  %v3703_v19 = vrot.slane %v12636_v27, 2 }
 0x203   : > { %9903 = vmatmul.mubr.msk.bf16.gmra.mxu0 %vm1183_vm7, %v3822_v0  ;;  %v2666_v41 = vrot.slane %v2664_v12, 6  ;;  %v2669_v47 = vrot.slane %v2667_v26, 7  ;;  %v9296_v44 = vpack.c.bf16 %v2264_v43, %v2264_v43  ;;  %v1862_v63 = vpop.f32.mrf.mxu0  ;;  %v3704_v0 = vrot.slane %v12633_v3, 3  ;;  %v12657_v37 = vpop.permute.xlu1 %3313 }
 0x204   : > { %3245 = vrot.lane.b32.xlu1 %v3149_v49, %s10376_s27  ;;  %9906 = vmatprep.mubr.msk.bf16.mxu0 %vm15474_vm5, %v15492_v45  ;;  %v12653_v49 = vld [vmem:[%s15426_s1 + $0x4e8] sm:$0xff]   ;;  %v2662_v55 = vrot.slane %v12594_v7, 4  ;;  %v2061_v4 = vadd.f32 %v11810_v59, %v1861_v38  ;;  %v15526_v8 = vrot.slane %v12587_v34, 1  ;;  %v15527_v12 = vrot.slane %v12488_v16, 1  ;;  %v3615_v38 = vpop.permute.xlu0 %3614 }
 0x205   : > { %v2670_v26 = vor.u32 %v2669_v47, %v2666_v41  ;;  %v2674_v13 = vshrl.u32 %v9296_v44, 16  ;;  %v2677_v5 = vshll.u32 %v9296_v44, 16  ;;  %v1863_v46 = vpop.f32.mrf.mxu0  ;;  %v12666_v30 = vor.u32 %v3704_v0, %v3703_v19 }
 0x206   : > { %v3294_v43 = vsel %vm605_vm1, %v15527_v12, %v15526_v8  ;;  %3577 = vrot.lane.b32.xlu0 %v3538_v42, %s10376_s27  ;;  %v3844_v59 = vsel %vm1183_vm7, %v11655_v10, %v3226_v35  ;;  %v2142_v7 = vmax.f32 %v2061_v4, 0.0  ;;  %v1864_v16 = vadd.f32 %v12147_v31, %v1863_v46 }
 0x207   : > { %v12672_v8 = vld [vmem:[#allocation2 + $0x68] sm:$0xff]   ;;  %v2671_v47 = vsel %vm11682_vm12, %v2662_v55, %v2670_v26  ;;  %v2676_v41 = vrot.slane %v2674_v13, 6  ;;  %v2679_v44 = vrot.slane %v2677_v5, 7  ;;  %v1865_v19 = vpop.f32.mrf.mxu0  ;;  %v3156_v0 = vrot.slane %v12633_v3, 1  ;;  %v12682_v4 = vpop.permute.xlu1 %3227 }
 0x208   : > { %3390 = vrot.lane.b32.xlu1 %v3294_v43, %s10377_s30  ;;  %2881 = vst.msk [vmem:[#allocation2 + $0x70] sm:$0xf] %vm15477_vm14, %v2671_v47  ;;  %v15528_v10 = vunpack.c.l.bf16 %v12563_v32  ;;  %v2064_v46 = vadd.f32 %v11869_v2, %v1864_v16  ;;  %v3706_v12 = vsel %vm15479_vm3, %v12546_v6, %v12666_v30  ;;  %v15529_v55 = vrot.slane %v12503_v36, 1  ;;  %v12696_v6 = vpop.permute.xlu0 %3559 }
 0x209   : > { %v2672_v13 = vrot.slane %v2670_v26, 4  ;;  %v2680_v19 = vor.u32 %v2679_v44, %v2676_v41  ;;  %v3539_v47 = vrot.slane %v12672_v8, 2  ;;  %v3887_v2 = vsel %vm15473_vm8, %v3844_v59, %v12551_v54 }
 0x20a   : > { %v2265_v35 = vmul.f32 %v15528_v10, %v2142_v7  ;;  %v3152_v5 = vor.u32 %v12506_v1, %v15529_v55  ;;  %3775 = vrot.lane.b32.xlu0 %v3706_v12, %s10377_s30  ;;  %v15470_v7 = vrot.slane %v12672_v8, 3  ;;  %v2143_v10 = vmax.f32 %v2064_v46, 0.0 }
 0x20b   : > { %v12699_v36 = vshll.u32 %v12672_v8, 16  ;;  %v2681_v1 = vsel %vm11682_vm12, %v2672_v13, %v2680_v19  ;;  %v3993_v26 = vsel %vm1183_vm7, %v12069_v20, %v3558_v17  ;;  %v15530_v54 = vrot.slane %v12587_v34, 2  ;;  %v12716_v12 = vpop.permute.xlu1 %3372 }
 0x20c   : > { %v9297_v16 = vpack.c.bf16 %v2265_v35, %v2265_v35  ;;  %3333 = vrot.lane.b32.xlu1 %v3294_v43, %s10375_s26  ;;  %v3157_v41 = vsel %vm392_vm2, %v3152_v5, %v3156_v0  ;;  %2882 = vst.msk [vmem:[#allocation2 + $0x74] sm:$0xf] %vm15477_vm14, %v2681_v1  ;;  %v15531_v35 = vunpack.c.h.bf16 %v12563_v32  ;;  %v15532_v20 = vrot.slane %v12587_v34, 3  ;;  %v1868_v5 = vpop.f32.mrf.mxu0 }
 0x20d   : > { %v3540_v43 = vsel %vm15478_vm0, %v15530_v54, %v3539_v47  ;;  %v4055_v55 = vsel %vm15473_vm8, %v3993_v26, %v3615_v38  ;;  %v3295_v13 = vrot.slane %v12672_v8, 1  ;;  %v12728_v32 = vshrl.u32 %v12672_v8, 16  ;;  %v3758_v38 = vpop.permute.xlu0 %3757  ;;  %v12738_v26 = vld [vmem:[%s15426_s1 + $0x4f0] sm:$0xff]  }
 0x20e   : > { %v2684_v59 = vshrl.u32 %v9297_v16, 16  ;;  %v2687_v44 = vshll.u32 %v9297_v16, 16  ;;  %v2266_v46 = vmul.f32 %v15531_v35, %v2143_v10  ;;  %v3824_v17 = vsel %vm1141_vm6, %v15532_v20, %v15470_v7  ;;  %3634 = vrot.lane.b32.xlu0 %v3540_v43, %s10375_s26 }
 0x20f   : > { %9907 = vmatmul.mubr.msk.bf16.gmra.mxu0 %vm1183_vm7, %v3824_v17  ;;  %v3708_v16 = vrot.slane %v12699_v36, 3  ;;  %v1869_v35 = vadd.f32 %v12147_v31, %v1868_v5  ;;  %v2682_v20 = vrot.slane %v2680_v19, 4  ;;  %v3929_v17 = vsel %vm15533_vm11, %v3887_v2, %v12623_v50  ;;  %v12745_v63 = vpop.permute.xlu1 %3315  ;;  %vm15539_vm11 = vmmov %vm15534_vm10 }
 0x210   : > { %v2686_v10 = vrot.slane %v2684_v59, 6  ;;  %v2689_v1 = vrot.slane %v2687_v44, 7  ;;  %v9298_v54 = vpack.c.bf16 %v2266_v46, %v2266_v46  ;;  %3247 = vrot.lane.b32.xlu1 %v3157_v41, %s10376_s27  ;;  %9910 = vmatprep.mubr.msk.bf16.mxu0 %vm15474_vm5, %v15492_v45  ;;  %v1870_v59 = vpop.f32.mrf.mxu0  ;;  %v4097_v44 = vsel %vm15534_vm10, %v4055_v55, %v3758_v38 }
 0x211   : > { %v3707_v41 = vrot.slane %v12728_v32, 2  ;;  %v2069_v42 = vadd.f32 %v11898_v53, %v1869_v35  ;;  %4403 = vmatprep.mubr.bf16.mxu1 %v4097_v44  ;;  %v15535_v19 = vrot.slane %v12587_v34, 1  ;;  %v3617_v34 = vpop.permute.xlu0 %3616  ;;  %v3164_v35 = vrot.slane %v12699_v36, 1 }
 0x212   : > { %v2690_v46 = vor.u32 %v2689_v1, %v2686_v10  ;;  %v2694_v31 = vshrl.u32 %v9298_v54, 16  ;;  %v2697_v5 = vshll.u32 %v9298_v54, 16  ;;  %3579 = vrot.lane.b32.xlu0 %v3540_v43, %s10376_s27  ;;  %v1871_v50 = vpop.f32.mrf.mxu0  ;;  %4404 = vmatmul.mubr.bf16.vlgmr.msra.gmra.mxu1 %v3929_v17 }
 0x213   : > { %v3296_v7 = vsel %vm605_vm1, %v15535_v19, %v3295_v13  ;;  %v12753_v2 = vor.u32 %v3708_v16, %v3707_v41  ;;  %v2144_v43 = vmax.f32 %v2069_v42, 0.0  ;;  %v12765_v16 = vld [vmem:[%s15427_s2] ss:$0 sm:$0xff]  ;;  %v12771_v59 = vld [vmem:[#allocation2 + $0x70] sm:$0xff]   ;;  %v3846_v42 = vsel %vm1183_vm7, %v11761_v56, %v12682_v4 }
 0x214   : > { %v2691_v53 = vsel %vm11682_vm12, %v2682_v20, %v2690_v46  ;;  %v2696_v1 = vrot.slane %v2694_v31, 6  ;;  %v2699_v54 = vrot.slane %v2697_v5, 7  ;;  %3392 = vrot.lane.b32.xlu1 %v3296_v7, %s10377_s30  ;;  %v1872_v38 = vadd.f32 %v12765_v16, %v1871_v50  ;;  %v1873_v17 = vpop.f32.mrf.mxu0  ;;  %v3230_v5 = vpop.permute.xlu1 %3229 }
 0x215   : > { %2883 = vst.msk [vmem:[#allocation2 + $0x78] sm:$0xf] %vm15477_vm14, %v2691_v53  ;;  %v3160_v20 = vor.u32 %v12636_v27, %v3156_v0  ;;  %v2692_v41 = vrot.slane %v2690_v46, 4  ;;  %v3710_v19 = vsel %vm15479_vm3, %v12666_v30, %v12753_v2  ;;  %v15536_v50 = vunpack.c.l.bf16 %v12592_v24  ;;  %v12795_v30 = vpop.permute.xlu0 %3561 }
 0x216   : > { %v12774_v31 = vor.u32 %v2699_v54, %v2696_v1  ;;  %v2072_v0 = vadd.f32 %v11971_v57, %v1872_v38  ;;  %3777 = vrot.lane.b32.xlu0 %v3710_v19, %s10377_s30  ;;  %v15472_v46 = vrot.slane %v12771_v59, 2  ;;  %v3463_v1 = vrot.slane %v12636_v27, 1 }
 0x217   : > { %v2267_v53 = vmul.f32 %v15536_v50, %v2144_v43  ;;  %v3996_v4 = vsel %vm1183_vm7, %v12140_v22, %v12696_v6  ;;  %v3165_v57 = vsel %vm392_vm2, %v3160_v20, %v3164_v35  ;;  %v15471_v54 = vrot.slane %v12771_v59, 3 }
 0x218   : > { %v2701_v56 = vsel %vm11682_vm12, %v2692_v41, %v12774_v31  ;;  %3335 = vrot.lane.b32.xlu1 %v3296_v7, %s10375_s26  ;;  %v2145_v43 = vmax.f32 %v2072_v0, 0.0  ;;  %v3542_v22 = vsel %vm15478_vm0, %v3539_v47, %v15472_v46  ;;  %v3889_v7 = vsel %vm15473_vm8, %v3846_v42, %v12657_v37  ;;  %v12810_v38 = vpop.permute.xlu1 %3374 }
 0x219   : > { %2884 = vst.msk [vmem:[#allocation2 + $0x7c] sm:$0xf] %vm15477_vm14, %v2701_v56  ;;  %v9299_v27 = vpack.c.bf16 %v2267_v53, %v2267_v53  ;;  %v4057_v6 = vsel %vm15473_vm8, %v3996_v4, %v3617_v34  ;;  %v15537_v17 = vrot.slane %v12672_v8, 3  ;;  %v12818_v41 = vshll.u32 %v12771_v59, 16  ;;  %v1876_v34 = vpop.f32.mrf.mxu0  ;;  %v3760_v56 = vpop.permute.xlu0 %3759 }
 0x21a   : > { %v12821_v19 = vshrl.u32 %v12771_v59, 16  ;;  %v15538_v37 = vunpack.c.h.bf16 %v12592_v24  ;;  %3636 = vrot.lane.b32.xlu0 %v3542_v22, %s10375_s26  ;;  %v3297_v53 = vrot.slane %v12771_v59, 1  ;;  %v1877_v0 = vadd.f32 %v12765_v16, %v1876_v34 }
 0x21b   : > { %v3826_v20 = vsel %vm1141_vm6, %v15537_v17, %v15471_v54  ;;  %v2704_v47 = vshrl.u32 %v9299_v27, 16  ;;  %v2707_v50 = vshll.u32 %v9299_v27, 16  ;;  %v3712_v17 = vrot.slane %v12818_v41, 3 }
 0x21c   : > { %v2268_v42 = vmul.f32 %v15538_v37, %v2145_v43  ;;  %9911 = vmatmul.mubr.msk.bf16.gmra.mxu0 %vm1183_vm7, %v3826_v20  ;;  %3249 = vrot.lane.b32.xlu1 %v3165_v57, %s10376_s27  ;;  %v3711_v4 = vrot.slane %v12821_v19, 2  ;;  %v3464_v24 = vrot.slane %v12633_v3, 2  ;;  %v1878_v37 = vpop.f32.mrf.mxu0  ;;  %v4100_v44 = vsel %vm15534_vm10, %v4057_v6, %v3760_v56  ;;  %v12838_v10 = vpop.permute.xlu1 %3317 }
 0x21d   : > { %9914 = vmatprep.mubr.msk.bf16.mxu0 %vm15474_vm5, %v15492_v45  ;;  %v2706_v27 = vrot.slane %v2704_v47, 6  ;;  %v2709_v43 = vrot.slane %v2707_v50, 7  ;;  %v2702_v57 = vrot.slane %v12774_v31, 4  ;;  %v2077_v34 = vadd.f32 %v11994_v61, %v1877_v0  ;;  %4411 = vmatprep.mubr.bf16.mxu1 %v4100_v44 }
 0x21e   : > { %v9300_v20 = vpack.c.bf16 %v2268_v42, %v2268_v42  ;;  %v3932_v55 = vsel %vm15539_vm11, %v3889_v7, %v12716_v12  ;;  %v12842_v54 = vor.u32 %v3712_v17, %v3711_v4  ;;  %v3298_v6 = vsel %vm605_vm1, %v3295_v13, %v3297_v53  ;;  %3581 = vrot.lane.b32.xlu0 %v3542_v22, %s10376_s27  ;;  %v1879_v61 = vpop.f32.mrf.mxu0  ;;  %v3619_v7 = vpop.permute.xlu0 %3618  ;;  %vm15544_vm11 = vmmov %vm15534_vm10 }
 0x21f   : > { %v2710_v46 = vor.u32 %v2709_v43, %v2706_v27  ;;  %4412 = vmatmul.mubr.bf16.gmra.mxu1 %v3932_v55  ;;  %v3848_v44 = vsel %vm1183_vm7, %v11805_v11, %v3230_v5  ;;  %v2146_v31 = vmax.f32 %v2077_v34, 0.0  ;;  %v1880_v12 = vadd.f32 %v12765_v16, %v1879_v61 }
 0x220   : > { %v2714_v3 = vshrl.u32 %v9300_v20, 16  ;;  %v2717_v47 = vshll.u32 %v9300_v20, 16  ;;  %3394 = vrot.lane.b32.xlu1 %v3298_v6, %s10377_s30  ;;  %v12854_v50 = vld [vmem:[#allocation2 + $0x78] sm:$0xff]   ;;  %v12856_v42 = vor.u32 %v3464_v24, %v3463_v1  ;;  %v1881_v0 = vpop.f32.mrf.mxu0  ;;  %v3172_v55 = vrot.slane %v12818_v41, 1  ;;  %v12865_v4 = vpop.permute.xlu1 %3231 }
 0x221   : > { %v2711_v8 = vsel %vm11682_vm12, %v2702_v57, %v2710_v46  ;;  %v15540_v11 = vunpack.c.l.bf16 %v12621_v15  ;;  %v2080_v56 = vadd.f32 %v12038_v29, %v1880_v12  ;;  %v3714_v1 = vsel %vm15479_vm3, %v12753_v2, %v12842_v54 }
 0x222   : > { %v2716_v13 = vrot.slane %v2714_v3, 6  ;;  %v2719_v22 = vrot.slane %v2717_v47, 7  ;;  %2885 = vst.msk [vmem:[#allocation2 + $0x80] sm:$0xf] %vm15477_vm14, %v2711_v8  ;;  %v3543_v17 = vrot.slane %v12854_v50, 2  ;;  %v2712_v24 = vrot.slane %v2710_v46, 4  ;;  %3779 = vrot.lane.b32.xlu0 %v3714_v1, %s10377_s30  ;;  %v12877_v57 = vpop.permute.xlu0 %3563 }
 0x223   : > { %v2269_v5 = vmul.f32 %v15540_v11, %v2146_v31  ;;  %v3168_v43 = vor.u32 %v12728_v32, %v3164_v35  ;;  %v3827_v20 = vrot.slane %v12854_v50, 3  ;;  %v2147_v29 = vmax.f32 %v2080_v56, 0.0 }
 0x224   : > { %v2720_v27 = vor.u32 %v2719_v22, %v2716_v13  ;;  %3337 = vrot.lane.b32.xlu1 %v3298_v6, %s10375_s26  ;;  %v15541_v2 = vrot.slane %v12771_v59, 2  ;;  %v12885_v34 = vshll.u32 %v12854_v50, 16  ;;  %v3999_v3 = vsel %vm1183_vm7, %v12168_v21, %v12795_v30  ;;  %v12902_v22 = vpop.permute.xlu1 %3376 }
 0x225   : > { %v9301_v37 = vpack.c.bf16 %v2269_v5, %v2269_v5  ;;  %v15542_v47 = vrot.slane %v12771_v59, 3  ;;  %v3891_v61 = vsel %vm15473_vm8, %v3848_v44, %v12745_v63  ;;  %v15543_v8 = vunpack.c.h.bf16 %v12621_v15  ;;  %v1884_v63 = vpop.f32.mrf.mxu0 }
 0x226   : > { %v3544_v46 = vsel %vm15478_vm0, %v15541_v2, %v3543_v17  ;;  %v2721_v35 = vsel %vm11682_vm12, %v2712_v24, %v2720_v27  ;;  %v3173_v21 = vsel %vm392_vm2, %v3168_v43, %v3172_v55  ;;  %v4059_v30 = vsel %vm15473_vm8, %v3999_v3, %v3619_v7  ;;  %v3762_v1 = vpop.permute.xlu0 %3761  ;;  %v12922_v24 = vld [vmem:[%s15426_s1 + $0x4f8] sm:$0xff]  }
 0x227   : > { %v3828_v6 = vsel %vm1141_vm6, %v15542_v47, %v3827_v20  ;;  %2886 = vst.msk [vmem:[#allocation2 + $0x84] sm:$0xf] %vm15477_vm14, %v2721_v35  ;;  %v2724_v31 = vshrl.u32 %v9301_v37, 16  ;;  %v2727_v12 = vshll.u32 %v9301_v37, 16  ;;  %v2270_v13 = vmul.f32 %v15543_v8, %v2147_v29  ;;  %3638 = vrot.lane.b32.xlu0 %v3544_v46, %s10375_s26  ;;  %v1886_v37 = vpop.f32.mrf.mxu0 }
 0x228   : > { %9915 = vmatmul.mubr.msk.bf16.gmra.mxu0 %vm1183_vm7, %v3828_v6  ;;  %v3299_v44 = vrot.slane %v12854_v50, 1  ;;  %v12912_v0 = vshrl.u32 %v12854_v50, 16  ;;  %v3716_v15 = vrot.slane %v12885_v34, 3  ;;  %3251 = vrot.lane.b32.xlu1 %v3173_v21, %s10376_s27  ;;  %v1885_v7 = vadd.f32 %v12765_v16, %v1884_v63 }
 0x229   : > { %9918 = vmatprep.mubr.msk.bf16.mxu0 %vm15474_vm5, %v15492_v45  ;;  %v2726_v11 = vrot.slane %v2724_v31, 6  ;;  %v2729_v5 = vrot.slane %v2727_v12, 7  ;;  %v9302_v56 = vpack.c.bf16 %v2270_v13, %v2270_v13  ;;  %v2722_v43 = vrot.slane %v2720_v27, 4  ;;  %v12929_v12 = vpop.permute.xlu1 %3319  ;;  %v1887_v8 = vpop.f32.mrf.mxu0 }
 0x22a   : > { %v4103_v29 = vsel %vm15534_vm10, %v4059_v30, %v3762_v1  ;;  %v3935_v2 = vsel %vm15544_vm11, %v3891_v61, %v12810_v38  ;;  %v3715_v35 = vrot.slane %v12912_v0, 2  ;;  %v2085_v31 = vadd.f32 %v12071_v14, %v1885_v7  ;;  %v10349_v30 = vld [vmem:[#allocation2 + $0x18] sm:$0xff]   ;;  %vm15547_vm11 = vmmov %vm15534_vm10 }
 0x22b   : > { %v2730_v3 = vor.u32 %v2729_v5, %v2726_v11  ;;  %v2734_v47 = vshrl.u32 %v9302_v56, 16  ;;  %v2737_v6 = vshll.u32 %v9302_v56, 16  ;;  %4419 = vmatprep.mubr.bf16.mxu1 %v4103_v29  ;;  %v3300_v27 = vsel %vm605_vm1, %v3297_v53, %v3299_v44  ;;  %3583 = vrot.lane.b32.xlu0 %v3544_v46, %s10376_s27  ;;  %v3621_v53 = vpop.permute.xlu0 %3620  ;;  %v1889_v11 = vpop.f32.mrf.mxu0 }
 0x22c   : > { %4420 = vmatmul.mubr.bf16.gmra.mxu1 %v3935_v2  ;;  %v12937_v38 = vor.u32 %v3716_v15, %v3715_v35  ;;  %v9420_v61 = vunpack.c.l.bf16 %v12922_v24  ;;  %v12943_v14 = vsel %vm15480_vm4, %v12548_v62, %v12856_v42  ;;  %3396 = vrot.lane.b32.xlu1 %v3300_v27, %s10377_s30  ;;  %v3180_v46 = vrot.slane %v12885_v34, 1 }
 0x22d   : > { %v2731_v13 = vsel %vm11682_vm12, %v2722_v43, %v2730_v3  ;;  %v2736_v21 = vrot.slane %v2734_v47, 6  ;;  %v2739_v59 = vrot.slane %v2737_v6, 7  ;;  %v3850_v63 = vsel %vm1183_vm7, %v10349_v30, %v12865_v4  ;;  %v3234_v43 = vpop.permute.xlu1 %3233 }
 0x22e   : > { %2887 = vst.msk [vmem:[#allocation2 + $0x88] sm:$0xf] %vm15477_vm14, %v2731_v13  ;;  %v2148_v15 = vmax.f32 %v2085_v31, 0.0  ;;  %v1888_v62 = vadd.f32 %v12765_v16, %v1887_v8  ;;  %v12953_v5 = vld [vmem:[#allocation2 + $0x80] sm:$0xff]   ;;  %v9421_v56 = vunpack.c.h.bf16 %v12922_v24  ;;  %v2732_v7 = vrot.slane %v2730_v3, 4 }
 0x22f   : > { %v12956_v1 = vor.u32 %v2739_v59, %v2736_v21  ;;  %v3718_v37 = vsel %vm15479_vm3, %v12842_v54, %v12937_v38  ;;  %v3176_v4 = vor.u32 %v12821_v19, %v3172_v55  ;;  %v4002_v29 = vsel %vm1183_vm7, %v12244_v28, %v12877_v57  ;;  %v12976_v55 = vpop.permute.xlu0 %3565 }
 0x230   : > { %v15545_v2 = vunpack.c.l.bf16 %v12653_v49  ;;  %v2088_v3 = vadd.f32 %v12134_v25, %v1888_v62  ;;  %3781 = vrot.lane.b32.xlu0 %v3718_v37, %s10377_s30  ;;  %v3545_v47 = vrot.slane %v12953_v5, 2  ;;  %3339 = vrot.lane.b32.xlu1 %v3300_v27, %s10375_s26  ;;  %v3829_v28 = vrot.slane %v12953_v5, 3  ;;  %v1892_v62 = vpop.f32.mrf.mxu0 }
 0x231   : > { %v2741_v54 = vsel %vm11682_vm12, %v2732_v7, %v12956_v1  ;;  %v3181_v6 = vsel %vm392_vm2, %v3176_v4, %v3180_v46  ;;  %v3893_v57 = vsel %vm15473_vm8, %v3850_v63, %v12838_v10  ;;  %v12990_v13 = vpop.permute.xlu1 %3378  ;;  %v12998_v21 = vshll.u32 %v12953_v5, 16 }
 0x232   : > { %v2271_v35 = vmul.f32 %v15545_v2, %v2148_v15  ;;  %2888 = vst.msk [vmem:[#allocation2 + $0x8c] sm:$0xf] %vm15477_vm14, %v2741_v54  ;;  %v2149_v31 = vmax.f32 %v2088_v3, 0.0  ;;  %v3546_v8 = vsel %vm15478_vm0, %v3543_v17, %v3545_v47  ;;  %v3938_v27 = vsel %vm15534_vm10, %v3893_v57, %v12902_v22  ;;  %v1894_v3 = vpop.f32.mrf.mxu0 }
 0x233   : > { %v3830_v10 = vsel %vm1141_vm6, %v3827_v20, %v3829_v28  ;;  %v13001_v59 = vshrl.u32 %v12953_v5, 16  ;;  %v13004_v30 = vor.u32 %v12912_v0, %v3180_v46  ;;  %v15546_v22 = vunpack.c.h.bf16 %v12653_v49  ;;  %v3764_v46 = vpop.permute.xlu0 %3763 }
 0x234   : > { %v9303_v25 = vpack.c.bf16 %v2271_v35, %v2271_v35  ;;  %3640 = vrot.lane.b32.xlu0 %v3546_v8, %s10375_s26  ;;  %9919 = vmatmul.mubr.msk.bf16.gmra.mxu0 %vm1183_vm7, %v3830_v10  ;;  %v3301_v20 = vrot.slane %v12953_v5, 1  ;;  %v4061_v11 = vsel %vm15473_vm8, %v4002_v29, %v3621_v53  ;;  %v1893_v7 = vadd.f32 %v12765_v16, %v1892_v62 }
 0x235   : > { %v2272_v15 = vmul.f32 %v15546_v22, %v2149_v31  ;;  %3253 = vrot.lane.b32.xlu1 %v3181_v6, %s10376_s27  ;;  %v3719_v37 = vrot.slane %v13001_v59, 2  ;;  %v3720_v4 = vrot.slane %v12998_v21, 3  ;;  %9922 = vmatprep.mubr.msk.bf16.mxu0 %vm15474_vm5, %v15492_v45  ;;  %v4106_v54 = vsel %vm15547_vm11, %v4061_v11, %v3764_v46  ;;  %v13021_v6 = vpop.permute.xlu1 %3321  ;;  %vm15550_vm11 = vmmov %vm15534_vm10 }
 0x236   : > { %v2744_v17 = vshrl.u32 %v9303_v25, 16  ;;  %v2747_v63 = vshll.u32 %v9303_v25, 16  ;;  %v2742_v53 = vrot.slane %v12956_v1, 4  ;;  %v2093_v29 = vadd.f32 %v12164_v33, %v1893_v7  ;;  %4427 = vmatprep.mubr.bf16.mxu1 %v4106_v54  ;;  %v1895_v1 = vpop.f32.mrf.mxu0  ;;  %v10350_v33 = vld [vmem:[#allocation2 + $0x20] sm:$0xff]  }
 0x237   : > { %v9304_v35 = vpack.c.bf16 %v2272_v15, %v2272_v15  ;;  %v13023_v57 = vor.u32 %v3720_v4, %v3719_v37  ;;  %v3467_v25 = vrot.slane %v12728_v32, 1  ;;  %4428 = vmatmul.mubr.bf16.gmra.mxu1 %v3938_v27  ;;  %v1896_v62 = vadd.f32 %v12765_v16, %v1895_v1  ;;  %v3623_v11 = vpop.permute.xlu0 %3622 }
 0x238   : > { %v2746_v49 = vrot.slane %v2744_v17, 6  ;;  %v2749_v2 = vrot.slane %v2747_v63, 7  ;;  %v3302_v17 = vsel %vm605_vm1, %v3299_v44, %v3301_v20  ;;  %3585 = vrot.lane.b32.xlu0 %v3546_v8, %s10376_s27  ;;  %v3852_v63 = vsel %vm1183_vm7, %v10350_v33, %v3234_v43  ;;  %v1897_v37 = vpop.f32.mrf.mxu0 }
 0x239   : > { %v2754_v10 = vshrl.u32 %v9304_v35, 16  ;;  %v2757_v22 = vshll.u32 %v9304_v35, 16  ;;  %v2150_v15 = vmax.f32 %v2093_v29, 0.0  ;;  %3398 = vrot.lane.b32.xlu1 %v3302_v17, %s10377_s30  ;;  %v13035_v7 = vld [vmem:[#allocation2 + $0x88] sm:$0xff]   ;;  %v3468_v46 = vrot.slane %v12699_v36, 2 }
 0x23a   : > { %v2750_v31 = vor.u32 %v2749_v2, %v2746_v49  ;;  %v3188_v27 = vrot.slane %v12998_v21, 1  ;;  %v15548_v43 = vunpack.c.l.bf16 %v12738_v26  ;;  %v2096_v49 = vadd.f32 %v12217_v60, %v1896_v62  ;;  %v3236_v2 = vpop.permute.xlu1 %3235 }
 0x23b   : > { %v2756_v44 = vrot.slane %v2754_v10, 6  ;;  %v2759_v8 = vrot.slane %v2757_v22, 7  ;;  %v3722_v35 = vsel %vm15479_vm3, %v12937_v38, %v13023_v57  ;;  %v3547_v3 = vrot.slane %v13035_v7, 2  ;;  %v3568_v60 = vpop.permute.xlu0 %3567 }
 0x23c   : > { %v2751_v50 = vsel %vm11682_vm12, %v2742_v53, %v2750_v31  ;;  %v2273_v4 = vmul.f32 %v15548_v43, %v2150_v15  ;;  %v2752_v54 = vrot.slane %v2750_v31, 4  ;;  %v4005_v29 = vsel %vm1183_vm7, %v12310_v18, %v12976_v55  ;;  %3783 = vrot.lane.b32.xlu0 %v3722_v35, %s10377_s30 }
 0x23d   : > { %2889 = vst.msk [vmem:[#allocation2 + $0x90] sm:$0xf] %vm15477_vm14, %v2751_v50  ;;  %v2760_v53 = vor.u32 %v2759_v8, %v2756_v44  ;;  %v3831_v10 = vrot.slane %v13035_v7, 3  ;;  %v2151_v1 = vmax.f32 %v2096_v49, 0.0  ;;  %3341 = vrot.lane.b32.xlu1 %v3302_v17, %s10375_s26  ;;  %v3548_v38 = vsel %vm15478_vm0, %v3545_v47, %v3547_v3 }
 0x23e   : > { %v9305_v22 = vpack.c.bf16 %v2273_v4, %v2273_v4  ;;  %v13061_v31 = vshll.u32 %v13035_v7, 16  ;;  %v3189_v55 = vsel %vm392_vm2, %v13004_v30, %v3188_v27  ;;  %v3895_v47 = vsel %vm15473_vm8, %v3852_v63, %v12929_v12  ;;  %v13079_v44 = vpop.permute.xlu1 %3380  ;;  %v10351_v4 = vld [vmem:[#allocation2 + $0x28] sm:$0xff]  }
 0x23f   : > { %v2761_v18 = vsel %vm11682_vm12, %v2752_v54, %v2760_v53  ;;  %v3832_v17 = vsel %vm1141_vm6, %v3829_v28, %v3831_v10  ;;  %v15549_v62 = vunpack.c.h.bf16 %v12738_v26  ;;  %v3303_v30 = vrot.slane %v13035_v7, 1  ;;  %v3766_v35 = vpop.permute.xlu0 %3765 }
 0x240   : > { %2890 = vst.msk [vmem:[#allocation2 + $0x94] sm:$0xf] %vm15477_vm14, %v2761_v18  ;;  %v2764_v33 = vshrl.u32 %v9305_v22, 16  ;;  %v2767_v15 = vshll.u32 %v9305_v22, 16  ;;  %9923 = vmatmul.mubr.msk.bf16.gmra.mxu0 %vm1183_vm7, %v3832_v17  ;;  %v4063_v8 = vsel %vm15473_vm8, %v4005_v29, %v3623_v11  ;;  %3642 = vrot.lane.b32.xlu0 %v3548_v38, %s10375_s26  ;;  %v3941_v12 = vsel %vm15534_vm10, %v3895_v47, %v12990_v13  ;;  %v1900_v11 = vpop.f32.mrf.mxu0  ;;  %v13098_v13 = vld [vmem:[%s15426_s1 + $0x500] sm:$0x3] }
 0x241   : > { %v2274_v50 = vmul.f32 %v15549_v62, %v2151_v1  ;;  %v13088_v28 = vshrl.u32 %v13035_v7, 16  ;;  %v3724_v63 = vrot.slane %v13061_v31, 3  ;;  %9926 = vmatprep.mubr.msk.bf16.mxu0 %vm15474_vm5, %v15492_v45  ;;  %v3854_v49 = vsel %vm1183_vm7, %v10351_v4, %v3236_v2  ;;  %3255 = vrot.lane.b32.xlu1 %v3189_v55, %s10376_s27 }
 0x242   : > { %v2766_v26 = vrot.slane %v2764_v33, 6  ;;  %v2769_v37 = vrot.slane %v2767_v15, 7  ;;  %v2762_v54 = vrot.slane %v2760_v53, 4  ;;  %v1901_v29 = vadd.f32 %v12765_v16, %v1900_v11  ;;  %v13103_v2 = vpop.permute.xlu1 %3323  ;;  %v1902_v55 = vpop.f32.mrf.mxu0 }
 0x243   : > { %v9306_v43 = vpack.c.bf16 %v2274_v50, %v2274_v50  ;;  %v4109_v22 = vsel %vm15550_vm11, %v4063_v8, %v3766_v35  ;;  %v3723_v1 = vrot.slane %v13088_v28, 2  ;;  %v3304_v33 = vsel %vm605_vm1, %v3301_v20, %v3303_v30  ;;  %vm15551_vm11 = vmmov %vm15534_vm10 }
 0x244   : > { %v2770_v18 = vor.u32 %v2769_v37, %v2766_v26  ;;  %4435 = vmatprep.mubr.bf16.mxu1 %v4109_v22  ;;  %v2101_v53 = vadd.f32 %v12246_v51, %v1901_v29  ;;  %3587 = vrot.lane.b32.xlu0 %v3548_v38, %s10376_s27  ;;  %v2236_v62 = vunpack.c.l.bf16 %v13098_v13  ;;  %v13119_v50 = vor.u32 %v3468_v46, %v3467_v25  ;;  %v1903_v51 = vpop.f32.mrf.mxu0  ;;  %v3625_v38 = vpop.permute.xlu0 %3624 }
 0x245   : > { %v2774_v17 = vshrl.u32 %v9306_v43, 16  ;;  %v2777_v47 = vshll.u32 %v9306_v43, 16  ;;  %4436 = vmatmul.mubr.bf16.gmra.mxu1 %v3941_v12  ;;  %v13112_v15 = vor.u32 %v3724_v63, %v3723_v1  ;;  %3400 = vrot.lane.b32.xlu1 %v3304_v33, %s10377_s30  ;;  %v3196_v12 = vrot.slane %v13061_v31, 1 }
 0x246   : > { %v2771_v5 = vsel %vm11682_vm12, %v2762_v54, %v2770_v18  ;;  %v4008_v32 = vsel %vm1183_vm7, %v12332_v39, %v3568_v60  ;;  %v2152_v63 = vmax.f32 %v2101_v53, 0.0  ;;  %v1904_v36 = vadd.f32 %v12765_v16, %v1903_v51  ;;  %v3238_v43 = vpop.permute.xlu1 %3237  ;;  %v1905_v4 = vpop.f32.mrf.mxu0 }
 0x247   : > { %v2776_v20 = vrot.slane %v2774_v17, 6  ;;  %v2779_v8 = vrot.slane %v2777_v47, 7  ;;  %2891 = vst.msk [vmem:[#allocation2 + $0x98] sm:$0xf] %vm15477_vm14, %v2771_v5  ;;  %v3192_v25 = vor.u32 %v13001_v59, %v3188_v27  ;;  %v13132_v46 = vld [vmem:[#allocation2 + $0x90] sm:$0xff]   ;;  %v2772_v26 = vrot.slane %v2770_v18, 4 }
 0x248   : > { %v3726_v11 = vsel %vm15479_vm3, %v13023_v57, %v13112_v15  ;;  %v13142_v39 = vsel %vm15480_vm4, %v12856_v42, %v13119_v50  ;;  %v2275_v60 = vmul.f32 %v9420_v61, %v2152_v63  ;;  %v2104_v27 = vadd.f32 %v12304_v48, %v1904_v36  ;;  %v13155_v42 = vpop.permute.xlu0 %3569  ;;  %v1908_v53 = vpop.f32.mrf.mxu0 }
 0x249   : > { %v13134_v37 = vor.u32 %v2779_v8, %v2776_v20  ;;  %3785 = vrot.lane.b32.xlu0 %v3726_v11, %s10377_s30  ;;  %v3549_v35 = vrot.slane %v13132_v46, 2  ;;  %v3897_v54 = vsel %vm15473_vm8, %v3854_v49, %v13021_v6  ;;  %3343 = vrot.lane.b32.xlu1 %v3304_v33, %s10375_s26  ;;  %v3197_v29 = vsel %vm392_vm2, %v3192_v25, %v3196_v12 }
 0x24a   : > { %v3833_v61 = vrot.slane %v13132_v46, 3  ;;  %v3944_v48 = vsel %vm15534_vm10, %v3897_v54, %v13079_v44  ;;  %v9307_v22 = vpack.c.bf16 %v2275_v60, %v2275_v60  ;;  %v2153_v1 = vmax.f32 %v2104_v27, 0.0  ;;  %v13169_v17 = vpop.permute.xlu1 %3382  ;;  %v1910_v63 = vpop.f32.mrf.mxu0 }
 0x24b   : > { %v2781_v57 = vsel %vm11682_vm12, %v2772_v26, %v13134_v37  ;;  %v3550_v6 = vsel %vm15478_vm0, %v3547_v3, %v3549_v35  ;;  %v3471_v49 = vrot.slane %v12821_v19, 1  ;;  %v4065_v18 = vsel %vm15473_vm8, %v4008_v32, %v3625_v38 }
 0x24c   : > { %2892 = vst.msk [vmem:[#allocation2 + $0x9c] sm:$0xf] %vm15477_vm14, %v2781_v57  ;;  %v3834_v44 = vsel %vm1141_vm6, %v3831_v10, %v3833_v61  ;;  %v13177_v47 = vshll.u32 %v13132_v46, 16  ;;  %v13180_v55 = vshrl.u32 %v13132_v46, 16  ;;  %v2784_v33 = vshrl.u32 %v9307_v22, 16  ;;  %v3768_v20 = vpop.permute.xlu0 %3767 }
 0x24d   : > { %v2787_v3 = vshll.u32 %v9307_v22, 16  ;;  %v2276_v19 = vmul.f32 %v9421_v56, %v2153_v1  ;;  %3644 = vrot.lane.b32.xlu0 %v3550_v6, %s10375_s26  ;;  %9927 = vmatmul.mubr.msk.bf16.gmra.mxu0 %vm1183_vm7, %v3834_v44  ;;  %v3305_v5 = vrot.slane %v13132_v46, 1  ;;  %v1909_v10 = vadd.f32 %v12765_v16, %v1908_v53 }
 0x24e   : > { %3257 = vrot.lane.b32.xlu1 %v3197_v29, %s10376_s27  ;;  %v3727_v8 = vrot.slane %v13180_v55, 2  ;;  %v3728_v51 = vrot.slane %v13177_v47, 3  ;;  %9930 = vmatprep.mubr.msk.bf16.mxu0 %vm15474_vm5, %v15492_v45  ;;  %v3472_v24 = vrot.slane %v12818_v41, 2  ;;  %v2786_v56 = vrot.slane %v2784_v33, 6  ;;  %v13197_v26 = vpop.permute.xlu1 %3325 }
 0x24f   : > { %v2789_v38 = vrot.slane %v2787_v3, 7  ;;  %v9308_v32 = vpack.c.bf16 %v2276_v19, %v2276_v19  ;;  %v4112_v36 = vsel %vm15551_vm11, %v4065_v18, %v3768_v20  ;;  %v2782_v25 = vrot.slane %v13134_v37, 4  ;;  %v10352_v37 = vld [vmem:[#allocation2 + $0x30] sm:$0xff]  }
 0x250   : > { %v2109_v16 = vadd.f32 %v12328_v23, %v1909_v10  ;;  %4443 = vmatprep.mubr.bf16.mxu1 %v4112_v36  ;;  %v13199_v4 = vor.u32 %v3728_v51, %v3727_v8  ;;  %v3200_v11 = vor.u32 %v13088_v28, %v3196_v12  ;;  %vm15476_vm10 = vsmask.f32 3328  ;;  %v1911_v23 = vpop.f32.mrf.mxu0  ;;  %v3627_v12 = vpop.permute.xlu0 %3626 }
 0x251   : > { %v2790_v60 = vor.u32 %v2789_v38, %v2786_v56  ;;  %v2794_v27 = vshrl.u32 %v9308_v32, 16  ;;  %v2797_v41 = vshll.u32 %v9308_v32, 16  ;;  %v3306_v54 = vsel %vm605_vm1, %v3303_v30, %v3305_v5  ;;  %3589 = vrot.lane.b32.xlu0 %v3550_v6, %s10376_s27  ;;  %4444 = vmatmul.mubr.bf16.gmra.mxu1 %v3944_v48 }
 0x252   : > { %v3856_v57 = vsel %vm1183_vm7, %v10352_v37, %v3238_v43  ;;  %v2154_v29 = vmax.f32 %v2109_v16, 0.0  ;;  %3402 = vrot.lane.b32.xlu1 %v3306_v54, %s10377_s30  ;;  %v3473_v1 = vor.u32 %v3472_v24, %v3471_v49  ;;  %v3475_v18 = vrot.slane %v12912_v0, 1  ;;  %v1912_v6 = vpop.f32.mrf.mxu0  ;;  %v13219_v33 = vpop.permute.xlu1 %3239 }
 0x253   : > { %v13210_v22 = vld [vmem:[#allocation2 + $0x98] sm:$0xff]   ;;  %v2791_v7 = vsel %vm11682_vm12, %v2782_v25, %v2790_v60  ;;  %v2796_v30 = vrot.slane %v2794_v27, 6  ;;  %v2799_v44 = vrot.slane %v2797_v41, 7  ;;  %v3204_v48 = vrot.slane %v13177_v47, 1 }
 0x254   : > { %2893 = vst.msk [vmem:[#allocation2 + $0xa0] sm:$0xf] %vm15477_vm14, %v2791_v7  ;;  %v2277_v43 = vmul.f32 %v2236_v62, %v2154_v29  ;;  %v3730_v49 = vsel %vm15479_vm3, %v13112_v15, %v13199_v4  ;;  %v3835_v0 = vrot.slane %v13210_v22, 3  ;;  %v3551_v3 = vrot.slane %v13210_v22, 2  ;;  %v13235_v15 = vpop.permute.xlu0 %3571 }
 0x255   : > { %v2792_v19 = vrot.slane %v2790_v60, 4  ;;  %v2800_v53 = vor.u32 %v2799_v44, %v2796_v30  ;;  %3787 = vrot.lane.b32.xlu0 %v3730_v49, %s10377_s30  ;;  %v13228_v10 = vshll.u32 %v13210_v22, 16  ;;  %v3476_v13 = vrot.slane %v12885_v34, 2 }
 0x256   : > { %v4011_v62 = vsel %vm1183_vm7, %v12406_v40, %v13155_v42  ;;  %v9309_v20 = vpack.c.bf16 %v2277_v43, %v2277_v43  ;;  %3345 = vrot.lane.b32.xlu1 %v3306_v54, %s10375_s26  ;;  %v3836_v8 = vsel %vm1141_vm6, %v3833_v61, %v3835_v0  ;;  %v3552_v34 = vsel %vm15478_vm0, %v3549_v35, %v3551_v3  ;;  %v13257_v38 = vpop.permute.xlu1 %3384  ;;  %v4605_v35 = vpop.f32.mrf.mxu0 }
 0x257   : > { %v2801_v40 = vsel %vm11682_vm12, %v2792_v19, %v2800_v53  ;;  %v4067_v42 = vsel %vm15473_vm8, %v4011_v62, %v3627_v12  ;;  %v3205_v51 = vsel %vm392_vm2, %v3200_v11, %v3204_v48  ;;  %9931 = vmatmul.mubr.msk.bf16.gmra.mxu0 %vm1183_vm7, %v3836_v8  ;;  %v3899_v61 = vsel %vm15473_vm8, %v3856_v57, %v13103_v2  ;;  %vm15552_vm8 = vmmov %vm15551_vm11 }
 0x258   : > { %2894 = vst.msk [vmem:[#allocation2 + $0xa4] sm:$0xf] %vm15477_vm14, %v2801_v40  ;;  %v2804_v24 = vshrl.u32 %v9309_v20, 16  ;;  %v2807_v56 = vshll.u32 %v9309_v20, 16  ;;  %v13260_v32 = vshrl.u32 %v13210_v22, 16  ;;  %v3732_v63 = vrot.slane %v13228_v10, 3  ;;  %9934 = vmatprep.mubr.msk.bf16.mxu0 %vm15474_vm5, %v15492_v45  ;;  %v9868_v27 = vpop.f32.mrf.mxu0  ;;  %v3770_v41 = vpop.permute.xlu0 %3769  ;;  %vm13284_vm5 = vmand %vm15477_vm14, %vm15476_vm10 }
 0x259   : > { %v2802_v36 = vrot.slane %v2800_v53, 4  ;;  %3646 = vrot.lane.b32.xlu0 %v3552_v34, %s10375_s26  ;;  %v13267_v2 = vrot.slane %v13210_v22, 1  ;;  %v13271_v25 = vsel %vm15480_vm4, %v13119_v50, %v3473_v1  ;;  %v3477_v16 = vor.u32 %v3476_v13, %v3475_v18  ;;  %v2895_v18 = vld [vmem:[#allocation2 + $0xa8] sm:$0xf] }
 0x25a   : > { %v2806_v11 = vrot.slane %v2804_v24, 6  ;;  %v2809_v60 = vrot.slane %v2807_v56, 7  ;;  %3259 = vrot.lane.b32.xlu1 %v3205_v51, %s10376_s27  ;;  %v3731_v54 = vrot.slane %v13260_v32, 2  ;;  %v3479_v23 = vrot.slane %v13001_v59, 1  ;;  %v13288_v7 = vpop.permute.xlu1 %3327  ;;  %v4608_v30 = vpop.f32.mrf.mxu0  ;;  %v10353_v24 = vld [vmem:[#allocation2 + $0x38] sm:$0xff]   ;;  %v10275_v50 = vld [vmem:[%s15426_s1 + $0x308] sm:$0xff]  }
 0x25b   : > { %v4115_v37 = vsel %vm15551_vm11, %v4067_v42, %v3770_v41  ;;  %v3947_v57 = vsel %vm15552_vm8, %v3899_v61, %v13169_v17  ;;  %v13280_v29 = vsel %vm15480_vm4, %v3473_v1, %v3477_v16  ;;  %v3480_v44 = vrot.slane %v12998_v21, 2  ;;  %v13299_v6 = vld [vmem:[#allocation2 + $0xa0] ss:$0 sps:$4 sm:$0x77]  }
 0x25c   : > { %v2810_v12 = vor.u32 %v2809_v60, %v2806_v11  ;;  %4451 = vmatprep.mubr.bf16.mxu1 %v4115_v37  ;;  %v13290_v59 = vor.u32 %v3732_v63, %v3731_v54  ;;  %v3483_v17 = vrot.slane %v13088_v28, 1  ;;  %v3308_v1 = vsel %vm605_vm1, %v3305_v5, %v13267_v2  ;;  %v9869_v28 = vpop.f32.mrf.mxu0  ;;  %v3629_v53 = vpop.permute.xlu0 %3628 }
 0x25d   : > { %3591 = vrot.lane.b32.xlu0 %v3552_v34, %s10376_s27  ;;  %4452 = vmatmul.mubr.bf16.gmra.mxu1 %v3947_v57  ;;  %v3484_v43 = vrot.slane %v13061_v31, 2  ;;  %v3487_v49 = vrot.slane %v13180_v55, 1  ;;  %v3488_v19 = vrot.slane %v13177_v47, 2  ;;  %v3481_v62 = vor.u32 %v3480_v44, %v3479_v23 }
 0x25e   : > { %v2811_v21 = vsel %vm11682_vm12, %v2802_v36, %v2810_v12  ;;  %3404 = vrot.lane.b32.xlu1 %v3308_v1, %s10377_s30  ;;  %v13311_v20 = vpop.permute.xlu1 %3241  ;;  %v3734_v31 = vsel %vm15479_vm3, %v13199_v4, %v13290_v59  ;;  %v3212_v8 = vrot.slane %v13228_v10, 1  ;;  %v3218_v61 = vshll.u32 %v13299_v6, 16  ;;  %v13336_v60 = vpop.f32.mrf.mxu0 }
 0x25f   : > { %v2896_v5 = vsel %vm13284_vm5, %v2811_v21, %v2895_v18  ;;  %v13309_v13 = vld [vmem:[#allocation2 + $0xa0] sm:$0xff]   ;;  %v3485_v34 = vor.u32 %v3484_v43, %v3483_v17  ;;  %v3489_v40 = vor.u32 %v3488_v19, %v3487_v49  ;;  %v3858_v56 = vsel %vm1183_vm7, %v10353_v24, %v13219_v33  ;;  %v2950_v24 = vld [vmem:[#allocation2 + $0xb4] sm:$0x1] }
 0x260   : > { %2897 = vst [vmem:[#allocation2 + $0xa8] sm:$0xf] %v2896_v5  ;;  %v3837_v42 = vrot.slane %v13309_v13, 3  ;;  %v13320_v51 = vrot.slane %v13309_v13, 2  ;;  %v13326_v4 = vpop.permute.xlu0 %3573  ;;  %v3208_v35 = vor.u32 %v13180_v55, %v3204_v48  ;;  %v3496_v63 = vshrl.u32 %v13309_v13, 16 }
 0x261   : > { %3789 = vrot.lane.b32.xlu0 %v3734_v31, %s10377_s30  ;;  %v3499_v36 = vshll.u32 %v13309_v13, 16  ;;  %v4014_v11 = vsel %vm1183_vm7, %v12472_v58, %v13235_v15  ;;  %v3491_v55 = vrot.slane %v13260_v32, 1  ;;  %v13353_v41 = vsel %vm15480_vm4, %v3477_v16, %v3481_v62 }
 0x262   : > { %3347 = vrot.lane.b32.xlu1 %v3308_v1, %s10375_s26  ;;  %v3838_v33 = vsel %vm1141_vm6, %v3835_v0, %v3837_v42  ;;  %v3554_v47 = vsel %vm15478_vm0, %v3551_v3, %v13320_v51  ;;  %v13348_v48 = vpop.permute.xlu1 %3386  ;;  %v3213_v27 = vsel %vm392_vm2, %v3208_v35, %v3212_v8  ;;  %v3735_v58 = vrot.slane %v3496_v63, 2  ;;  %v9872_v0 = vpop.f32.mrf.mxu0  ;;  %v2948_v3 = vld [vmem:[#allocation2 + $0xac] sm:$0xf] }
 0x263   : > { %9935 = vmatmul.mubr.msk.bf16.gmra.mxu0 %vm1183_vm7, %v3838_v33  ;;  %v3736_v15 = vrot.slane %v3499_v36, 3  ;;  %v13356_v54 = vrot.slane %v3218_v61, 1  ;;  %vm15555_vm8 = vmmov 0   ;;  %v13361_v23 = vsel %vm15480_vm4, %v3481_v62, %v3485_v34  ;;  %v2949_v61 = vld [vmem:[#allocation2 + $0xb0] sm:$0xf] }
 0x264   : > { %9938 = vmatprep.mubr.msk.bf16.mxu0 %vm15555_vm8, %v15492_v45  ;;  %v13364_v37 = vsel %vm15480_vm4, %v3485_v34, %v3489_v40  ;;  %v3492_v57 = vrot.slane %v13228_v10, 2  ;;  %vm15556_vm11 = vcmask 523264   ;;  %v3772_v12 = vpop.permute.xlu0 %3771  ;;  %v3498_v18 = vrot.slane %v3496_v63, 1  ;;  %v13372_v1 = vpop.f32.mrf.mxu0 }
 0x265   : > { %3648 = vrot.lane.b32.xlu0 %v3554_v47, %s10375_s26  ;;  %v4069_v16 = vsel %vm15556_vm11, %v4014_v11, %v3629_v53  ;;  %v3501_v30 = vrot.slane %v3499_v36, 2  ;;  %vm15557_vm10 = vmmov %vm15556_vm11  ;;  %v3216_v17 = vor.u32 %v13260_v32, %v3212_v8  ;;  %vm15558_vm14 = vcmask 785408  }
 0x266   : > { %3261 = vrot.lane.b32.xlu1 %v3213_v27, %s10376_s27  ;;  %v3901_v44 = vsel %vm15557_vm10, %v3858_v56, %v13197_v26  ;;  %v4118_v43 = vsel %vm15558_vm14, %v4069_v16, %v3772_v12  ;;  %v3493_v19 = vor.u32 %v3492_v57, %v3491_v55  ;;  %vm15559_vm0 = vmmov %vm15558_vm14  ;;  %v13377_v21 = vpop.permute.xlu1 %3329  ;;  %v13379_v28 = vor.u32 %v3736_v15, %v3735_v58  ;;  %v9873_v32 = vpop.f32.mrf.mxu0  ;;  %v10354_v15 = vld [vmem:[#allocation2 + $0x40] sm:$0xff]  }
 0x267   : > { %v2945_v49 = vld [vmem:[#allocation2 + $0xa8] sm:$0xf]  ;;  %v3950_v10 = vsel %vm15559_vm0, %v3901_v44, %v13257_v38  ;;  %4459 = vmatprep.mubr.bf16.mxu1 %v4118_v43  ;;  %v13383_v5 = vor.u32 %v3501_v30, %v3498_v18  ;;  %v3221_v26 = vsel %vm392_vm2, %v3216_v17, %v13356_v54  ;;  %v3366_v62 = vrot.slane %v13309_v13, 1  ;;  %vm15561_vm14 = vmmov %vm15557_vm10 }
 0x268   : > { %v13381_v53 = vcombine.low %v2945_v49, %v2948_v3  ;;  %4460 = vmatmul.mubr.bf16.gmra.mxu1 %v3950_v10  ;;  %v13390_v38 = vsel %vm15480_vm4, %v3489_v40, %v3493_v19  ;;  %v3631_v31 = vpop.permute.xlu0 %3630  ;;  %v13394_v34 = vcombine.low %v2945_v49, %v2945_v49  ;;  %v3738_v40 = vsel %vm15479_vm3, %v13290_v59, %v13379_v28  ;;  %v13416_v27 = vld [vmem:[#allocation2 + $0xa8] ss:$0 sps:$4 sm:$0x77]  }
 0x269   : > { %3593 = vrot.lane.b32.xlu0 %v3554_v47, %s10376_s27  ;;  %v13399_v35 = vsel %vm15480_vm4, %v3493_v19, %v13383_v5  ;;  %v3367_v47 = vsel %vm605_vm1, %v13267_v2, %v3366_v62  ;;  %v3309_v55 = vrot.slane %v13299_v6, 1  ;;  %v13418_v59 = vcombine.low %v2949_v61, %v2950_v24 }
 0x26a   : > { %3263 = vrot.lane.b32.xlu1 %v3221_v26, %s10376_s27  ;;  %v3839_v8 = vrot.slane %v13381_v53, 3  ;;  %v3610_v56 = vrot.slane %v13381_v53, 2  ;;  %v13401_v63 = vpop.permute.xlu1 %3243  ;;  %v3740_v11 = vshrl.u32 %v13381_v53, 16  ;;  %v3743_v33 = vshll.u32 %v13381_v53, 16  ;;  %v13429_v3 = vpop.f32.mrf.mxu0 }
 0x26b   : > { %v3508_v58 = vshll.u32 %v13394_v34, 16  ;;  %v3860_v0 = vsel %vm1183_vm7, %v10354_v15, %v13311_v20  ;;  %vm15560_vm0 = vcmask 1045504   ;;  %v3555_v16 = vrot.slane %v13394_v34, 2 }
 0x26c   : > { %v3840_v36 = vsel %vm1141_vm6, %v3837_v42, %v3839_v8  ;;  %v13421_v13 = vpop.permute.xlu0 %3575  ;;  %v3505_v42 = vshrl.u32 %v13394_v34, 16  ;;  %v3611_v57 = vsel %vm15560_vm0, %v13320_v51, %v3610_v56  ;;  %v3742_v18 = vrot.slane %v3740_v11, 2  ;;  %v9876_v49 = vpop.f32.mrf.mxu0 }
 0x26d   : > { %3791 = vrot.lane.b32.xlu0 %v3738_v40, %s10377_s30  ;;  %9939 = vmatmul.mubr.msk.bf16.gmra.mxu0 %vm1183_vm7, %v3840_v36  ;;  %v3745_v30 = vrot.slane %v3743_v33, 3  ;;  %v3510_v17 = vrot.slane %v3508_v58, 2  ;;  %v4017_v43 = vsel %vm1183_vm7, %v12535_v9, %v13326_v4  ;;  %v3310_v20 = vsel %vm605_vm1, %v13267_v2, %v3309_v55 }
 0x26e   : > { %3406 = vrot.lane.b32.xlu1 %v3367_v47, %s10377_s30  ;;  %9942 = vmatprep.mubr.msk.bf16.mxu0 %vm15555_vm8, %v15492_v45  ;;  %v13436_v12 = vpop.permute.xlu1 %3388  ;;  %v3507_v44 = vrot.slane %v3505_v42, 1  ;;  %v3368_v19 = vrot.slane %v13416_v27, 1  ;;  %v3841_v10 = vrot.slane %v13418_v59, 3  ;;  %v4071_v26 = vsel %vm15561_vm14, %v4017_v43, %v3631_v31  ;;  %v13454_v4 = vpop.f32.mrf.mxu0  ;;  %v10355_v43 = vld [vmem:[#allocation2 + $0x48] sm:$0xff]  }
 0x26f   : > { %v8980_v24 = vcombine.low %v2949_v61, %v2949_v61  ;;  %v3903_v9 = vsel %vm15557_vm10, %v3860_v0, %v13288_v7  ;;  %vm15562_vm11 = vcmask 785408   ;;  %v3749_v36 = vshrl.u32 %v13418_v59, 16 }
 0x270   : > { %v3774_v32 = vpop.permute.xlu0 %3773  ;;  %v13450_v40 = vor.u32 %v3510_v17, %v3507_v44  ;;  %v3752_v11 = vshll.u32 %v13418_v59, 16  ;;  %vm15563_vm0 = vmmov %vm15562_vm11  ;;  %vm15564_vm14 = vcmask 1045504   ;;  %v3746_v7 = vor.u32 %v3745_v30, %v3742_v18  ;;  %v9877_v59 = vpop.f32.mrf.mxu0 }
 0x271   : > { %3650 = vrot.lane.b32.xlu0 %v3611_v57, %s10375_s26  ;;  %v4121_v2 = vsel %vm15562_vm11, %v4071_v26, %v3774_v32  ;;  %v3953_v31 = vsel %vm15563_vm0, %v3903_v9, %v13348_v48  ;;  %v3556_v61 = vsel %vm15564_vm14, %v13320_v51, %v3555_v16  ;;  %v3369_v27 = vsel %vm605_vm1, %v3366_v62, %v3368_v19  ;;  %vm15565_vm10 = vmmov %vm15564_vm14 }
 0x272   : > { %3349 = vrot.lane.b32.xlu1 %v3310_v20, %s10375_s26  ;;  %v13461_v33 = vpop.permute.xlu1 %3331  ;;  %4467 = vmatprep.mubr.bf16.mxu1 %v4121_v2  ;;  %v13470_v47 = vsel %vm15480_vm4, %v13383_v5, %v13450_v40  ;;  %v3842_v48 = vsel %vm1141_vm6, %v3839_v8, %v3841_v10  ;;  %v3222_v42 = vshrl.u32 %v13299_v6, 16  ;;  %v3612_v58 = vrot.slane %v8980_v24, 2 }
 0x273   : > { %4468 = vmatmul.mubr.bf16.gmra.mxu1 %v3953_v31  ;;  %v3747_v15 = vsel %vm15479_vm3, %v13379_v28, %v3746_v7  ;;  %v3751_v0 = vrot.slane %v3749_v36, 2  ;;  %v3754_v8 = vrot.slane %v3752_v11, 3  ;;  %v15566_v28 = vld [vmem:[#allocation13_spill] sm:$0xff]  ;;  %vm15567_vm11 = vcmask 523264  }
 0x274   : > { %v3633_v51 = vpop.permute.xlu0 %3632  ;;  %v3224_v62 = vor.u32 %v3222_v42, %v13356_v54  ;;  %v3613_v44 = vsel %vm15565_vm10, %v3610_v56, %v3612_v58  ;;  %v3862_v54 = vsel %vm1183_vm7, %v10355_v43, %v13401_v63  ;;  %v4020_v20 = vsel %vm1183_vm7, %v15566_v28, %v13421_v13  ;;  %vm15568_vm0 = vmmov %vm15567_vm11  ;;  %v10356_v11 = vld [vmem:[#allocation2 + $0x50] sm:$0xff]  }
 0x275   : > { %3595 = vrot.lane.b32.xlu0 %v3556_v61, %s10376_s27  ;;  %9943 = vmatmul.mubr.msk.bf16.gmra.mxu0 %vm1183_vm7, %v3842_v48  ;;  %v3755_v17 = vor.u32 %v3754_v8, %v3751_v0  ;;  %v4073_v53 = vsel %vm15567_vm11, %v4020_v20, %v3633_v51  ;;  %v3905_v63 = vsel %vm15568_vm0, %v3862_v54, %v13377_v21  ;;  %vm15569_vm14 = vcmask 785408   ;;  %vm15571_vm11 = vmmov %vm15568_vm0 }
 0x276   : > { %3408 = vrot.lane.b32.xlu1 %v3369_v27, %s10377_s30  ;;  %9946 = vmatprep.mubr.msk.bf16.mxu0 %vm15555_vm8, %v15492_v45  ;;  %v3246_v5 = vpop.permute.xlu1 %3245  ;;  %vm15570_vm10 = vmmov %vm15569_vm14 }
 0x277   : > { %v3756_v13 = vsel %vm15479_vm3, %v3746_v7, %v3755_v17 }
 0x278   : > { %v3578_v57 = vpop.permute.xlu0 %3577  ;;  %v13485_v30 = vpop.f32.mrf.mxu0 }
 0x279   : > { %3793 = vrot.lane.b32.xlu0 %v3747_v15, %s10377_s30  ;;  %v10357_v15 = vld [vmem:[#allocation2 + $0x58] sm:$0xff]  }
 0x27a   : > { %3265 = vrot.lane.b32.xlu1 %v3224_v62, %s10376_s27  ;;  %v3391_v18 = vpop.permute.xlu1 %3390  ;;  %v9880_v49 = vpop.f32.mrf.mxu0 }
 0x27c   : > { %v3776_v56 = vpop.permute.xlu0 %3775  ;;  %v13505_v32 = vpop.f32.mrf.mxu0 }
 0x27d   : > { %3652 = vrot.lane.b32.xlu0 %v3613_v44, %s10375_s26  ;;  %9947 = vmatmul.mubr.msk.bf16.gmra.mxu0 %vm1183_vm7, %v3841_v10  ;;  %v4124_v6 = vsel %vm15569_vm14, %v4073_v53, %v3776_v56  ;;  %vm15572_vm14 = vmmov %vm15570_vm10 }
 0x27e   : > { %3351 = vrot.lane.b32.xlu1 %v3309_v55, %s10375_s26  ;;  %9954 = vmatprep.mubr.msk.bf16.mxu0 %vm15555_vm8, %v15492_v45  ;;  %v3334_v26 = vpop.permute.xlu1 %3333  ;;  %v3956_v55 = vsel %vm15570_vm10, %v3905_v63, %v13436_v12  ;;  %v9881_v10 = vpop.f32.mrf.mxu0  ;;  %v3864_v12 = vsel %vm1183_vm7, %v10356_v11, %v3246_v5 }
 0x27f   : > { %4475 = vmatprep.mubr.bf16.mxu1 %v4124_v6  ;;  %v3907_v34 = vsel %vm15568_vm0, %v3864_v12, %v13461_v33 }
 0x280   : > { %4476 = vmatmul.mubr.bf16.gmra.mxu1 %v3956_v55  ;;  %v3635_v24 = vpop.permute.xlu0 %3634  ;;  %v3959_v59 = vsel %vm15570_vm10, %v3907_v34, %v3391_v18 }
 0x281   : > { %3795 = vrot.lane.b32.xlu0 %v3756_v13, %s10377_s30  ;;  %v10358_v13 = vld [vmem:[#allocation2 + $0x60] sm:$0xff]  }
 0x282   : > { %3410 = vrot.lane.b32.xlu1 %v3368_v19, %s10377_s30  ;;  %v3248_v9 = vpop.permute.xlu1 %3247  ;;  %v13516_v2 = vpop.f32.mrf.mxu0  ;;  %v4023_v19 = vsel %vm1183_vm7, %v12943_v14, %v3578_v57 }
 0x283   : > { %v4075_v61 = vsel %vm15571_vm11, %v4023_v19, %v3635_v24  ;;  %v3866_v0 = vsel %vm1183_vm7, %v10357_v15, %v3248_v9  ;;  %vm15573_vm11 = vmmov %vm15568_vm0 }
 0x284   : > { %v3580_v21 = vpop.permute.xlu0 %3579  ;;  %v9884_v31 = vpop.f32.mrf.mxu0  ;;  %v3909_v44 = vsel %vm15568_vm0, %v3866_v0, %v3334_v26 }
 0x285   : > { %3597 = vrot.lane.b32.xlu0 %v3555_v16, %s10376_s27  ;;  %v4026_v33 = vsel %vm1183_vm7, %v13142_v39, %v3580_v21 }
 0x286   : > { %v3393_v36 = vpop.permute.xlu1 %3392  ;;  %v13523_v27 = vpop.f32.mrf.mxu0 }
 0x287   : > { %v3962_v28 = vsel %vm15570_vm10, %v3909_v44, %v3393_v36 }
 0x288   : > { %v3778_v7 = vpop.permute.xlu0 %3777  ;;  %v9885_v51 = vpop.f32.mrf.mxu0 }
 0x289   : > { %3654 = vrot.lane.b32.xlu0 %v3612_v58, %s10375_s26  ;;  %v4127_v48 = vsel %vm15572_vm14, %v4075_v61, %v3778_v7  ;;  %vm15574_vm14 = vmmov %vm15570_vm10 }
 0x28a   : > { %v3336_v16 = vpop.permute.xlu1 %3335  ;;  %4483 = vmatprep.mubr.bf16.mxu1 %v4127_v48  ;;  %v10359_v48 = vld [vmem:[#allocation2 + $0x68] sm:$0xff]  }
 0x28b   : > { %4484 = vmatmul.mubr.bf16.gmra.mxu1 %v3959_v59 }
 0x28c   : > { %v3637_v42 = vpop.permute.xlu0 %3636 }
 0x28d   : > { %3797 = vrot.lane.b32.xlu0 %v3755_v17, %s10377_s30  ;;  %v4077_v57 = vsel %vm15573_vm11, %v4026_v33, %v3637_v42  ;;  %vm15575_vm11 = vmmov %vm15568_vm0 }
 0x28e   : > { %v3250_v14 = vpop.permute.xlu1 %3249 }
 0x28f   : > { %v3868_v6 = vsel %vm1183_vm7, %v10358_v13, %v3250_v14 }
 0x290   : > { %v3582_v58 = vpop.permute.xlu0 %3581  ;;  %v3911_v21 = vsel %vm15568_vm0, %v3868_v6, %v3336_v16 }
 0x291   : > { %v13530_v62 = vpop.f32.mrf.mxu0  ;;  %v4029_v55 = vsel %vm1183_vm7, %v13271_v25, %v3582_v58 }
 0x292   : > { %v3395_v5 = vpop.permute.xlu1 %3394 }
 0x293   : > { %v9888_v8 = vpop.f32.mrf.mxu0  ;;  %v3965_v12 = vsel %vm15570_vm10, %v3911_v21, %v3395_v5 }
 0x294   : > { %v3780_v18 = vpop.permute.xlu0 %3779 }
 0x295   : > { %v4130_v43 = vsel %vm15574_vm14, %v4077_v57, %v3780_v18  ;;  %v13538_v54 = vpop.f32.mrf.mxu0  ;;  %vm15576_vm14 = vmmov %vm15570_vm10 }
 0x296   : > { %v3338_v17 = vpop.permute.xlu1 %3337  ;;  %4491 = vmatprep.mubr.bf16.mxu1 %v4130_v43 }
 0x297   : > { %4492 = vmatmul.mubr.bf16.gmra.mxu1 %v3962_v28  ;;  %v9889_v20 = vpop.f32.mrf.mxu0  ;;  %v10360_v28 = vld [vmem:[#allocation2 + $0x70] sm:$0xff]  }
 0x299   : > { %v3639_v49 = vpop.permute.xlu0 %3638 }
 0x29a   : > { %v3252_v53 = vpop.permute.xlu1 %3251  ;;  %v4079_v10 = vsel %vm15575_vm11, %v4029_v55, %v3639_v49  ;;  %vm15577_vm11 = vmmov %vm15568_vm0 }
 0x29b   : > { %v3870_v59 = vsel %vm1183_vm7, %v10359_v48, %v3252_v53 }
 0x29c   : > { %v13541_v39 = vpop.f32.mrf.mxu0  ;;  %v3913_v58 = vsel %vm15568_vm0, %v3870_v59, %v3338_v17 }
 0x29d   : > { %v3584_v56 = vpop.permute.xlu0 %3583 }
 0x29e   : > { %v3397_v63 = vpop.permute.xlu1 %3396  ;;  %v9892_v26 = vpop.f32.mrf.mxu0  ;;  %v4032_v16 = vsel %vm1183_vm7, %v13280_v29, %v3584_v56 }
 0x29f   : > { %v3968_v33 = vsel %vm15570_vm10, %v3913_v58, %v3397_v63 }
 0x2a0   : > { %v13547_v9 = vpop.f32.mrf.mxu0 }
 0x2a2   : > { %v3782_v24 = vpop.permute.xlu0 %3781  ;;  %v3340_v36 = vpop.permute.xlu1 %3339 }
 0x2a3   : > { %v4133_v11 = vsel %vm15576_vm14, %v4079_v10, %v3782_v24  ;;  %v9893_v31 = vpop.f32.mrf.mxu0  ;;  %vm15578_vm14 = vmmov %vm15570_vm10 }
 0x2a4   : > { %4499 = vmatprep.mubr.bf16.mxu1 %v4133_v11 }
 0x2a5   : > { %4500 = vmatmul.mubr.bf16.gmra.mxu1 %v3965_v12 }
 0x2a6   : > { %v3641_v19 = vpop.permute.xlu0 %3640 }
 0x2a7   : > { %v3254_v61 = vpop.permute.xlu1 %3253  ;;  %v4081_v42 = vsel %vm15577_vm11, %v4032_v16, %v3641_v19  ;;  %vm15579_vm11 = vmmov %vm15568_vm0 }
 0x2a8   : > { %v3872_v20 = vsel %vm1183_vm7, %v10360_v28, %v3254_v61 }
 0x2a9   : > { %v3915_v13 = vsel %vm15568_vm0, %v3872_v20, %v3340_v36  ;;  %v13594_v20 = vld [vmem:[%s15427_s2 + $0x1] ss:$0 sm:$0xff] }
 0x2aa   : > { %v3586_v7 = vpop.permute.xlu0 %3585  ;;  %v13552_v25 = vpop.f32.mrf.mxu0 }
 0x2ab   : > { %v3399_v34 = vpop.permute.xlu1 %3398  ;;  %v4035_v49 = vsel %vm1183_vm7, %v13353_v41, %v3586_v7  ;;  %v10361_v41 = vld [vmem:[#allocation2 + $0x78] sm:$0xff]  }
 0x2ac   : > { %v9896_v51 = vpop.f32.mrf.mxu0  ;;  %v3971_v55 = vsel %vm15570_vm10, %v3915_v13, %v3399_v34 }
 0x2ae   : > { %v3784_v14 = vpop.permute.xlu0 %3783  ;;  %v13560_v0 = vpop.f32.mrf.mxu0 }
 0x2af   : > { %v3342_v5 = vpop.permute.xlu1 %3341  ;;  %v4136_v15 = vsel %vm15578_vm14, %v4081_v42, %v3784_v14  ;;  %vm15580_vm14 = vmmov %vm15570_vm10 }
 0x2b0   : > { %4507 = vmatprep.mubr.bf16.mxu1 %v4136_v15  ;;  %v9897_v8 = vpop.f32.mrf.mxu0 }
 0x2b1   : > { %4508 = vmatmul.mubr.bf16.gmra.mxu1 %v3968_v33  ;;  %v10362_v8 = vld [vmem:[#allocation2 + $0x80] sm:$0xff]  }
 0x2b2   : > { %v3643_v57 = vpop.permute.xlu0 %3642 }
 0x2b3   : > { %v3256_v18 = vpop.permute.xlu1 %3255  ;;  %v4083_v53 = vsel %vm15579_vm11, %v4035_v49, %v3643_v57  ;;  %vm15581_vm11 = vmmov %vm15568_vm0 }
 0x2b4   : > { %v3874_v31 = vsel %vm1183_vm7, %v10361_v41, %v3256_v18 }
 0x2b5   : > { %v3917_v34 = vsel %vm15568_vm0, %v3874_v31, %v3342_v5 }
 0x2b6   : > { %v3588_v44 = vpop.permute.xlu0 %3587  ;;  %v13563_v29 = vpop.f32.mrf.mxu0 }
 0x2b7   : > { %v3401_v43 = vpop.permute.xlu1 %3400  ;;  %v4038_v36 = vsel %vm1183_vm7, %v13361_v23, %v3588_v44 }
 0x2b8   : > { %v9900_v17 = vpop.f32.mrf.mxu0  ;;  %v3974_v51 = vsel %vm15570_vm10, %v3917_v34, %v3401_v43 }
 0x2ba   : > { %v13569_v63 = vpop.f32.mrf.mxu0 }
 0x2bb   : > { %v3786_v56 = vpop.permute.xlu0 %3785  ;;  %v3344_v6 = vpop.permute.xlu1 %3343 }
 0x2bc   : > { %v4139_v26 = vsel %vm15580_vm14, %v4083_v53, %v3786_v56  ;;  %v9901_v10 = vpop.f32.mrf.mxu0  ;;  %vm15582_vm14 = vmmov %vm15570_vm10  ;;  %v10162_v56 = vld [vmem:[%s15426_s1 + $0x1a8] sm:$0xff]  }
 0x2bd   : > { %4515 = vmatprep.mubr.bf16.mxu1 %v4139_v26  ;;  %9951 = vmatpush3.bf16.msra.mxu0 %v10162_v56 }
 0x2be   : > { %4516 = vmatmul.mubr.bf16.gmra.mxu1 %v3971_v55  ;;  %9952 = vmatprep.subr.bf16.mxu0 %v15492_v45 }
 0x2bf   : > { %v3645_v24 = vpop.permute.xlu0 %3644 }
 0x2c0   : > { %v3258_v21 = vpop.permute.xlu1 %3257  ;;  %v4085_v61 = vsel %vm15581_vm11, %v4038_v36, %v3645_v24  ;;  %vm15583_vm11 = vmmov %vm15568_vm0  ;;  %v10363_v36 = vld [vmem:[#allocation2 + $0x88] sm:$0xff]  }
 0x2c1   : > { %v3876_v57 = vsel %vm1183_vm7, %v10362_v8, %v3258_v21 }
 0x2c2   : > { %v3919_v17 = vsel %vm15568_vm0, %v3876_v57, %v3344_v6 }
 0x2c3   : > { %v3590_v11 = vpop.permute.xlu0 %3589  ;;  %v13575_v19 = vpop.f32.mrf.mxu0 }
 0x2c4   : > { %v3403_v12 = vpop.permute.xlu1 %3402  ;;  %v4041_v5 = vsel %vm1183_vm7, %v13364_v37, %v3590_v11 }
 0x2c5   : > { %v9904_v7 = vpop.f32.mrf.mxu0  ;;  %v3977_v37 = vsel %vm15570_vm10, %v3919_v17, %v3403_v12 }
 0x2c7   : > { %v3788_v48 = vpop.permute.xlu0 %3787  ;;  %v13583_v42 = vpop.f32.mrf.mxu0 }
 0x2c8   : > { %v3346_v59 = vpop.permute.xlu1 %3345  ;;  %v4142_v16 = vsel %vm15582_vm14, %v4085_v61, %v3788_v48  ;;  %vm15584_vm14 = vmmov %vm15570_vm10 }
 0x2c9   : > { %4523 = vmatprep.mubr.bf16.mxu1 %v4142_v16  ;;  %v9905_v14 = vpop.f32.mrf.mxu0 }
 0x2ca   : > { %4524 = vmatmul.mubr.bf16.gmra.mxu1 %v3974_v51 }
 0x2cb   : > { %v3647_v58 = vpop.permute.xlu0 %3646 }
 0x2cc   : > { %v3260_v15 = vpop.permute.xlu1 %3259  ;;  %v4087_v44 = vsel %vm15583_vm11, %v4041_v5, %v3647_v58  ;;  %vm15585_vm11 = vmmov %vm15568_vm0 }
 0x2cd   : > { %v3878_v61 = vsel %vm1183_vm7, %v10363_v36, %v3260_v15 }
 0x2ce   : > { %v3921_v51 = vsel %vm15568_vm0, %v3878_v61, %v3346_v59 }
 0x2cf   : > { %v3592_v33 = vpop.permute.xlu0 %3591  ;;  %v13586_v18 = vpop.f32.mrf.mxu0 }
 0x2d0   : > { %v3405_v23 = vpop.permute.xlu1 %3404  ;;  %v4044_v7 = vsel %vm1183_vm7, %v13390_v38, %v3592_v33 }
 0x2d1   : > { %v9908_v43 = vpop.f32.mrf.mxu0  ;;  %v3980_v8 = vsel %vm15570_vm10, %v3921_v51, %v3405_v23  ;;  %v10163_v23 = vld [vmem:[%s15426_s1 + $0x1a0] sm:$0xff]  }
 0x2d2   : > { %v4405_v26 = vpop.f32.mrf.mxu1  ;;  %9953 = vmatpush3.bf16.msra.mxu0 %v10163_v23 }
 0x2d3   : > { %v3790_v28 = vpop.permute.xlu0 %3789  ;;  %v13602_v13 = vpop.f32.mrf.mxu0  ;;  %9982 = vmatprep.subr.bf16.mxu0 %v15492_v45 }
 0x2d4   : > { %v3348_v49 = vpop.permute.xlu1 %3347  ;;  %v4145_v53 = vsel %vm15584_vm14, %v4087_v44, %v3790_v28  ;;  %v4407_v24 = vpop.f32.mrf.mxu1  ;;  %vm15586_vm14 = vmmov %vm15570_vm10 }
 0x2d5   : > { %4531 = vmatprep.mubr.bf16.mxu1 %v4145_v53  ;;  %v9909_v55 = vpop.f32.mrf.mxu0 }
 0x2d6   : > { %4532 = vmatmul.mubr.bf16.gmra.mxu1 %v3977_v37  ;;  %v4408_v21 = vpop.f32.mrf.mxu1 }
 0x2d7   : > { %v3649_v10 = vpop.permute.xlu0 %3648 }
 0x2d8   : > { %v3262_v6 = vpop.permute.xlu1 %3261  ;;  %v4410_v31 = vpop.f32.mrf.mxu1  ;;  %v4089_v48 = vsel %vm15585_vm11, %v4044_v7, %v3649_v10  ;;  %vm15587_vm11 = vmmov %vm15568_vm0 }
 0x2d9   : > { %v3880_v26 = vsel %vm1183_vm7, %v13132_v46, %v3262_v6 }
 0x2da   : > { %v3923_v61 = vsel %vm15568_vm0, %v3880_v26, %v3348_v49 }
 0x2db   : > { %v3594_v11 = vpop.permute.xlu0 %3593 }
 0x2dc   : > { %v3264_v41 = vpop.permute.xlu1 %3263  ;;  %v13606_v12 = vpop.f32.mrf.mxu0  ;;  %v4047_v10 = vsel %vm1183_vm7, %v13399_v35, %v3594_v11 }
 0x2de   : > { %v9912_v34 = vpop.f32.mrf.mxu0 }
 0x2df   : > { %v3792_v16 = vpop.permute.xlu0 %3791  ;;  %v4413_v15 = vpop.f32.mrf.mxu1 }
 0x2e0   : > { %v3407_v14 = vpop.permute.xlu1 %3406  ;;  %v4148_v58 = vsel %vm15586_vm14, %v4089_v48, %v3792_v16  ;;  %v13614_v57 = vpop.f32.mrf.mxu0  ;;  %v4414_v5 = vadd.f32 %v13594_v20, %v4413_v15  ;;  %vm15588_vm14 = vmmov %vm15570_vm10  ;;  %v3882_v15 = vsel %vm1183_vm7, %v13210_v22, %v3264_v41 }
 0x2e1   : > { %4539 = vmatprep.mubr.bf16.mxu1 %v4148_v58  ;;  %v4415_v43 = vpop.f32.mrf.mxu1 }
 0x2e2   : > { %4540 = vmatmul.mubr.bf16.gmra.mxu1 %v3980_v8  ;;  %v9913_v44 = vpop.f32.mrf.mxu0  ;;  %v4614_v33 = vadd.f32 %v13336_v60, %v4414_v5 }
 0x2e3   : > { %v3651_v38 = vpop.permute.xlu0 %3650  ;;  %v4416_v59 = vpop.f32.mrf.mxu1 }
 0x2e4   : > { %v4773_v28 = vmax.f32 %v4614_v33, 0.0  ;;  %v3350_v17 = vpop.permute.xlu1 %3349  ;;  %v4417_v53 = vadd.f32 %v13594_v20, %v4416_v59  ;;  %v4091_v24 = vsel %vm15587_vm11, %v4047_v10, %v3651_v38  ;;  %vm15589_vm11 = vmmov %vm15568_vm0 }
 0x2e5   : > { %v4418_v37 = vpop.f32.mrf.mxu1  ;;  %v3925_v33 = vsel %vm15568_vm0, %v3882_v15, %v3350_v17 }
 0x2e6   : > { %4814 = vst.msk [vmem:[#allocation3 + $0x23] sm:$0xff] %vm1183_vm7, %v4773_v28  ;;  %v4617_v55 = vadd.f32 %v13372_v1, %v4417_v53  ;;  %v3983_v1 = vsel %vm15570_vm10, %v3923_v61, %v3407_v14 }
 0x2e7   : > { %v3596_v56 = vpop.permute.xlu0 %3595 }
 0x2e8   : > { %v13626_v60 = vpop.f32.mrf.mxu0  ;;  %v4774_v21 = vmax.f32 %v4617_v55, 0.0  ;;  %v3409_v7 = vpop.permute.xlu1 %3408  ;;  %v4050_v49 = vsel %vm1183_vm7, %v13470_v47, %v3596_v56 }
 0x2e9   : > { %v3986_v47 = vsel %vm15570_vm10, %v3925_v33, %v3409_v7 }
 0x2ea   : > { %v9916_v31 = vpop.f32.mrf.mxu0  ;;  %4815 = vst.msk [vmem:[#allocation3 + $0x2b] sm:$0xff] %vm1183_vm7, %v4774_v21 }
 0x2eb   : > { %v3794_v36 = vpop.permute.xlu0 %3793 }
 0x2ec   : > { %v4151_v46 = vsel %vm15588_vm14, %v4091_v24, %v3794_v36  ;;  %v13636_v6 = vpop.f32.mrf.mxu0  ;;  %v4421_v35 = vpop.f32.mrf.mxu1  ;;  %vm15590_vm14 = vmmov %vm15570_vm10  ;;  %v10157_v24 = vld [vmem:[#allocation2 + $0xa0] ss:$0 sps:$4 sm:$0x33]  }
 0x2ed   : > { %4547 = vmatprep.mubr.bf16.mxu1 %v4151_v46  ;;  %v4422_v11 = vadd.f32 %v13594_v20, %v4421_v35  ;;  %v3266_v58 = vpop.permute.xlu1 %3265 }
 0x2ee   : > { %4548 = vmatmul.mubr.bf16.gmra.mxu1 %v3983_v1  ;;  %v9917_v48 = vpop.f32.mrf.mxu0  ;;  %v4423_v51 = vpop.f32.mrf.mxu1  ;;  %v3885_v7 = vsel %vm1183_vm7, %v10157_v24, %v3266_v58  ;;  %v5010_v24 = vld [vmem:[#allocation4] sm:$0xf] }
 0x2ef   : > { %v3653_v34 = vpop.permute.xlu0 %3652  ;;  %v4622_v16 = vadd.f32 %v13429_v3, %v4422_v11 }
 0x2f0   : > { %v4424_v14 = vpop.f32.mrf.mxu1  ;;  %v4093_v5 = vsel %vm15589_vm11, %v4050_v49, %v3653_v34  ;;  %vm15591_vm11 = vmmov %vm15568_vm0 }
 0x2f1   : > { %v4775_v8 = vmax.f32 %v4622_v16, 0.0  ;;  %v4425_v44 = vadd.f32 %v13594_v20, %v4424_v14  ;;  %v3352_v56 = vpop.permute.xlu1 %3351 }
 0x2f2   : > { %v4426_v3 = vpop.f32.mrf.mxu1  ;;  %v3927_v11 = vsel %vm15568_vm0, %v3885_v7, %v3352_v56  ;;  %vm15593_vm0 = vcmask 257027  }
 0x2f3   : > { %v3796_v38 = vpop.permute.xlu0 %3795  ;;  %4816 = vst.msk [vmem:[#allocation3 + $0x33] sm:$0xff] %vm1183_vm7, %v4775_v8  ;;  %v4625_v28 = vadd.f32 %v13454_v4, %v4425_v44 }
 0x2f4   : > { %v4154_v43 = vsel %vm15590_vm14, %v4093_v5, %v3796_v38  ;;  %v13651_v59 = vpop.f32.mrf.mxu0  ;;  %vm15592_vm14 = vmmov %vm15570_vm10 }
 0x2f5   : > { %4555 = vmatprep.mubr.bf16.mxu1 %v4154_v43  ;;  %v4776_v22 = vmax.f32 %v4625_v28, 0.0  ;;  %v3411_v21 = vpop.permute.xlu1 %3410 }
 0x2f6   : > { %4556 = vmatmul.mubr.bf16.gmra.mxu1 %v3986_v47  ;;  %v9920_v41 = vpop.f32.mrf.mxu0 }
 0x2f7   : > { %v3598_v53 = vpop.permute.xlu0 %3597  ;;  %4817 = vst.msk [vmem:[#allocation3 + $0x3b] sm:$0xff] %vm1183_vm7, %v4776_v22  ;;  %v4429_v23 = vpop.f32.mrf.mxu1 }
 0x2f8   : > { %v13654_v17 = vpop.f32.mrf.mxu0  ;;  %v4430_v37 = vadd.f32 %v13594_v20, %v4429_v23  ;;  %v4053_v31 = vsel %vm1183_vm7, %v13450_v40, %v3598_v53  ;;  %v3989_v40 = vsel %vm15570_vm10, %v3927_v11, %v3411_v21  ;;  %v5011_v21 = vld [vmem:[#allocation4 + $0x4] sm:$0xf]  ;;  %vm15595_vm10 = vcmask 1045504  }
 0x2f9   : > { %v4431_v4 = vpop.f32.mrf.mxu1  ;;  %v13686_v7 = vcombine.low %v5010_v24, %v5011_v21 }
 0x2fa   : > { %v9921_v26 = vpop.f32.mrf.mxu0  ;;  %v4630_v10 = vadd.f32 %v13485_v30, %v4430_v37  ;;  %v4854_v8 = vld [vmem:[#allocation3 + $0x26] ss:$2 sm:$0xff]  ;;  %v4856_v14 = vld [vmem:[#allocation3 + $0x27] ss:$2 sm:$0xff] }
 0x2fb   : > { %v3655_v55 = vpop.permute.xlu0 %3654  ;;  %v4432_v61 = vpop.f32.mrf.mxu1  ;;  %v4861_v43 = vmax.f32 %v4854_v8, %v4856_v14 }
 0x2fc   : > { %v4777_v36 = vmax.f32 %v4630_v10, 0.0  ;;  %v4095_v46 = vsel %vm15591_vm11, %v4053_v31, %v3655_v55  ;;  %v4433_v1 = vadd.f32 %v13594_v20, %v4432_v61  ;;  %vm4874_vm11 = vcmask 256000   ;;  %v5024_v61 = vld [vmem:[#allocation4] sm:$0xe] }
 0x2fd   : > { %v4434_v30 = vpop.f32.mrf.mxu1 }
 0x2fe   : > { %4818 = vst.msk [vmem:[#allocation3 + $0x43] sm:$0xff] %vm1183_vm7, %v4777_v36  ;;  %v4633_v16 = vadd.f32 %v13505_v32, %v4433_v1  ;;  %v9037_v30 = vcombine.low %v5024_v61, %v5011_v21 }
 0x2ff   : > { %v3798_v35 = vpop.permute.xlu0 %3797 }
 0x300   : > { %v4157_v48 = vsel %vm15592_vm14, %v4095_v46, %v3798_v35  ;;  %v13666_v34 = vpop.f32.mrf.mxu0  ;;  %v4778_v49 = vmax.f32 %v4633_v16, 0.0  ;;  %v5073_v16 = vshll.u32 %v13686_v7, 16  ;;  %vm15594_vm14 = vcmask 257024  }
 0x301   : > { %4563 = vmatprep.mubr.bf16.mxu1 %v4157_v48 }
 0x302   : > { %4564 = vmatmul.mubr.bf16.gmra.mxu1 %v3989_v40  ;;  %v9924_v51 = vpop.f32.mrf.mxu0  ;;  %4819 = vst.msk [vmem:[#allocation3 + $0x4b] sm:$0xff] %vm1183_vm7, %v4778_v49 }
 0x304   : > { %v13670_v58 = vpop.f32.mrf.mxu0 }
 0x305   : > { %v4437_v15 = vpop.f32.mrf.mxu1  ;;  %v4858_v38 = vld [vmem:[#allocation3 + $0x38] ss:$2 sm:$0xff]  ;;  %v4860_v33 = vld [vmem:[#allocation3 + $0x39] ss:$2 sm:$0xff] }
 0x306   : > { %v4438_v5 = vadd.f32 %v13594_v20, %v4437_v15  ;;  %v9925_v44 = vpop.f32.mrf.mxu0  ;;  %v4862_v47 = vmax.f32 %v4858_v38, %v4860_v33  ;;  %v5071_v33 = vshrl.u32 %v13686_v7, 16 }
 0x307   : > { %v4439_v3 = vpop.f32.mrf.mxu1 }
 0x308   : > { %v4638_v32 = vadd.f32 %v13516_v2, %v4438_v5  ;;  %v4863_v22 = vmax.f32 %v4861_v43, %v4862_v47  ;;  %v5075_v3 = vrot.slane %v5073_v16, 1 }
 0x309   : > { %v4440_v28 = vpop.f32.mrf.mxu1 }
 0x30a   : > { %v4779_v41 = vmax.f32 %v4638_v32, 0.0  ;;  %v4441_v53 = vadd.f32 %v13594_v20, %v4440_v28  ;;  %v9310_v23 = vpack.c.bf16 %v4863_v22, %v4863_v22 }
 0x30b   : > { %v4442_v56 = vpop.f32.mrf.mxu1 }
 0x30c   : > { %4820 = vst.msk [vmem:[#allocation3 + $0x53] sm:$0xff] %vm1183_vm7, %v4779_v41  ;;  %v4641_v37 = vadd.f32 %v13523_v27, %v4441_v53  ;;  %v4868_v55 = vrot.slane %v9310_v23, 5  ;;  %v5076_v53 = vor.u32 %v5075_v3, %v5071_v33  ;;  %v5029_v33 = vld [vmem:[#allocation4 + $0x4] sm:$0xc] }
 0x30d   : > { %v13678_v26 = vpop.f32.mrf.mxu0 }
 0x30e   : > { %v4780_v10 = vmax.f32 %v4641_v37, 0.0  ;;  %v4869_v2 = vrot.slane %v4868_v55, 4  ;;  %4873 = vst.msk [vmem:[#allocation4 + $0x8] sm:$0x8] %vm15593_vm0, %v4868_v55  ;;  %vm15596_vm0 = vcmask 257025  }
 0x30f   : > { %v9928_v4 = vpop.f32.mrf.mxu0 }
 0x310   : > { %4821 = vst.msk [vmem:[#allocation3 + $0x5b] sm:$0xff] %vm1183_vm7, %v4780_v10 }
 0x311   : > { %v13682_v31 = vpop.f32.mrf.mxu0  ;;  %v4445_v36 = vpop.f32.mrf.mxu1  ;;  %4875 = vst.msk [vmem:[#allocation4 + $0xc] sm:$0x7] %vm4874_vm11, %v4869_v2 }
 0x312   : > { %v4446_v27 = vadd.f32 %v13594_v20, %v4445_v36 }
 0x313   : > { %v9929_v46 = vpop.f32.mrf.mxu0  ;;  %v4447_v1 = vpop.f32.mrf.mxu1  ;;  %v4877_v55 = vld [vmem:[#allocation3 + $0x4a] ss:$2 sm:$0xff]  ;;  %v4879_v10 = vld [vmem:[#allocation3 + $0x4b] ss:$2 sm:$0xff] }
 0x314   : > { %v4646_v35 = vadd.f32 %v13530_v62, %v4446_v27  ;;  %v5142_v62 = vrot.slane %v9037_v30, 1  ;;  %v4884_v46 = vmax.f32 %v4877_v55, %v4879_v10 }
 0x315   : > { %v4448_v11 = vpop.f32.mrf.mxu1  ;;  %v13695_v15 = vld [vmem:[#allocation4 + $0x8] sm:$0xf] }
 0x316   : > { %v4781_v48 = vmax.f32 %v4646_v35, 0.0  ;;  %v4449_v40 = vadd.f32 %v13594_v20, %v4448_v11 }
 0x317   : > { %v4450_v51 = vpop.f32.mrf.mxu1  ;;  %v13691_v49 = vpop.f32.mrf.mxu0 }
 0x318   : > { %4822 = vst.msk [vmem:[#allocation3 + $0x63] sm:$0xff] %vm1183_vm7, %v4781_v48  ;;  %v4649_v8 = vadd.f32 %v13538_v54, %v4449_v40  ;;  %v13697_v5 = vld [vmem:[#allocation4 + $0xc] sm:$0xf] }
 0x319   : > { %v9932_v14 = vpop.f32.mrf.mxu0  ;;  %v13701_v38 = vcombine.low %v13695_v15, %v13697_v5 }
 0x31a   : > { %v4782_v44 = vmax.f32 %v4649_v8, 0.0 }
 0x31b   : > { %v13704_v43 = vpop.f32.mrf.mxu0  ;;  %v5143_v54 = vrot.slane %v13701_v38, 1  ;;  %v5078_v47 = vshll.u32 %v13701_v38, 16 }
 0x31c   : > { %4823 = vst.msk [vmem:[#allocation3 + $0x6b] sm:$0xff] %vm1183_vm7, %v4782_v44 }
 0x31d   : > { %v4453_v32 = vpop.f32.mrf.mxu1  ;;  %v9933_v28 = vpop.f32.mrf.mxu0  ;;  %v5144_v41 = vsel %vm605_vm1, %v5142_v62, %v5143_v54  ;;  %v13713_v56 = vrot.slane %v5078_v47, 1  ;;  %v5025_v62 = vld [vmem:[#allocation4 + $0x4] sm:$0xe] }
 0x31e   : > { %v4454_v22 = vadd.f32 %v13594_v20, %v4453_v32  ;;  %5155 = vrot.lane.b32.xlu1 %v5144_v41, %s10375_s26  ;;  %v9038_v32 = vcombine.low %v5025_v62, %v13695_v15 }
 0x31f   : > { %v4455_v23 = vpop.f32.mrf.mxu1  ;;  %v5081_v2 = vsel %vm392_vm2, %v5076_v53, %v13713_v56  ;;  %v4881_v36 = vld [vmem:[#allocation3 + $0x5c] ss:$2 sm:$0xff] }
 0x320   : > { %v4654_v37 = vadd.f32 %v13541_v39, %v4454_v22  ;;  %v9046_v23 = vcombine.low %v5029_v33, %v13695_v15  ;;  %v5213_v10 = vshrl.u32 %v9038_v32, 16  ;;  %v10166_v15 = vld [vmem:[%s15426_s1 + $0x198] sm:$0xff]  }
 0x321   : > { %v4456_v4 = vpop.f32.mrf.mxu1  ;;  %9518 = vmatprep.subr.bf16.mxu1 %v10166_v15 }
 0x322   : > { %v4783_v24 = vmax.f32 %v4654_v37, 0.0  ;;  %v4457_v21 = vadd.f32 %v13594_v20, %v4456_v4  ;;  %5125 = vrot.lane.b32.xlu1 %v5081_v2, %s10376_s27  ;;  %v5216_v4 = vshll.u32 %v9038_v32, 16 }
 0x323   : > { %v4883_v27 = vld [vmem:[#allocation3 + $0x5d] ss:$2 sm:$0xff]  ;;  %v4458_v61 = vpop.f32.mrf.mxu1  ;;  %v13723_v35 = vpop.f32.mrf.mxu0 }
 0x324   : > { %v4885_v1 = vmax.f32 %v4881_v36, %v4883_v27  ;;  %4824 = vst.msk [vmem:[#allocation3 + $0x73] sm:$0xff] %vm1183_vm7, %v4783_v24  ;;  %v4657_v39 = vadd.f32 %v13547_v9, %v4457_v21  ;;  %v5277_v36 = vrot.slane %v9046_v23, 2  ;;  %v5182_v27 = vrot.slane %v9038_v32, 1 }
 0x325   : > { %v9936_v48 = vpop.f32.mrf.mxu0 }
 0x326   : > { %v4886_v11 = vmax.f32 %v4884_v46, %v4885_v1  ;;  %v4784_v30 = vmax.f32 %v4657_v39, 0.0  ;;  %v5218_v48 = vrot.slane %v5216_v4, 2 }
 0x327   : > { %v13726_v16 = vpop.f32.mrf.mxu0 }
 0x328   : > { %v4887_v40 = vpack.c.bf16 %v4886_v11, %v4886_v11  ;;  %4825 = vst.msk [vmem:[#allocation3 + $0x7b] sm:$0xff] %vm1183_vm7, %v4784_v30  ;;  %v4461_v51 = vpop.f32.mrf.mxu1  ;;  %v5215_v30 = vrot.slane %v5213_v10, 1 }
 0x329   : > { %v4462_v8 = vadd.f32 %v13594_v20, %v4461_v51  ;;  %v9937_v14 = vpop.f32.mrf.mxu0 }
 0x32a   : > { %4888 = vst.msk [vmem:[#allocation4 + $0x10] sm:$0xf] %vm15594_vm14, %v4887_v40  ;;  %v4463_v44 = vpop.f32.mrf.mxu1  ;;  %v10168_v40 = vld [vmem:[%s15426_s1 + $0x190] sm:$0xff]   ;;  %v5219_v23 = vor.u32 %v5218_v48, %v5215_v30  ;;  %vm15597_vm14 = vcmask 253952  }
 0x32b   : > { %v4662_v9 = vadd.f32 %v13552_v25, %v4462_v8 }
 0x32c   : > { %v4464_v3 = vpop.f32.mrf.mxu1 }
 0x32d   : > { %v13731_v47 = vpop.f32.mrf.mxu0  ;;  %v4785_v28 = vmax.f32 %v4662_v9, 0.0  ;;  %v4465_v22 = vadd.f32 %v13594_v20, %v4464_v3  ;;  %v10169_v9 = vld [vmem:[%s15426_s1 + $0x150] sm:$0xff]  }
 0x32e   : > { %v4466_v41 = vpop.f32.mrf.mxu1 }
 0x32f   : > { %v9940_v53 = vpop.f32.mrf.mxu0  ;;  %4826 = vst.msk [vmem:[#allocation3 + $0x83] sm:$0xff] %vm1183_vm7, %v4785_v28  ;;  %v4665_v37 = vadd.f32 %v13560_v0, %v4465_v22  ;;  %v10167_v0 = vld [vmem:[%s15426_s1 + $0x158] sm:$0xff]   ;;  %v4890_v22 = vld [vmem:[#allocation3 + $0x6e] ss:$2 sm:$0xff]  ;;  %v4892_v41 = vld [vmem:[#allocation3 + $0x6f] ss:$2 sm:$0xff] }
 0x330   : > { %9519 = vmatpush3.bf16.msra.mxu1 %v10167_v0 }
 0x331   : > { %v13738_v55 = vpop.f32.mrf.mxu0  ;;  %v13740_v25 = vld [vmem:[#allocation4 + $0x10] sm:$0xf]  ;;  %v4786_v24 = vmax.f32 %v4665_v37, 0.0  ;;  %9520 = vmatprep.subr.bf16.mxu1 %v10168_v40  ;;  %v10170_v40 = vld [vmem:[%s15426_s1 + $0x188] sm:$0xff]  }
 0x332   : > { %v13744_v21 = vcombine.low %v13697_v5, %v13740_v25 }
 0x333   : > { %v9941_v2 = vpop.f32.mrf.mxu0  ;;  %4827 = vst.msk [vmem:[#allocation3 + $0x8b] sm:$0xff] %vm1183_vm7, %v4786_v24  ;;  %v4469_v11 = vpop.f32.mrf.mxu1 }
 0x334   : > { %v5278_v61 = vrot.slane %v13744_v21, 2  ;;  %v5183_v46 = vrot.slane %v13744_v21, 1  ;;  %v5221_v1 = vshrl.u32 %v13744_v21, 16  ;;  %v5224_v39 = vshll.u32 %v13744_v21, 16  ;;  %9521 = vmatpush3.bf16.msra.mxu1 %v10169_v9 }
 0x335   : > { %v4470_v51 = vadd.f32 %v13594_v20, %v4469_v11  ;;  %v13761_v8 = vpop.f32.mrf.mxu0  ;;  %v4471_v33 = vpop.f32.mrf.mxu1  ;;  %9522 = vmatprep.subr.bf16.mxu1 %v10170_v40 }
 0x336   : > { %v5279_v14 = vsel %vm15595_vm10, %v5277_v36, %v5278_v61  ;;  %v5184_v62 = vsel %vm605_vm1, %v5182_v27, %v5183_v46  ;;  %v5223_v44 = vrot.slane %v5221_v1, 1  ;;  %v5226_v3 = vrot.slane %v5224_v39, 2 }
 0x337   : > { %5290 = vrot.lane.b32.xlu0 %v5279_v14, %s10376_s27  ;;  %5195 = vrot.lane.b32.xlu1 %v5184_v62, %s10377_s30  ;;  %v4670_v32 = vadd.f32 %v13563_v29, %v4470_v51  ;;  %v9944_v28 = vpop.f32.mrf.mxu0  ;;  %v4472_v53 = vpop.f32.mrf.mxu1  ;;  %v4897_v29 = vmax.f32 %v4890_v22, %v4892_v41  ;;  %v10171_v51 = vld [vmem:[%s15426_s1 + $0x148] sm:$0xff]  }
 0x338   : > { %v13775_v37 = vor.u32 %v5226_v3, %v5223_v44  ;;  %v4473_v4 = vadd.f32 %v13594_v20, %v4472_v53  ;;  %9523 = vmatpush3.bf16.msra.mxu1 %v10171_v51 }
 0x339   : > { %v4787_v10 = vmax.f32 %v4670_v32, 0.0  ;;  %v4760_v24 = vpop.f32.mrf.mxu0  ;;  %v4474_v27 = vpop.f32.mrf.mxu1  ;;  %v5030_v32 = vld [vmem:[#allocation4 + $0x8] sm:$0xc] }
 0x33a   : > { %v4894_v2 = vld [vmem:[#allocation3 + $0x80] ss:$2 sm:$0xff]  ;;  %v4896_v36 = vld [vmem:[#allocation3 + $0x81] ss:$2 sm:$0xff]  ;;  %v13780_v15 = vsel %vm15480_vm4, %v5219_v23, %v13775_v37  ;;  %v4673_v1 = vadd.f32 %v13569_v63, %v4473_v4  ;;  %v9047_v41 = vcombine.low %v5030_v32, %v13697_v5  ;;  %v5033_v23 = vld [vmem:[#allocation4 + $0x8] sm:$0x8] }
 0x33b   : > { %v4898_v0 = vmax.f32 %v4894_v2, %v4896_v36  ;;  %4828 = vst.msk [vmem:[#allocation3 + $0x93] sm:$0xff] %vm1183_vm7, %v4787_v10  ;;  %v9945_v39 = vpop.f32.mrf.mxu0  ;;  %v9051_v4 = vcombine.low %v5033_v23, %v13697_v5 }
 0x33c   : > { %v4788_v30 = vmax.f32 %v4673_v1, 0.0  ;;  %v5342_v2 = vshrl.u32 %v9047_v41, 16  ;;  %v5345_v36 = vshll.u32 %v9047_v41, 16  ;;  %v5082_v1 = vshrl.u32 %v13701_v38, 16 }
 0x33d   : > { %v4899_v11 = vmax.f32 %v4897_v29, %v4898_v0  ;;  %v5400_v29 = vrot.slane %v9051_v4, 3  ;;  %v5311_v0 = vrot.slane %v9047_v41, 2 }
 0x33e   : > { %4829 = vst.msk [vmem:[#allocation3 + $0x9b] sm:$0xff] %vm1183_vm7, %v4788_v30  ;;  %v5344_v40 = vrot.slane %v5342_v2, 2  ;;  %v5347_v51 = vrot.slane %v5345_v36, 3  ;;  %v10175_v2 = vld [vmem:[%s15426_s1 + $0x138] sm:$0xff]  }
 0x33f   : > { %v9311_v48 = vpack.c.bf16 %v4899_v11, %v4899_v11 }
 0x340   : > { %v4477_v62 = vpop.f32.mrf.mxu1 }
 0x341   : > { %v4904_v14 = vrot.slane %v9311_v48, 7  ;;  %v4478_v44 = vadd.f32 %v13594_v20, %v4477_v62 }
 0x342   : > { %v4479_v9 = vpop.f32.mrf.mxu1 }
 0x343   : > { %v4905_v63 = vrot.slane %v4904_v14, 4  ;;  %4909 = vst.msk [vmem:[#allocation4 + $0x14] sm:$0xe] %vm15596_vm0, %v4904_v14  ;;  %v4678_v33 = vadd.f32 %v13575_v19, %v4478_v44  ;;  %v10172_v14 = vld [vmem:[%s15426_s1 + $0x180] sm:$0xff]   ;;  %vm4930_vm0 = vcmask 257026  }
 0x344   : > { %v4480_v3 = vpop.f32.mrf.mxu1  ;;  %9524 = vmatprep.subr.bf16.mxu1 %v10172_v14 }
 0x345   : > { %4910 = vst.msk [vmem:[#allocation4 + $0x18] sm:$0x1] %vm15597_vm14, %v4905_v63  ;;  %v4789_v28 = vmax.f32 %v4678_v33, 0.0  ;;  %v4481_v22 = vadd.f32 %v13594_v20, %v4480_v3  ;;  %v10173_v3 = vld [vmem:[%s15426_s1 + $0x140] sm:$0xff]   ;;  %v4914_v14 = vld [vmem:[#allocation3 + $0x93] ss:$2 sm:$0xff] }
 0x346   : > { %v4482_v53 = vpop.f32.mrf.mxu1  ;;  %9525 = vmatpush3.bf16.msra.mxu1 %v10173_v3  ;;  %vm15598_vm14 = vcmask 254976  }
 0x347   : > { %4830 = vst.msk [vmem:[#allocation3 + $0xa3] sm:$0xff] %vm1183_vm7, %v4789_v28  ;;  %v4681_v10 = vadd.f32 %v13583_v42, %v4481_v22  ;;  %v5084_v53 = vor.u32 %v5082_v1, %v13713_v56  ;;  %v4765_v1 = vpop.f32.mrf.mxu0 }
 0x349   : > { %v4790_v19 = vmax.f32 %v4681_v10, 0.0  ;;  %v5348_v10 = vor.u32 %v5347_v51, %v5344_v40  ;;  %v4912_v51 = vld [vmem:[#allocation3 + $0x92] ss:$2 sm:$0xff] }
 0x34a   : > { %v13800_v24 = vld [vmem:[#allocation4 + $0x14] sm:$0xf] }
 0x34b   : > { %v13804_v27 = vcombine.low %v13740_v25, %v13800_v24  ;;  %4831 = vst.msk [vmem:[#allocation3 + $0xab] sm:$0xff] %vm1183_vm7, %v4790_v19  ;;  %v4485_v39 = vpop.f32.mrf.mxu1 }
 0x34c   : > { %v4486_v48 = vadd.f32 %v13594_v20, %v4485_v39 }
 0x34d   : > { %v5401_v42 = vrot.slane %v13804_v27, 3  ;;  %v5312_v5 = vrot.slane %v13804_v27, 2  ;;  %v5145_v11 = vrot.slane %v13804_v27, 1  ;;  %v5086_v30 = vshll.u32 %v13804_v27, 16  ;;  %v4487_v62 = vpop.f32.mrf.mxu1 }
 0x34e   : > { %v5090_v25 = vshrl.u32 %v13804_v27, 16  ;;  %v4686_v32 = vadd.f32 %v13586_v18, %v4486_v48  ;;  %v10179_v48 = vld [vmem:[%s15426_s1 + $0x168] sm:$0xff]  }
 0x34f   : > { %v5402_v44 = vsel %vm1141_vm6, %v5400_v29, %v5401_v42  ;;  %v5313_v63 = vsel %vm15595_vm10, %v5311_v0, %v5312_v5  ;;  %v5146_v9 = vsel %vm605_vm1, %v5143_v54, %v5145_v11  ;;  %v5350_v33 = vrot.slane %v5086_v30, 3  ;;  %v10174_v54 = vld [vmem:[%s15426_s1 + $0x178] sm:$0xff]   ;;  %v4488_v41 = vpop.f32.mrf.mxu1  ;;  %v10177_v0 = vld [vmem:[%s15426_s1 + $0x170] sm:$0xff]  }
 0x350   : > { %9955 = vmatmul.mubr.msk.bf16.vlgmr.msra.gmra.mxu0 %vm1183_vm7, %v5402_v44  ;;  %5324 = vrot.lane.b32.xlu0 %v5313_v63, %s10375_s26  ;;  %v5349_v28 = vrot.slane %v5090_v25, 2  ;;  %v13836_v22 = vrot.slane %v5086_v30, 1  ;;  %v4791_v18 = vmax.f32 %v4686_v32, 0.0  ;;  %v4489_v23 = vadd.f32 %v13594_v20, %v4488_v41  ;;  %v9948_v30 = vpop.f32.mrf.mxu0  ;;  %v10180_v32 = vld [vmem:[%s15426_s1 + $0x128] sm:$0xff]  }
 0x351   : > { %5157 = vrot.lane.b32.xlu1 %v5146_v9, %s10375_s26  ;;  %9958 = vmatprep.mubr.msk.bf16.mxu0 %vm15555_vm8, %v15492_v45  ;;  %v4490_v19 = vpop.f32.mrf.mxu1 }
 0x352   : > { %v13846_v4 = vor.u32 %v5350_v33, %v5349_v28  ;;  %4832 = vst.msk [vmem:[#allocation3 + $0xb3] sm:$0xff] %vm1183_vm7, %v4791_v18  ;;  %v4689_v56 = vadd.f32 %v13602_v13, %v4489_v23  ;;  %v5089_v29 = vsel %vm392_vm2, %v5084_v53, %v13836_v22  ;;  %9526 = vmatprep.subr.bf16.mxu1 %v10174_v54  ;;  %v10178_v13 = vld [vmem:[%s15426_s1 + $0x130] sm:$0xff]   ;;  %v4768_v40 = vpop.f32.mrf.mxu0  ;;  %v4916_v9 = vld [vmem:[#allocation3 + $0xa4] ss:$2 sm:$0xff] }
 0x353   : > { %9527 = vmatpush3.bf16.msra.mxu1 %v10175_v2  ;;  %v4919_v28 = vmax.f32 %v4912_v51, %v4914_v14  ;;  %v10181_v53 = vld [vmem:[%s15426_s1 + $0x160] sm:$0xff]  }
 0x354   : > { %v5352_v36 = vsel %vm15479_vm3, %v5348_v10, %v13846_v4  ;;  %v4792_v39 = vmax.f32 %v4689_v56, 0.0  ;;  %9528 = vmatprep.subr.bf16.mxu1 %v10177_v0  ;;  %v9949_v63 = vpop.f32.mrf.mxu0  ;;  %v10182_v56 = vld [vmem:[%s15426_s1 + $0x120] sm:$0xff]  }
 0x355   : > { %5383 = vrot.lane.b32.xlu0 %v5352_v36, %s10377_s30  ;;  %5127 = vrot.lane.b32.xlu1 %v5089_v29, %s10376_s27 }
 0x356   : > { %4833 = vst.msk [vmem:[#allocation3 + $0xbb] sm:$0xff] %vm1183_vm7, %v4792_v39 }
 0x357   : > { %v4493_v62 = vpop.f32.mrf.mxu1  ;;  %9529 = vmatpush3.bf16.msra.mxu1 %v10178_v13 }
 0x358   : > { %v4494_v44 = vadd.f32 %v13594_v20, %v4493_v62  ;;  %9530 = vmatprep.subr.bf16.mxu1 %v10179_v48 }
 0x359   : > { %v4918_v33 = vld [vmem:[#allocation3 + $0xa5] ss:$2 sm:$0xff]  ;;  %v4495_v3 = vpop.f32.mrf.mxu1 }
 0x35a   : > { %v4920_v54 = vmax.f32 %v4916_v9, %v4918_v33  ;;  %v4694_v41 = vadd.f32 %v13606_v12, %v4494_v44 }
 0x35b   : > { %v4496_v18 = vpop.f32.mrf.mxu1  ;;  %9531 = vmatpush3.bf16.msra.mxu1 %v10180_v32 }
 0x35c   : > { %v4921_v23 = vmax.f32 %v4919_v28, %v4920_v54  ;;  %v4793_v10 = vmax.f32 %v4694_v41, 0.0  ;;  %v4497_v19 = vadd.f32 %v13594_v20, %v4496_v18  ;;  %9532 = vmatprep.subr.bf16.mxu1 %v10181_v53 }
 0x35d   : > { %v4498_v2 = vpop.f32.mrf.mxu1 }
 0x35e   : > { %v9312_v36 = vpack.c.bf16 %v4921_v23, %v4921_v23  ;;  %4834 = vst.msk [vmem:[#allocation3 + $0xc3] sm:$0xff] %vm1183_vm7, %v4793_v10  ;;  %v4697_v12 = vadd.f32 %v13614_v57, %v4497_v19 }
 0x35f   : > { %9533 = vmatpush3.bf16.msra.mxu1 %v10182_v56 }
 0x360   : > { %v4926_v29 = vrot.slane %v9312_v36, 6  ;;  %v4794_v0 = vmax.f32 %v4697_v12, 0.0 }
 0x362   : > { %v4927_v1 = vrot.slane %v4926_v29, 4  ;;  %4931 = vst.msk [vmem:[#allocation4 + $0x18] sm:$0xc] %vm4930_vm0, %v4926_v29 }
 0x363   : > { %4835 = vst.msk [vmem:[#allocation3 + $0xcb] sm:$0xff] %vm1183_vm7, %v4794_v0 }
 0x364   : > { %4933 = vst.msk [vmem:[#allocation4 + $0x1c] sm:$0x3] %vm15598_vm14, %v4927_v1  ;;  %vm15599_vm14 = vcmask 257027  }
 0x365   : > { %v4501_v39 = vpop.f32.mrf.mxu1  ;;  %v4935_v54 = vld [vmem:[#allocation3 + $0xb6] ss:$2 sm:$0xff]  ;;  %v4937_v41 = vld [vmem:[#allocation3 + $0xb7] ss:$2 sm:$0xff] }
 0x366   : > { %v4502_v30 = vadd.f32 %v13594_v20, %v4501_v39  ;;  %v4942_v56 = vmax.f32 %v4935_v54, %v4937_v41 }
 0x367   : > { %v4503_v13 = vpop.f32.mrf.mxu1 }
 0x368   : > { %v4702_v48 = vadd.f32 %v13626_v60, %v4502_v30 }
 0x369   : > { %v4504_v40 = vpop.f32.mrf.mxu1  ;;  %v5016_v62 = vld [vmem:[#allocation4 + $0x18] sm:$0xf] }
 0x36a   : > { %v4795_v57 = vmax.f32 %v4702_v48, 0.0  ;;  %v4505_v51 = vadd.f32 %v13594_v20, %v4504_v40  ;;  %v13892_v63 = vcombine.low %v13800_v24, %v5016_v62 }
 0x36b   : > { %v4506_v14 = vpop.f32.mrf.mxu1 }
 0x36c   : > { %4836 = vst.msk [vmem:[#allocation3 + $0xd3] sm:$0xff] %vm1183_vm7, %v4795_v57  ;;  %v4705_v44 = vadd.f32 %v13636_v6, %v4505_v51  ;;  %v5280_v33 = vrot.slane %v13892_v63, 2  ;;  %v5185_v3 = vrot.slane %v13892_v63, 1  ;;  %v5230_v60 = vshrl.u32 %v13892_v63, 16 }
 0x36d   : > { %v5233_v32 = vshll.u32 %v13892_v63, 16 }
 0x36e   : > { %v4796_v9 = vmax.f32 %v4705_v44, 0.0  ;;  %v5281_v6 = vsel %vm15595_vm10, %v5278_v61, %v5280_v33  ;;  %v5186_v24 = vsel %vm605_vm1, %v5183_v46, %v5185_v3  ;;  %v5232_v28 = vrot.slane %v5230_v60, 1 }
 0x36f   : > { %5292 = vrot.lane.b32.xlu0 %v5281_v6, %s10376_s27  ;;  %5197 = vrot.lane.b32.xlu1 %v5186_v24, %s10377_s30  ;;  %v5235_v18 = vrot.slane %v5233_v32, 2 }
 0x370   : > { %4837 = vst.msk [vmem:[#allocation3 + $0xdb] sm:$0xff] %vm1183_vm7, %v4796_v9 }
 0x371   : > { %v4509_v53 = vpop.f32.mrf.mxu1  ;;  %v13912_v2 = vor.u32 %v5235_v18, %v5232_v28 }
 0x372   : > { %v4510_v23 = vadd.f32 %v13594_v20, %v4509_v53 }
 0x373   : > { %v4939_v10 = vld [vmem:[#allocation3 + $0xc8] ss:$2 sm:$0xff]  ;;  %v4941_v19 = vld [vmem:[#allocation3 + $0xc9] ss:$2 sm:$0xff]  ;;  %v4511_v61 = vpop.f32.mrf.mxu1  ;;  %v13918_v12 = vsel %vm15480_vm4, %v13775_v37, %v13912_v2 }
 0x374   : > { %v4943_v21 = vmax.f32 %v4939_v10, %v4941_v19  ;;  %v4710_v46 = vadd.f32 %v13651_v59, %v4510_v23 }
 0x375   : > { %v4512_v36 = vpop.f32.mrf.mxu1 }
 0x376   : > { %v4944_v29 = vmax.f32 %v4942_v56, %v4943_v21  ;;  %v4797_v0 = vmax.f32 %v4710_v46, 0.0  ;;  %v4513_v1 = vadd.f32 %v13594_v20, %v4512_v36 }
 0x377   : > { %v4514_v39 = vpop.f32.mrf.mxu1 }
 0x378   : > { %v9313_v30 = vpack.c.bf16 %v4944_v29, %v4944_v29  ;;  %4838 = vst.msk [vmem:[#allocation3 + $0xe3] sm:$0xff] %vm1183_vm7, %v4797_v0  ;;  %v4713_v13 = vadd.f32 %v13654_v17, %v4513_v1  ;;  %v5092_v0 = vor.u32 %v5090_v25, %v13836_v22 }
 0x37a   : > { %v4949_v48 = vrot.slane %v9313_v30, 5  ;;  %v4798_v40 = vmax.f32 %v4713_v13, 0.0 }
 0x37c   : > { %v4950_v57 = vrot.slane %v4949_v48, 4  ;;  %4953 = vst.msk [vmem:[#allocation4 + $0x1c] sm:$0x8] %vm15599_vm14, %v4949_v48  ;;  %vm15601_vm14 = vcmask 257024  }
 0x37d   : > { %4839 = vst.msk [vmem:[#allocation3 + $0xeb] sm:$0xff] %vm1183_vm7, %v4798_v40 }
 0x37e   : > { %v4517_v59 = vpop.f32.mrf.mxu1  ;;  %4954 = vst.msk [vmem:[#allocation4 + $0x20] sm:$0x7] %vm4874_vm11, %v4950_v57  ;;  %vm15600_vm11 = vmmov %vm15595_vm10 }
 0x37f   : > { %v4518_v37 = vadd.f32 %v13594_v20, %v4517_v59  ;;  %v4956_v39 = vld [vmem:[#allocation3 + $0xda] ss:$2 sm:$0xff]  ;;  %v4958_v30 = vld [vmem:[#allocation3 + $0xdb] ss:$2 sm:$0xff] }
 0x380   : > { %v4519_v51 = vpop.f32.mrf.mxu1 }
 0x381   : > { %v4718_v14 = vadd.f32 %v13666_v34, %v4518_v37 }
 0x382   : > { %v4520_v44 = vpop.f32.mrf.mxu1 }
 0x383   : > { %v4799_v9 = vmax.f32 %v4718_v14, 0.0  ;;  %v4521_v60 = vadd.f32 %v13594_v20, %v4520_v44  ;;  %v5017_v17 = vld [vmem:[#allocation4 + $0x1c] sm:$0xf] }
 0x384   : > { %v4522_v32 = vpop.f32.mrf.mxu1  ;;  %v13929_v6 = vcombine.low %v5016_v62, %v5017_v17 }
 0x385   : > { %4840 = vst.msk [vmem:[#allocation3 + $0xf3] sm:$0xff] %vm1183_vm7, %v4799_v9  ;;  %v4721_v24 = vadd.f32 %v13670_v58, %v4521_v60  ;;  %v13933_v28 = vld [vmem:[#allocation4 + $0x20] sm:$0xf] }
 0x386   : > { %v5403_v41 = vrot.slane %v13929_v6, 3  ;;  %v5314_v53 = vrot.slane %v13929_v6, 2  ;;  %v5147_v34 = vrot.slane %v13929_v6, 1  ;;  %v5094_v18 = vshll.u32 %v13929_v6, 16 }
 0x387   : > { %v4800_v54 = vmax.f32 %v4721_v24, 0.0  ;;  %v13940_v23 = vcombine.low %v5017_v17, %v13933_v28  ;;  %v5098_v62 = vshrl.u32 %v13929_v6, 16 }
 0x388   : > { %v5404_v58 = vsel %vm1141_vm6, %v5401_v42, %v5403_v41  ;;  %v5315_v10 = vsel %vm15600_vm11, %v5312_v5, %v5314_v53  ;;  %v5148_v19 = vsel %vm605_vm1, %v5145_v11, %v5147_v34  ;;  %v13961_v56 = vrot.slane %v5094_v18, 1  ;;  %vm15602_vm11 = vmmov %vm15595_vm10 }
 0x389   : > { %4841 = vst.msk [vmem:[#allocation3 + $0xfb] sm:$0xff] %vm1183_vm7, %v4800_v54  ;;  %9959 = vmatmul.mubr.msk.bf16.gmra.mxu0 %vm1183_vm7, %v5404_v58  ;;  %5326 = vrot.lane.b32.xlu0 %v5315_v10, %s10375_s26  ;;  %v5282_v42 = vrot.slane %v13940_v23, 2  ;;  %v5353_v21 = vrot.slane %v5098_v62, 2  ;;  %v5354_v46 = vrot.slane %v5094_v18, 3  ;;  %v5239_v11 = vshrl.u32 %v13940_v23, 16 }
 0x38a   : > { %v4525_v61 = vpop.f32.mrf.mxu1  ;;  %5159 = vrot.lane.b32.xlu1 %v5148_v19, %s10375_s26  ;;  %9962 = vmatprep.mubr.msk.bf16.mxu0 %vm15555_vm8, %v15492_v45  ;;  %v5242_v36 = vshll.u32 %v13940_v23, 16  ;;  %v5097_v59 = vsel %vm392_vm2, %v5092_v0, %v13961_v56  ;;  %v5187_v22 = vrot.slane %v13940_v23, 1 }
 0x38b   : > { %v4526_v5 = vadd.f32 %v13594_v20, %v4525_v61  ;;  %v5283_v1 = vsel %vm15595_vm10, %v5280_v33, %v5282_v42  ;;  %v13981_v48 = vor.u32 %v5354_v46, %v5353_v21  ;;  %v5241_v40 = vrot.slane %v5239_v11, 1 }
 0x38c   : > { %v4527_v29 = vpop.f32.mrf.mxu1  ;;  %v5244_v57 = vrot.slane %v5242_v36, 2  ;;  %v4960_v14 = vld [vmem:[#allocation3 + $0xec] ss:$2 sm:$0xff]  ;;  %vm15603_vm10 = vcmask 257025  }
 0x38d   : > { %v4726_v13 = vadd.f32 %v13678_v26, %v4526_v5  ;;  %5294 = vrot.lane.b32.xlu0 %v5283_v1, %s10376_s27  ;;  %v4963_v26 = vmax.f32 %v4956_v39, %v4958_v30  ;;  %v5356_v32 = vsel %vm15479_vm3, %v13846_v4, %v13981_v48 }
 0x38e   : > { %v4528_v25 = vpop.f32.mrf.mxu1  ;;  %5129 = vrot.lane.b32.xlu1 %v5097_v59, %s10376_s27  ;;  %v13989_v51 = vor.u32 %v5244_v57, %v5241_v40 }
 0x38f   : > { %v4801_v37 = vmax.f32 %v4726_v13, 0.0  ;;  %v4529_v33 = vadd.f32 %v13594_v20, %v4528_v25  ;;  %v5188_v20 = vsel %vm605_vm1, %v5185_v3, %v5187_v22 }
 0x390   : > { %v4962_v44 = vld [vmem:[#allocation3 + $0xed] ss:$2 sm:$0xff]  ;;  %v4530_v9 = vpop.f32.mrf.mxu1  ;;  %v13999_v24 = vsel %vm15480_vm4, %v13912_v2, %v13989_v51  ;;  %v14013_v2 = vld [vmem:[%s15427_s2 + $0x1] ss:$0 sm:$0xff] }
 0x391   : > { %v4964_v60 = vmax.f32 %v4960_v14, %v4962_v44  ;;  %4842 = vst.msk [vmem:[#allocation3 + $0x103] sm:$0xff] %vm1183_vm7, %v4801_v37  ;;  %v4729_v17 = vadd.f32 %v13682_v31, %v4529_v33  ;;  %5385 = vrot.lane.b32.xlu0 %v5356_v32, %s10377_s30  ;;  %v5100_v14 = vor.u32 %v5098_v62, %v13961_v56 }
 0x392   : > { %5199 = vrot.lane.b32.xlu1 %v5188_v20, %s10377_s30 }
 0x393   : > { %v4965_v54 = vmax.f32 %v4963_v26, %v4964_v60  ;;  %v4802_v18 = vmax.f32 %v4729_v17, 0.0 }
 0x395   : > { %v4966_v31 = vpack.c.bf16 %v4965_v54, %v4965_v54  ;;  %4843 = vst.msk [vmem:[#allocation3 + $0x10b] sm:$0xff] %vm1183_vm7, %v4802_v18 }
 0x396   : > { %v4533_v4 = vpop.f32.mrf.mxu1 }
 0x397   : > { %4967 = vst.msk [vmem:[#allocation4 + $0x24] sm:$0xf] %vm15601_vm14, %v4966_v31  ;;  %v4534_v58 = vadd.f32 %v14013_v2, %v4533_v4  ;;  %vm15604_vm14 = vcmask 253952  }
 0x398   : > { %v4535_v63 = vpop.f32.mrf.mxu1 }
 0x399   : > { %v4734_v3 = vadd.f32 %v13691_v49, %v4534_v58 }
 0x39a   : > { %v4536_v10 = vpop.f32.mrf.mxu1 }
 0x39b   : > { %v4803_v19 = vmax.f32 %v4734_v3, 0.0  ;;  %v4537_v61 = vadd.f32 %v14013_v2, %v4536_v10 }
 0x39c   : > { %v4538_v21 = vpop.f32.mrf.mxu1 }
 0x39d   : > { %4844 = vst.msk [vmem:[#allocation3 + $0x113] sm:$0xff] %vm1183_vm7, %v4803_v19  ;;  %v4737_v46 = vadd.f32 %v13704_v43, %v4537_v61 }
 0x39e   : > { %v14020_v5 = vld [vmem:[#allocation4 + $0x24] sm:$0xf] }
 0x39f   : > { %v14024_v11 = vcombine.low %v13933_v28, %v14020_v5  ;;  %v4804_v36 = vmax.f32 %v4737_v46, 0.0 }
 0x3a1   : > { %4845 = vst.msk [vmem:[#allocation3 + $0x11b] sm:$0xff] %vm1183_vm7, %v4804_v36  ;;  %v5405_v49 = vrot.slane %v14024_v11, 3  ;;  %v5316_v29 = vrot.slane %v14024_v11, 2  ;;  %v5149_v0 = vrot.slane %v14024_v11, 1  ;;  %v5102_v1 = vshll.u32 %v14024_v11, 16 }
 0x3a2   : > { %v4541_v39 = vpop.f32.mrf.mxu1  ;;  %v5106_v43 = vshrl.u32 %v14024_v11, 16 }
 0x3a3   : > { %v4542_v30 = vadd.f32 %v14013_v2, %v4541_v39  ;;  %v5406_v28 = vsel %vm1141_vm6, %v5403_v41, %v5405_v49  ;;  %v5317_v13 = vsel %vm15602_vm11, %v5314_v53, %v5316_v29  ;;  %v5150_v40 = vsel %vm605_vm1, %v5147_v34, %v5149_v0  ;;  %v4969_v53 = vld [vmem:[#allocation3 + $0xfe] ss:$2 sm:$0xff]  ;;  %v4971_v34 = vld [vmem:[#allocation3 + $0xff] ss:$2 sm:$0xff] }
 0x3a4   : > { %9963 = vmatmul.mubr.msk.bf16.gmra.mxu0 %vm1183_vm7, %v5406_v28  ;;  %5328 = vrot.lane.b32.xlu0 %v5317_v13, %s10375_s26  ;;  %v4543_v57 = vpop.f32.mrf.mxu1  ;;  %v5357_v41 = vrot.slane %v5106_v43, 2  ;;  %v5358_v59 = vrot.slane %v5102_v1, 3  ;;  %v14052_v25 = vrot.slane %v5102_v1, 1  ;;  %v4976_v54 = vmax.f32 %v4969_v53, %v4971_v34  ;;  %v5156_v34 = vpop.permute.xlu1 %5155 }
 0x3a5   : > { %v4742_v37 = vadd.f32 %v13723_v35, %v4542_v30  ;;  %5161 = vrot.lane.b32.xlu1 %v5150_v40, %s10375_s26  ;;  %9966 = vmatprep.mubr.msk.bf16.mxu0 %vm15555_vm8, %v15492_v45 }
 0x3a6   : > { %v4544_v33 = vpop.f32.mrf.mxu1  ;;  %v14058_v26 = vor.u32 %v5358_v59, %v5357_v41  ;;  %v5105_v32 = vsel %vm392_vm2, %v5100_v14, %v14052_v25 }
 0x3a7   : > { %v4805_v44 = vmax.f32 %v4742_v37, 0.0  ;;  %v4545_v9 = vadd.f32 %v14013_v2, %v4544_v33 }
 0x3a8   : > { %v4973_v60 = vld [vmem:[#allocation3 + $0x110] ss:$2 sm:$0xff]  ;;  %v4975_v17 = vld [vmem:[#allocation3 + $0x111] ss:$2 sm:$0xff]  ;;  %v5360_v35 = vsel %vm15479_vm3, %v13981_v48, %v14058_v26  ;;  %v4546_v20 = vpop.f32.mrf.mxu1 }
 0x3a9   : > { %v4977_v18 = vmax.f32 %v4973_v60, %v4975_v17  ;;  %4846 = vst.msk [vmem:[#allocation3 + $0x123] sm:$0xff] %vm1183_vm7, %v4805_v44  ;;  %v4745_v31 = vadd.f32 %v13726_v16, %v4545_v9  ;;  %5387 = vrot.lane.b32.xlu0 %v5360_v35, %s10377_s30  ;;  %5131 = vrot.lane.b32.xlu1 %v5105_v32, %s10376_s27  ;;  %v5291_v44 = vpop.permute.xlu0 %5290 }
 0x3ab   : > { %v4978_v62 = vmax.f32 %v4976_v54, %v4977_v18  ;;  %v4806_v56 = vmax.f32 %v4745_v31, 0.0 }
 0x3ad   : > { %v9314_v4 = vpack.c.bf16 %v4978_v62, %v4978_v62  ;;  %4847 = vst.msk [vmem:[#allocation3 + $0x12b] sm:$0xff] %vm1183_vm7, %v4806_v56 }
 0x3ae   : > { %v4549_v48 = vpop.f32.mrf.mxu1 }
 0x3af   : > { %v4983_v58 = vrot.slane %v9314_v4, 7  ;;  %v4550_v63 = vadd.f32 %v14013_v2, %v4549_v48 }
 0x3b0   : > { %v4551_v3 = vpop.f32.mrf.mxu1 }
 0x3b1   : > { %v4984_v10 = vrot.slane %v4983_v58, 4  ;;  %4987 = vst.msk [vmem:[#allocation4 + $0x28] sm:$0xe] %vm15603_vm10, %v4983_v58  ;;  %v4750_v19 = vadd.f32 %v13731_v47, %v4550_v63  ;;  %v5465_v58 = vsel %vm1183_vm7, %v13780_v15, %v5291_v44  ;;  %vm15605_vm10 = vcmask 523264   ;;  %v5028_v15 = vld [vmem:[#allocation4 + $0x34] sm:$0xf] }
 0x3b2   : > { %v4552_v16 = vpop.f32.mrf.mxu1 }
 0x3b3   : > { %4988 = vst.msk [vmem:[#allocation4 + $0x2c] sm:$0x1] %vm15604_vm14, %v4984_v10  ;;  %v4807_v61 = vmax.f32 %v4750_v19, 0.0  ;;  %v4553_v21 = vadd.f32 %v14013_v2, %v4552_v16  ;;  %vm15606_vm14 = vmmov %vm15605_vm10 }
 0x3b4   : > { %v4554_v46 = vpop.f32.mrf.mxu1  ;;  %v4990_v60 = vld [vmem:[#allocation3 + $0x122] ss:$2 sm:$0xff]  ;;  %v4992_v17 = vld [vmem:[#allocation3 + $0x123] ss:$2 sm:$0xff] }
 0x3b5   : > { %4848 = vst.msk [vmem:[#allocation3 + $0x133] sm:$0xff] %vm1183_vm7, %v4807_v61  ;;  %v4753_v36 = vadd.f32 %v13738_v55, %v4553_v21  ;;  %v4997_v18 = vmax.f32 %v4990_v60, %v4992_v17 }
 0x3b6   : > { %v4557_v1 = vpop.f32.mrf.mxu1 }
 0x3b7   : > { %v4808_v39 = vmax.f32 %v4753_v36, 0.0  ;;  %v4558_v30 = vadd.f32 %v14013_v2, %v4557_v1  ;;  %v14121_v36 = vcombine.low %v5028_v15, %v5028_v15 }
 0x3b8   : > { %v4559_v28 = vpop.f32.mrf.mxu1  ;;  %v5020_v13 = vld [vmem:[#allocation4 + $0x28] sm:$0xf] }
 0x3b9   : > { %4849 = vst.msk [vmem:[#allocation3 + $0x13b] sm:$0xff] %vm1183_vm7, %v4808_v39  ;;  %v4758_v47 = vadd.f32 %v13761_v8, %v4558_v30  ;;  %v14085_v40 = vcombine.low %v14020_v5, %v5020_v13 }
 0x3ba   : > { %v4560_v57 = vpop.f32.mrf.mxu1 }
 0x3bb   : > { %v4809_v41 = vmax.f32 %v4758_v47, 0.0  ;;  %v5284_v59 = vrot.slane %v14085_v40, 2  ;;  %v5189_v37 = vrot.slane %v14085_v40, 1  ;;  %v5248_v53 = vshrl.u32 %v14085_v40, 16 }
 0x3bc   : > { %v4562_v55 = vpop.f32.mrf.mxu1  ;;  %v5251_v2 = vshll.u32 %v14085_v40, 16 }
 0x3bd   : > { %4850 = vst.msk [vmem:[#allocation3 + $0x143] sm:$0xff] %vm1183_vm7, %v4809_v41  ;;  %v5285_v8 = vsel %vm15602_vm11, %v5282_v42, %v5284_v59  ;;  %v5190_v5 = vsel %vm605_vm1, %v5187_v22, %v5189_v37  ;;  %v5250_v33 = vrot.slane %v5248_v53, 1  ;;  %v5126_v22 = vpop.permute.xlu1 %5125  ;;  %vm15607_vm11 = vcmask 785408  }
 0x3be   : > { %5296 = vrot.lane.b32.xlu0 %v5285_v8, %s10376_s27  ;;  %5201 = vrot.lane.b32.xlu1 %v5190_v5, %s10377_s30  ;;  %v5253_v14 = vrot.slane %v5251_v2, 2  ;;  %v5414_v56 = vsel %vm1183_vm7, %v13686_v7, %v5126_v22  ;;  %vm15608_vm3 = vmmov %vm15607_vm11  ;;  %v5266_v55 = vshrl.u32 %v14121_v36, 16  ;;  %v5269_v53 = vshll.u32 %v14121_v36, 16 }
 0x3bf   : > { %v5429_v19 = vsel %vm15606_vm14, %v5414_v56, %v5156_v34 }
 0x3c0   : > { %v14104_v9 = vor.u32 %v5253_v14, %v5250_v33  ;;  %v4994_v32 = vld [vmem:[#allocation3 + $0x134] ss:$2 sm:$0xff]  ;;  %v5271_v14 = vrot.slane %v5269_v53, 2 }
 0x3c1   : > { %v5196_v48 = vpop.permute.xlu1 %5195 }
 0x3c2   : > { %v4565_v35 = vpop.f32.mrf.mxu1  ;;  %v14109_v42 = vsel %vm15480_vm4, %v13989_v51, %v14104_v9  ;;  %v5325_v23 = vpop.permute.xlu0 %5324  ;;  %v5443_v61 = vsel %vm15608_vm3, %v5429_v19, %v5196_v48  ;;  %vm15609_vm4 = vcmask 254976   ;;  %vm15610_vm3 = vcmask 1045504  }
 0x3c3   : > { %v5485_v51 = vsel %vm15605_vm10, %v5465_v58, %v5325_v23  ;;  %v5032_v35 = vld [vmem:[#allocation4 + $0x3c] sm:$0x1]  ;;  %vm15612_vm10 = vmmov %vm15610_vm3 }
 0x3c4   : > { %v4996_v20 = vld [vmem:[#allocation3 + $0x135] ss:$2 sm:$0xff]  ;;  %v4567_v54 = vpop.f32.mrf.mxu1  ;;  %vm15613_vm14 = vmmov %vm15610_vm3 }
 0x3c5   : > { %v4998_v31 = vmax.f32 %v4994_v32, %v4996_v20  ;;  %v5288_v32 = vrot.slane %v14121_v36, 2  ;;  %v14166_v20 = vld [vmem:[#allocation4 + $0x34] ss:$0 sps:$4 sm:$0x77]  }
 0x3c6   : > { %v4568_v62 = vpop.f32.mrf.mxu1  ;;  %v5193_v19 = vrot.slane %v14166_v20, 1 }
 0x3c7   : > { %v4999_v4 = vmax.f32 %v4997_v18, %v4998_v31  ;;  %v5384_v10 = vpop.permute.xlu0 %5383 }
 0x3c8   : > { %v4569_v63 = vpop.f32.mrf.mxu1  ;;  %v5499_v16 = vsel %vm15607_vm11, %v5485_v51, %v5384_v10  ;;  %vm15614_vm11 = vsmask.f32 6400 }
 0x3c9   : > { %v9315_v3 = vpack.c.bf16 %v4999_v4, %v4999_v4  ;;  %5721 = vmatprep.mubr.bf16.mxu1 %v5499_v16 }
 0x3ca   : > { %5722 = vmatmul.mubr.bf16.vlgmr.msra.gmra.mxu1 %v5443_v61 }
 0x3cb   : > { %v5004_v21 = vrot.slane %v9315_v3, 6 }
 0x3cd   : > { %v5005_v7 = vrot.slane %v5004_v21, 4  ;;  %5008 = vst.msk [vmem:[#allocation4 + $0x2c] sm:$0xc] %vm4930_vm0, %v5004_v21 }
 0x3cf   : > { %5009 = vst.msk [vmem:[#allocation4 + $0x30] sm:$0x3] %vm15609_vm4, %v5005_v7  ;;  %vm15611_vm4 = vmmov %vm15610_vm3 }
 0x3d4   : > { %v5021_v46 = vld [vmem:[#allocation4 + $0x2c] sm:$0xf] }
 0x3d5   : > { %v14123_v1 = vcombine.low %v5020_v13, %v5021_v46 }
 0x3d6   : > { %v5026_v39 = vld [vmem:[#allocation4 + $0x30] sm:$0xf] }
 0x3d7   : > { %v5407_v30 = vrot.slane %v14123_v1, 3  ;;  %v5318_v28 = vrot.slane %v14123_v1, 2  ;;  %v5151_v47 = vrot.slane %v14123_v1, 1  ;;  %v5110_v57 = vshll.u32 %v14123_v1, 16 }
 0x3d8   : > { %v14129_v41 = vcombine.low %v5021_v46, %v5026_v39  ;;  %v14142_v5 = vcombine.low %v5026_v39, %v5028_v15  ;;  %v5114_v23 = vshrl.u32 %v14123_v1, 16 }
 0x3d9   : > { %v5408_v13 = vsel %vm1141_vm6, %v5405_v49, %v5407_v30  ;;  %v5319_v2 = vsel %vm15610_vm3, %v5316_v29, %v5318_v28  ;;  %v5152_v8 = vsel %vm605_vm1, %v5149_v0, %v5151_v47  ;;  %v5112_v34 = vrot.slane %v5110_v57, 1  ;;  %v5031_v29 = vld [vmem:[#allocation4 + $0x38] sm:$0xf]  ;;  %vm15615_vm3 = vmmov %vm15614_vm11 }
 0x3da   : > { %9967 = vmatmul.mubr.msk.bf16.gmra.mxu0 %vm1183_vm7, %v5408_v13  ;;  %5330 = vrot.lane.b32.xlu0 %v5319_v2, %s10375_s26  ;;  %v5286_v33 = vrot.slane %v14129_v41, 2  ;;  %v5108_v49 = vor.u32 %v5106_v43, %v14052_v25  ;;  %v5268_v0 = vrot.slane %v5266_v55, 1  ;;  %v5409_v60 = vrot.slane %v14142_v5, 3  ;;  %v14162_v25 = vld [vmem:[#allocation4 + $0x30] ss:$0 sps:$4 sm:$0x77]  }
 0x3db   : > { %5163 = vrot.lane.b32.xlu1 %v5152_v8, %s10375_s26  ;;  %9970 = vmatprep.mubr.msk.bf16.mxu0 %vm15555_vm8, %v15492_v45  ;;  %v5320_v17 = vrot.slane %v14142_v5, 2  ;;  %v5191_v43 = vrot.slane %v14129_v41, 1  ;;  %v5257_v54 = vshrl.u32 %v14129_v41, 16  ;;  %v5260_v18 = vshll.u32 %v14129_v41, 16 }
 0x3dc   : > { %v5287_v44 = vsel %vm15611_vm4, %v5284_v59, %v5286_v33  ;;  %v5113_v22 = vsel %vm392_vm2, %v5108_v49, %v5112_v34  ;;  %v9050_v59 = vcombine.low %v5031_v29, %v5032_v35  ;;  %v14170_v31 = vor.u32 %v5271_v14, %v5268_v0 }
 0x3dd   : > { %v5410_v62 = vsel %vm1141_vm6, %v5407_v30, %v5409_v60  ;;  %v5321_v56 = vsel %vm15612_vm10, %v5318_v28, %v5320_v17  ;;  %v5361_v4 = vrot.slane %v5114_v23, 2  ;;  %v5362_v48 = vrot.slane %v5110_v57, 3 }
 0x3de   : > { %5298 = vrot.lane.b32.xlu0 %v5287_v44, %s10376_s27  ;;  %v5192_v58 = vsel %vm605_vm1, %v5189_v37, %v5191_v43  ;;  %v5153_v63 = vrot.slane %v14162_v25, 1  ;;  %v5259_v3 = vrot.slane %v5257_v54, 1  ;;  %v5262_v51 = vrot.slane %v5260_v18, 2 }
 0x3df   : > { %5133 = vrot.lane.b32.xlu1 %v5113_v22, %s10376_s27  ;;  %v5411_v10 = vrot.slane %v9050_v59, 3  ;;  %v9049_v16 = vcombine.low %v5031_v29, %v5031_v29  ;;  %v5289_v21 = vsel %vm15613_vm14, %v5286_v33, %v5288_v32  ;;  %v5363_v7 = vor.u32 %v5362_v48, %v5361_v4 }
 0x3e0   : > { %v5263_v61 = vor.u32 %v5262_v51, %v5259_v3  ;;  %v5366_v40 = vshrl.u32 %v14142_v5, 16  ;;  %v5369_v37 = vshll.u32 %v14142_v5, 16  ;;  %v5154_v15 = vsel %vm605_vm1, %v5151_v47, %v5153_v63 }
 0x3e1   : > { %v5118_v46 = vshll.u32 %v14162_v25, 16  ;;  %v5322_v30 = vrot.slane %v9049_v16, 2  ;;  %v5412_v28 = vsel %vm1141_vm6, %v5409_v60, %v5411_v10  ;;  %vm15616_vm4 = vsmask.f32 5376  ;;  %v5293_v44 = vpop.permute.xlu0 %5292  ;;  %v5158_v60 = vpop.permute.xlu1 %5157 }
 0x3e2   : > { %9971 = vmatmul.mubr.msk.bf16.gmra.mxu0 %vm1183_vm7, %v5410_v62  ;;  %5332 = vrot.lane.b32.xlu0 %v5321_v56, %s10375_s26  ;;  %v14192_v36 = vsel %vm15614_vm11, %v14104_v9, %v5263_v61  ;;  %v14196_v39 = vsel %vm15615_vm3, %v5263_v61, %v14170_v31  ;;  %v5364_v57 = vsel %vm15616_vm4, %v14058_v26, %v5363_v7  ;;  %v5368_v41 = vrot.slane %v5366_v40, 2  ;;  %vm15617_vm14 = vmmov %vm15616_vm4  ;;  %v188_v56 = vld [vmem:[#allocation5 + $0x4] sm:$0x3] }
 0x3e3   : > { %5203 = vrot.lane.b32.xlu1 %v5192_v58, %s10377_s30  ;;  %9974 = vmatprep.mubr.msk.bf16.mxu0 %vm15555_vm8, %v15492_v45  ;;  %v5371_v47 = vrot.slane %v5369_v37, 3  ;;  %v5194_v9 = vsel %vm605_vm1, %v5191_v43, %v5193_v19  ;;  %v5116_v55 = vor.u32 %v5114_v23, %v5112_v34  ;;  %v5120_v53 = vrot.slane %v5118_v46, 1  ;;  %vm15618_vm11 = vmmov %vm15616_vm4 }
 0x3e4   : > { %v5323_v13 = vsel %vm15612_vm10, %v5320_v17, %v5322_v30  ;;  %v5375_v8 = vshrl.u32 %v9050_v59, 16  ;;  %v5378_v26 = vshll.u32 %v9050_v59, 16  ;;  %v5122_v33 = vshrl.u32 %v14162_v25, 16 }
 0x3e5   : > { %v5372_v2 = vor.u32 %v5371_v47, %v5368_v41  ;;  %v5121_v5 = vsel %vm392_vm2, %v5116_v55, %v5120_v53  ;;  %v5128_v23 = vpop.permute.xlu1 %5127  ;;  %vm15619_vm3 = vcmask 523264   ;;  %vm15621_vm10 = vcmask 785408  }
 0x3e6   : > { %5300 = vrot.lane.b32.xlu0 %v5289_v21, %s10376_s27  ;;  %v5124_v49 = vor.u32 %v5122_v33, %v5120_v53  ;;  %v5377_v29 = vrot.slane %v5375_v8, 2  ;;  %v5380_v0 = vrot.slane %v5378_v26, 3  ;;  %v5416_v43 = vsel %vm1183_vm7, %v13701_v38, %v5128_v23  ;;  %vm15620_vm4 = vmmov %vm15619_vm3 }
 0x3e7   : > { %5165 = vrot.lane.b32.xlu1 %v5154_v15, %s10375_s26  ;;  %v5373_v34 = vsel %vm15617_vm14, %v5363_v7, %v5372_v2  ;;  %v5431_v54 = vsel %vm15620_vm4, %v5416_v43, %v5158_v60  ;;  %vm15622_vm14 = vmmov %vm15621_vm10  ;;  %v189_v38 = vsel %vm11220_vm13, 0, %v188_v56 }
 0x3e8   : > { %v5381_v14 = vor.u32 %v5380_v0, %v5377_v29  ;;  %190 = vst [vmem:[#allocation5 + $0x4] sm:$0x3] %v189_v38  ;;  %vm15625_vm4 = vmmov %vm15621_vm10 }
 0x3e9   : > { %v5198_v25 = vpop.permute.xlu1 %5197 }
 0x3ea   : > { %9975 = vmatmul.mubr.msk.bf16.gmra.mxu0 %vm1183_vm7, %v5412_v28  ;;  %5389 = vrot.lane.b32.xlu0 %v5364_v57, %s10377_s30  ;;  %v5382_v17 = vsel %vm15618_vm11, %v5372_v2, %v5381_v14  ;;  %v5446_v62 = vsel %vm15622_vm14, %v5431_v54, %v5198_v25  ;;  %vm15624_vm11 = vmmov %vm15619_vm3 }
 0x3eb   : > { %5205 = vrot.lane.b32.xlu1 %v5194_v9, %s10377_s30  ;;  %9978 = vmatprep.mubr.msk.bf16.mxu0 %vm15555_vm8, %v15492_v45  ;;  %vm15627_vm14 = vmmov %vm15619_vm3 }
 0x3ee   : > { %5334 = vrot.lane.b32.xlu0 %v5323_v13, %s10375_s26 }
 0x3ef   : > { %5135 = vrot.lane.b32.xlu1 %v5121_v5, %s10376_s27 }
 0x3f2   : > { %5391 = vrot.lane.b32.xlu0 %v5373_v34, %s10377_s30  ;;  %9979 = vmatmul.mubr.msk.bf16.gmra.mxu0 %vm1183_vm7, %v5411_v10 }
 0x3f3   : > { %5137 = vrot.lane.b32.xlu1 %v5124_v49, %s10376_s27  ;;  %9986 = vmatprep.mubr.msk.bf16.mxu0 %vm15555_vm8, %v15492_v45 }
 0x3f6   : > { %5302 = vrot.lane.b32.xlu0 %v5288_v32, %s10376_s27  ;;  %v5468_v32 = vsel %vm1183_vm7, %v13918_v12, %v5293_v44 }
 0x3f7   : > { %5167 = vrot.lane.b32.xlu1 %v5153_v63, %s10375_s26 }
 0x3fa   : > { %5393 = vrot.lane.b32.xlu0 %v5382_v17, %s10377_s30 }
 0x3fb   : > { %5207 = vrot.lane.b32.xlu1 %v5193_v19, %s10377_s30  ;;  %v5327_v35 = vpop.permute.xlu0 %5326 }
 0x3fc   : > { %v5487_v59 = vsel %vm15619_vm3, %v5468_v32, %v5327_v35  ;;  %v5160_v48 = vpop.permute.xlu1 %5159 }
 0x3fe   : > { %5336 = vrot.lane.b32.xlu0 %v5322_v30, %s10375_s26 }
 0x3ff   : > { %v5295_v22 = vpop.permute.xlu0 %5294 }
 0x400   : > { %v5130_v63 = vpop.permute.xlu1 %5129  ;;  %v5471_v16 = vsel %vm1183_vm7, %v13999_v24, %v5295_v22 }
 0x401   : > { %v5418_v19 = vsel %vm1183_vm7, %v13804_v27, %v5130_v63 }
 0x402   : > { %5395 = vrot.lane.b32.xlu0 %v5381_v14, %s10377_s30  ;;  %v5433_v40 = vsel %vm15619_vm3, %v5418_v19, %v5160_v48 }
 0x403   : > { %v5386_v20 = vpop.permute.xlu0 %5385 }
 0x404   : > { %v5502_v18 = vsel %vm15621_vm10, %v5487_v59, %v5386_v20  ;;  %v5200_v61 = vpop.permute.xlu1 %5199  ;;  %vm15626_vm10 = vmmov %vm15625_vm4 }
 0x405   : > { %5729 = vmatprep.mubr.bf16.mxu1 %v5502_v18  ;;  %v5449_v15 = vsel %vm15626_vm10, %v5433_v40, %v5200_v61 }
 0x406   : > { %5730 = vmatmul.mubr.bf16.gmra.mxu1 %v5446_v62 }
 0x410   : > { %v14236_v58 = vpop.f32.mrf.mxu0 }
 0x412   : > { %v9956_v12 = vpop.f32.mrf.mxu0 }
 0x414   : > { %v14238_v3 = vpop.f32.mrf.mxu0 }
 0x416   : > { %v5329_v51 = vpop.permute.xlu0 %5328  ;;  %v9957_v10 = vpop.f32.mrf.mxu0 }
 0x417   : > { %v5489_v21 = vsel %vm15624_vm11, %v5471_v16, %v5329_v51  ;;  %v5162_v46 = vpop.permute.xlu1 %5161  ;;  %vm15628_vm11 = vmmov %vm15619_vm3  ;;  %v10189_v16 = vld [vmem:[#allocation4 + $0x30] ss:$0 sps:$4 sm:$0x33]  }
 0x418   : > { %vm15629_vm3 = vmmov %vm15625_vm4 }
 0x419   : > { %vm15631_vm10 = vmmov %vm15628_vm11 }
 0x41b   : > { %v5388_v7 = vpop.permute.xlu0 %5387  ;;  %v5132_v30 = vpop.permute.xlu1 %5131 }
 0x41c   : > { %v5505_v37 = vsel %vm15625_vm4, %v5489_v21, %v5388_v7  ;;  %v5420_v33 = vsel %vm1183_vm7, %v13929_v6, %v5132_v30  ;;  %vm15630_vm4 = vmmov %vm15629_vm3  ;;  %v5878_v30 = vld [vmem:[%s15426_s1 + $0x500] sm:$0xc] }
 0x41d   : > { %5737 = vmatprep.mubr.bf16.mxu1 %v5505_v37  ;;  %v5435_v0 = vsel %vm15628_vm11, %v5420_v33, %v5162_v46  ;;  %vm15633_vm11 = vmmov %vm15629_vm3  ;;  %v10197_v46 = vld [vmem:[%s15426_s1 + $0x238] sm:$0xff]  }
 0x41e   : > { %5738 = vmatmul.mubr.bf16.gmra.mxu1 %v5449_v15  ;;  %9983 = vmatpush3.bf16.msra.mxu0 %v10197_v46 }
 0x41f   : > { %9984 = vmatprep.subr.bf16.mxu0 %v15492_v45 }
 0x430   : > { %v5297_v28 = vpop.permute.xlu0 %5296  ;;  %v5202_v57 = vpop.permute.xlu1 %5201 }
 0x431   : > { %v5474_v34 = vsel %vm1183_vm7, %v14109_v42, %v5297_v28  ;;  %v5452_v60 = vsel %vm15630_vm4, %v5435_v0, %v5202_v57  ;;  %vm15634_vm4 = vmmov %vm15631_vm10  ;;  %v5879_v28 = vld [vmem:[%s15426_s1 + $0x504] sm:$0xf] }
 0x449   : > { %v14248_v27 = vpop.f32.mrf.mxu0 }
 0x44b   : > { %v9960_v41 = vpop.f32.mrf.mxu0 }
 0x44c   : > { %v5331_v24 = vpop.permute.xlu0 %5330  ;;  %v5891_v41 = vunpack.c.l.bf16 %v5878_v30 }
 0x44d   : > { %v5164_v47 = vpop.permute.xlu1 %5163  ;;  %v14250_v9 = vpop.f32.mrf.mxu0  ;;  %v5491_v49 = vsel %vm15627_vm14, %v5474_v34, %v5331_v24  ;;  %vm15632_vm14 = vmmov %vm15631_vm10  ;;  %v5892_v24 = vunpack.c.l.bf16 %v5879_v28  ;;  %v191_v28 = vld [vmem:[#allocation5 + $0x34] sm:$0x8] }
 0x44f   : > { %v9961_v55 = vpop.f32.mrf.mxu0 }
 0x450   : > { %v5299_v53 = vpop.permute.xlu0 %5298  ;;  %v14306_v55 = vld [vmem:[%s15427_s2 + $0x2] ss:$0 sm:$0xff] }
 0x451   : > { %v5134_v13 = vpop.permute.xlu1 %5133  ;;  %v5477_v42 = vsel %vm1183_vm7, %v14192_v36, %v5299_v53 }
 0x452   : > { %v5422_v6 = vsel %vm1183_vm7, %v14024_v11, %v5134_v13 }
 0x453   : > { %v5437_v25 = vsel %vm15632_vm14, %v5422_v6, %v5164_v47  ;;  %vm15636_vm14 = vmmov %vm15629_vm3  ;;  %v9466_v47 = vld [vmem:[%s15426_s1 + $0x508] sm:$0xff]  }
 0x454   : > { %v5333_v2 = vpop.permute.xlu0 %5332  ;;  %v9425_v30 = vunpack.c.h.bf16 %v9466_v47 }
 0x455   : > { %v5204_v8 = vpop.permute.xlu1 %5203  ;;  %v5493_v23 = vsel %vm15631_vm10, %v5477_v42, %v5333_v2  ;;  %vm15635_vm10 = vmmov %vm15634_vm4  ;;  %v5918_v2 = vrot.slane %v5891_v41, 4  ;;  %v9467_v41 = vld [vmem:[%s15426_s1 + $0x510] sm:$0xff]  }
 0x456   : > { %v5455_v59 = vsel %vm15629_vm3, %v5437_v25, %v5204_v8  ;;  %v5919_v8 = vrot.slane %v5892_v24, 4  ;;  %v10308_v24 = vld [vmem:[%s15426_s1 + $0x380] sm:$0xff]  }
 0x458   : > { %v5301_v26 = vpop.permute.xlu0 %5300 }
 0x459   : > { %v5166_v5 = vpop.permute.xlu1 %5165  ;;  %v5480_v56 = vsel %vm1183_vm7, %v14196_v39, %v5301_v26 }
 0x45c   : > { %v5390_v29 = vpop.permute.xlu0 %5389 }
 0x45d   : > { %v5206_v14 = vpop.permute.xlu1 %5205  ;;  %v5508_v44 = vsel %vm15629_vm3, %v5491_v49, %v5390_v29 }
 0x45e   : > { %5745 = vmatprep.mubr.bf16.mxu1 %v5508_v44 }
 0x45f   : > { %5746 = vmatmul.mubr.bf16.gmra.mxu1 %v5452_v60 }
 0x460   : > { %v5335_v17 = vpop.permute.xlu0 %5334 }
 0x461   : > { %v5136_v35 = vpop.permute.xlu1 %5135  ;;  %v5495_v48 = vsel %vm15635_vm10, %v5480_v56, %v5335_v17 }
 0x462   : > { %v5424_v11 = vsel %vm1183_vm7, %v14123_v1, %v5136_v35 }
 0x463   : > { %v5439_v38 = vsel %vm15634_vm4, %v5424_v11, %v5166_v5  ;;  %v9424_v5 = vunpack.c.l.bf16 %v9466_v47 }
 0x464   : > { %v14265_v22 = vpop.f32.mrf.mxu0  ;;  %v5392_v43 = vpop.permute.xlu0 %5391 }
 0x465   : > { %v5511_v32 = vsel %vm15633_vm11, %v5493_v23, %v5392_v43  ;;  %v5138_v54 = vpop.permute.xlu1 %5137  ;;  %vm15637_vm11 = vmmov %vm15629_vm3 }
 0x466   : > { %5753 = vmatprep.mubr.bf16.mxu1 %v5511_v32  ;;  %v9964_v20 = vpop.f32.mrf.mxu0  ;;  %v5458_v10 = vsel %vm15637_vm11, %v5439_v38, %v5206_v14  ;;  %v5427_v39 = vsel %vm1183_vm7, %v10189_v16, %v5138_v54  ;;  %vm15638_vm3 = vmmov %vm15634_vm4  ;;  %v5921_v14 = vrot.slane %v9424_v5, 4 }
 0x467   : > { %5754 = vmatmul.mubr.bf16.gmra.mxu1 %v5455_v59  ;;  %vm15639_vm4 = vmmov %vm15638_vm3 }
 0x468   : > { %v14272_v18 = vpop.f32.mrf.mxu0  ;;  %v5303_v36 = vpop.permute.xlu0 %5302  ;;  %vm15640_vm10 = vmmov %vm15637_vm11  ;;  %vm5917_vm11 = vcmask 1043456  }
 0x469   : > { %v5168_v63 = vpop.permute.xlu1 %5167  ;;  %v5483_v19 = vsel %vm1183_vm7, %v14170_v31, %v5303_v36  ;;  %v10198_v31 = vld [vmem:[%s15426_s1 + $0x230] sm:$0xff]   ;;  %v5920_v0 = vsel %vm5917_vm11, %v5918_v2, %v5919_v8  ;;  %v5922_v6 = vsel %vm5917_vm11, %v5919_v8, %v5921_v14  ;;  %v6150_v36 = vld [vmem:[#allocation5 + $0x4] sm:$0xe] }
 0x46a   : > { %v9965_v62 = vpop.f32.mrf.mxu0  ;;  %v5441_v40 = vsel %vm15639_vm4, %v5427_v39, %v5168_v63  ;;  %9985 = vmatpush3.bf16.msra.mxu0 %v10198_v31 }
 0x46c   : > { %v5394_v12 = vpop.permute.xlu0 %5393 }
 0x46d   : > { %v5514_v51 = vsel %vm15636_vm14, %v5495_v48, %v5394_v12  ;;  %v5208_v61 = vpop.permute.xlu1 %5207  ;;  %vm15641_vm14 = vmmov %vm15640_vm10 }
 0x46e   : > { %5761 = vmatprep.mubr.bf16.mxu1 %v5514_v51  ;;  %v5461_v15 = vsel %vm15641_vm14, %v5441_v40, %v5208_v61 }
 0x46f   : > { %5762 = vmatmul.mubr.bf16.gmra.mxu1 %v5458_v10 }
 0x470   : > { %v5337_v1 = vpop.permute.xlu0 %5336 }
 0x471   : > { %v5497_v21 = vsel %vm15638_vm3, %v5483_v19, %v5337_v1  ;;  %vm15643_vm3 = vcmask 257024  }
 0x472   : > { %vm15646_vm4 = vmmov %vm15643_vm3 }
 0x473   : > { %vm15648_vm14 = vmmov %vm15643_vm3 }
 0x474   : > { %v5396_v7 = vpop.permute.xlu0 %5395 }
 0x475   : > { %v5517_v37 = vsel %vm15640_vm10, %v5497_v21, %v5396_v7  ;;  %vm15647_vm10 = vcmask 1045504  }
 0x476   : > { %5769 = vmatprep.mubr.bf16.mxu1 %v5517_v37 }
 0x477   : > { %5770 = vmatmul.mubr.bf16.gmra.mxu1 %v5461_v15 }
 0x48a   : > { %v9534_v57 = vpop.f32.mrf.mxu1 }
 0x48c   : > { %v9535_v53 = vpop.f32.mrf.mxu1 }
 0x48d   : > { %v9536_v13 = vadd.f32 %v9535_v53, %v9534_v57  ;;  %v192_v53 = vsel %vm12392_vm9, 0, %v191_v28 }
 0x48e   : > { %v9537_v26 = vpop.f32.mrf.mxu1  ;;  %193 = vst [vmem:[#allocation5 + $0x34] sm:$0x8] %v192_v53  ;;  %v10209_v53 = vld [vmem:[%s15426_s1 + $0x220] sm:$0xff]  }
 0x48f   : > { %v5724_v33 = vadd.f32 %v9536_v13, %v14306_v55 }
 0x490   : > { %v9538_v34 = vpop.f32.mrf.mxu1 }
 0x491   : > { %v5812_v49 = vadd.f32 %v14236_v58, %v5724_v33  ;;  %v9539_v29 = vadd.f32 %v9538_v34, %v9537_v26  ;;  %v5923_v26 = vrot.slane %v9425_v30, 4  ;;  %v9428_v33 = vunpack.c.l.bf16 %v9467_v41 }
 0x493   : > { %v5865_v44 = vmax.f32 %v5812_v49, 0.0  ;;  %v5727_v60 = vadd.f32 %v9539_v29, %v14306_v55 }
 0x495   : > { %v5956_v17 = vmul.f32 %v5920_v0, %v5865_v44  ;;  %v5815_v35 = vadd.f32 %v14238_v3, %v5727_v60  ;;  %v5924_v60 = vsel %vm5917_vm11, %v5921_v14, %v5923_v26 }
 0x497   : > { %v9316_v42 = vpack.c.bf16 %v5956_v17, %v5956_v17  ;;  %v5866_v23 = vmax.f32 %v5815_v35, 0.0  ;;  %v5925_v17 = vrot.slane %v9428_v33, 4 }
 0x499   : > { %v6010_v25 = vshrl.u32 %v9316_v42, 16  ;;  %v6013_v32 = vshll.u32 %v9316_v42, 16  ;;  %v5957_v59 = vmul.f32 %v5922_v6, %v5866_v23 }
 0x49a   : > { %v14314_v43 = vpop.f32.mrf.mxu0 }
 0x49b   : > { %v6012_v20 = vrot.slane %v6010_v25, 6  ;;  %v6015_v54 = vrot.slane %v6013_v32, 7  ;;  %v9317_v11 = vpack.c.bf16 %v5957_v59, %v5957_v59  ;;  %v5926_v25 = vsel %vm5917_vm11, %v5923_v26, %v5925_v17 }
 0x49c   : > { %v9968_v58 = vpop.f32.mrf.mxu0 }
 0x49d   : > { %v6016_v56 = vor.u32 %v6015_v54, %v6012_v20  ;;  %v6019_v38 = vshrl.u32 %v9317_v11, 16  ;;  %v6022_v48 = vshll.u32 %v9317_v11, 16 }
 0x49e   : > { %v14316_v62 = vpop.f32.mrf.mxu0 }
 0x49f   : > { %v6151_v63 = vsel %vm11234_vm15, %v6016_v56, %v6150_v36  ;;  %v6021_v51 = vrot.slane %v6019_v38, 6  ;;  %v6024_v10 = vrot.slane %v6022_v48, 7  ;;  %v6017_v19 = vrot.slane %v6016_v56, 4  ;;  %vm15645_vm15 = vmmov %vm15643_vm3 }
 0x4a0   : > { %v9969_v3 = vpop.f32.mrf.mxu0  ;;  %6152 = vst [vmem:[#allocation5 + $0x4] sm:$0xe] %v6151_v63 }
 0x4a1   : > { %v6025_v16 = vor.u32 %v6024_v10, %v6021_v51  ;;  %v6167_v3 = vld [vmem:[#allocation5] sm:$0xf] }
 0x4a2   : > { %v14320_v1 = vpop.f32.mrf.mxu0  ;;  %v10206_v10 = vld [vmem:[%s15426_s1 + $0x228] sm:$0xff]  }
 0x4a3   : > { %v6026_v39 = vsel %vm11682_vm12, %v6017_v19, %v6025_v16  ;;  %v6027_v56 = vrot.slane %v6025_v16, 4  ;;  %v10207_v19 = vld [vmem:[%s15426_s1 + $0x1e8] sm:$0xff]   ;;  %v9429_v16 = vunpack.c.h.bf16 %v9467_v41  ;;  %9585 = vmatprep.subr.bf16.mxu1 %v10206_v10 }
 0x4a4   : > { %v9972_v61 = vpop.f32.mrf.mxu0  ;;  %6153 = vst.msk [vmem:[#allocation5 + $0x8] sm:$0xf] %vm15643_vm3, %v6026_v39  ;;  %9586 = vmatpush3.bf16.msra.mxu1 %v10207_v19  ;;  %vm15649_vm3 = vsmask.f32 6400 }
 0x4a5   : > { %v14356_v61 = vld [vmem:[%s15426_s1 + $0x518] sm:$0xff]   ;;  %9587 = vmatprep.subr.bf16.mxu1 %v10209_v53  ;;  %v10218_v53 = vld [vmem:[%s15426_s1 + $0x208] sm:$0xff]  }
 0x4a6   : > { %v14325_v21 = vpop.f32.mrf.mxu0  ;;  %v9432_v41 = vunpack.c.l.bf16 %v14356_v61 }
 0x4a7   : > { %v6168_v12 = vld [vmem:[#allocation5 + $0x4] sm:$0xf] }
 0x4a8   : > { %v9973_v7 = vpop.f32.mrf.mxu0 }
 0x4aa   : > { %v14327_v40 = vpop.f32.mrf.mxu0 }
 0x4ac   : > { %v9976_v37 = vpop.f32.mrf.mxu0 }
 0x4ae   : > { %v14329_v15 = vpop.f32.mrf.mxu0 }
 0x4b0   : > { %v9977_v46 = vpop.f32.mrf.mxu0 }
 0x4b1   : > { %v14360_v46 = vcombine.low %v6167_v3, %v6168_v12 }
 0x4b2   : > { %v14331_v57 = vpop.f32.mrf.mxu0 }
 0x4b3   : > { %v6230_v33 = vshll.u32 %v14360_v46, 16 }
 0x4b4   : > { %v9980_v2 = vpop.f32.mrf.mxu0 }
 0x4b6   : > { %v5862_v34 = vpop.f32.mrf.mxu0 }
 0x4b8   : > { %v9981_v29 = vpop.f32.mrf.mxu0 }
 0x4b9   : > { %v14375_v29 = vrot.slane %v9432_v41, 4 }
 0x4c6   : > { %v9540_v31 = vpop.f32.mrf.mxu1 }
 0x4c8   : > { %v9541_v13 = vpop.f32.mrf.mxu1 }
 0x4c9   : > { %v9542_v8 = vadd.f32 %v9541_v13, %v9540_v31  ;;  %v6181_v31 = vld [vmem:[#allocation5] sm:$0xe]  ;;  %v10210_v13 = vld [vmem:[%s15426_s1 + $0x1e0] sm:$0xff]  }
 0x4ca   : > { %v9543_v5 = vpop.f32.mrf.mxu1  ;;  %9588 = vmatpush3.bf16.msra.mxu1 %v10210_v13  ;;  %v10219_v13 = vld [vmem:[%s15426_s1 + $0x1c8] sm:$0xff]  }
 0x4cb   : > { %v5732_v47 = vadd.f32 %v9542_v8, %v14306_v55  ;;  %v5927_v8 = vrot.slane %v9429_v16, 4 }
 0x4cc   : > { %v9544_v49 = vpop.f32.mrf.mxu1 }
 0x4cd   : > { %v5820_v0 = vadd.f32 %v14248_v27, %v5732_v47  ;;  %v9545_v44 = vadd.f32 %v9544_v49, %v9543_v5  ;;  %v9099_v5 = vcombine.low %v6181_v31, %v6168_v12  ;;  %v6169_v47 = vld [vmem:[#allocation5 + $0x8] sm:$0xf] }
 0x4cf   : > { %v5867_v35 = vmax.f32 %v5820_v0, 0.0  ;;  %v5735_v6 = vadd.f32 %v9545_v44, %v14306_v55  ;;  %v10211_v44 = vld [vmem:[%s15426_s1 + $0x218] sm:$0xff]  }
 0x4d0   : > { %9589 = vmatprep.subr.bf16.mxu1 %v10211_v44 }
 0x4d1   : > { %v5958_v42 = vmul.f32 %v5924_v60, %v5867_v35  ;;  %v5823_v23 = vadd.f32 %v14250_v9, %v5735_v6  ;;  %v10212_v60 = vld [vmem:[%s15426_s1 + $0x1d8] sm:$0xff]   ;;  %v5928_v6 = vsel %vm5917_vm11, %v5925_v17, %v5927_v8  ;;  %v5930_v17 = vsel %vm5917_vm11, %v5927_v8, %v14375_v29 }
 0x4d2   : > { %9590 = vmatpush3.bf16.msra.mxu1 %v10212_v60 }
 0x4d3   : > { %v9318_v32 = vpack.c.bf16 %v5958_v42, %v5958_v42  ;;  %v5868_v59 = vmax.f32 %v5823_v23, 0.0 }
 0x4d5   : > { %v6029_v58 = vshrl.u32 %v9318_v32, 16  ;;  %v6032_v20 = vshll.u32 %v9318_v32, 16  ;;  %v5959_v54 = vmul.f32 %v5926_v25, %v5868_v59  ;;  %v6186_v25 = vld [vmem:[#allocation5 + $0x4] sm:$0xc]  ;;  %v6299_v59 = vrot.slane %v9099_v5, 1 }
 0x4d6   : > { %v6182_v32 = vld [vmem:[#allocation5 + $0x4] sm:$0xe] }
 0x4d7   : > { %v6031_v11 = vrot.slane %v6029_v58, 6  ;;  %v6034_v36 = vrot.slane %v6032_v20, 7  ;;  %v9319_v27 = vpack.c.bf16 %v5959_v54, %v5959_v54  ;;  %v9108_v58 = vcombine.low %v6186_v25, %v6169_v47 }
 0x4d8   : > { %v6232_v20 = vrot.slane %v6230_v33, 1  ;;  %v9100_v54 = vcombine.low %v6182_v32, %v6169_v47  ;;  %v10221_v32 = vld [vmem:[%s15426_s1 + $0x200] sm:$0xff]  }
 0x4d9   : > { %v6035_v38 = vor.u32 %v6034_v36, %v6031_v11  ;;  %v6039_v14 = vshrl.u32 %v9319_v27, 16  ;;  %v6042_v48 = vshll.u32 %v9319_v27, 16 }
 0x4da   : > { %v6370_v10 = vshrl.u32 %v9100_v54, 16  ;;  %v6373_v19 = vshll.u32 %v9100_v54, 16 }
 0x4db   : > { %v6036_v63 = vsel %vm11682_vm12, %v6027_v56, %v6035_v38  ;;  %v6041_v9 = vrot.slane %v6039_v14, 6  ;;  %v6044_v51 = vrot.slane %v6042_v48, 7  ;;  %v6037_v39 = vrot.slane %v6035_v38, 4 }
 0x4dc   : > { %6154 = vst.msk [vmem:[#allocation5 + $0xc] sm:$0xf] %vm15645_vm15, %v6036_v63  ;;  %v6228_v38 = vshrl.u32 %v14360_v46, 16  ;;  %v10215_v63 = vld [vmem:[%s15426_s1 + $0x210] sm:$0xff]   ;;  %v6372_v33 = vrot.slane %v6370_v10, 1  ;;  %vm15650_vm15 = vmmov %vm15646_vm4 }
 0x4dd   : > { %v14358_v7 = vor.u32 %v6044_v51, %v6041_v9  ;;  %9591 = vmatprep.subr.bf16.mxu1 %v10215_v63  ;;  %v6187_v10 = vld [vmem:[#allocation5 + $0x8] sm:$0xc] }
 0x4de   : > { %v9546_v37 = vpop.f32.mrf.mxu1  ;;  %v6233_v9 = vor.u32 %v6232_v20, %v6228_v38 }
 0x4df   : > { %v6046_v30 = vsel %vm11682_vm12, %v6037_v39, %v14358_v7 }
 0x4e0   : > { %v9547_v28 = vpop.f32.mrf.mxu1  ;;  %6155 = vst.msk [vmem:[#allocation5 + $0x10] sm:$0xf] %vm15646_vm4, %v6046_v30  ;;  %vm15651_vm4 = vmmov %vm15647_vm10 }
 0x4e1   : > { %v9548_v2 = vadd.f32 %v9547_v28, %v9546_v37  ;;  %v6434_v37 = vrot.slane %v9108_v58, 2 }
 0x4e2   : > { %v9549_v26 = vpop.f32.mrf.mxu1 }
 0x4e3   : > { %v5740_v34 = vadd.f32 %v9548_v2, %v14306_v55  ;;  %v14377_v0 = vld [vmem:[#allocation5 + $0xc] sm:$0xf] }
 0x4e4   : > { %v9550_v49 = vpop.f32.mrf.mxu1  ;;  %v14388_v23 = vcombine.low %v6169_v47, %v14377_v0 }
 0x4e5   : > { %v5828_v35 = vadd.f32 %v14265_v22, %v5740_v34  ;;  %v9551_v42 = vadd.f32 %v9550_v49, %v9549_v26  ;;  %v6375_v34 = vrot.slane %v6373_v19, 2 }
 0x4e6   : > { %v6300_v27 = vrot.slane %v14388_v23, 1  ;;  %v6235_v22 = vshll.u32 %v14388_v23, 16 }
 0x4e7   : > { %v5869_v11 = vmax.f32 %v5828_v35, 0.0  ;;  %v5743_v36 = vadd.f32 %v9551_v42, %v14306_v55  ;;  %v14395_v56 = vld [vmem:[#allocation5 + $0x10] sm:$0xf]  ;;  %v6047_v42 = vrot.slane %v14358_v7, 4  ;;  %v6376_v7 = vor.u32 %v6375_v34, %v6372_v33 }
 0x4e8   : > { %v6301_v3 = vsel %vm605_vm1, %v6299_v59, %v6300_v27  ;;  %v14404_v12 = vcombine.low %v14377_v0, %v14395_v56  ;;  %v14410_v51 = vrot.slane %v6235_v22, 1  ;;  %v10222_v59 = vld [vmem:[%s15426_s1 + $0x1c0] sm:$0xff]  }
 0x4e9   : > { %v5960_v14 = vmul.f32 %v5928_v6, %v5869_v11  ;;  %v5831_v48 = vadd.f32 %v14272_v18, %v5743_v36  ;;  %6312 = vrot.lane.b32.xlu1 %v6301_v3, %s10375_s26  ;;  %v10216_v18 = vld [vmem:[%s15426_s1 + $0x1d0] sm:$0xff]   ;;  %v6339_v6 = vrot.slane %v9100_v54, 1  ;;  %v10225_v3 = vld [vmem:[%s15426_s1 + $0x1b8] sm:$0xff]  }
 0x4ea   : > { %v6435_v31 = vrot.slane %v14404_v12, 2  ;;  %v6238_v30 = vsel %vm392_vm2, %v6233_v9, %v14410_v51  ;;  %v6340_v28 = vrot.slane %v14404_v12, 1  ;;  %v6378_v41 = vshrl.u32 %v14404_v12, 16  ;;  %9592 = vmatpush3.bf16.msra.mxu1 %v10216_v18 }
 0x4eb   : > { %v9320_v16 = vpack.c.bf16 %v5960_v14, %v5960_v14  ;;  %v5870_v39 = vmax.f32 %v5831_v48, 0.0  ;;  %v6381_v49 = vshll.u32 %v14404_v12, 16  ;;  %9593 = vmatprep.subr.bf16.mxu1 %v10218_v53  ;;  %v10224_v48 = vld [vmem:[%s15426_s1 + $0x1f8] sm:$0xff]   ;;  %v9109_v18 = vcombine.low %v6187_v10, %v14377_v0 }
 0x4ec   : > { %v6436_v5 = vsel %vm15647_vm10, %v6434_v37, %v6435_v31  ;;  %v6380_v47 = vrot.slane %v6378_v41, 1  ;;  %v6341_v54 = vsel %vm605_vm1, %v6339_v6, %v6340_v28  ;;  %v10228_v37 = vld [vmem:[%s15426_s1 + $0x1b0] sm:$0xff]   ;;  %vm15652_vm10 = vsmask.f32 5376 }
 0x4ed   : > { %v6049_v2 = vshrl.u32 %v9320_v16, 16  ;;  %v6052_v8 = vshll.u32 %v9320_v16, 16  ;;  %v5961_v26 = vmul.f32 %v5930_v17, %v5870_v39  ;;  %6447 = vrot.lane.b32.xlu0 %v6436_v5, %s10376_s27  ;;  %6282 = vrot.lane.b32.xlu1 %v6238_v30, %s10376_s27  ;;  %v6383_v25 = vrot.slane %v6381_v49, 2  ;;  %v6190_v16 = vld [vmem:[#allocation5 + $0x8] sm:$0x8] }
 0x4ee   : > { %9594 = vmatpush3.bf16.msra.mxu1 %v10219_v13  ;;  %v10227_v39 = vld [vmem:[%s15426_s1 + $0x1f0] sm:$0xff]   ;;  %v9113_v30 = vcombine.low %v6190_v16, %v14377_v0  ;;  %v6499_v53 = vshrl.u32 %v9109_v18, 16  ;;  %v6502_v13 = vshll.u32 %v9109_v18, 16 }
 0x4ef   : > { %v6051_v44 = vrot.slane %v6049_v2, 6  ;;  %v6054_v60 = vrot.slane %v6052_v8, 7  ;;  %v9321_v35 = vpack.c.bf16 %v5961_v26, %v5961_v26  ;;  %v14443_v36 = vor.u32 %v6383_v25, %v6380_v47  ;;  %9595 = vmatprep.subr.bf16.mxu1 %v10221_v32 }
 0x4f0   : > { %v6557_v8 = vrot.slane %v9113_v30, 3  ;;  %v6468_v26 = vrot.slane %v9109_v18, 2  ;;  %v6501_v49 = vrot.slane %v6499_v53, 2  ;;  %v6239_v32 = vshrl.u32 %v14388_v23, 16 }
 0x4f1   : > { %v6055_v58 = vor.u32 %v6054_v60, %v6051_v44  ;;  %v6059_v20 = vshrl.u32 %v9321_v35, 16  ;;  %v6062_v11 = vshll.u32 %v9321_v35, 16  ;;  %6352 = vrot.lane.b32.xlu1 %v6341_v54, %s10377_s30  ;;  %v14450_v14 = vsel %vm15649_vm3, %v6376_v7, %v14443_v36 }
 0x4f2   : > { %9596 = vmatpush3.bf16.msra.mxu1 %v10222_v59  ;;  %v6504_v44 = vrot.slane %v6502_v13, 3 }
 0x4f3   : > { %v6056_v22 = vsel %vm11682_vm12, %v6047_v42, %v6055_v58  ;;  %v6061_v17 = vrot.slane %v6059_v20, 6  ;;  %v6064_v38 = vrot.slane %v6062_v11, 7  ;;  %v6057_v63 = vrot.slane %v6055_v58, 4  ;;  %9597 = vmatprep.subr.bf16.mxu1 %v10224_v48 }
 0x4f4   : > { %6156 = vst.msk [vmem:[#allocation5 + $0x14] sm:$0xf] %vm15648_vm14, %v6056_v22  ;;  %v6505_v20 = vor.u32 %v6504_v44, %v6501_v49  ;;  %vm15653_vm14 = vmmov %vm15651_vm4 }
 0x4f5   : > { %v14458_v9 = vor.u32 %v6064_v38, %v6061_v17 }
 0x4f6   : > { %9598 = vmatpush3.bf16.msra.mxu1 %v10225_v3 }
 0x4f7   : > { %v6066_v19 = vsel %vm11682_vm12, %v6057_v63, %v14458_v9  ;;  %9599 = vmatprep.subr.bf16.mxu1 %v10227_v39 }
 0x4f8   : > { %6157 = vst.msk [vmem:[#allocation5 + $0x18] sm:$0xf] %vm15650_vm15, %v6066_v19 }
 0x4fa   : > { %9600 = vmatpush3.bf16.msra.mxu1 %v10228_v37  ;;  %v9433_v37 = vunpack.c.h.bf16 %v14356_v61 }
 0x4fb   : > { %v6172_v41 = vld [vmem:[#allocation5 + $0x14] sm:$0xf] }
 0x4fc   : > { %v14473_v2 = vcombine.low %v14395_v56, %v6172_v41 }
 0x4fe   : > { %v6558_v5 = vrot.slane %v14473_v2, 3  ;;  %v6469_v33 = vrot.slane %v14473_v2, 2  ;;  %v6302_v34 = vrot.slane %v14473_v2, 1  ;;  %v6243_v47 = vshll.u32 %v14473_v2, 16 }
 0x4ff   : > { %v6247_v0 = vshrl.u32 %v14473_v2, 16  ;;  %v14480_v60 = vld [vmem:[#allocation5 + $0x18] sm:$0xf] }
 0x500   : > { %v6559_v56 = vsel %vm1141_vm6, %v6557_v8, %v6558_v5  ;;  %v6470_v35 = vsel %vm15651_vm4, %v6468_v26, %v6469_v33  ;;  %v6303_v6 = vsel %vm605_vm1, %v6300_v27, %v6302_v34  ;;  %v6507_v42 = vrot.slane %v6243_v47, 3  ;;  %vm15654_vm4 = vmmov %vm15650_vm15 }
 0x501   : > { %9987 = vmatmul.mubr.msk.bf16.vlgmr.msra.gmra.mxu0 %vm1183_vm7, %v6559_v56  ;;  %6481 = vrot.lane.b32.xlu0 %v6470_v35, %s10375_s26  ;;  %v6506_v25 = vrot.slane %v6247_v0, 2  ;;  %v6245_v59 = vrot.slane %v6243_v47, 1  ;;  %v14497_v58 = vcombine.low %v6172_v41, %v14480_v60  ;;  %v6241_v27 = vor.u32 %v6239_v32, %v14410_v51  ;;  %v9470_v35 = vld [vmem:[%s15426_s1 + $0x528] sm:$0xff]  }
 0x502   : > { %6314 = vrot.lane.b32.xlu1 %v6303_v6, %s10375_s26  ;;  %9990 = vmatprep.mubr.msk.bf16.mxu0 %vm15555_vm8, %v15492_v45  ;;  %v5931_v41 = vrot.slane %v9433_v37, 4 }
 0x503   : > { %v14502_v11 = vor.u32 %v6507_v42, %v6506_v25  ;;  %v14505_v54 = vor.u32 %v6247_v0, %v6245_v59  ;;  %v6387_v7 = vshrl.u32 %v14497_v58, 16  ;;  %v6390_v22 = vshll.u32 %v14497_v58, 16 }
 0x504   : > { %v6246_v38 = vsel %vm392_vm2, %v6241_v27, %v6245_v59  ;;  %v6437_v48 = vrot.slane %v14497_v58, 2  ;;  %v6342_v3 = vrot.slane %v14497_v58, 1 }
 0x505   : > { %v6509_v17 = vsel %vm15652_vm10, %v6505_v20, %v14502_v11  ;;  %v6389_v51 = vrot.slane %v6387_v7, 1  ;;  %v6392_v63 = vrot.slane %v6390_v22, 2  ;;  %vm15655_vm10 = vmmov %vm15654_vm4 }
 0x506   : > { %6540 = vrot.lane.b32.xlu0 %v6509_v17, %s10377_s30  ;;  %6284 = vrot.lane.b32.xlu1 %v6246_v38, %s10376_s27  ;;  %v6438_v19 = vsel %vm15653_vm14, %v6435_v31, %v6437_v48  ;;  %v6343_v18 = vsel %vm605_vm1, %v6340_v28, %v6342_v3  ;;  %v9469_v31 = vld [vmem:[%s15426_s1 + $0x520] sm:$0xff]  }
 0x507   : > { %v14516_v10 = vor.u32 %v6392_v63, %v6389_v51  ;;  %v9436_v53 = vunpack.c.l.bf16 %v9469_v31  ;;  %v9437_v49 = vunpack.c.h.bf16 %v9469_v31 }
 0x509   : > { %v14533_v16 = vsel %vm15649_vm3, %v14443_v36, %v14516_v10  ;;  %v5932_v36 = vsel %vm5917_vm11, %v14375_v29, %v5931_v41  ;;  %v5933_v0 = vrot.slane %v9436_v53, 4  ;;  %v5935_v59 = vrot.slane %v9437_v49, 4  ;;  %vm15657_vm3 = vmmov %vm15654_vm4 }
 0x50a   : > { %6449 = vrot.lane.b32.xlu0 %v6438_v19, %s10376_s27  ;;  %6354 = vrot.lane.b32.xlu1 %v6343_v18, %s10377_s30  ;;  %v9440_v29 = vunpack.c.l.bf16 %v9470_v35 }
 0x50b   : > { %v5936_v18 = vsel %vm5917_vm11, %v5933_v0, %v5935_v59 }
 0x50c   : > { %v5937_v37 = vrot.slane %v9440_v29, 4 }
 0x51f   : > { %v9552_v39 = vpop.f32.mrf.mxu1 }
 0x521   : > { %v9553_v30 = vpop.f32.mrf.mxu1 }
 0x522   : > { %v9554_v12 = vadd.f32 %v9553_v30, %v9552_v39  ;;  %v9441_v30 = vunpack.c.h.bf16 %v9470_v35 }
 0x523   : > { %v9555_v28 = vpop.f32.mrf.mxu1 }
 0x524   : > { %v5748_v13 = vadd.f32 %v9554_v12, %v14306_v55 }
 0x525   : > { %v9556_v8 = vpop.f32.mrf.mxu1 }
 0x526   : > { %v5836_v26 = vadd.f32 %v14314_v43, %v5748_v13  ;;  %v9557_v47 = vadd.f32 %v9556_v8, %v9555_v28  ;;  %v5934_v43 = vsel %vm5917_vm11, %v5931_v41, %v5933_v0  ;;  %v6067_v13 = vrot.slane %v14458_v9, 4 }
 0x527   : > { %v9558_v61 = vpop.f32.mrf.mxu1  ;;  %v5939_v9 = vrot.slane %v9441_v30, 4 }
 0x528   : > { %v5871_v44 = vmax.f32 %v5836_v26, 0.0  ;;  %v5751_v56 = vadd.f32 %v9557_v47, %v14306_v55 }
 0x529   : > { %v9559_v6 = vpop.f32.mrf.mxu1 }
 0x52a   : > { %v5962_v42 = vmul.f32 %v5932_v36, %v5871_v44  ;;  %v5839_v25 = vadd.f32 %v14316_v62, %v5751_v56  ;;  %v9560_v32 = vadd.f32 %v9559_v6, %v9558_v61  ;;  %v5890_v62 = vld [vmem:[%s15426_s1 + $0x530] sm:$0xf]  ;;  %v5938_v44 = vsel %vm5917_vm11, %v5935_v59, %v5937_v37 }
 0x52b   : > { %v9561_v20 = vpop.f32.mrf.mxu1 }
 0x52c   : > { %v9322_v27 = vpack.c.bf16 %v5962_v42, %v5962_v42  ;;  %v5872_v7 = vmax.f32 %v5839_v25, 0.0  ;;  %v5756_v22 = vadd.f32 %v9560_v32, %v14306_v55 }
 0x52d   : > { %v9562_v17 = vpop.f32.mrf.mxu1 }
 0x52e   : > { %v6069_v38 = vshrl.u32 %v9322_v27, 16  ;;  %v6072_v51 = vshll.u32 %v9322_v27, 16  ;;  %v5963_v63 = vmul.f32 %v5934_v43, %v5872_v7  ;;  %v5844_v19 = vadd.f32 %v14320_v1, %v5756_v22 }
 0x52f   : > { %v9563_v39 = vadd.f32 %v9562_v17, %v9561_v20  ;;  %v9564_v31 = vpop.f32.mrf.mxu1  ;;  %v5903_v1 = vunpack.c.l.bf16 %v5890_v62  ;;  %v5940_v62 = vsel %vm5917_vm11, %v5937_v37, %v5939_v9 }
 0x530   : > { %v6071_v12 = vrot.slane %v6069_v38, 6  ;;  %v6074_v41 = vrot.slane %v6072_v51, 7  ;;  %v9323_v28 = vpack.c.bf16 %v5963_v63, %v5963_v63  ;;  %v5873_v53 = vmax.f32 %v5844_v19, 0.0 }
 0x531   : > { %v5759_v8 = vadd.f32 %v9563_v39, %v14306_v55  ;;  %v9565_v26 = vpop.f32.mrf.mxu1  ;;  %v5941_v22 = vrot.slane %v5903_v1, 4 }
 0x532   : > { %v6075_v47 = vor.u32 %v6074_v41, %v6071_v12  ;;  %v6079_v36 = vshrl.u32 %v9323_v28, 16  ;;  %v6082_v61 = vshll.u32 %v9323_v28, 16  ;;  %v5964_v49 = vmul.f32 %v5936_v18, %v5873_v53 }
 0x533   : > { %v5847_v0 = vadd.f32 %v14325_v21, %v5759_v8  ;;  %v9566_v56 = vadd.f32 %v9565_v26, %v9564_v31  ;;  %v9567_v35 = vpop.f32.mrf.mxu1 }
 0x534   : > { %v6076_v6 = vsel %vm11682_vm12, %v6067_v13, %v6075_v47  ;;  %v6081_v42 = vrot.slane %v6079_v36, 6  ;;  %v6084_v25 = vrot.slane %v6082_v61, 7  ;;  %v9324_v32 = vpack.c.bf16 %v5964_v49, %v5964_v49 }
 0x535   : > { %6158 = vst.msk [vmem:[#allocation5 + $0x1c] sm:$0xf] %vm15650_vm15, %v6076_v6  ;;  %v5874_v43 = vmax.f32 %v5847_v0, 0.0  ;;  %v5764_v20 = vadd.f32 %v9566_v56, %v14306_v55  ;;  %v9568_v29 = vpop.f32.mrf.mxu1  ;;  %v6077_v27 = vrot.slane %v6075_v47, 4  ;;  %vm15658_vm15 = vmmov %vm15657_vm3 }
 0x536   : > { %v6085_v7 = vor.u32 %v6084_v25, %v6081_v42  ;;  %v9569_v21 = vadd.f32 %v9568_v29, %v9567_v35  ;;  %v6089_v59 = vshrl.u32 %v9324_v32, 16  ;;  %v6092_v17 = vshll.u32 %v9324_v32, 16 }
 0x537   : > { %v5965_v38 = vmul.f32 %v5938_v44, %v5874_v43  ;;  %v5852_v51 = vadd.f32 %v14327_v40, %v5764_v20  ;;  %v9570_v63 = vpop.f32.mrf.mxu1  ;;  %v5942_v40 = vsel %vm5917_vm11, %v5939_v9, %v5941_v22  ;;  %vm15656_vm11 = vmmov %vm15654_vm4 }
 0x538   : > { %v6086_v19 = vsel %vm11682_vm12, %v6077_v27, %v6085_v7  ;;  %v5767_v18 = vadd.f32 %v9569_v21, %v14306_v55  ;;  %v6091_v39 = vrot.slane %v6089_v59, 6  ;;  %v6094_v31 = vrot.slane %v6092_v17, 7 }
 0x539   : > { %6159 = vst.msk [vmem:[#allocation5 + $0x20] sm:$0xf] %vm15654_vm4, %v6086_v19  ;;  %v9325_v30 = vpack.c.bf16 %v5965_v38, %v5965_v38  ;;  %v5875_v12 = vmax.f32 %v5852_v51, 0.0  ;;  %v9571_v41 = vpop.f32.mrf.mxu1  ;;  %v6087_v28 = vrot.slane %v6085_v7, 4  ;;  %vm15659_vm4 = vsmask.f32 5376 }
 0x53a   : > { %v5855_v53 = vadd.f32 %v14329_v15, %v5767_v18  ;;  %v9572_v13 = vadd.f32 %v9571_v41, %v9570_v63  ;;  %v6095_v8 = vor.u32 %v6094_v31, %v6091_v39 }
 0x53b   : > { %v6099_v26 = vshrl.u32 %v9325_v30, 16  ;;  %v6102_v1 = vshll.u32 %v9325_v30, 16  ;;  %v5966_v47 = vmul.f32 %v5940_v62, %v5875_v12  ;;  %v9573_v37 = vpop.f32.mrf.mxu1 }
 0x53c   : > { %v5876_v36 = vmax.f32 %v5855_v53, 0.0  ;;  %v5772_v61 = vadd.f32 %v9572_v13, %v14306_v55  ;;  %v6174_v49 = vld [vmem:[#allocation5 + $0x1c] sm:$0xf]  ;;  %v6096_v0 = vsel %vm11682_vm12, %v6087_v28, %v6095_v8  ;;  %v6097_v9 = vrot.slane %v6095_v8, 4 }
 0x53d   : > { %v6101_v44 = vrot.slane %v6099_v26, 6  ;;  %v6104_v56 = vrot.slane %v6102_v1, 7  ;;  %v9574_v35 = vpop.f32.mrf.mxu1  ;;  %6160 = vst.msk [vmem:[#allocation5 + $0x24] sm:$0xf] %vm15655_vm10, %v6096_v0  ;;  %v9326_v15 = vpack.c.bf16 %v5966_v47, %v5966_v47  ;;  %v14577_v25 = vcombine.low %v14480_v60, %v6174_v49 }
 0x53e   : > { %v5860_v6 = vadd.f32 %v14331_v57, %v5772_v61  ;;  %v5967_v42 = vmul.f32 %v5942_v40, %v5876_v36 }
 0x53f   : > { %v6105_v32 = vor.u32 %v6104_v56, %v6101_v44  ;;  %v6109_v43 = vshrl.u32 %v9326_v15, 16  ;;  %v6112_v55 = vshll.u32 %v9326_v15, 16  ;;  %v6560_v21 = vrot.slane %v14577_v25, 3 }
 0x540   : > { %v5877_v20 = vmax.f32 %v5860_v6, 0.0  ;;  %v9327_v29 = vpack.c.bf16 %v5967_v42, %v5967_v42  ;;  %v6471_v59 = vrot.slane %v14577_v25, 2  ;;  %v6175_v51 = vld [vmem:[#allocation5 + $0x20] sm:$0xf]  ;;  %v6304_v18 = vrot.slane %v14577_v25, 1 }
 0x541   : > { %v6106_v27 = vsel %vm11682_vm12, %v6097_v9, %v6105_v32  ;;  %v6107_v7 = vrot.slane %v6105_v32, 4  ;;  %v6111_v57 = vrot.slane %v6109_v43, 6  ;;  %v6114_v17 = vrot.slane %v6112_v55, 7  ;;  %v6164_v6 = vld [vmem:[#allocation5 + $0x34] sm:$0xf] }
 0x542   : > { %6161 = vst.msk [vmem:[#allocation5 + $0x28] sm:$0xf] %vm15656_vm11, %v6106_v27  ;;  %v5968_v60 = vmul.f32 %v5941_v22, %v5877_v20  ;;  %v6119_v38 = vshrl.u32 %v9327_v29, 16  ;;  %v6122_v63 = vshll.u32 %v9327_v29, 16  ;;  %v6561_v19 = vsel %vm1141_vm6, %v6558_v5, %v6560_v21  ;;  %vm15662_vm11 = vmmov %vm15659_vm4 }
 0x543   : > { %v6472_v62 = vsel %vm15653_vm14, %v6469_v33, %v6471_v59  ;;  %v6115_v39 = vor.u32 %v6114_v17, %v6111_v57  ;;  %9991 = vmatmul.mubr.msk.bf16.gmra.mxu0 %vm1183_vm7, %v6561_v19  ;;  %v6251_v22 = vshll.u32 %v14577_v25, 16  ;;  %v6305_v5 = vsel %vm605_vm1, %v6302_v34, %v6304_v18 }
 0x544   : > { %v9328_v31 = vpack.c.bf16 %v5968_v60, %v5968_v60  ;;  %v6121_v30 = vrot.slane %v6119_v38, 6  ;;  %6483 = vrot.lane.b32.xlu0 %v6472_v62, %s10375_s26  ;;  %v6124_v12 = vrot.slane %v6122_v63, 7  ;;  %v6255_v41 = vshrl.u32 %v14577_v25, 16  ;;  %9994 = vmatprep.mubr.msk.bf16.mxu0 %vm15555_vm8, %v15492_v45  ;;  %v6176_v28 = vld [vmem:[#allocation5 + $0x24] sm:$0xf] }
 0x545   : > { %v14602_v33 = vcombine.low %v6174_v49, %v6175_v51  ;;  %v6116_v53 = vsel %vm11682_vm12, %v6107_v7, %v6115_v39  ;;  %v6117_v13 = vrot.slane %v6115_v39, 4  ;;  %6316 = vrot.lane.b32.xlu1 %v6305_v5, %s10375_s26  ;;  %v6511_v1 = vrot.slane %v6251_v22, 3 }
 0x546   : > { %v6129_v40 = vshrl.u32 %v9328_v31, 16  ;;  %v6132_v8 = vshll.u32 %v9328_v31, 16  ;;  %6162 = vst.msk [vmem:[#allocation5 + $0x2c] sm:$0xf] %vm15657_vm3, %v6116_v53  ;;  %v6125_v26 = vor.u32 %v6124_v12, %v6121_v30  ;;  %v6510_v34 = vrot.slane %v6255_v41, 2 }
 0x547   : > { %v6253_v47 = vrot.slane %v6251_v22, 1  ;;  %v14608_v61 = vcombine.low %v6175_v51, %v6176_v28  ;;  %v6439_v56 = vrot.slane %v14602_v33, 2  ;;  %v6344_v42 = vrot.slane %v14602_v33, 1 }
 0x548   : > { %v6131_v37 = vrot.slane %v6129_v40, 6  ;;  %v6134_v36 = vrot.slane %v6132_v8, 7  ;;  %v6126_v49 = vsel %vm11682_vm12, %v6117_v13, %v6125_v26  ;;  %v6512_v0 = vor.u32 %v6511_v1, %v6510_v34  ;;  %v14682_v1 = vld [vmem:[#allocation5 + $0x38] sm:$0xf] }
 0x549   : > { %v6254_v44 = vsel %vm392_vm2, %v14505_v54, %v6253_v47  ;;  %v6127_v35 = vrot.slane %v6125_v26, 4  ;;  %6163 = vst.msk [vmem:[#allocation5 + $0x30] sm:$0xf] %vm15658_vm15, %v6126_v49  ;;  %v6562_v9 = vrot.slane %v14608_v61, 3  ;;  %v6259_v43 = vshll.u32 %v14608_v61, 16 }
 0x54a   : > { %v6135_v15 = vor.u32 %v6134_v36, %v6131_v37  ;;  %6286 = vrot.lane.b32.xlu1 %v6254_v44, %s10376_s27  ;;  %v6513_v32 = vsel %vm15659_vm4, %v14502_v11, %v6512_v0  ;;  %v6263_v20 = vshrl.u32 %v14608_v61, 16  ;;  %v6345_v27 = vsel %vm605_vm1, %v6342_v3, %v6344_v42  ;;  %v6177_v7 = vld [vmem:[#allocation5 + $0x28] sm:$0xf] }
 0x54b   : > { %6542 = vrot.lane.b32.xlu0 %v6513_v32, %s10377_s30  ;;  %v6563_v55 = vsel %vm1141_vm6, %v6560_v21, %v6562_v9  ;;  %v6306_v11 = vrot.slane %v14608_v61, 1  ;;  %v6473_v3 = vrot.slane %v14608_v61, 2  ;;  %v6515_v17 = vrot.slane %v6259_v43, 3 }
 0x54c   : > { %v6136_v54 = vsel %vm11682_vm12, %v6127_v35, %v6135_v15  ;;  %9995 = vmatmul.mubr.msk.bf16.gmra.mxu0 %vm1183_vm7, %v6563_v55  ;;  %vm15660_vm12 = vmmov %vm15653_vm14  ;;  %v6514_v57 = vrot.slane %v6263_v20, 2  ;;  %v14648_v38 = vcombine.low %v6176_v28, %v6177_v7  ;;  %v6257_v62 = vor.u32 %v6255_v41, %v6253_v47  ;;  %v6189_v47 = vld [vmem:[#allocation5 + $0x3c] sm:$0x1] }
 0x54d   : > { %v6165_v29 = vsel %vm13284_vm5, %v6136_v54, %v6164_v6  ;;  %v6440_v52 = vsel %vm15660_vm12, %v6437_v48, %v6439_v56  ;;  %9998 = vmatprep.mubr.msk.bf16.mxu0 %vm15555_vm8, %v15492_v45  ;;  %v6178_v21 = vld [vmem:[#allocation5 + $0x2c] sm:$0xf]  ;;  %v6307_v58 = vsel %vm605_vm1, %v6304_v18, %v6306_v11  ;;  %v6261_v48 = vrot.slane %v6259_v43, 1  ;;  %vm15661_vm10 = vmmov %vm15660_vm12 }
 0x54e   : > { %6166 = vst [vmem:[#allocation5 + $0x34] sm:$0xf] %v6165_v29  ;;  %6356 = vrot.lane.b32.xlu1 %v6345_v27, %s10377_s30  ;;  %v14645_v60 = vcombine.low %v6177_v7, %v6178_v21  ;;  %v6474_v63 = vsel %vm15661_vm10, %v6471_v59, %v6473_v3  ;;  %v14656_v19 = vor.u32 %v6515_v17, %v6514_v57  ;;  %v6346_v31 = vrot.slane %v14648_v38, 1  ;;  %vm15663_vm14 = vmmov %vm15661_vm10 }
 0x54f   : > { %6451 = vrot.lane.b32.xlu0 %v6440_v52, %s10376_s27  ;;  %v6262_v18 = vsel %vm392_vm2, %v6257_v62, %v6261_v48  ;;  %v6441_v28 = vrot.slane %v14648_v38, 2  ;;  %v6396_v40 = vshrl.u32 %v14602_v33, 16  ;;  %v6399_v8 = vshll.u32 %v14602_v33, 16  ;;  %vm15664_vm3 = vmmov %vm15661_vm10 }
 0x550   : > { %v6564_v51 = vrot.slane %v14645_v60, 3  ;;  %v6183_v30 = vld [vmem:[#allocation5 + $0x30] sm:$0xf]  ;;  %v6267_v12 = vshll.u32 %v14645_v60, 16  ;;  %v6271_v5 = vshrl.u32 %v14645_v60, 16  ;;  %v6517_v41 = vsel %vm15662_vm11, %v6512_v0, %v14656_v19  ;;  %vm15668_vm11 = vmmov %vm15664_vm3 }
 0x551   : > { %v6475_v53 = vrot.slane %v14645_v60, 2  ;;  %v6347_v26 = vsel %vm605_vm1, %v6344_v42, %v6346_v31  ;;  %v6308_v34 = vrot.slane %v14645_v60, 1  ;;  %v14686_v0 = vcombine.low %v6178_v21, %v6183_v30  ;;  %v14702_v42 = vld [vmem:[#allocation5 + $0x30] ss:$0 sps:$4 sm:$0x77]  }
 0x552   : > { %6318 = vrot.lane.b32.xlu1 %v6307_v58, %s10375_s26  ;;  %v6565_v39 = vsel %vm1141_vm6, %v6562_v9, %v6564_v51  ;;  %v6518_v36 = vrot.slane %v6271_v5, 2  ;;  %v6519_v49 = vrot.slane %v6267_v12, 3  ;;  %v6442_v44 = vsel %vm15663_vm14, %v6439_v56, %v6441_v28 }
 0x553   : > { %6485 = vrot.lane.b32.xlu0 %v6474_v63, %s10375_s26  ;;  %v6476_v15 = vsel %vm15664_vm3, %v6473_v3, %v6475_v53  ;;  %v14700_v6 = vcombine.low %v14682_v1, %v6189_v47  ;;  %v6398_v9 = vrot.slane %v6396_v40, 1  ;;  %v6401_v32 = vrot.slane %v6399_v8, 2 }
 0x554   : > { %9999 = vmatmul.mubr.msk.bf16.gmra.mxu0 %vm1183_vm7, %v6565_v39  ;;  %v6309_v33 = vsel %vm605_vm1, %v6306_v11, %v6308_v34  ;;  %v6269_v56 = vrot.slane %v6267_v12, 1  ;;  %v6405_v43 = vshrl.u32 %v14648_v38, 16  ;;  %v6408_v54 = vshll.u32 %v14648_v38, 16 }
 0x555   : > { %v6185_v22 = vld [vmem:[#allocation5 + $0x34] sm:$0xf]  ;;  %10002 = vmatprep.mubr.msk.bf16.mxu0 %vm15555_vm8, %v15492_v45  ;;  %v14711_v55 = vor.u32 %v6519_v49, %v6518_v36  ;;  %v6265_v29 = vor.u32 %v6263_v20, %v6261_v48  ;;  %v6402_v27 = vor.u32 %v6401_v32, %v6398_v9  ;;  %v6414_v11 = vshrl.u32 %v14686_v0, 16 }
 0x556   : > { %6288 = vrot.lane.b32.xlu1 %v6262_v18, %s10376_s27  ;;  %v14666_v59 = vcombine.low %v6183_v30, %v6185_v22  ;;  %v14693_v35 = vcombine.low %v6185_v22, %v6185_v22  ;;  %v6407_v7 = vrot.slane %v6405_v43, 1  ;;  %v6410_v52 = vrot.slane %v6408_v54, 2 }
 0x557   : > { %6544 = vrot.lane.b32.xlu0 %v6517_v41, %s10377_s30  ;;  %v6417_v21 = vshll.u32 %v14686_v0, 16  ;;  %v6568_v57 = vrot.slane %v14700_v6, 3  ;;  %v6275_v17 = vshll.u32 %v14702_v42, 16  ;;  %vm15665_vm15 = vsmask.f32 6400 }
 0x558   : > { %v6566_v13 = vrot.slane %v14666_v59, 3  ;;  %v6423_v3 = vshrl.u32 %v14693_v35, 16  ;;  %v14725_v20 = vsel %vm15665_vm15, %v14516_v10, %v6402_v27  ;;  %v6416_v58 = vrot.slane %v6414_v11, 1  ;;  %vm15666_vm12 = vmmov %vm15665_vm15 }
 0x559   : > { %v6270_v48 = vsel %vm392_vm2, %v6265_v29, %v6269_v56  ;;  %v6411_v63 = vor.u32 %v6410_v52, %v6407_v7  ;;  %v6419_v62 = vrot.slane %v6417_v21, 2  ;;  %v6426_v18 = vshll.u32 %v14693_v35, 16  ;;  %vm15667_vm10 = vmmov %vm15666_vm12 }
 0x55a   : > { %6358 = vrot.lane.b32.xlu1 %v6347_v26, %s10377_s30  ;;  %v6567_v37 = vsel %vm1141_vm6, %v6564_v51, %v6566_v13  ;;  %v6348_v51 = vrot.slane %v14686_v0, 1  ;;  %v6425_v39 = vrot.slane %v6423_v3, 1  ;;  %v6521_v30 = vsel %vm15659_vm4, %v14656_v19, %v14711_v55  ;;  %vm15669_vm14 = vmmov %vm15667_vm10 }
 0x55b   : > { %6453 = vrot.lane.b32.xlu0 %v6442_v44, %s10376_s27  ;;  %v6443_v22 = vrot.slane %v14686_v0, 2  ;;  %v14736_v10 = vsel %vm15666_vm12, %v6402_v27, %v6411_v63  ;;  %v6420_v12 = vor.u32 %v6419_v62, %v6416_v58  ;;  %v6569_v41 = vsel %vm1141_vm6, %v6566_v13, %v6568_v57  ;;  %v6313_v38 = vpop.permute.xlu1 %6312  ;;  %vm15670_vm15 = vmmov %vm15664_vm3 }
 0x55c   : > { %10003 = vmatmul.mubr.msk.bf16.gmra.mxu0 %vm1183_vm7, %v6567_v37  ;;  %v6428_v40 = vrot.slane %v6426_v18, 2  ;;  %v6349_v8 = vsel %vm605_vm1, %v6346_v31, %v6348_v51  ;;  %v6273_v26 = vor.u32 %v6271_v5, %v6269_v56  ;;  %v6277_v47 = vrot.slane %v6275_v17, 1  ;;  %vm15671_vm12 = vmmov %vm15664_vm3 }
 0x55d   : > { %10006 = vmatprep.mubr.msk.bf16.mxu0 %vm15555_vm8, %v15492_v45  ;;  %v14745_v19 = vsel %vm15667_vm10, %v6411_v63, %v6420_v12  ;;  %v6444_v13 = vsel %vm15668_vm11, %v6441_v28, %v6443_v22  ;;  %v6477_v31 = vrot.slane %v14666_v59, 2  ;;  %v6523_v36 = vshrl.u32 %v14666_v59, 16 }
 0x55e   : > { %6320 = vrot.lane.b32.xlu1 %v6309_v33, %s10375_s26  ;;  %v14748_v37 = vor.u32 %v6428_v40, %v6425_v39  ;;  %v6526_v5 = vshll.u32 %v14666_v59, 16  ;;  %v6278_v0 = vsel %vm392_vm2, %v6273_v26, %v6277_v47  ;;  %v6310_v44 = vrot.slane %v14702_v42, 1 }
 0x55f   : > { %6487 = vrot.lane.b32.xlu0 %v6476_v15, %s10375_s26  ;;  %v10223_v15 = vld [vmem:[#allocation5 + $0x34] ss:$0 sps:$4 sm:$0x77]   ;;  %v6478_v28 = vsel %vm15664_vm3, %v6475_v53, %v6477_v31  ;;  %v6445_v59 = vrot.slane %v14693_v35, 2  ;;  %v6525_v9 = vrot.slane %v6523_v36, 2  ;;  %v9111_v43 = vcombine.low %v14682_v1, %v14682_v1  ;;  %v6448_v54 = vpop.permute.xlu0 %6447  ;;  %v6283_v11 = vpop.permute.xlu1 %6282 }
 0x560   : > { %v14761_v49 = vsel %vm15669_vm14, %v6420_v12, %v14748_v37  ;;  %v6528_v32 = vrot.slane %v6526_v5, 3  ;;  %v6311_v33 = vsel %vm605_vm1, %v6308_v34, %v6310_v44  ;;  %v6350_v56 = vrot.slane %v10223_v15, 1 }
 0x561   : > { %v6446_v53 = vsel %vm15670_vm15, %v6443_v22, %v6445_v59  ;;  %v6532_v29 = vshrl.u32 %v14700_v6, 16  ;;  %v6535_v27 = vshll.u32 %v14700_v6, 16  ;;  %v6279_v7 = vshrl.u32 %v14702_v42, 16  ;;  %vm15676_vm15 = vmmov %vm15659_vm4 }
 0x562   : > { %6290 = vrot.lane.b32.xlu1 %v6270_v48, %s10376_s27  ;;  %v6529_v35 = vor.u32 %v6528_v32, %v6525_v9  ;;  %v6351_v34 = vsel %vm605_vm1, %v6348_v51, %v6350_v56  ;;  %v6479_v52 = vrot.slane %v9111_v43, 2  ;;  %v6571_v6 = vsel %vm1183_vm7, %v14360_v46, %v6283_v11 }
 0x563   : > { %6546 = vrot.lane.b32.xlu0 %v6521_v30, %s10377_s30  ;;  %v6534_v3 = vrot.slane %v6532_v29, 2  ;;  %v6281_v17 = vor.u32 %v6279_v7, %v6277_v47  ;;  %v6622_v58 = vsel %vm1183_vm7, %v14450_v14, %v6448_v54  ;;  %v6353_v48 = vpop.permute.xlu1 %6352  ;;  %vm15672_vm10 = vcmask 523264  }
 0x564   : > { %10007 = vmatmul.mubr.msk.bf16.gmra.mxu0 %vm1183_vm7, %v6569_v41  ;;  %v6530_v1 = vsel %vm15659_vm4, %v14711_v55, %v6529_v35  ;;  %v6480_v42 = vsel %vm15671_vm12, %v6477_v31, %v6479_v52  ;;  %vm15673_vm11 = vmmov %vm15672_vm10  ;;  %vm15674_vm14 = vcmask 785408  }
 0x565   : > { %10010 = vmatprep.mubr.msk.bf16.mxu0 %vm15555_vm8, %v15492_v45  ;;  %v6586_v62 = vsel %vm15673_vm11, %v6571_v6, %v6313_v38  ;;  %vm15675_vm3 = vmmov %vm15674_vm14 }
 0x566   : > { %6360 = vrot.lane.b32.xlu1 %v6349_v8, %s10377_s30  ;;  %v6600_v46 = vsel %vm15675_vm3, %v6586_v62, %v6353_v48  ;;  %vm15677_vm4 = vmmov %vm15672_vm10 }
 0x567   : > { %6455 = vrot.lane.b32.xlu0 %v6444_v13, %s10376_s27  ;;  %vm15678_vm12 = vmmov %vm15677_vm4 }
 0x568   : > { %vm15680_vm11 = vmmov %vm15675_vm3 }
 0x56a   : > { %6292 = vrot.lane.b32.xlu1 %v6278_v0, %s10376_s27 }
 0x56b   : > { %6489 = vrot.lane.b32.xlu0 %v6478_v28, %s10375_s26 }
 0x56c   : > { %10011 = vmatmul.mubr.msk.bf16.gmra.mxu0 %vm1183_vm7, %v6568_v57  ;;  %v6537_v57 = vrot.slane %v6535_v27, 3 }
 0x56e   : > { %6322 = vrot.lane.b32.xlu1 %v6311_v33, %s10375_s26  ;;  %v6538_v51 = vor.u32 %v6537_v57, %v6534_v3 }
 0x56f   : > { %6457 = vrot.lane.b32.xlu0 %v6446_v53, %s10376_s27 }
 0x570   : > { %v6539_v14 = vsel %vm15676_vm15, %v6529_v35, %v6538_v51 }
 0x572   : > { %6362 = vrot.lane.b32.xlu1 %v6351_v34, %s10377_s30 }
 0x573   : > { %v6482_v21 = vpop.permute.xlu0 %6481  ;;  %6548 = vrot.lane.b32.xlu0 %v6530_v1, %s10377_s30 }
 0x574   : > { %v6642_v55 = vsel %vm15672_vm10, %v6622_v58, %v6482_v21  ;;  %v6315_v18 = vpop.permute.xlu1 %6314  ;;  %vm15679_vm10 = vmmov %vm15675_vm3 }
 0x575   : > { %vm15682_vm3 = vmmov %vm15677_vm4 }
 0x576   : > { %6294 = vrot.lane.b32.xlu1 %v6281_v17, %s10376_s27  ;;  %vm15683_vm15 = vmmov %vm15679_vm10 }
 0x577   : > { %6491 = vrot.lane.b32.xlu0 %v6480_v42, %s10375_s26 }
 0x578   : > { %v6541_v63 = vpop.permute.xlu0 %6540  ;;  %v6285_v30 = vpop.permute.xlu1 %6284 }
 0x579   : > { %v6656_v39 = vsel %vm15674_vm14, %v6642_v55, %v6541_v63  ;;  %v6573_v8 = vsel %vm1183_vm7, %v14388_v23, %v6285_v30  ;;  %vm15681_vm14 = vmmov %vm15677_vm4 }
 0x57a   : > { %6324 = vrot.lane.b32.xlu1 %v6310_v44, %s10375_s26  ;;  %6878 = vmatprep.mubr.bf16.mxu1 %v6656_v39  ;;  %v6588_v36 = vsel %vm15678_vm12, %v6573_v8, %v6315_v18  ;;  %vm15685_vm12 = vmmov %vm15682_vm3 }
 0x57b   : > { %6879 = vmatmul.mubr.bf16.vlgmr.msra.gmra.mxu1 %v6600_v46  ;;  %6550 = vrot.lane.b32.xlu0 %v6539_v14, %s10377_s30 }
 0x57c   : > { %v6355_v22 = vpop.permute.xlu1 %6354  ;;  %v6450_v12 = vpop.permute.xlu0 %6449 }
 0x57d   : > { %v6625_v47 = vsel %vm1183_vm7, %v14533_v16, %v6450_v12  ;;  %v6603_v0 = vsel %vm15680_vm11, %v6588_v36, %v6355_v22  ;;  %v10229_v36 = vld [vmem:[#allocation5 + $0x30] ss:$0 sps:$4 sm:$0x33]  }
 0x57e   : > { %6364 = vrot.lane.b32.xlu1 %v6350_v56, %s10377_s30 }
 0x57f   : > { %6459 = vrot.lane.b32.xlu0 %v6445_v59, %s10376_s27 }
 0x583   : > { %6493 = vrot.lane.b32.xlu0 %v6479_v52, %s10375_s26 }
 0x587   : > { %6552 = vrot.lane.b32.xlu0 %v6538_v51, %s10377_s30 }
 0x5b6   : > { %v6484_v40 = vpop.permute.xlu0 %6483 }
 0x5b7   : > { %v6317_v41 = vpop.permute.xlu1 %6316  ;;  %v6644_v13 = vsel %vm15677_vm4, %v6625_v47, %v6484_v40  ;;  %vm15684_vm4 = vmmov %vm15679_vm10 }
 0x5b8   : > { %vm15687_vm11 = vmmov %vm15684_vm4 }
 0x5bc   : > { %v6287_v26 = vpop.permute.xlu1 %6286 }
 0x5bd   : > { %v6543_v31 = vpop.permute.xlu0 %6542  ;;  %v6575_v32 = vsel %vm1183_vm7, %v14473_v2, %v6287_v26 }
 0x5be   : > { %v6659_v5 = vsel %vm15679_vm10, %v6644_v13, %v6543_v31  ;;  %v6590_v53 = vsel %vm15682_vm3, %v6575_v32, %v6317_v41  ;;  %vm15686_vm10 = vmmov %vm15682_vm3 }
 0x5bf   : > { %6886 = vmatprep.mubr.bf16.mxu1 %v6659_v5 }
 0x5c0   : > { %v6357_v44 = vpop.permute.xlu1 %6356  ;;  %6887 = vmatmul.mubr.bf16.gmra.mxu1 %v6603_v0 }
 0x5c1   : > { %v6968_v15 = vpop.f32.mrf.mxu0  ;;  %v6452_v38 = vpop.permute.xlu0 %6451  ;;  %v6606_v29 = vsel %vm15684_vm4, %v6590_v53, %v6357_v44 }
 0x5c2   : > { %v6628_v56 = vsel %vm1183_vm7, %v14725_v20, %v6452_v38 }
 0x5c3   : > { %v9988_v28 = vpop.f32.mrf.mxu0 }
 0x5c4   : > { %v6319_v23 = vpop.permute.xlu1 %6318 }
 0x5c5   : > { %v14814_v59 = vpop.f32.mrf.mxu0  ;;  %v6486_v9 = vpop.permute.xlu0 %6485 }
 0x5c6   : > { %v6646_v43 = vsel %vm15681_vm14, %v6628_v56, %v6486_v9  ;;  %vm15688_vm14 = vmmov %vm15684_vm4 }
 0x5c7   : > { %v9989_v16 = vpop.f32.mrf.mxu0 }
 0x5c8   : > { %v6289_v33 = vpop.permute.xlu1 %6288 }
 0x5c9   : > { %v6545_v54 = vpop.permute.xlu0 %6544  ;;  %v6577_v2 = vsel %vm1183_vm7, %v14577_v25, %v6289_v33 }
 0x5ca   : > { %v6662_v35 = vsel %vm15683_vm15, %v6646_v43, %v6545_v54  ;;  %v6592_v3 = vsel %vm15686_vm10, %v6577_v2, %v6319_v23  ;;  %vm15689_vm15 = vmmov %vm15682_vm3 }
 0x5cb   : > { %6894 = vmatprep.mubr.bf16.mxu1 %v6662_v35  ;;  %vm15691_vm10 = vmmov %vm15682_vm3 }
 0x5cc   : > { %v6359_v27 = vpop.permute.xlu1 %6358  ;;  %6895 = vmatmul.mubr.bf16.gmra.mxu1 %v6606_v29 }
 0x5cd   : > { %v6454_v11 = vpop.permute.xlu0 %6453  ;;  %v6609_v17 = vsel %vm15688_vm14, %v6592_v3, %v6359_v27  ;;  %vm15693_vm14 = vmmov %vm15684_vm4  ;;  %v14872_v3 = vld [vmem:[%s15427_s2 + $0x3] ss:$0 sm:$0xff] }
 0x5ce   : > { %v6631_v20 = vsel %vm1183_vm7, %v14736_v10, %v6454_v11 }
 0x5d0   : > { %v6321_v34 = vpop.permute.xlu1 %6320 }
 0x5d1   : > { %v6488_v7 = vpop.permute.xlu0 %6487 }
 0x5d2   : > { %v6648_v52 = vsel %vm15685_vm12, %v6631_v20, %v6488_v7  ;;  %vm15690_vm12 = vmmov %vm15684_vm4 }
 0x5d4   : > { %v6291_v1 = vpop.permute.xlu1 %6290 }
 0x5d5   : > { %v6547_v21 = vpop.permute.xlu0 %6546  ;;  %v6579_v10 = vsel %vm1183_vm7, %v14608_v61, %v6291_v1 }
 0x5d6   : > { %v6665_v57 = vsel %vm15687_vm11, %v6648_v52, %v6547_v21  ;;  %v6594_v39 = vsel %vm15689_vm15, %v6579_v10, %v6321_v34  ;;  %vm15692_vm11 = vmmov %vm15682_vm3 }
 0x5d7   : > { %6902 = vmatprep.mubr.bf16.mxu1 %v6665_v57  ;;  %vm15695_vm15 = vmmov %vm15691_vm10 }
 0x5d8   : > { %v6361_v6 = vpop.permute.xlu1 %6360  ;;  %6903 = vmatmul.mubr.bf16.gmra.mxu1 %v6609_v17 }
 0x5d9   : > { %v6456_v58 = vpop.permute.xlu0 %6455  ;;  %v6612_v18 = vsel %vm15690_vm12, %v6594_v39, %v6361_v6  ;;  %v10240_v39 = vld [vmem:[%s15426_s1 + $0x278] sm:$0xff]  }
 0x5da   : > { %v6634_v55 = vsel %vm1183_vm7, %v14745_v19, %v6456_v58 }
 0x5dc   : > { %v6293_v48 = vpop.permute.xlu1 %6292 }
 0x5dd   : > { %v6490_v42 = vpop.permute.xlu0 %6489  ;;  %v6581_v19 = vsel %vm1183_vm7, %v14645_v60, %v6293_v48 }
 0x5de   : > { %v6650_v63 = vsel %vm15682_vm3, %v6634_v55, %v6490_v42  ;;  %vm15694_vm3 = vmmov %vm15684_vm4 }
 0x5df   : > { %vm15697_vm12 = vmmov %vm15694_vm3 }
 0x5e0   : > { %v6323_v25 = vpop.permute.xlu1 %6322 }
 0x5e1   : > { %v6458_v51 = vpop.permute.xlu0 %6457  ;;  %v6596_v40 = vsel %vm15692_vm11, %v6581_v19, %v6323_v25  ;;  %vm15699_vm11 = vcmask 257027  }
 0x5e2   : > { %v6637_v22 = vsel %vm1183_vm7, %v14761_v49, %v6458_v51 }
 0x5e4   : > { %v6363_v46 = vpop.permute.xlu1 %6362 }
 0x5e5   : > { %v6549_v62 = vpop.permute.xlu0 %6548  ;;  %v6615_v26 = vsel %vm15694_vm3, %v6596_v40, %v6363_v46  ;;  %v10241_v46 = vld [vmem:[%s15426_s1 + $0x2b0] sm:$0xff]  }
 0x5e6   : > { %v6668_v14 = vsel %vm15684_vm4, %v6650_v63, %v6549_v62  ;;  %vm15696_vm4 = vmmov %vm15691_vm10  ;;  %v10239_v62 = vld [vmem:[%s15426_s1 + $0x2b8] sm:$0xff]  }
 0x5e7   : > { %6910 = vmatprep.mubr.bf16.mxu1 %v6668_v14  ;;  %9652 = vmatprep.subr.bf16.mxu1 %v10239_v62  ;;  %v10243_v14 = vld [vmem:[%s15426_s1 + $0x2a8] sm:$0xff]  }
 0x5e8   : > { %6911 = vmatmul.mubr.bf16.gmra.mxu1 %v6612_v18  ;;  %v6295_v61 = vpop.permute.xlu1 %6294  ;;  %v10244_v18 = vld [vmem:[%s15426_s1 + $0x268] sm:$0xff]  }
 0x5e9   : > { %v6492_v30 = vpop.permute.xlu0 %6491  ;;  %v6584_v60 = vsel %vm1183_vm7, %v10229_v36, %v6295_v61  ;;  %9653 = vmatpush3.bf16.msra.mxu1 %v10240_v39 }
 0x5ea   : > { %v6652_v12 = vsel %vm15691_vm10, %v6637_v22, %v6492_v30  ;;  %vm15698_vm10 = vmmov %vm15694_vm3  ;;  %9654 = vmatprep.subr.bf16.mxu1 %v10241_v46  ;;  %vm15701_vm3 = vcmask 254976  }
 0x5ec   : > { %v6325_v13 = vpop.permute.xlu1 %6324 }
 0x5ed   : > { %v6551_v41 = vpop.permute.xlu0 %6550  ;;  %v6598_v15 = vsel %vm15696_vm4, %v6584_v60, %v6325_v13  ;;  %vm15702_vm4 = vcmask 1045504  }
 0x5ee   : > { %v6671_v8 = vsel %vm15693_vm14, %v6652_v12, %v6551_v41  ;;  %vm15700_vm14 = vcmask 253952  }
 0x5ef   : > { %6918 = vmatprep.mubr.bf16.mxu1 %v6671_v8 }
 0x5f0   : > { %6919 = vmatmul.mubr.bf16.gmra.mxu1 %v6615_v26  ;;  %v6365_v49 = vpop.permute.xlu1 %6364 }
 0x5f1   : > { %v6460_v47 = vpop.permute.xlu0 %6459  ;;  %v6618_v28 = vsel %vm15698_vm10, %v6598_v15, %v6365_v49  ;;  %vm15704_vm10 = vsmask.f32 5376 }
 0x5f2   : > { %v6640_v5 = vsel %vm1183_vm7, %v14748_v37, %v6460_v47 }
 0x5f5   : > { %v6494_v31 = vpop.permute.xlu0 %6493 }
 0x5f6   : > { %v6654_v0 = vsel %vm15695_vm15, %v6640_v5, %v6494_v31  ;;  %vm7215_vm15 = vsmask.f32 4352 }
 0x5f9   : > { %v6553_v44 = vpop.permute.xlu0 %6552 }
 0x5fa   : > { %v6674_v38 = vsel %vm15697_vm12, %v6654_v0, %v6553_v44  ;;  %vm15703_vm12 = vmmov %vm15702_vm4 }
 0x5fb   : > { %6926 = vmatprep.mubr.bf16.mxu1 %v6674_v38 }
 0x5fc   : > { %6927 = vmatmul.mubr.bf16.gmra.mxu1 %v6618_v28 }
 0x603   : > { %v6976_v23 = vpop.f32.mrf.mxu0 }
 0x605   : > { %v9992_v9 = vpop.f32.mrf.mxu0 }
 0x607   : > { %v6979_v16 = vpop.f32.mrf.mxu0 }
 0x609   : > { %v9993_v32 = vpop.f32.mrf.mxu0 }
 0x60c   : > { %v6984_v33 = vpop.f32.mrf.mxu0 }
 0x60e   : > { %v9996_v56 = vpop.f32.mrf.mxu0 }
 0x610   : > { %v14855_v37 = vpop.f32.mrf.mxu0 }
 0x612   : > { %v9997_v43 = vpop.f32.mrf.mxu0 }
 0x614   : > { %v14857_v54 = vpop.f32.mrf.mxu0 }
 0x616   : > { %v10000_v53 = vpop.f32.mrf.mxu0 }
 0x618   : > { %v14859_v35 = vpop.f32.mrf.mxu0 }
 0x61a   : > { %v10001_v29 = vpop.f32.mrf.mxu0 }
 0x61c   : > { %v14861_v27 = vpop.f32.mrf.mxu0 }
 0x61e   : > { %v10004_v11 = vpop.f32.mrf.mxu0 }
 0x620   : > { %v14863_v34 = vpop.f32.mrf.mxu0 }
 0x622   : > { %v10005_v7 = vpop.f32.mrf.mxu0 }
 0x624   : > { %v14865_v2 = vpop.f32.mrf.mxu0 }
 0x626   : > { %v10008_v1 = vpop.f32.mrf.mxu0 }
 0x628   : > { %v14867_v20 = vpop.f32.mrf.mxu0 }
 0x62a   : > { %v10009_v52 = vpop.f32.mrf.mxu0 }
 0x62c   : > { %v7016_v51 = vpop.f32.mrf.mxu0 }
 0x62e   : > { %v10012_v10 = vpop.f32.mrf.mxu0 }
 0x630   : > { %v7019_v55 = vpop.f32.mrf.mxu0 }
 0x632   : > { %v10013_v63 = vpop.f32.mrf.mxu0 }
 0x63b   : > { %v9601_v21 = vpop.f32.mrf.mxu1 }
 0x63d   : > { %v9602_v57 = vpop.f32.mrf.mxu1 }
 0x63f   : > { %v9604_v17 = vpop.f32.mrf.mxu1 }
 0x641   : > { %v9605_v6 = vpop.f32.mrf.mxu1 }
 0x642   : > { %v9606_v58 = vadd.f32 %v9605_v6, %v9604_v17 }
 0x644   : > { %v6884_v48 = vadd.f32 %v9606_v58, %v14872_v3 }
 0x646   : > { %v6972_v42 = vadd.f32 %v14814_v59, %v6884_v48  ;;  %v10242_v59 = vld [vmem:[%s15426_s1 + $0x270] sm:$0xff]  }
 0x647   : > { %9655 = vmatpush3.bf16.msra.mxu1 %v10242_v59 }
 0x648   : > { %v7023_v25 = vmax.f32 %v6972_v42, 0.0  ;;  %9656 = vmatprep.subr.bf16.mxu1 %v10243_v14 }
 0x64a   : > { %7036 = vst.msk [vmem:[#allocation6 + $0x13] sm:$0xff] %vm1183_vm7, %v7023_v25 }
 0x64b   : > { %9657 = vmatpush3.bf16.msra.mxu1 %v10244_v18 }
 0x680   : > { %v9607_v30 = vpop.f32.mrf.mxu1 }
 0x682   : > { %v9608_v22 = vpop.f32.mrf.mxu1 }
 0x683   : > { %v9609_v61 = vadd.f32 %v9608_v22, %v9607_v30 }
 0x684   : > { %v9610_v19 = vpop.f32.mrf.mxu1 }
 0x685   : > { %v6889_v12 = vadd.f32 %v9609_v61, %v14872_v3 }
 0x686   : > { %v9611_v41 = vpop.f32.mrf.mxu1 }
 0x687   : > { %v6977_v40 = vadd.f32 %v6976_v23, %v6889_v12  ;;  %v9612_v8 = vadd.f32 %v9611_v41, %v9610_v19 }
 0x689   : > { %v7024_v26 = vmax.f32 %v6977_v40, 0.0  ;;  %v6892_v47 = vadd.f32 %v9612_v8, %v14872_v3 }
 0x68b   : > { %7037 = vst.msk [vmem:[#allocation6 + $0x1b] sm:$0xff] %vm1183_vm7, %v7024_v26  ;;  %v6980_v13 = vadd.f32 %v6979_v16, %v6892_v47 }
 0x68c   : > { %v9613_v31 = vpop.f32.mrf.mxu1 }
 0x68d   : > { %v7025_v36 = vmax.f32 %v6980_v13, 0.0 }
 0x68e   : > { %v9614_v49 = vpop.f32.mrf.mxu1 }
 0x68f   : > { %7038 = vst.msk [vmem:[#allocation6 + $0x23] sm:$0xff] %vm1183_vm7, %v7025_v36  ;;  %v9615_v5 = vadd.f32 %v9614_v49, %v9613_v31  ;;  %v10245_v31 = vld [vmem:[%s15426_s1 + $0x2a0] sm:$0xff]   ;;  %v10247_v49 = vld [vmem:[%s15426_s1 + $0x298] sm:$0xff]  }
 0x690   : > { %v9616_v60 = vpop.f32.mrf.mxu1  ;;  %v10246_v36 = vld [vmem:[%s15426_s1 + $0x260] sm:$0xff]   ;;  %9658 = vmatprep.subr.bf16.mxu1 %v10245_v31 }
 0x691   : > { %v6897_v0 = vadd.f32 %v9615_v5, %v14872_v3  ;;  %9659 = vmatpush3.bf16.msra.mxu1 %v10246_v36 }
 0x692   : > { %v9617_v44 = vpop.f32.mrf.mxu1  ;;  %v7049_v28 = vld [vmem:[#allocation6 + $0x16] ss:$2 sm:$0xf]  ;;  %v7051_v23 = vld [vmem:[#allocation6 + $0x17] ss:$2 sm:$0xf]  ;;  %9660 = vmatprep.subr.bf16.mxu1 %v10247_v49 }
 0x693   : > { %v6985_v15 = vadd.f32 %v6984_v33, %v6897_v0  ;;  %v9618_v38 = vadd.f32 %v9617_v44, %v9616_v60  ;;  %v7056_v16 = vmax.f32 %v7049_v28, %v7051_v23  ;;  %v10248_v44 = vld [vmem:[%s15426_s1 + $0x258] sm:$0xff]   ;;  %v10249_v28 = vld [vmem:[%s15426_s1 + $0x290] sm:$0xff]   ;;  %v10253_v49 = vld [vmem:[%s15426_s1 + $0x280] sm:$0xff]  }
 0x695   : > { %v7026_v9 = vmax.f32 %v6985_v15, 0.0  ;;  %v6900_v32 = vadd.f32 %v9618_v38, %v14872_v3  ;;  %9661 = vmatpush3.bf16.msra.mxu1 %v10248_v44  ;;  %v7131_v44 = vld [vmem:[#allocation7 + $0x14] sm:$0xf] }
 0x696   : > { %v7053_v56 = vld [vmem:[#allocation6 + $0x20] ss:$2 sm:$0xf]  ;;  %v7055_v43 = vld [vmem:[#allocation6 + $0x21] ss:$2 sm:$0xf]  ;;  %9662 = vmatprep.subr.bf16.mxu1 %v10249_v28 }
 0x697   : > { %v7057_v53 = vmax.f32 %v7053_v56, %v7055_v43  ;;  %7039 = vst.msk [vmem:[#allocation6 + $0x2b] sm:$0xff] %vm1183_vm7, %v7026_v9  ;;  %v6988_v29 = vadd.f32 %v14855_v37, %v6900_v32 }
 0x698   : > { %v9619_v11 = vpop.f32.mrf.mxu1 }
 0x699   : > { %v7058_v7 = vmax.f32 %v7056_v16, %v7057_v53  ;;  %v7027_v1 = vmax.f32 %v6988_v29, 0.0 }
 0x69a   : > { %v9620_v52 = vpop.f32.mrf.mxu1 }
 0x69b   : > { %v9329_v21 = vpack.c.bf16 %v7058_v7, %v7058_v7  ;;  %7040 = vst.msk [vmem:[#allocation6 + $0x33] sm:$0xff] %vm1183_vm7, %v7027_v1  ;;  %v9621_v33 = vadd.f32 %v9620_v52, %v9619_v11 }
 0x69c   : > { %v9622_v57 = vpop.f32.mrf.mxu1 }
 0x69d   : > { %v7063_v17 = vrot.slane %v9329_v21, 5  ;;  %v6905_v6 = vadd.f32 %v9621_v33, %v14872_v3 }
 0x69e   : > { %v9623_v58 = vpop.f32.mrf.mxu1  ;;  %v7070_v63 = vld [vmem:[#allocation6 + $0x2a] ss:$2 sm:$0xf]  ;;  %v7072_v62 = vld [vmem:[#allocation6 + $0x2b] ss:$2 sm:$0xf] }
 0x69f   : > { %v7064_v48 = vrot.slane %v7063_v17, 4  ;;  %7067 = vst.msk [vmem:[#allocation7 + $0x4] sm:$0x8] %vm15699_vm11, %v7063_v17  ;;  %v6993_v42 = vadd.f32 %v14857_v54, %v6905_v6  ;;  %v9624_v25 = vadd.f32 %v9623_v58, %v9622_v57  ;;  %v7077_v54 = vmax.f32 %v7070_v63, %v7072_v62  ;;  %vm15705_vm11 = vmmov %vm15704_vm10 }
 0x6a1   : > { %7068 = vst.msk [vmem:[#allocation7 + $0x8] sm:$0x1] %vm15700_vm14, %v7064_v48  ;;  %v7028_v37 = vmax.f32 %v6993_v42, 0.0  ;;  %v6908_v51 = vadd.f32 %v9624_v25, %v14872_v3  ;;  %v7126_v25 = vld [vmem:[#allocation7] sm:$0x8]  ;;  %vm15706_vm14 = vcmask 523264  }
 0x6a2   : > { %v7074_v46 = vld [vmem:[#allocation6 + $0x34] ss:$2 sm:$0xf] }
 0x6a3   : > { %7041 = vst.msk [vmem:[#allocation6 + $0x3b] sm:$0xff] %vm1183_vm7, %v7028_v37  ;;  %v6996_v10 = vadd.f32 %v14859_v35, %v6908_v51 }
 0x6a5   : > { %v7029_v55 = vmax.f32 %v6996_v10, 0.0 }
 0x6a6   : > { %v7120_v52 = vld [vmem:[#allocation7 + $0x4] sm:$0xf] }
 0x6a7   : > { %7042 = vst.msk [vmem:[#allocation6 + $0x43] sm:$0xff] %vm1183_vm7, %v7029_v55  ;;  %v7125_v55 = vld [vmem:[#allocation7] sm:$0xe]  ;;  %v9148_v62 = vcombine.low %v7126_v25, %v7120_v52 }
 0x6a8   : > { %v9625_v39 = vpop.f32.mrf.mxu1 }
 0x6a9   : > { %v7201_v28 = vrot.slane %v9148_v62, 3 }
 0x6aa   : > { %v7076_v59 = vld [vmem:[#allocation6 + $0x35] ss:$2 sm:$0xf]  ;;  %v9626_v14 = vpop.f32.mrf.mxu1 }
 0x6ab   : > { %v7078_v18 = vmax.f32 %v7074_v46, %v7076_v59  ;;  %v9627_v30 = vadd.f32 %v9626_v14, %v9625_v39  ;;  %v7119_v39 = vld [vmem:[#allocation7] sm:$0xf] }
 0x6ac   : > { %v9628_v22 = vpop.f32.mrf.mxu1  ;;  %v10251_v46 = vld [vmem:[%s15426_s1 + $0x288] sm:$0xff]  }
 0x6ad   : > { %v7079_v61 = vmax.f32 %v7077_v54, %v7078_v18  ;;  %v6913_v19 = vadd.f32 %v9627_v30, %v14872_v3  ;;  %v9147_v54 = vcombine.low %v7125_v55, %v7120_v52  ;;  %v14950_v30 = vcombine.low %v7119_v39, %v7120_v52 }
 0x6ae   : > { %v9629_v12 = vpop.f32.mrf.mxu1  ;;  %v7088_v32 = vld [vmem:[#allocation6 + $0x3e] ss:$2 sm:$0xf]  ;;  %v7090_v56 = vld [vmem:[#allocation6 + $0x3f] ss:$2 sm:$0xf] }
 0x6af   : > { %v9330_v41 = vpack.c.bf16 %v7079_v61, %v7079_v61  ;;  %v7001_v35 = vadd.f32 %v14861_v27, %v6913_v19  ;;  %v9630_v40 = vadd.f32 %v9629_v12, %v9628_v22  ;;  %v7095_v11 = vmax.f32 %v7088_v32, %v7090_v56  ;;  %v10252_v12 = vld [vmem:[%s15426_s1 + $0x248] sm:$0xff]   ;;  %v14977_v32 = vld [vmem:[#allocation7 + $0x14] sm:$0x3] }
 0x6b0   : > { %v9631_v8 = vpop.f32.mrf.mxu1  ;;  %v7217_v61 = vshrl.u32 %v9148_v62, 16  ;;  %v7220_v19 = vshll.u32 %v9148_v62, 16 }
 0x6b1   : > { %v7084_v26 = vrot.slane %v9330_v41, 6  ;;  %v7030_v47 = vmax.f32 %v7001_v35, 0.0  ;;  %v6916_v13 = vadd.f32 %v9630_v40, %v14872_v3  ;;  %v7182_v40 = vrot.slane %v9147_v54, 1 }
 0x6b2   : > { %v9632_v5 = vpop.f32.mrf.mxu1  ;;  %v7219_v31 = vrot.slane %v7217_v61, 3  ;;  %v7222_v36 = vrot.slane %v7220_v19, 4 }
 0x6b3   : > { %7086 = vst.msk [vmem:[#allocation7 + $0x8] sm:$0xc] %vm4930_vm0, %v7084_v26  ;;  %v7004_v27 = vadd.f32 %v14863_v34, %v6916_v13  ;;  %v9633_v60 = vadd.f32 %v9632_v5, %v9631_v8  ;;  %vm7104_vm0 = vcmask 256001   ;;  %v7153_v26 = vshll.u32 %v14950_v30, 16  ;;  %v10254_v5 = vld [vmem:[%s15426_s1 + $0x240] sm:$0xff]  }
 0x6b4   : > { %7043 = vst.msk [vmem:[#allocation6 + $0x4b] sm:$0xff] %vm1183_vm7, %v7030_v47  ;;  %v9634_v0 = vpop.f32.mrf.mxu1  ;;  %v7223_v56 = vor.u32 %v7222_v36, %v7219_v31 }
 0x6b5   : > { %v7031_v15 = vmax.f32 %v7004_v27, 0.0  ;;  %v6921_v38 = vadd.f32 %v9633_v60, %v14872_v3 }
 0x6b6   : > { %v9635_v23 = vpop.f32.mrf.mxu1 }
 0x6b7   : > { %7044 = vst.msk [vmem:[#allocation6 + $0x53] sm:$0xff] %vm1183_vm7, %v7031_v15  ;;  %v7009_v34 = vadd.f32 %v14865_v2, %v6921_v38  ;;  %v9636_v9 = vadd.f32 %v9635_v23, %v9634_v0  ;;  %v7132_v15 = vld [vmem:[#allocation7 + $0x18] sm:$0x1]  ;;  %v7155_v23 = vrot.slane %v7153_v26, 1 }
 0x6b9   : > { %v7032_v43 = vmax.f32 %v7009_v34, 0.0  ;;  %v6924_v16 = vadd.f32 %v9636_v9, %v14872_v3  ;;  %v7130_v34 = vld [vmem:[#allocation7 + $0x4] sm:$0xc] }
 0x6ba   : > { %v14939_v21 = vld [vmem:[#allocation7 + $0x8] sm:$0xf] }
 0x6bb   : > { %v7092_v53 = vld [vmem:[#allocation6 + $0x48] ss:$2 sm:$0xf]  ;;  %v7094_v29 = vld [vmem:[#allocation6 + $0x49] ss:$2 sm:$0xf]  ;;  %v7012_v1 = vadd.f32 %v14867_v20, %v6924_v16  ;;  %v9151_v33 = vcombine.low %v7120_v52, %v14939_v21  ;;  %v9154_v9 = vcombine.low %v7130_v34, %v14939_v21  ;;  %v9155_v52 = vcombine.low %v7131_v44, %v7131_v44 }
 0x6bc   : > { %v7096_v7 = vmax.f32 %v7092_v53, %v7094_v29  ;;  %7045 = vst.msk [vmem:[#allocation6 + $0x5b] sm:$0xff] %vm1183_vm7, %v7032_v43  ;;  %v9637_v2 = vpop.f32.mrf.mxu1  ;;  %v10250_v20 = vld [vmem:[%s15426_s1 + $0x250] sm:$0xff]   ;;  %v7133_v16 = vld [vmem:[#allocation7 + $0x4] sm:$0x8]  ;;  %v7151_v29 = vshrl.u32 %v14950_v30, 16 }
 0x6bd   : > { %v7033_v17 = vmax.f32 %v7012_v1, 0.0  ;;  %7240 = vrot.lane.b32.xlu0 %v9151_v33, %s10376_s27  ;;  %9663 = vmatpush3.bf16.msra.mxu1 %v10250_v20  ;;  %v14985_v2 = vcombine.low %v7131_v44, %v7132_v15  ;;  %v7270_v55 = vshll.u32 %v9154_v9, 16 }
 0x6be   : > { %v7097_v57 = vmax.f32 %v7095_v11, %v7096_v7  ;;  %v9638_v3 = vpop.f32.mrf.mxu1  ;;  %v7107_v37 = vld [vmem:[#allocation6 + $0x52] ss:$2 sm:$0xf]  ;;  %v7109_v51 = vld [vmem:[#allocation6 + $0x53] ss:$2 sm:$0xf]  ;;  %9664 = vmatprep.subr.bf16.mxu1 %v10251_v46 }
 0x6bf   : > { %7046 = vst.msk [vmem:[#allocation6 + $0x63] sm:$0xff] %vm1183_vm7, %v7033_v17  ;;  %v7114_v59 = vmax.f32 %v7107_v37, %v7109_v51  ;;  %v7128_v7 = vld [vmem:[#allocation7 + $0x14] sm:$0x1]  ;;  %v7156_v3 = vor.u32 %v7155_v23, %v7151_v29  ;;  %v7255_v46 = vrot.slane %v9155_v52, 2  ;;  %v7272_v26 = vrot.slane %v7270_v55, 3 }
 0x6c0   : > { %v9331_v6 = vpack.c.bf16 %v7097_v57, %v7097_v57  ;;  %v9640_v58 = vpop.f32.mrf.mxu1  ;;  %v9157_v57 = vcombine.low %v7133_v16, %v14939_v21  ;;  %v9153_v16 = vcombine.low %v14977_v32, %v14977_v32 }
 0x6c1   : > { %9665 = vmatpush3.bf16.msra.mxu1 %v10252_v12 }
 0x6c2   : > { %v7102_v48 = vrot.slane %v9331_v6, 7  ;;  %v9641_v42 = vpop.f32.mrf.mxu1  ;;  %9666 = vmatprep.subr.bf16.mxu1 %v10253_v49  ;;  %v7301_v62 = vrot.slane %v9157_v57, 3 }
 0x6c3   : > { %v7111_v10 = vld [vmem:[#allocation6 + $0x5c] ss:$2 sm:$0xf] }
 0x6c4   : > { %7105 = vst.msk [vmem:[#allocation7 + $0xc] sm:$0x6] %vm7104_vm0, %v7102_v48  ;;  %v7252_v48 = vrot.slane %v9154_v9, 2  ;;  %vm15707_vm0 = vmmov %vm15706_vm14 }
 0x6c5   : > { %9667 = vmatpush3.bf16.msra.mxu1 %v10254_v5 }
 0x6c6   : > { %v7113_v63 = vld [vmem:[#allocation6 + $0x5d] ss:$2 sm:$0xf]  ;;  %10014 = vmatprep.subr.bf16.mxu1 %v15492_v45 }
 0x6c7   : > { %v7115_v14 = vmax.f32 %v7111_v10, %v7113_v63  ;;  %v7267_v10 = vshrl.u32 %v9154_v9, 16 }
 0x6c9   : > { %v7116_v18 = vmax.f32 %v7114_v59, %v7115_v14  ;;  %v7304_v59 = vrot.slane %v14985_v2, 3 }
 0x6cb   : > { %v7122_v22 = vld [vmem:[#allocation7 + $0xc] sm:$0xf]  ;;  %v7117_v41 = vpack.c.bf16 %v7116_v18, %v7116_v18 }
 0x6cc   : > { %v14956_v35 = vcombine.low %v14939_v21, %v7122_v22 }
 0x6cd   : > { %7118 = vst.msk [vmem:[#allocation7 + $0x10] sm:$0x3] %vm15701_vm3, %v7117_v41  ;;  %vm15708_vm3 = vcmask 785408  }
 0x6ce   : > { %v7183_v8 = vrot.slane %v14956_v35, 1  ;;  %v7158_v47 = vshll.u32 %v14956_v35, 16  ;;  %v7162_v13 = vshrl.u32 %v14956_v35, 16  ;;  %v7202_v60 = vrot.slane %v14956_v35, 3 }
 0x6d0   : > { %v7184_v27 = vsel %vm605_vm1, %v7182_v40, %v7183_v8  ;;  %v7224_v0 = vrot.slane %v7162_v13, 3  ;;  %v7225_v38 = vrot.slane %v7158_v47, 4  ;;  %v7203_v53 = vsel %vm1141_vm6, %v7201_v28, %v7202_v60 }
 0x6d1   : > { %7187 = vrot.lane.b32.xlu1 %v7184_v27, %s10375_s26  ;;  %v7160_v11 = vrot.slane %v7158_v47, 1  ;;  %v7269_v40 = vrot.slane %v7267_v10, 2  ;;  %v7287_v27 = vshll.u32 %v14985_v2, 16 }
 0x6d2   : > { %v7226_v43 = vor.u32 %v7225_v38, %v7224_v0 }
 0x6d3   : > { %v7161_v20 = vsel %vm392_vm2, %v7156_v3, %v7160_v11  ;;  %v7273_v38 = vor.u32 %v7272_v26, %v7269_v40  ;;  %v7164_v28 = vor.u32 %v7162_v13, %v7160_v11 }
 0x6d4   : > { %v7127_v1 = vld [vmem:[#allocation7 + $0x10] sm:$0xf]  ;;  %v14988_v33 = vsel %vm7215_vm15, %v7223_v56, %v7226_v43  ;;  %v7289_v56 = vrot.slane %v7287_v27, 3 }
 0x6d5   : > { %7206 = vrot.lane.b32.xlu1 %v7203_v53, %s10377_s30  ;;  %v9152_v17 = vcombine.low %v7122_v22, %v7127_v1  ;;  %v10233_v6 = vld [vmem:[#allocation7 + $0x10] ss:$0 sps:$4 sm:$0x77]   ;;  %v9150_v58 = vcombine.low %v7127_v1, %v14977_v32  ;;  %v9149_v42 = vcombine.low %v7127_v1, %v7128_v7 }
 0x6d6   : > { %v7185_v37 = vrot.slane %v10233_v6, 1  ;;  %v7166_v22 = vshll.u32 %v10233_v6, 16  ;;  %v7170_v53 = vshrl.u32 %v10233_v6, 16  ;;  %v10261_v27 = vld [vmem:[%s15426_s1 + $0x358] sm:$0xff]  }
 0x6d7   : > { %7242 = vrot.lane.b32.xlu0 %v9152_v17, %s10376_s27  ;;  %v7253_v25 = vrot.slane %v9152_v17, 2  ;;  %v7275_v51 = vshrl.u32 %v9152_v17, 16  ;;  %v7278_v63 = vshll.u32 %v9152_v17, 16  ;;  %v7229_v21 = vshrl.u32 %v9150_v58, 16 }
 0x6d8   : > { %v7204_v14 = vrot.slane %v9149_v42, 3  ;;  %v7186_v61 = vsel %vm605_vm1, %v7183_v8, %v7185_v37  ;;  %v7232_v12 = vshll.u32 %v9150_v58, 16  ;;  %v7302_v41 = vrot.slane %v9152_v17, 3 }
 0x6d9   : > { %7173 = vrot.lane.b32.xlu1 %v7161_v20, %s10376_s27  ;;  %v7254_v39 = vsel %vm15702_vm4, %v7252_v48, %v7253_v25  ;;  %v7277_v54 = vrot.slane %v7275_v51, 2  ;;  %v7280_v18 = vrot.slane %v7278_v63, 3  ;;  %v7231_v19 = vrot.slane %v7229_v21, 3  ;;  %vm15709_vm4 = vmmov %vm15708_vm3  ;;  %v10257_v63 = vld [vmem:[%s15426_s1 + $0x2c0] sm:$0xff]  }
 0x6da   : > { %v7234_v47 = vrot.slane %v7232_v12, 4  ;;  %v15003_v31 = vsel %vm1141_vm6, %v7301_v62, %v7302_v41  ;;  %v15008_v36 = vsel %vm1141_vm6, %v7302_v41, %v7304_v59  ;;  %v7256_v49 = vsel %vm15703_vm12, %v7253_v25, %v7255_v46  ;;  %vm15710_vm12 = vmmov %vm15707_vm0 }
 0x6db   : > { %7257 = vrot.lane.b32.xlu0 %v7254_v39, %s10375_s26  ;;  %v7281_v5 = vor.u32 %v7280_v18, %v7277_v54  ;;  %v7284_v8 = vshrl.u32 %v14985_v2, 16  ;;  %v7205_v0 = vsel %vm1141_vm6, %v7202_v60, %v7204_v14  ;;  %v7168_v44 = vrot.slane %v7166_v22, 1  ;;  %v10263_v2 = vld [vmem:[%s15426_s1 + $0x350] sm:$0xff]  }
 0x6dc   : > { %v15017_v15 = vor.u32 %v7234_v47, %v7231_v19 }
 0x6dd   : > { %7189 = vrot.lane.b32.xlu1 %v7186_v61, %s10375_s26  ;;  %v7282_v34 = vsel %vm15704_vm10, %v7273_v38, %v7281_v5  ;;  %v7286_v9 = vrot.slane %v7284_v8, 2  ;;  %v7169_v60 = vsel %vm392_vm2, %v7164_v28, %v7168_v44  ;;  %v7172_v29 = vor.u32 %v7170_v53, %v7168_v44  ;;  %vm15711_vm10 = vmmov %vm15707_vm0  ;;  %v10256_v61 = vld [vmem:[#allocation7 + $0x10] ss:$0 sps:$4 sm:$0x33]   ;;  %v199_v8 = vld [vmem:[#allocation8] sm:$0xf] }
 0x6de   : > { %v7236_v23 = vsel %vm7215_vm15, %v7226_v43, %v15017_v15  ;;  %v10278_v44 = vld [vmem:[%s15426_s1 + $0x338] sm:$0xff]   ;;  %v10280_v38 = vld [vmem:[%s15426_s1 + $0x330] sm:$0xff]  }
 0x6df   : > { %7259 = vrot.lane.b32.xlu0 %v7256_v49, %s10375_s26  ;;  %v7290_v7 = vor.u32 %v7289_v56, %v7286_v9  ;;  %v10281_v28 = vld [vmem:[%s15426_s1 + $0x2f0] sm:$0xff]  }
 0x6e1   : > { %7208 = vrot.lane.b32.xlu1 %v7205_v0, %s10377_s30  ;;  %v7291_v13 = vsel %vm15705_vm11, %v7281_v5, %v7290_v7  ;;  %vm15712_vm11 = vmmov %vm15708_vm3  ;;  %v10277_v0 = vld [vmem:[%s15426_s1 + $0x300] sm:$0xff]  }
 0x6e3   : > { %7292 = vrot.lane.b32.xlu0 %v7282_v34, %s10377_s30  ;;  %v10283_v34 = vld [vmem:[%s15426_s1 + $0x2e8] sm:$0xff]  }
 0x6e5   : > { %7175 = vrot.lane.b32.xlu1 %v7169_v60, %s10376_s27 }
 0x6e7   : > { %7244 = vrot.lane.b32.xlu0 %v9153_v16, %s10376_s27 }
 0x6e9   : > { %7177 = vrot.lane.b32.xlu1 %v7172_v29, %s10376_s27 }
 0x6eb   : > { %7294 = vrot.lane.b32.xlu0 %v7291_v13, %s10377_s30 }
 0x6ed   : > { %7191 = vrot.lane.b32.xlu1 %v7185_v37, %s10375_s26  ;;  %v10255_v37 = vld [vmem:[%s15426_s1 + $0x2c8] sm:$0xff]  }
 0x6ef   : > { %7261 = vrot.lane.b32.xlu0 %v7255_v46, %s10375_s26 }
 0x6f1   : > { %7210 = vrot.lane.b32.xlu1 %v7204_v14, %s10377_s30 }
 0x6f3   : > { %7296 = vrot.lane.b32.xlu0 %v7290_v7, %s10377_s30 }
 0x72f   : > { %v7241_v43 = vpop.permute.xlu0 %7240 }
 0x730   : > { %v7330_v48 = vsel %vm1183_vm7, %v14988_v33, %v7241_v43 }
 0x743   : > { %v7188_v32 = vpop.permute.xlu1 %7187 }
 0x747   : > { %v7207_v11 = vpop.permute.xlu1 %7206 }
 0x749   : > { %v7243_v1 = vpop.permute.xlu0 %7242 }
 0x74a   : > { %v7333_v62 = vsel %vm1183_vm7, %v7236_v23, %v7243_v1  ;;  %v10282_v23 = vld [vmem:[%s15426_s1 + $0x328] sm:$0xff]  }
 0x74b   : > { %v7174_v52 = vpop.permute.xlu1 %7173 }
 0x74c   : > { %v7307_v3 = vsel %vm1183_vm7, %v14950_v30, %v7174_v52  ;;  %v9158_v52 = vld [vmem:[%s15427_s2 + $0x4] ss:$0 sm:$0xff] }
 0x74d   : > { %v7258_v57 = vpop.permute.xlu0 %7257  ;;  %v7314_v42 = vsel %vm15706_vm14, %v7307_v3, %v7188_v32  ;;  %vm15713_vm14 = vmmov %vm15708_vm3 }
 0x74e   : > { %v7338_v20 = vsel %vm15707_vm0, %v7330_v48, %v7258_v57  ;;  %v7320_v55 = vsel %vm15709_vm4, %v7314_v42, %v7207_v11 }
 0x74f   : > { %v7190_v17 = vpop.permute.xlu1 %7189 }
 0x751   : > { %v7260_v6 = vpop.permute.xlu0 %7259 }
 0x752   : > { %v7340_v46 = vsel %vm15711_vm10, %v7333_v62, %v7260_v6  ;;  %vm15716_vm10 = vsmask.f32 3328 }
 0x753   : > { %v7209_v58 = vpop.permute.xlu1 %7208 }
 0x755   : > { %v7293_v25 = vpop.permute.xlu0 %7292 }
 0x756   : > { %v7344_v10 = vsel %vm15708_vm3, %v7338_v20, %v7293_v25  ;;  %vm15714_vm3 = vmmov %vm15707_vm0  ;;  %v9471_v25 = vld [vmem:[%s15426_s1 + $0x538] sm:$0xff]  }
 0x757   : > { %v7176_v51 = vpop.permute.xlu1 %7175  ;;  %7542 = vmatprep.mubr.bf16.mxu1 %v7344_v10 }
 0x758   : > { %7543 = vmatmul.mubr.bf16.vlgmr.msra.gmra.mxu1 %v7320_v55  ;;  %v7309_v30 = vsel %vm1183_vm7, %v14956_v35, %v7176_v51 }
 0x759   : > { %10015 = vmatpush3.bf16.msra.mxu1 %v10255_v37  ;;  %v7245_v33 = vpop.permute.xlu0 %7244  ;;  %v7316_v39 = vsel %vm15710_vm12, %v7309_v30, %v7190_v17  ;;  %vm15715_vm12 = vmmov %vm15709_vm4  ;;  %v7627_v17 = vld [vmem:[%s15426_s1 + $0x534] ss:$12 sps:$4 sm:$0xff]  }
 0x75a   : > { %10016 = vmatprep.subr.bf16.mxu1 %v15492_v45  ;;  %v7323_v18 = vsel %vm15713_vm14, %v7316_v39, %v7209_v58  ;;  %v7336_v19 = vsel %vm1183_vm7, %v15017_v15, %v7245_v33  ;;  %v10279_v15 = vld [vmem:[%s15426_s1 + $0x2f8] sm:$0xff]   ;;  %v7632_v42 = vunpack.c.l.bf16 %v7627_v17  ;;  %vm15719_vm14 = vcmask 257024  }
 0x75b   : > { %v7178_v21 = vpop.permute.xlu1 %7177 }
 0x75c   : > { %v7312_v41 = vsel %vm1183_vm7, %v10256_v61, %v7178_v21 }
 0x75d   : > { %v7295_v14 = vpop.permute.xlu0 %7294  ;;  %10017 = vmatpush3.bf16.msra.mxu1 %v10257_v63  ;;  %v9444_v63 = vunpack.c.l.bf16 %v9471_v25 }
 0x75e   : > { %v7347_v35 = vsel %vm15712_vm11, %v7340_v46, %v7295_v14  ;;  %10030 = vmatprep.subr.bf16.mxu1 %v15492_v45 }
 0x75f   : > { %v7192_v54 = vpop.permute.xlu1 %7191  ;;  %7550 = vmatprep.mubr.bf16.mxu1 %v7347_v35 }
 0x760   : > { %7551 = vmatmul.mubr.bf16.gmra.mxu1 %v7323_v18  ;;  %v7318_v47 = vsel %vm15714_vm3, %v7312_v41, %v7192_v54  ;;  %v9445_v41 = vunpack.c.h.bf16 %v9471_v25 }
 0x761   : > { %v7262_v22 = vpop.permute.xlu0 %7261 }
 0x762   : > { %v7342_v40 = vsel %vm15707_vm0, %v7336_v19, %v7262_v22  ;;  %vm15720_vm0 = vmmov %vm15719_vm14 }
 0x763   : > { %v7211_v12 = vpop.permute.xlu1 %7210  ;;  %vm15721_vm3 = vmmov %vm15720_vm0 }
 0x764   : > { %v7326_v5 = vsel %vm15715_vm12, %v7318_v47, %v7211_v12  ;;  %vm15723_vm12 = vcmask 1045504  }
 0x765   : > { %v7297_v26 = vpop.permute.xlu0 %7296 }
 0x766   : > { %v7350_v49 = vsel %vm15709_vm4, %v7342_v40, %v7297_v26  ;;  %vm15722_vm4 = vmmov %vm15720_vm0 }
 0x767   : > { %7558 = vmatprep.mubr.bf16.mxu1 %v7350_v49 }
 0x768   : > { %7559 = vmatmul.mubr.bf16.gmra.mxu1 %v7326_v5 }
 0x769   : > { %10018 = vmatprep.mubr.msk.bf16.mxu1 %vm15555_vm8, %v15492_v45 }
 0x770   : > { %10019 = vmatmul.mubr.msk.bf16.vlgmr.msra.gmra.mxu1 %vm1183_vm7, %v15003_v31  ;;  %v200_v31 = vsel %vm13284_vm5, 0, %v199_v8  ;;  %vm7658_vm5 = vsmask.f32 7440 }
 0x771   : > { %10022 = vmatprep.mubr.msk.bf16.mxu1 %vm15555_vm8, %v15492_v45  ;;  %201 = vst [vmem:[#allocation8] sm:$0xf] %v200_v31  ;;  %10031 = vmatpush3.bf16.msra.mxu1 %v10261_v27  ;;  %vm15135_vm11 = vmor %vm15716_vm10, %vm7658_vm5  ;;  %vm15724_vm5 = vsmask.f32 5376 }
 0x772   : > { %10032 = vmatprep.subr.bf16.mxu1 %v15492_v45 }
 0x775   : > { %10033 = vmatpush3.bf16.msra.mxu1 %v10263_v2 }
 0x778   : > { %10023 = vmatmul.mubr.msk.bf16.gmra.mxu1 %vm1183_vm7, %v15008_v36  ;;  %v10276_v36 = vld [vmem:[%s15426_s1 + $0x340] sm:$0xff]  }
 0x779   : > { %10026 = vmatprep.mubr.msk.bf16.mxu1 %vm15555_vm8, %v15492_v45  ;;  %v7715_v12 = vld [vmem:[#allocation8] sm:$0x8] }
 0x780   : > { %10027 = vmatmul.mubr.msk.bf16.gmra.mxu1 %vm1183_vm7, %v7304_v59  ;;  %v10274_v59 = vld [vmem:[%s15426_s1 + $0x348] sm:$0xff]  }
 0x781   : > { %10034 = vmatprep.mubr.msk.bf16.mxu1 %vm15555_vm8, %v15492_v45  ;;  %9691 = vmatprep.subr.bf16.mxu0 %v10274_v59 }
 0x782   : > { %9692 = vmatpush3.bf16.msra.mxu0 %v10275_v50 }
 0x783   : > { %9693 = vmatprep.subr.bf16.mxu0 %v10276_v36 }
 0x786   : > { %9694 = vmatpush3.bf16.msra.mxu0 %v10277_v0 }
 0x787   : > { %9695 = vmatprep.subr.bf16.mxu0 %v10278_v44 }
 0x78a   : > { %9696 = vmatpush3.bf16.msra.mxu0 %v10279_v15  ;;  %v7635_v15 = vunpack.c.h.bf16 %v7627_v17 }
 0x78b   : > { %9697 = vmatprep.subr.bf16.mxu0 %v10280_v38 }
 0x78e   : > { %9698 = vmatpush3.bf16.msra.mxu0 %v10281_v28  ;;  %v7631_v28 = vld [vmem:[%s15426_s1 + $0x544] sm:$0x3] }
 0x78f   : > { %9699 = vmatprep.subr.bf16.mxu0 %v10282_v23 }
 0x792   : > { %9700 = vmatpush3.bf16.msra.mxu0 %v10283_v34 }
 0x818   : > { %v9668_v9 = vpop.f32.mrf.mxu1 }
 0x81a   : > { %v9669_v56 = vpop.f32.mrf.mxu1 }
 0x81b   : > { %v9670_v11 = vadd.f32 %v9669_v56, %v9668_v9 }
 0x81c   : > { %v9671_v60 = vpop.f32.mrf.mxu1 }
 0x81d   : > { %v7545_v6 = vadd.f32 %v9670_v11, %v9158_v52 }
 0x81e   : > { %v9672_v16 = vpop.f32.mrf.mxu1 }
 0x81f   : > { %v9673_v3 = vadd.f32 %v9672_v16, %v9671_v60 }
 0x820   : > { %v9674_v53 = vpop.f32.mrf.mxu1 }
 0x821   : > { %v7548_v10 = vadd.f32 %v9673_v3, %v9158_v52 }
 0x822   : > { %v9675_v29 = vpop.f32.mrf.mxu1 }
 0x823   : > { %v9676_v37 = vadd.f32 %v9675_v29, %v9674_v53 }
 0x824   : > { %v9677_v7 = vpop.f32.mrf.mxu1 }
 0x825   : > { %v7553_v46 = vadd.f32 %v9676_v37, %v9158_v52 }
 0x826   : > { %v9678_v13 = vpop.f32.mrf.mxu1 }
 0x827   : > { %v9679_v14 = vadd.f32 %v9678_v13, %v9677_v7 }
 0x828   : > { %v9680_v32 = vpop.f32.mrf.mxu1 }
 0x829   : > { %v7556_v8 = vadd.f32 %v9679_v14, %v9158_v52 }
 0x82a   : > { %v9681_v43 = vpop.f32.mrf.mxu1 }
 0x82b   : > { %v9682_v19 = vadd.f32 %v9681_v43, %v9680_v32  ;;  %v7636_v32 = vunpack.c.l.bf16 %v7631_v28 }
 0x82c   : > { %v9683_v1 = vpop.f32.mrf.mxu1 }
 0x82d   : > { %v7561_v56 = vadd.f32 %v9682_v19, %v9158_v52 }
 0x82e   : > { %v9684_v57 = vpop.f32.mrf.mxu1 }
 0x830   : > { %v7600_v58 = vpop.f32.mrf.mxu1 }
 0x831   : > { %v7601_v48 = vadd.f32 %v7600_v58, %v7545_v6 }
 0x832   : > { %v10020_v20 = vpop.f32.mrf.mxu1 }
 0x833   : > { %v7622_v51 = vmax.f32 %v7601_v48, 0.0  ;;  %v10285_v20 = vld [vmem:[%s15426_s1 + $0x2e0] sm:$0xff]  }
 0x834   : > { %v7603_v55 = vpop.f32.mrf.mxu1 }
 0x835   : > { %v7637_v30 = vmul.f32 %v7632_v42, %v7622_v51  ;;  %v7604_v33 = vadd.f32 %v7603_v55, %v7548_v10  ;;  %v10284_v42 = vld [vmem:[%s15426_s1 + $0x320] sm:$0xff]  }
 0x836   : > { %v10021_v21 = vpop.f32.mrf.mxu1  ;;  %9701 = vmatprep.subr.bf16.mxu0 %v10284_v42 }
 0x837   : > { %v9332_v62 = vpack.c.bf16 %v7637_v30, %v7637_v30  ;;  %v7623_v39 = vmax.f32 %v7604_v33, 0.0  ;;  %9702 = vmatpush3.bf16.msra.mxu0 %v10285_v20 }
 0x838   : > { %v7608_v54 = vpop.f32.mrf.mxu1 }
 0x839   : > { %v7661_v35 = vshll.u32 %v9332_v62, 16  ;;  %v7664_v18 = vshrl.u32 %v9332_v62, 16  ;;  %v7638_v22 = vmul.f32 %v9444_v63, %v7623_v39  ;;  %v7609_v61 = vadd.f32 %v7608_v54, %v7553_v46 }
 0x83a   : > { %v10024_v40 = vpop.f32.mrf.mxu1 }
 0x83b   : > { %v7663_v26 = vrot.slane %v7661_v35, 5  ;;  %v7666_v47 = vrot.slane %v7664_v18, 4  ;;  %v9333_v49 = vpack.c.bf16 %v7638_v22, %v7638_v22  ;;  %v7624_v5 = vmax.f32 %v7609_v61, 0.0 }
 0x83c   : > { %v7611_v31 = vpop.f32.mrf.mxu1 }
 0x83d   : > { %v7667_v27 = vor.u32 %v7666_v47, %v7663_v26  ;;  %v7716_v2 = vsel %vm12392_vm9, %v7663_v26, %v7715_v12  ;;  %v7670_v59 = vshll.u32 %v9333_v49, 16  ;;  %v7674_v50 = vshrl.u32 %v9333_v49, 16  ;;  %v10286_v26 = vld [vmem:[%s15426_s1 + $0x318] sm:$0xff]  }
 0x83e   : > { %7717 = vst [vmem:[#allocation8] sm:$0x8] %v7716_v2  ;;  %v7639_v0 = vmul.f32 %v9445_v41, %v7624_v5  ;;  %v7612_v44 = vadd.f32 %v7611_v31, %v7556_v8  ;;  %v10025_v38 = vpop.f32.mrf.mxu1  ;;  %v10287_v47 = vld [vmem:[%s15426_s1 + $0x2d8] sm:$0xff]   ;;  %9703 = vmatprep.subr.bf16.mxu0 %v10286_v26 }
 0x83f   : > { %v7668_v23 = vrot.slane %v7667_v27, 4  ;;  %v7672_v34 = vrot.slane %v7670_v59, 5  ;;  %v7676_v9 = vrot.slane %v7674_v50, 4  ;;  %v7722_v31 = vld [vmem:[#allocation8 + $0x14] sm:$0x3]  ;;  %9704 = vmatpush3.bf16.msra.mxu0 %v10287_v47 }
 0x840   : > { %v9334_v60 = vpack.c.bf16 %v7639_v0, %v7639_v0  ;;  %v7625_v16 = vmax.f32 %v7612_v44, 0.0  ;;  %v7616_v53 = vpop.f32.mrf.mxu1 }
 0x841   : > { %v7673_v29 = vsel %vm15135_vm11, %v7668_v23, %v7672_v34  ;;  %v7677_v7 = vor.u32 %v7676_v9, %v7672_v34  ;;  %v7617_v13 = vadd.f32 %v7616_v53, %v7561_v56 }
 0x842   : > { %7718 = vst.msk [vmem:[#allocation8 + $0x4] sm:$0xf] %vm15719_vm14, %v7673_v29  ;;  %v7680_v43 = vshll.u32 %v9334_v60, 16  ;;  %v7684_v11 = vshrl.u32 %v9334_v60, 16  ;;  %v7640_v1 = vmul.f32 %v7635_v15, %v7625_v16  ;;  %v10028_v57 = vpop.f32.mrf.mxu1 }
 0x843   : > { %v7678_v17 = vrot.slane %v7677_v7, 4  ;;  %v7626_v3 = vmax.f32 %v7617_v13, 0.0  ;;  %v10288_v57 = vld [vmem:[%s15426_s1 + $0x310] sm:$0xff]  }
 0x844   : > { %v7682_v6 = vrot.slane %v7680_v43, 5  ;;  %v7686_v58 = vrot.slane %v7684_v11, 4  ;;  %v9335_v52 = vpack.c.bf16 %v7640_v1, %v7640_v1  ;;  %v7619_v48 = vpop.f32.mrf.mxu1  ;;  %9705 = vmatprep.subr.bf16.mxu0 %v10288_v57 }
 0x845   : > { %v7641_v25 = vmul.f32 %v7636_v32, %v7626_v3  ;;  %v7732_v61 = vld [vmem:[#allocation8] sm:$0x8]  ;;  %v7738_v48 = vld [vmem:[#allocation8 + $0x18] sm:$0x1] }
 0x846   : > { %v7683_v37 = vsel %vm15135_vm11, %v7678_v17, %v7682_v6  ;;  %v7687_v51 = vor.u32 %v7686_v58, %v7682_v6  ;;  %v7690_v10 = vshll.u32 %v9335_v52, 16  ;;  %v7694_v55 = vshrl.u32 %v9335_v52, 16  ;;  %v10029_v30 = vpop.f32.mrf.mxu1  ;;  %v7725_v19 = vld [vmem:[#allocation8] sm:$0xf]  ;;  %v10289_v17 = vld [vmem:[%s15426_s1 + $0x2d0] sm:$0xff]  }
 0x847   : > { %7719 = vst.msk [vmem:[#allocation8 + $0x8] sm:$0xf] %vm15720_vm0, %v7683_v37  ;;  %v9336_v33 = vpack.c.bf16 %v7641_v25, %v7641_v25  ;;  %v7731_v5 = vld [vmem:[#allocation8] sm:$0xe]  ;;  %9706 = vmatpush3.bf16.msra.mxu0 %v10289_v17 }
 0x848   : > { %v7688_v63 = vrot.slane %v7687_v51, 4  ;;  %v7692_v21 = vrot.slane %v7690_v10, 5  ;;  %v7696_v62 = vrot.slane %v7694_v55, 4 }
 0x849   : > { %v7700_v39 = vshll.u32 %v9336_v33, 16  ;;  %v7704_v46 = vshrl.u32 %v9336_v33, 16  ;;  %v7726_v14 = vld [vmem:[#allocation8 + $0x4] sm:$0xf] }
 0x84a   : > { %v7693_v54 = vsel %vm15135_vm11, %v7688_v63, %v7692_v21  ;;  %v7697_v35 = vor.u32 %v7696_v62, %v7692_v21  ;;  %v9190_v41 = vcombine.low %v7732_v61, %v7726_v14  ;;  %v15157_v40 = vcombine.low %v7725_v19, %v7726_v14  ;;  %v7739_v38 = vld [vmem:[#allocation8 + $0x4] sm:$0x8] }
 0x84b   : > { %7720 = vst.msk [vmem:[#allocation8 + $0xc] sm:$0xf] %vm15721_vm3, %v7693_v54  ;;  %v7702_v18 = vrot.slane %v7700_v39, 5  ;;  %v7706_v22 = vrot.slane %v7704_v46, 4  ;;  %v9189_v2 = vcombine.low %v7731_v5, %v7726_v14  ;;  %v7736_v60 = vld [vmem:[#allocation8 + $0x4] sm:$0xc] }
 0x84c   : > { %v7698_v12 = vrot.slane %v7697_v35, 4  ;;  %v7759_v0 = vshll.u32 %v15157_v40, 16  ;;  %v7822_v44 = vshrl.u32 %v9190_v41, 16  ;;  %v7807_v56 = vrot.slane %v9190_v41, 3 }
 0x84d   : > { %v7707_v49 = vor.u32 %v7706_v22, %v7702_v18  ;;  %v7788_v23 = vrot.slane %v9189_v2, 1  ;;  %v7825_v16 = vshll.u32 %v9190_v41, 16  ;;  %v7757_v29 = vshrl.u32 %v15157_v40, 16 }
 0x84e   : > { %v7703_v8 = vsel %vm15135_vm11, %v7698_v12, %v7702_v18  ;;  %v7727_v27 = vld [vmem:[#allocation8 + $0x8] sm:$0xf]  ;;  %v7761_v7 = vrot.slane %v7759_v0, 1  ;;  %v7824_v13 = vrot.slane %v7822_v44, 3 }
 0x84f   : > { %v7708_v59 = vrot.slane %v7707_v49, 4  ;;  %7721 = vst.msk [vmem:[#allocation8 + $0x10] sm:$0xf] %vm15722_vm4, %v7703_v8  ;;  %v9193_v50 = vcombine.low %v7726_v14, %v7727_v27  ;;  %v9199_v34 = vcombine.low %v7739_v38, %v7727_v27  ;;  %v9196_v53 = vcombine.low %v7736_v60, %v7727_v27 }
 0x850   : > { %v7827_v42 = vrot.slane %v7825_v16, 4  ;;  %v7762_v61 = vor.u32 %v7761_v7, %v7757_v29 }
 0x851   : > { %v7723_v15 = vsel %vm11220_vm13, %v7708_v59, %v7722_v31  ;;  %7845 = vrot.lane.b32.xlu0 %v9193_v50, %s10376_s27  ;;  %v7906_v6 = vrot.slane %v9199_v34, 3  ;;  %v7857_v20 = vrot.slane %v9196_v53, 2  ;;  %v7872_v37 = vshrl.u32 %v9196_v53, 16 }
 0x852   : > { %7724 = vst [vmem:[#allocation8 + $0x14] sm:$0x3] %v7723_v15  ;;  %v7728_v28 = vld [vmem:[#allocation8 + $0xc] sm:$0xf]  ;;  %v7875_v51 = vshll.u32 %v9196_v53, 16  ;;  %v7828_v26 = vor.u32 %v7827_v42, %v7824_v13 }
 0x853   : > { %v15172_v9 = vcombine.low %v7727_v27, %v7728_v28  ;;  %v7874_v19 = vrot.slane %v7872_v37, 2 }
 0x854   : > { %v7877_v8 = vrot.slane %v7875_v51, 3 }
 0x855   : > { %v7789_v32 = vrot.slane %v15172_v9, 1  ;;  %v7808_v43 = vrot.slane %v15172_v9, 3  ;;  %v7764_v11 = vshll.u32 %v15172_v9, 16  ;;  %v7768_v1 = vshrl.u32 %v15172_v9, 16 }
 0x856   : > { %v15185_v3 = vld [vmem:[#allocation8 + $0x10] sm:$0xf] }
 0x857   : > { %v7790_v58 = vsel %vm605_vm1, %v7788_v23, %v7789_v32  ;;  %v15189_v52 = vcombine.low %v7728_v28, %v15185_v3  ;;  %v7766_v25 = vrot.slane %v7764_v11, 1  ;;  %v7809_v10 = vsel %vm1141_vm6, %v7807_v56, %v7808_v43  ;;  %v15200_v39 = vld [vmem:[#allocation8 + $0x10] ss:$0 sps:$4 sm:$0x77]  }
 0x858   : > { %7793 = vrot.lane.b32.xlu1 %v7790_v58, %s10375_s26  ;;  %v7829_v46 = vrot.slane %v7768_v1, 3  ;;  %v7830_v14 = vrot.slane %v7764_v11, 4  ;;  %v7791_v5 = vrot.slane %v15200_v39, 1  ;;  %v7772_v27 = vshll.u32 %v15200_v39, 16 }
 0x859   : > { %7847 = vrot.lane.b32.xlu0 %v15189_v52, %s10376_s27  ;;  %v7907_v55 = vrot.slane %v15189_v52, 3  ;;  %v7858_v30 = vrot.slane %v15189_v52, 2  ;;  %v7735_v33 = vld [vmem:[#allocation8 + $0x14] sm:$0x3]  ;;  %v7880_v18 = vshrl.u32 %v15189_v52, 16  ;;  %v7883_v22 = vshll.u32 %v15189_v52, 16 }
 0x85a   : > { %v7737_v63 = vld [vmem:[#allocation8 + $0x14] sm:$0xf]  ;;  %v9192_v21 = vcombine.low %v15185_v3, %v7735_v33  ;;  %v7767_v47 = vsel %vm392_vm2, %v7762_v61, %v7766_v25  ;;  %v9195_v49 = vcombine.low %v7735_v33, %v7735_v33  ;;  %v7831_v59 = vor.u32 %v7830_v14, %v7829_v46 }
 0x85b   : > { %v9198_v62 = vcombine.low %v7737_v63, %v7738_v48  ;;  %v7908_v54 = vsel %vm1141_vm6, %v7906_v6, %v7907_v55  ;;  %v7859_v35 = vsel %vm15723_vm12, %v7857_v20, %v7858_v30  ;;  %v7882_v12 = vrot.slane %v7880_v18, 2  ;;  %v7734_v57 = vld [vmem:[#allocation8 + $0x14] sm:$0x1] }
 0x85c   : > { %7812 = vrot.lane.b32.xlu1 %v7809_v10, %s10377_s30  ;;  %10035 = vmatmul.mubr.msk.bf16.vlgmr.msra.gmra.mxu1 %vm1183_vm7, %v7908_v54  ;;  %v7885_v41 = vrot.slane %v7883_v22, 3  ;;  %v9197_v2 = vcombine.low %v7737_v63, %v7737_v63  ;;  %v7832_v15 = vsel %vm7215_vm15, %v7828_v26, %v7831_v59  ;;  %v7834_v38 = vshrl.u32 %v9192_v21, 16 }
 0x85d   : > { %7862 = vrot.lane.b32.xlu0 %v7859_v35, %s10375_s26  ;;  %10038 = vmatprep.mubr.msk.bf16.mxu1 %vm15555_vm8, %v15492_v45  ;;  %v7909_v31 = vrot.slane %v9198_v62, 3  ;;  %v7889_v0 = vshrl.u32 %v9198_v62, 16  ;;  %v7892_v44 = vshll.u32 %v9198_v62, 16  ;;  %v7792_v28 = vsel %vm605_vm1, %v7789_v32, %v7791_v5  ;;  %vm15725_vm1 = vmmov %vm15723_vm12 }
 0x85e   : > { %v7886_v50 = vor.u32 %v7885_v41, %v7882_v12  ;;  %v7878_v23 = vor.u32 %v7877_v8, %v7874_v19  ;;  %v7770_v34 = vor.u32 %v7768_v1, %v7766_v25  ;;  %v7837_v56 = vshll.u32 %v9192_v21, 16 }
 0x85f   : > { %v7910_v60 = vsel %vm1141_vm6, %v7907_v55, %v7909_v31  ;;  %v7774_v16 = vrot.slane %v7772_v27, 1  ;;  %v7860_v53 = vrot.slane %v9197_v2, 2  ;;  %v7836_v29 = vrot.slane %v7834_v38, 3  ;;  %v10290_v2 = vld [vmem:[#allocation8 + $0x10] ss:$0 sps:$4 sm:$0x33]  }
 0x860   : > { %7779 = vrot.lane.b32.xlu1 %v7767_v47, %s10376_s27  ;;  %v7887_v7 = vsel %vm15724_vm5, %v7878_v23, %v7886_v50  ;;  %v7891_v13 = vrot.slane %v7889_v0, 2  ;;  %v7894_v11 = vrot.slane %v7892_v44, 3  ;;  %v7839_v17 = vrot.slane %v7837_v56, 4 }
 0x861   : > { %7849 = vrot.lane.b32.xlu0 %v9195_v49, %s10376_s27  ;;  %v7775_v1 = vsel %vm392_vm2, %v7770_v34, %v7774_v16  ;;  %v9191_v6 = vcombine.low %v15185_v3, %v7734_v57  ;;  %v7861_v58 = vsel %vm15725_vm1, %v7858_v30, %v7860_v53  ;;  %v7776_v52 = vshrl.u32 %v15200_v39, 16  ;;  %vm15726_vm2 = vmmov %vm15724_vm5 }
 0x862   : > { %v7840_v32 = vor.u32 %v7839_v17, %v7836_v29  ;;  %v7895_v48 = vor.u32 %v7894_v11, %v7891_v13  ;;  %v10299_v17 = vld [vmem:[%s15426_s1 + $0x3d8] sm:$0xff]  }
 0x863   : > { %v7778_v20 = vor.u32 %v7776_v52, %v7774_v16  ;;  %v7810_v25 = vrot.slane %v9191_v6, 3  ;;  %9730 = vmatprep.subr.bf16.mxu1 %v10299_v17  ;;  %v10305_v6 = vld [vmem:[%s15426_s1 + $0x458] sm:$0xff]   ;;  %v10302_v52 = vld [vmem:[%s15426_s1 + $0x390] sm:$0xff]  }
 0x864   : > { %10039 = vmatmul.mubr.msk.bf16.gmra.mxu1 %vm1183_vm7, %v7910_v60  ;;  %7795 = vrot.lane.b32.xlu1 %v7792_v28, %s10375_s26  ;;  %v7841_v42 = vsel %vm7215_vm15, %v7831_v59, %v7840_v32  ;;  %vm15729_vm15 = vcmask 785408  }
 0x865   : > { %7897 = vrot.lane.b32.xlu0 %v7887_v7, %s10377_s30  ;;  %10042 = vmatprep.mubr.msk.bf16.mxu1 %vm15555_vm8, %v15492_v45  ;;  %v7896_v45 = vsel %vm15726_vm2, %v7886_v50, %v7895_v48  ;;  %v7811_v3 = vsel %vm1141_vm6, %v7808_v43, %v7810_v25  ;;  %vm15727_vm6 = vcmask 523264   ;;  %vm15730_vm10 = vmmov %vm15729_vm15 }
 0x866   : > { %vm15728_vm8 = vmmov %vm15727_vm6  ;;  %9752 = vmatprep.subr.bf16.mxu0 %v10305_v6  ;;  %v10312_v6 = vld [vmem:[%s15426_s1 + $0x378] sm:$0xff]  }
 0x867   : > { %vm15731_vm14 = vmmov %vm15727_vm6 }
 0x868   : > { %7781 = vrot.lane.b32.xlu1 %v7775_v1, %s10376_s27  ;;  %vm15732_vm0 = vmmov %vm15730_vm10  ;;  %v10301_v1 = vld [vmem:[%s15426_s1 + $0x3d0] sm:$0xff]  }
 0x869   : > { %7864 = vrot.lane.b32.xlu0 %v7861_v58, %s10375_s26  ;;  %vm15733_vm3 = vmmov %vm15727_vm6  ;;  %v10306_v58 = vld [vmem:[%s15426_s1 + $0x418] sm:$0xff]  }
 0x86a   : > { %vm15734_vm4 = vmmov %vm15732_vm0 }
 0x86b   : > { %vm15735_vm12 = vmmov %vm15733_vm3 }
 0x86c   : > { %10043 = vmatmul.mubr.msk.bf16.gmra.mxu1 %vm1183_vm7, %v7909_v31  ;;  %7783 = vrot.lane.b32.xlu1 %v7778_v20, %s10376_s27  ;;  %vm15736_vm5 = vmmov %vm15732_vm0  ;;  %v10307_v20 = vld [vmem:[%s15426_s1 + $0x3c0] sm:$0xff]  }
 0x86d   : > { %7899 = vrot.lane.b32.xlu0 %v7896_v45, %s10377_s30  ;;  %vm15737_vm1 = vmmov %vm15733_vm3  ;;  %v9200_v45 = vld [vmem:[%s15427_s2 + $0x5] ss:$0 sm:$0xff] }
 0x86e   : > { %vm15738_vm2 = vmmov %vm15732_vm0 }
 0x870   : > { %7814 = vrot.lane.b32.xlu1 %v7811_v3, %s10377_s30 }
 0x871   : > { %7866 = vrot.lane.b32.xlu0 %v7860_v53, %s10375_s26 }
 0x874   : > { %7797 = vrot.lane.b32.xlu1 %v7791_v5, %s10375_s26 }
 0x875   : > { %7901 = vrot.lane.b32.xlu0 %v7895_v48, %s10377_s30  ;;  %v10303_v48 = vld [vmem:[%s15426_s1 + $0x3c8] sm:$0xff]  }
 0x878   : > { %7816 = vrot.lane.b32.xlu1 %v7810_v25, %s10377_s30 }
 0x8c3   : > { %v7846_v37 = vpop.permute.xlu0 %7845 }
 0x8c4   : > { %v7935_v21 = vsel %vm1183_vm7, %v7832_v15, %v7846_v37 }
 0x8ca   : > { %v7794_v51 = vpop.permute.xlu1 %7793 }
 0x8cb   : > { %v7848_v10 = vpop.permute.xlu0 %7847 }
 0x8cc   : > { %v7938_v61 = vsel %vm1183_vm7, %v7841_v42, %v7848_v10  ;;  %v10304_v42 = vld [vmem:[%s15426_s1 + $0x388] sm:$0xff]  }
 0x8ce   : > { %v7813_v55 = vpop.permute.xlu1 %7812 }
 0x8cf   : > { %v7863_v30 = vpop.permute.xlu0 %7862 }
 0x8d0   : > { %v7943_v46 = vsel %vm15728_vm8, %v7935_v21, %v7863_v30 }
 0x8d2   : > { %v7780_v33 = vpop.permute.xlu1 %7779 }
 0x8d3   : > { %v7912_v63 = vsel %vm1183_vm7, %v15157_v40, %v7780_v33  ;;  %v7850_v43 = vpop.permute.xlu0 %7849 }
 0x8d4   : > { %v7919_v62 = vsel %vm15727_vm6, %v7912_v63, %v7794_v51  ;;  %v7941_v31 = vsel %vm1183_vm7, %v7840_v32, %v7850_v43  ;;  %v10300_v32 = vld [vmem:[%s15426_s1 + $0x398] sm:$0xff]  }
 0x8d5   : > { %v7925_v35 = vsel %vm15730_vm10, %v7919_v62, %v7813_v55  ;;  %9731 = vmatpush3.bf16.msra.mxu1 %v10300_v32  ;;  %vm15745_vm10 = vmmov %vm15737_vm1 }
 0x8d6   : > { %v7796_v39 = vpop.permute.xlu1 %7795  ;;  %9732 = vmatprep.subr.bf16.mxu1 %v10301_v1 }
 0x8d7   : > { %v7898_v14 = vpop.permute.xlu0 %7897 }
 0x8d8   : > { %v7949_v54 = vsel %vm15729_vm15, %v7943_v46, %v7898_v14 }
 0x8d9   : > { %8147 = vmatprep.mubr.bf16.mxu0 %v7949_v54  ;;  %9733 = vmatpush3.bf16.msra.mxu1 %v10302_v52 }
 0x8da   : > { %8148 = vmatmul.mubr.bf16.vlgmr.msra.gmra.mxu0 %v7925_v35  ;;  %v7782_v18 = vpop.permute.xlu1 %7781  ;;  %9734 = vmatprep.subr.bf16.mxu1 %v10303_v48 }
 0x8db   : > { %v7865_v22 = vpop.permute.xlu0 %7864  ;;  %v7914_v19 = vsel %vm1183_vm7, %v15172_v9, %v7782_v18  ;;  %9753 = vmatpush3.bf16.msra.mxu0 %v10306_v58  ;;  %v10314_v58 = vld [vmem:[%s15426_s1 + $0x408] sm:$0xff]  }
 0x8dc   : > { %v7945_v12 = vsel %vm15731_vm14, %v7938_v61, %v7865_v22  ;;  %v7921_v47 = vsel %vm15733_vm3, %v7914_v19, %v7796_v39  ;;  %v8303_v22 = vld [vmem:[#allocation9] sm:$0x8]  ;;  %vm15746_vm14 = vmmov %vm15732_vm0 }
 0x8dd   : > { %9735 = vmatpush3.bf16.msra.mxu1 %v10304_v42 }
 0x8de   : > { %v7784_v40 = vpop.permute.xlu1 %7783  ;;  %9736 = vmatprep.subr.bf16.mxu1 %v10307_v20 }
 0x8df   : > { %v7900_v41 = vpop.permute.xlu0 %7899  ;;  %v7917_v0 = vsel %vm1183_vm7, %v10290_v2, %v7784_v40 }
 0x8e0   : > { %v7952_v26 = vsel %vm15732_vm0, %v7945_v12, %v7900_v41 }
 0x8e1   : > { %8155 = vmatprep.mubr.bf16.mxu0 %v7952_v26  ;;  %9737 = vmatpush3.bf16.msra.mxu1 %v10308_v24 }
 0x8e2   : > { %v7815_v49 = vpop.permute.xlu1 %7814 }
 0x8e3   : > { %v7928_v5 = vsel %vm15734_vm4, %v7921_v47, %v7815_v49  ;;  %v7867_v8 = vpop.permute.xlu0 %7866  ;;  %vm15749_vm4 = vmmov %vm15738_vm2 }
 0x8e4   : > { %8156 = vmatmul.mubr.bf16.gmra.mxu0 %v7928_v5  ;;  %v7947_v59 = vsel %vm15735_vm12, %v7941_v31, %v7867_v8  ;;  %vm15750_vm12 = vmmov %vm15738_vm2 }
 0x8e6   : > { %v7798_v27 = vpop.permute.xlu1 %7797 }
 0x8e7   : > { %v7902_v9 = vpop.permute.xlu0 %7901  ;;  %v7923_v44 = vsel %vm15737_vm1, %v7917_v0, %v7798_v27 }
 0x8e8   : > { %v7955_v50 = vsel %vm15736_vm5, %v7947_v59, %v7902_v9 }
 0x8e9   : > { %8163 = vmatprep.mubr.bf16.mxu0 %v7955_v50 }
 0x8ea   : > { %v7817_v15 = vpop.permute.xlu1 %7816 }
 0x8eb   : > { %v7931_v38 = vsel %vm15738_vm2, %v7923_v44, %v7817_v15 }
 0x8ec   : > { %8164 = vmatmul.mubr.bf16.gmra.mxu0 %v7931_v38 }
 0x91c   : > { %v8205_v28 = vpop.f32.mrf.mxu1 }
 0x91e   : > { %v10036_v23 = vpop.f32.mrf.mxu1 }
 0x91f   : > { %v10309_v23 = vld [vmem:[%s15426_s1 + $0x450] sm:$0xff]  }
 0x920   : > { %v8208_v34 = vpop.f32.mrf.mxu1  ;;  %9754 = vmatprep.subr.bf16.mxu0 %v10309_v23 }
 0x922   : > { %v10037_v56 = vpop.f32.mrf.mxu1 }
 0x924   : > { %v8213_v60 = vpop.f32.mrf.mxu1 }
 0x926   : > { %v10040_v16 = vpop.f32.mrf.mxu1 }
 0x928   : > { %v15264_v53 = vpop.f32.mrf.mxu1 }
 0x92a   : > { %v10041_v29 = vpop.f32.mrf.mxu1 }
 0x92c   : > { %v15266_v7 = vpop.f32.mrf.mxu1 }
 0x92e   : > { %v10044_v13 = vpop.f32.mrf.mxu1 }
 0x92f   : > { %v10311_v13 = vld [vmem:[%s15426_s1 + $0x3b8] sm:$0xff]  }
 0x930   : > { %v8224_v11 = vpop.f32.mrf.mxu1  ;;  %9738 = vmatprep.subr.bf16.mxu1 %v10311_v13 }
 0x931   : > { %9739 = vmatpush3.bf16.msra.mxu1 %v10312_v6 }
 0x932   : > { %v10045_v57 = vpop.f32.mrf.mxu1 }
 0x99a   : > { %v9707_v25 = vpop.f32.mrf.mxu0 }
 0x99c   : > { %v9708_v3 = vpop.f32.mrf.mxu0 }
 0x99d   : > { %v9709_v37 = vadd.f32 %v9708_v3, %v9707_v25 }
 0x99e   : > { %v9710_v51 = vpop.f32.mrf.mxu0 }
 0x99f   : > { %v8150_v10 = vadd.f32 %v9709_v37, %v9200_v45 }
 0x9a0   : > { %v9711_v55 = vpop.f32.mrf.mxu0 }
 0x9a1   : > { %v8206_v30 = vadd.f32 %v8205_v28, %v8150_v10  ;;  %v9712_v33 = vadd.f32 %v9711_v55, %v9710_v51  ;;  %v10315_v55 = vld [vmem:[%s15426_s1 + $0x3b0] sm:$0xff]  }
 0x9a2   : > { %9740 = vmatprep.subr.bf16.mxu1 %v10315_v55 }
 0x9a3   : > { %v8227_v63 = vmax.f32 %v8206_v30, 0.0  ;;  %v8153_v43 = vadd.f32 %v9712_v33, %v9200_v45  ;;  %v10317_v30 = vld [vmem:[%s15426_s1 + $0x440] sm:$0xff]  }
 0x9a4   : > { %v9713_v21 = vpop.f32.mrf.mxu0 }
 0x9a5   : > { %v9337_v62 = vpack.c.bf16 %v8227_v63, %v8227_v63  ;;  %v8209_v39 = vadd.f32 %v8208_v34, %v8153_v43  ;;  %v10310_v34 = vld [vmem:[%s15426_s1 + $0x410] sm:$0xff]   ;;  %v10318_v43 = vld [vmem:[%s15426_s1 + $0x400] sm:$0xff]  }
 0x9a6   : > { %v9714_v46 = vpop.f32.mrf.mxu0  ;;  %9755 = vmatpush3.bf16.msra.mxu0 %v10310_v34  ;;  %v10327_v34 = vld [vmem:[%s15426_s1 + $0x428] sm:$0xff]  }
 0x9a7   : > { %v8249_v14 = vshll.u32 %v9337_v62, 16  ;;  %v8252_v54 = vshrl.u32 %v9337_v62, 16  ;;  %v8228_v35 = vmax.f32 %v8209_v39, 0.0  ;;  %v9715_v18 = vadd.f32 %v9714_v46, %v9713_v21 }
 0x9a8   : > { %v9716_v61 = vpop.f32.mrf.mxu0 }
 0x9a9   : > { %v8251_v40 = vrot.slane %v8249_v14, 5  ;;  %v8254_v19 = vrot.slane %v8252_v54, 4  ;;  %v9338_v12 = vpack.c.bf16 %v8228_v35, %v8228_v35  ;;  %v8158_v41 = vadd.f32 %v9715_v18, %v9200_v45  ;;  %v10319_v35 = vld [vmem:[%s15426_s1 + $0x3a8] sm:$0xff]  }
 0x9aa   : > { %v9717_v26 = vpop.f32.mrf.mxu0 }
 0x9ab   : > { %v8255_v47 = vor.u32 %v8254_v19, %v8251_v40  ;;  %v8304_v49 = vsel %vm12392_vm9, %v8251_v40, %v8303_v22  ;;  %v8258_v5 = vshll.u32 %v9338_v12, 16  ;;  %v8262_v8 = vshrl.u32 %v9338_v12, 16 }
 0x9ac   : > { %8305 = vst [vmem:[#allocation9] sm:$0x8] %v8304_v49  ;;  %v8214_v31 = vadd.f32 %v8213_v60, %v8158_v41  ;;  %v9718_v27 = vadd.f32 %v9717_v26, %v9716_v61  ;;  %v9719_v2 = vpop.f32.mrf.mxu0  ;;  %vm15739_vm9 = vcmask 257024   ;;  %v10320_v41 = vld [vmem:[%s15426_s1 + $0x368] sm:$0xff]   ;;  %v10321_v26 = vld [vmem:[%s15426_s1 + $0x438] sm:$0xff]  }
 0x9ad   : > { %v8256_v59 = vrot.slane %v8255_v47, 4  ;;  %v8260_v9 = vrot.slane %v8258_v5, 5  ;;  %v8264_v50 = vrot.slane %v8262_v8, 4  ;;  %vm15740_vm6 = vmmov %vm15739_vm9  ;;  %v10322_v47 = vld [vmem:[%s15426_s1 + $0x3f8] sm:$0xff]   ;;  %v8310_v5 = vld [vmem:[#allocation9 + $0x14] sm:$0x3] }
 0x9ae   : > { %v8229_v0 = vmax.f32 %v8214_v31, 0.0  ;;  %v8161_v44 = vadd.f32 %v9718_v27, %v9200_v45  ;;  %v9720_v15 = vpop.f32.mrf.mxu0  ;;  %vm15741_vm8 = vmmov %vm15740_vm6  ;;  %v10323_v27 = vld [vmem:[%s15426_s1 + $0x3a0] sm:$0xff]  }
 0x9af   : > { %v8261_v38 = vsel %vm15135_vm11, %v8256_v59, %v8260_v9  ;;  %v9721_v28 = vadd.f32 %v9720_v15, %v9719_v2  ;;  %v8265_v56 = vor.u32 %v8264_v50, %v8260_v9  ;;  %vm15742_vm15 = vmmov %vm15740_vm6  ;;  %v10325_v15 = vld [vmem:[%s15426_s1 + $0x430] sm:$0xff]  }
 0x9b0   : > { %8306 = vst.msk [vmem:[#allocation9 + $0x4] sm:$0xf] %vm15739_vm9, %v8261_v38  ;;  %v9339_v60 = vpack.c.bf16 %v8229_v0, %v8229_v0  ;;  %v8217_v16 = vadd.f32 %v15264_v53, %v8161_v44  ;;  %v9722_v29 = vpop.f32.mrf.mxu0  ;;  %v10313_v53 = vld [vmem:[%s15426_s1 + $0x448] sm:$0xff]   ;;  %v10324_v44 = vld [vmem:[%s15426_s1 + $0x360] sm:$0xff]   ;;  %v10326_v38 = vld [vmem:[%s15426_s1 + $0x3f0] sm:$0xff]  }
 0x9b1   : > { %v8166_v11 = vadd.f32 %v9721_v28, %v9200_v45  ;;  %v8266_v48 = vrot.slane %v8265_v56, 4  ;;  %9756 = vmatprep.subr.bf16.mxu0 %v10313_v53 }
 0x9b2   : > { %v8268_v57 = vshll.u32 %v9339_v60, 16  ;;  %v8272_v17 = vshrl.u32 %v9339_v60, 16  ;;  %v8230_v32 = vmax.f32 %v8217_v16, 0.0  ;;  %v9723_v1 = vpop.f32.mrf.mxu0  ;;  %9757 = vmatpush3.bf16.msra.mxu0 %v10314_v58  ;;  %v10328_v16 = vld [vmem:[%s15426_s1 + $0x3e8] sm:$0xff]  }
 0x9b3   : > { %v8222_v52 = vadd.f32 %v15266_v7, %v8166_v11  ;;  %v10316_v7 = vld [vmem:[%s15426_s1 + $0x370] sm:$0xff]   ;;  %9758 = vmatprep.subr.bf16.mxu0 %v10317_v30  ;;  %v10329_v11 = vld [vmem:[%s15426_s1 + $0x420] sm:$0xff]  }
 0x9b4   : > { %v8270_v42 = vrot.slane %v8268_v57, 5  ;;  %v8274_v20 = vrot.slane %v8272_v17, 4  ;;  %v9340_v25 = vpack.c.bf16 %v8230_v32, %v8230_v32  ;;  %9741 = vmatpush3.bf16.msra.mxu1 %v10316_v7  ;;  %v10330_v32 = vld [vmem:[%s15426_s1 + $0x3e0] sm:$0xff]  }
 0x9b5   : > { %v8231_v45 = vmax.f32 %v8222_v52, 0.0  ;;  %9742 = vmatprep.subr.bf16.mxu1 %v10319_v35 }
 0x9b6   : > { %v8271_v3 = vsel %vm15135_vm11, %v8266_v48, %v8270_v42  ;;  %v8275_v37 = vor.u32 %v8274_v20, %v8270_v42  ;;  %v8278_v51 = vshll.u32 %v9340_v25, 16  ;;  %v8282_v10 = vshrl.u32 %v9340_v25, 16  ;;  %9759 = vmatpush3.bf16.msra.mxu0 %v10318_v43 }
 0x9b7   : > { %8307 = vst.msk [vmem:[#allocation9 + $0x8] sm:$0xf] %vm15740_vm6, %v8271_v3  ;;  %v9341_v33 = vpack.c.bf16 %v8231_v45, %v8231_v45  ;;  %v15338_v63 = vld [vmem:[#allocation9 + $0x4] sm:$0x8]  ;;  %9760 = vmatprep.subr.bf16.mxu0 %v10321_v26 }
 0x9b8   : > { %v8276_v21 = vrot.slane %v8275_v37, 4  ;;  %v8280_v62 = vrot.slane %v8278_v51, 5  ;;  %v8284_v39 = vrot.slane %v8282_v10, 4  ;;  %v9227_v46 = vcombine.low %v15338_v63, %v15338_v63  ;;  %9743 = vmatpush3.bf16.msra.mxu1 %v10320_v41 }
 0x9b9   : > { %v8288_v14 = vshll.u32 %v9341_v33, 16  ;;  %v8292_v54 = vshrl.u32 %v9341_v33, 16  ;;  %9744 = vmatprep.subr.bf16.mxu1 %v10323_v27 }
 0x9ba   : > { %v8281_v18 = vsel %vm15135_vm11, %v8276_v21, %v8280_v62  ;;  %v8285_v22 = vor.u32 %v8284_v39, %v8280_v62  ;;  %v8325_v61 = vshrl.u32 %v9227_v46, 16  ;;  %9761 = vmatpush3.bf16.msra.mxu0 %v10322_v47 }
 0x9bb   : > { %8308 = vst.msk [vmem:[#allocation9 + $0xc] sm:$0xf] %vm15741_vm8, %v8281_v18  ;;  %v8290_v40 = vrot.slane %v8288_v14, 5  ;;  %v8294_v19 = vrot.slane %v8292_v54, 4  ;;  %9762 = vmatprep.subr.bf16.mxu0 %v10325_v15 }
 0x9bc   : > { %v8286_v12 = vrot.slane %v8285_v22, 4  ;;  %8327 = vrot.lane.b32.xlu1 %v8325_v61, %s10376_s27  ;;  %9745 = vmatpush3.bf16.msra.mxu1 %v10324_v44 }
 0x9bd   : > { %v8295_v49 = vor.u32 %v8294_v19, %v8290_v40 }
 0x9be   : > { %v8291_v8 = vsel %vm15135_vm11, %v8286_v12, %v8290_v40  ;;  %v10292_v31 = vld [vmem:[#allocation9 + $0x8] ss:$0 sps:$4 sm:$0x88]   ;;  %9763 = vmatpush3.bf16.msra.mxu0 %v10326_v38  ;;  %vm15744_vm11 = vmmov %vm15732_vm0 }
 0x9bf   : > { %v8296_v2 = vrot.slane %v8295_v49, 4  ;;  %8309 = vst.msk [vmem:[#allocation9 + $0x10] sm:$0xf] %vm15742_vm15, %v8291_v8  ;;  %v10293_v59 = vld [vmem:[#allocation9 + $0x8] ss:$0 sps:$4 sm:$0x11]   ;;  %8354 = vrot.lane.b32.xlu0 %v10292_v31, %s10375_s26  ;;  %9764 = vmatprep.subr.bf16.mxu0 %v10327_v34  ;;  %vm15747_vm0 = vmmov %vm15737_vm1 }
 0x9c0   : > { %v10295_v9 = vld [vmem:[#allocation9 + $0x8] ss:$0 sps:$4 sm:$0x44]   ;;  %v8332_v50 = vrot.slane %v10293_v59, 5  ;;  %v8357_v0 = vshrl.u32 %v10292_v31, 16  ;;  %v8336_v60 = vshrl.u32 %v10293_v59, 16  ;;  %vm15748_vm3 = vmmov %vm15747_vm0 }
 0x9c1   : > { %v8311_v36 = vsel %vm11220_vm13, %v8296_v2, %v8310_v5  ;;  %v8346_v24 = vshrl.u32 %v10295_v9, 16  ;;  %v8344_v10 = vrot.slane %v10295_v9, 7  ;;  %vm15743_vm13 = vmmov %vm15737_vm1 }
 0x9c2   : > { %8312 = vst [vmem:[#allocation9 + $0x14] sm:$0x3] %v8311_v36  ;;  %v10294_v28 = vld [vmem:[#allocation9 + $0xc] ss:$0 sps:$4 sm:$0x44]   ;;  %8333 = vrot.lane.b32.xlu1 %v8332_v50, %s10375_s26  ;;  %9765 = vmatpush3.bf16.msra.mxu0 %v10328_v16  ;;  %v8338_v1 = vrot.slane %v8336_v60, 5 }
 0x9c3   : > { %v10296_v4 = vld [vmem:[#allocation9 + $0xc] ss:$0 sps:$4 sm:$0x22]   ;;  %8359 = vrot.lane.b32.xlu0 %v8357_v0, %s10377_s30  ;;  %v8374_v23 = vrot.slane %v10294_v28, 7  ;;  %v8348_v29 = vrot.slane %v8346_v24, 7  ;;  %9766 = vmatprep.subr.bf16.mxu0 %v10329_v11  ;;  %v8378_v58 = vshrl.u32 %v10294_v28, 16 }
 0x9c4   : > { %v8366_v56 = vshrl.u32 %v10296_v4, 16  ;;  %v8364_v54 = vrot.slane %v10296_v4, 6  ;;  %v8497_v36 = vld [vmem:[%s15427_s2 + $0x6] sm:$0x1] }
 0x9c5   : > { %v8380_v42 = vrot.slane %v8378_v58, 7 }
 0x9c6   : > { %v10297_v13 = vld [vmem:[#allocation9 + $0x10] ss:$0 sps:$4 sm:$0x11]   ;;  %8375 = vrot.lane.b32.xlu1 %v8374_v23, %s10375_s26  ;;  %v8368_v57 = vrot.slane %v8366_v56, 6  ;;  %9767 = vmatpush3.bf16.msra.mxu0 %v10330_v32 }
 0x9c7   : > { %8349 = vrot.lane.b32.xlu0 %v8348_v29, %s10376_s27  ;;  %v8388_v17 = vshrl.u32 %v10297_v13, 16  ;;  %v10298_v6 = vld [vmem:[#allocation9 + $0x10] ss:$0 sps:$4 sm:$0x22]   ;;  %v8386_v22 = vrot.slane %v10297_v13, 5 }
 0x9c8   : > { %v8396_v52 = vrot.slane %v10298_v6, 6  ;;  %v8400_v48 = vshrl.u32 %v10298_v6, 16 }
 0x9c9   : > { %v8390_v53 = vrot.slane %v8388_v17, 5 }
 0x9ca   : > { %8369 = vrot.lane.b32.xlu1 %v8368_v57, %s10376_s27  ;;  %v8402_v20 = vrot.slane %v8400_v48, 6 }
 0x9cb   : > { %8339 = vrot.lane.b32.xlu0 %v8338_v1, %s10377_s30 }
 0x9ce   : > { %8391 = vrot.lane.b32.xlu1 %v8390_v53, %s10376_s27 }
 0x9cf   : > { %8397 = vrot.lane.b32.xlu0 %v8396_v52, %s10375_s26 }
 0x9d2   : > { %8381 = vrot.lane.b32.xlu1 %v8380_v42, %s10377_s30 }
 0x9d3   : > { %8403 = vrot.lane.b32.xlu0 %v8402_v20, %s10377_s30 }
 0xa2e   : > { %v8328_v25 = vpop.permute.xlu1 %8327 }
 0xa2f   : > { %v8407_v33 = vsel %vm1183_vm7, %v15338_v63, %v8328_v25 }
 0xa31   : > { %v8355_v45 = vpop.permute.xlu0 %8354 }
 0xa34   : > { %v8334_v3 = vpop.permute.xlu1 %8333 }
 0xa35   : > { %v8360_v37 = vpop.permute.xlu0 %8359  ;;  %v8409_v62 = vsel %vm15745_vm10, %v8407_v33, %v8334_v3 }
 0xa38   : > { %v8376_v51 = vpop.permute.xlu1 %8375 }
 0xa39   : > { %v8350_v55 = vpop.permute.xlu0 %8349 }
 0xa3a   : > { %v8414_v7 = vsel %vm1183_vm7, %v8344_v10, %v8350_v55 }
 0xa3b   : > { %v8416_v30 = vsel %vm15743_vm13, %v8414_v7, %v8355_v45 }
 0xa3c   : > { %v8370_v43 = vpop.permute.xlu1 %8369  ;;  %v8418_v21 = vsel %vm15744_vm11, %v8416_v30, %v8360_v37 }
 0xa3d   : > { %v8340_v39 = vpop.permute.xlu0 %8339  ;;  %v8503_v46 = vrot.slane %v8418_v21, 3  ;;  %v8421_v61 = vsel %vm1183_vm7, %v8364_v54, %v8370_v43 }
 0xa3e   : > { %v8411_v14 = vsel %vm15746_vm14, %v8409_v62, %v8340_v39  ;;  %v8423_v19 = vsel %vm15747_vm0, %v8421_v61, %v8376_v51 }
 0xa3f   : > { %v8502_v35 = vrot.slane %v8411_v14, 3  ;;  %8734 = vmatprep.mubr.bf16.mxu1 %v8503_v46 }
 0xa40   : > { %v8392_v18 = vpop.permute.xlu1 %8391 }
 0xa41   : > { %8735 = vmatmul.mubr.bf16.vlgmr.msra.gmra.mxu1 %v8502_v35  ;;  %v8398_v40 = vpop.permute.xlu0 %8397  ;;  %v8428_v63 = vsel %vm1183_vm7, %v8386_v22, %v8392_v18  ;;  %vm15751_vm7 = vcmask 253952  }
 0xa42   : > { %v8430_v41 = vsel %vm15748_vm3, %v8428_v63, %v8398_v40 }
 0xa44   : > { %v8382_v12 = vpop.permute.xlu1 %8381 }
 0xa45   : > { %v8425_v26 = vsel %vm15749_vm4, %v8423_v19, %v8382_v12  ;;  %v8404_v47 = vpop.permute.xlu0 %8403 }
 0xa46   : > { %v8432_v49 = vsel %vm15750_vm12, %v8430_v41, %v8404_v47  ;;  %v8504_v8 = vrot.slane %v8425_v26, 3 }
 0xa47   : > { %v8505_v5 = vrot.slane %v8432_v49, 3 }
 0xa49   : > { %8774 = vmatprep.mubr.bf16.mxu0 %v8505_v5 }
 0xa4a   : > { %8775 = vmatmul.mubr.bf16.vlgmr.msra.gmra.mxu0 %v8504_v8 }
 0xb01   : > { %v9746_v31 = vpop.f32.mrf.mxu1 }
 0xb03   : > { %v9747_v27 = vpop.f32.mrf.mxu1 }
 0xb04   : > { %v9748_v9 = vadd.f32 %v9747_v27, %v9746_v31 }
 0xb05   : > { %v9749_v2 = vpop.f32.mrf.mxu1 }
 0xb06   : > { %v8737_v44 = vadd.f32 %v9748_v9, %v8497_v36 }
 0xb07   : > { %v9750_v59 = vpop.f32.mrf.mxu1 }
 0xb0a   : > { %v9768_v50 = vpop.f32.mrf.mxu0 }
 0xb0c   : > { %v9769_v0 = vpop.f32.mrf.mxu0 }
 0xb0d   : > { %v9770_v15 = vadd.f32 %v9769_v0, %v9768_v50 }
 0xb0e   : > { %v9771_v38 = vpop.f32.mrf.mxu0 }
 0xb0f   : > { %v8777_v28 = vadd.f32 %v9770_v15, %v8737_v44 }
 0xb10   : > { %v9772_v24 = vpop.f32.mrf.mxu0 }
 0xb11   : > { %8782 = vst.msk [vmem:[%s166_s7] sm:$0x1] %vm15751_vm7, %v8777_v28 }
 0xb12 PF: > { %s13_s12 = sadd.s32 1, %s10371_s12  }
 0xb13   : > { %p10_p4 = scmp.ge.s32.totalorder %s13_s12, 4  }
 0xb15   :  { %12 = sbr.rel (!%p10_p4) target bundleno = 1 (0x1), region = 110 }

</bundles_post_ra>
